<compile_context>
chip_gen: v6e
topology: v6e:2x2x1
jax: 0.10.0
libtpu: 0.0.40
codegen_flags: <defaults>
</compile_context>

<pallas_src>
import functools

import numpy as np
import jax
import jax.numpy as jnp
from jax.experimental import pallas as pl
from jax.experimental.pallas import tpu as pltpu

BN_EPS = 1e-5


def _round_up(x, m):
    return ((x + m - 1) // m) * m


# ----------------------------------------------------------------------------- Pallas kernel
def _mm_kernel(x_ref, w_ref, s_ref, t_ref, o_ref, *, act, neg_slope):
    # single MXU matmul over the flattened K*Cin contraction, f32 accumulation
    acc = jnp.dot(x_ref[...], w_ref[...], preferred_element_type=jnp.float32)
    y = acc * s_ref[...] + t_ref[...]          # fused (bias + BatchNorm) scale/shift
    if act == "relu":
        y = jnp.maximum(y, 0.0)
    elif act == "leaky_relu":
        y = jnp.where(y >= 0.0, y, neg_slope * y)
    o_ref[...] = y.astype(o_ref.dtype)


def _fused_matmul(x_col, packed, cout, act="none", neg_slope=0.2):
    """x_col: (M, K*Cin) activations; packed = (w_pad bf16 (kc_p, cout_p), s_pad, t_pad)."""
    w_pad, s_pad, t_pad = packed
    M, KC = x_col.shape
    kc_p, cout_p = w_pad.shape

    tm = min(512, _round_up(M, 8))
    m_p = _round_up(M, tm)
    tn = min(256, cout_p)

    # bf16 operands into the MXU; pad M and the contraction to the padded weight shape
    x_p = jnp.pad(x_col.astype(jnp.bfloat16), ((0, m_p - M), (0, kc_p - KC)))

    grid = (m_p // tm, cout_p // tn)
    out = pl.pallas_call(
        functools.partial(_mm_kernel, act=act, neg_slope=neg_slope),
        out_shape=jax.ShapeDtypeStruct((m_p, cout_p), jnp.float32),
        grid_spec=pltpu.PrefetchScalarGridSpec(
            num_scalar_prefetch=0,
            grid=grid,
            in_specs=[
                pl.BlockSpec((tm, kc_p), lambda i, j: (i, 0)),
                pl.BlockSpec((kc_p, tn), lambda i, j: (0, j)),
                pl.BlockSpec((1, tn), lambda i, j: (0, j)),
                pl.BlockSpec((1, tn), lambda i, j: (0, j)),
            ],
            out_specs=pl.BlockSpec((tm, tn), lambda i, j: (i, j)),
        ),
        compiler_params=pltpu.CompilerParams(
            dimension_semantics=("parallel", "parallel")),
    )(x_p, w_pad, s_pad, t_pad)
    return out[:M, :cout]


# ----------------------------------------------------------------------------- layer wrappers
def _im2col_nlc(x, K, stride, padding):
    """x: (B, L, C) channels-last -> (B*L_out, K*C); lanes ordered tap-major, channel-minor."""
    B, L, C = x.shape
    xp = jnp.pad(x, ((0, 0), (padding, padding), (0, 0))) if padding else x
    L_out = (L + 2 * padding - K) // stride + 1
    taps = [jax.lax.slice(xp, (0, k, 0), (B, k + (L_out - 1) * stride + 1, C),
                          (1, stride, 1)) for k in range(K)]
    x_col = jnp.concatenate(taps, axis=-1)          # (B, L_out, K*C)
    return x_col.reshape(B * L_out, K * C), L_out


def conv1d_nlc(x, packed, K, cout, *, stride, padding, act, neg_slope=0.2):
    """Channels-last Conv1d (PyTorch semantics): x (B, L, Cin) -> (B, L_out, Cout)."""
    B = x.shape[0]
    x_col, L_out = _im2col_nlc(x, K, stride, padding)
    out = _fused_matmul(x_col, packed, cout, act, neg_slope)
    return out.reshape(B, L_out, cout)


def conv_transpose1d_nlc(x, packed, K, cout, *, stride, padding, output_padding, act,
                         neg_slope=0.2):
    """Channels-last ConvTranspose1d lowered to a stride-1 conv on a zero-dilated/padded
    input; the kernel was already flipped/transposed at init (prepare_params)."""
    B, L, C = x.shape
    if stride > 1:                                   # zero-dilate the input along length
        xd = jnp.zeros((B, (L - 1) * stride + 1, C), x.dtype).at[:, ::stride, :].set(x)
    else:
        xd = x
    left = K - 1 - padding
    right = K - 1 - padding + output_padding
    xp = jnp.pad(xd, ((0, 0), (left, right), (0, 0)))
    return conv1d_nlc(xp, packed, K, cout, stride=1, padding=0, act=act,
                      neg_slope=neg_slope)


# ----------------------------------------------------------------------------- parameters
def layer_specs(n_filters):
    nf = n_filters
    return {
        # name: (kind, Cin, Cout, K)   kinds: conv / conv_nb / convT / convT_nb
        "enc0": ("conv", 2, 64, 3), "enc1": ("conv", 64, 64, 3), "enc2": ("conv", 64, 64, 3),
        "dec0": ("convT", 64, 64, 3), "dec1": ("convT", 64, 64, 3), "dec2": ("convT", 64, 2, 3),
        "in": ("conv_nb", 2, 128 * nf, 256),
        "down1": ("conv", nf, nf * 2, 3), "down2": ("conv", nf * 2, nf * 4, 3),
        "down3": ("conv", nf * 4, nf * 8, 3), "down4": ("conv", nf * 8, nf * 16, 3),
        "equal1": ("conv", nf * 16, nf * 32, 3), "equal2": ("conv", nf * 32, nf * 16, 3),
        "up1": ("convT", nf * 16, nf * 8, 3), "cat1": ("convT", nf * 16, nf * 8, 3),
        "up2": ("convT", nf * 8, nf * 4, 3), "cat2": ("convT", nf * 8, nf * 4, 3),
        "up3": ("convT", nf * 4, nf * 2, 3), "cat3": ("convT", nf * 4, nf * 2, 3),
        "up4": ("convT", nf * 2, nf, 3),
        "out": ("convT_nb", nf, 1, 25),
    }


def init_params(key, n_filters=8):
    specs = layer_specs(n_filters)
    params = {}
    keys = jax.random.split(key, len(specs))
    for k_rng, (name, (kind, cin, cout, ks)) in zip(keys, specs.items()):
        if kind in ("conv", "conv_nb"):
            wshape = (cout, cin, ks)      # Conv1d weight layout
        else:
            wshape = (cin, cout, ks)      # ConvTranspose1d weight layout
        w = 0.05 * jax.random.normal(k_rng, wshape, jnp.float32)
        b = None if kind.endswith("_nb") else jnp.zeros((cout,), jnp.float32)
        params[name] = (w, b)
    return params


def _fold_bn_scale_shift(cout, bias, use_bn):
    # eval-mode BN with init stats: y = (z - 0)/sqrt(1+eps) * 1 + 0 ; bias folded in.
    s = (1.0 / np.sqrt(1.0 + BN_EPS)) if use_bn else 1.0
    scale = jnp.full((cout,), s, jnp.float32)
    shift = scale * bias if bias is not None else jnp.zeros((cout,), jnp.float32)
    return scale, shift


def _pack(w_flat, scale, shift):
    """w_flat: (K*Cin, Cout) f32 -> bf16 weight + f32 scale/shift padded to (8,128) tiles."""
    KC, Cout = w_flat.shape
    kc_p = _round_up(KC, 128)
    cout_p = _round_up(Cout, 128)
    w_pad = jnp.zeros((kc_p, cout_p), jnp.bfloat16).at[:KC, :Cout].set(
        w_flat.astype(jnp.bfloat16))
    s_pad = jnp.zeros((1, cout_p), jnp.float32).at[0, :Cout].set(scale)
    t_pad = jnp.zeros((1, cout_p), jnp.float32).at[0, :Cout].set(shift)
    return (w_pad, s_pad, t_pad)


def prepare_params(params, n_filters=8):
    """One-time weight preprocessing (outside the jitted forward): fold BN, pre-flip
    ConvTranspose kernels, flatten to (K*Cin, Cout), pad, and cast weights to bf16."""
    specs = layer_specs(n_filters)
    prepped = {}
    for name, (kind, cin, cout, ks) in specs.items():
        w, b = params[name]
        use_bn = (name != "out")
        if kind in ("convT", "convT_nb"):
            # ConvTranspose1d -> equivalent stride-1 conv kernel (Cout, Cin, K)
            w = jnp.transpose(jnp.flip(w, axis=2), (1, 0, 2))
        # channels-last im2col lane layout: index = k*Cin + ci (tap-major, channel-minor)
        w_flat = jnp.transpose(w, (2, 1, 0)).reshape(ks * cin, cout)
        scale, shift = _fold_bn_scale_shift(cout, b, use_bn)
        if name == "in":
            # permute output columns so that reshape(B, 128, nf) of the matmul output
            # directly equals PyTorch's x.view(B, nf, 128) in channels-last layout
            nf = n_filters
            l_in = cout // nf
            idx = np.arange(cout)
            perm = (idx % nf) * l_in + (idx // nf)
            w_flat = w_flat[:, perm]
            scale = scale[perm]
            shift = shift[perm]
        prepped[name] = _pack(w_flat, scale, shift)
    return prepped


# ----------------------------------------------------------------------------- forward pass
def forward(prepped, inp, n_filters=8):
    nf = n_filters
    specs = layer_specs(nf)
    B = inp.shape[0]

    def conv(name, x, **kw):
        _, _, cout, ks = specs[name]
        return conv1d_nlc(x, prepped[name], ks, cout, **kw)

    def convT(name, x, **kw):
        _, _, cout, ks = specs[name]
        return conv_transpose1d_nlc(x, prepped[name], ks, cout, **kw)

    # --- autoencoder (channels-last throughout) ---
    x = jnp.transpose(inp, (0, 2, 1))                      # NCL -> NLC once
    for name in ("enc0", "enc1", "enc2"):
        x = conv(name, x, stride=2, padding=1, act="leaky_relu")
    for name in ("dec0", "dec1", "dec2"):
        x = convT(name, x, stride=2, padding=1, output_padding=1, act="leaky_relu")
    x1_nlc = x                                             # (B, 256, 2)
    x1 = jnp.transpose(x1_nlc, (0, 2, 1))                  # NCL output of the AE

    # --- in layer: Conv1d(2, 128*nf, kernel=256, stride=128, bias=False) + BN.
    # With L=256 there is exactly one output position, so it is a single
    # (B, 512) @ (512, 128*nf) matmul on the flattened channels-last x1.
    _, _, cout_in, _ = specs["in"]
    x = _fused_matmul(x1_nlc.reshape(B, -1), prepped["in"], cout_in, act="none")
    x = x.reshape(B, cout_in // nf, nf)                    # (B, 128, nf) channels-last

    # --- frequency-representation U-Net ---
    xd1 = conv("down1", x, stride=1, padding=1, act="relu")
    xd2 = conv("down2", xd1, stride=2, padding=1, act="relu")
    xd3 = conv("down3", xd2, stride=2, padding=1, act="relu")
    xd4 = conv("down4", xd3, stride=2, padding=1, act="relu")
    xe1 = conv("equal1", xd4, stride=1, padding=1, act="relu")
    xe2 = conv("equal2", xe1, stride=1, padding=1, act="relu")

    xu1 = convT("up1", xe2, stride=2, padding=1, output_padding=1, act="relu")
    xc1 = convT("cat1", jnp.concatenate([xu1, xd3], axis=-1),
                stride=1, padding=1, output_padding=0, act="relu")
    xu2 = convT("up2", xc1, stride=2, padding=1, output_padding=1, act="relu")
    xc2 = convT("cat2", jnp.concatenate([xu2, xd2], axis=-1),
                stride=1, padding=1, output_padding=0, act="relu")
    xu3 = convT("up3", xc2, stride=2, padding=1, output_padding=1, act="relu")
    xc3 = convT("cat3", jnp.concatenate([xu3, xd1], axis=-1),
                stride=1, padding=1, output_padding=0, act="relu")
    xu4 = convT("up4", xc3, stride=1, padding=1, output_padding=0, act="relu")

    # out layer: ConvTranspose1d(nf, 1, 25, stride=8, padding=9, bias=False), no BN
    x2 = convT("out", xu4, stride=8, padding=9, output_padding=0, act="none")
    x2 = x2.reshape(B, -1)                                 # (B, 1023)
    return x1, x2


# ----------------------------------------------------------------------------- main
if __name__ == "__main__":
    n_filters = 8
    key = jax.random.PRNGKey(0)
    pkey, xkey = jax.random.split(key)
    params = init_params(pkey, n_filters)
    prepped = prepare_params(params, n_filters)            # one-time weight preprocessing

    # input: (batch, 2 [re/im channels], signal_dim=256) — signal_dim is hard-coded to
    # 256 inside the module's __init__.
    inp = jax.random.normal(xkey, (2, 2, 256), jnp.float32)

    fwd = jax.jit(functools.partial(forward, n_filters=n_filters))
    x1, x2 = fwd(prepped, inp)
    jax.block_until_ready((x1, x2))

    assert x1.shape == (2, 2, 256), x1.shape
    assert x2.shape == (2, 1023), x2.shape
    assert jnp.all(jnp.isfinite(x1)) and jnp.all(jnp.isfinite(x2))
    print("KERNEL_OK")
</pallas_src>

<mosaic_0001>
module attributes {stable_mosaic.version = 11 : i64} {
  func.func @_mm_kernel(%arg0: i32, %arg1: i32, %arg2: memref<256x128xbf16, #tpu.memory_space<vmem>>, %arg3: memref<128x128xbf16, #tpu.memory_space<vmem>>, %arg4: memref<1x128xf32, #tpu.memory_space<vmem>>, %arg5: memref<1x128xf32, #tpu.memory_space<vmem>>, %arg6: memref<256x128xf32, #tpu.memory_space<vmem>>) attributes {dimension_semantics = [#tpu.dimension_semantics<parallel>, #tpu.dimension_semantics<parallel>], iteration_bounds = array<i64: 1, 1>, scalar_prefetch = 0 : i64, scratch_operands = 0 : i64, tpu.core_type = #tpu.core_type<tc>, window_params = [{transform_indices = @transform_0, window_bounds = array<i64: 256, 128>}, {transform_indices = @transform_1, window_bounds = array<i64: 128, 128>}, {transform_indices = @transform_2, window_bounds = array<i64: 1, 128>}, {transform_indices = @transform_3, window_bounds = array<i64: 1, 128>}, {transform_indices = @transform_4, window_bounds = array<i64: 256, 128>}]} {
    %c0 = arith.constant 0 : index
    %c0_0 = arith.constant 0 : index
    %0 = vector.load %arg2[%c0, %c0_0] : memref<256x128xbf16, #tpu.memory_space<vmem>>, vector<256x128xbf16>
    %c0_1 = arith.constant 0 : index
    %c0_2 = arith.constant 0 : index
    %1 = vector.load %arg3[%c0_1, %c0_2] : memref<128x128xbf16, #tpu.memory_space<vmem>>, vector<128x128xbf16>
    %cst = arith.constant dense<0.000000e+00> : vector<256x128xf32>
    %2 = tpu.matmul %0, %1, %cst {dimension_numbers = #tpu.dot_dimension_numbers<[1], [0], [0], [1], [0, 0, 1, 1], [], []>} : vector<256x128xbf16>, vector<128x128xbf16>, vector<256x128xf32> -> vector<256x128xf32>
    %c0_3 = arith.constant 0 : index
    %c0_4 = arith.constant 0 : index
    %3 = vector.load %arg4[%c0_3, %c0_4] : memref<1x128xf32, #tpu.memory_space<vmem>>, vector<1x128xf32>
    %4 = vector.broadcast %3 : vector<1x128xf32> to vector<256x128xf32>
    %5 = arith.mulf %2, %4 : vector<256x128xf32>
    %c0_5 = arith.constant 0 : index
    %c0_6 = arith.constant 0 : index
    %6 = vector.load %arg5[%c0_5, %c0_6] : memref<1x128xf32, #tpu.memory_space<vmem>>, vector<1x128xf32>
    %7 = vector.broadcast %6 : vector<1x128xf32> to vector<256x128xf32>
    %8 = arith.addf %5, %7 : vector<256x128xf32>
    %cst_7 = arith.constant 0.000000e+00 : f32
    %9 = vector.broadcast %cst_7 : f32 to vector<256x128xf32>
    %10 = arith.cmpf oge, %8, %9 : vector<256x128xf32>
    %cst_8 = arith.constant 2.000000e-01 : f32
    %11 = vector.broadcast %cst_8 : f32 to vector<256x128xf32>
    %12 = arith.mulf %11, %8 : vector<256x128xf32>
    %13 = arith.select %10, %8, %12 : vector<256x128xi1>, vector<256x128xf32>
    %c0_9 = arith.constant 0 : index
    %c0_10 = arith.constant 0 : index
    %14 = vector.load %arg6[%c0_9, %c0_10] : memref<256x128xf32, #tpu.memory_space<vmem>>, vector<256x128xf32>
    tpu.vector_store %arg6[%c0_9, %c0_10], %13 {strides = array<i32>} : memref<256x128xf32, #tpu.memory_space<vmem>>, vector<256x128xf32>,
    return
  }
  func.func @transform_0(%arg0: i32, %arg1: i32) -> (i32, i32) {
    %c0_i32 = arith.constant 0 : i32
    %c0_i32_0 = arith.constant 0 : i32
    return %arg0, %c0_i32 : i32, i32
  }
  func.func @transform_1(%arg0: i32, %arg1: i32) -> (i32, i32) {
    %c0_i32 = arith.constant 0 : i32
    %c0_i32_0 = arith.constant 0 : i32
    return %c0_i32, %arg1 : i32, i32
  }
  func.func @transform_2(%arg0: i32, %arg1: i32) -> (i32, i32) {
    %c0_i32 = arith.constant 0 : i32
    %c0_i32_0 = arith.constant 0 : i32
    return %c0_i32, %arg1 : i32, i32
  }
  func.func @transform_3(%arg0: i32, %arg1: i32) -> (i32, i32) {
    %c0_i32 = arith.constant 0 : i32
    %c0_i32_0 = arith.constant 0 : i32
    return %c0_i32, %arg1 : i32, i32
  }
  func.func @transform_4(%arg0: i32, %arg1: i32) -> (i32, i32) {
    %c0_i32 = arith.constant 0 : i32
    return %arg0, %arg1 : i32, i32
  }
}

module attributes {stable_mosaic.version = 11 : i64} {
  func.func @_mm_kernel(%arg0: i32, %arg1: i32, %arg2: memref<128x256xbf16, #tpu.memory_space<vmem>>, %arg3: memref<256x128xbf16, #tpu.memory_space<vmem>>, %arg4: memref<1x128xf32, #tpu.memory_space<vmem>>, %arg5: memref<1x128xf32, #tpu.memory_space<vmem>>, %arg6: memref<128x128xf32, #tpu.memory_space<vmem>>) attributes {dimension_semantics = [#tpu.dimension_semantics<parallel>, #tpu.dimension_semantics<parallel>], iteration_bounds = array<i64: 1, 1>, scalar_prefetch = 0 : i64, scratch_operands = 0 : i64, tpu.core_type = #tpu.core_type<tc>, window_params = [{transform_indices = @transform_0, window_bounds = array<i64: 128, 256>}, {transform_indices = @transform_1, window_bounds = array<i64: 256, 128>}, {transform_indices = @transform_2, window_bounds = array<i64: 1, 128>}, {transform_indices = @transform_3, window_bounds = array<i64: 1, 128>}, {transform_indices = @transform_4, window_bounds = array<i64: 128, 128>}]} {
    %c0 = arith.constant 0 : index
    %c0_0 = arith.constant 0 : index
    %0 = vector.load %arg2[%c0, %c0_0] : memref<128x256xbf16, #tpu.memory_space<vmem>>, vector<128x256xbf16>
    %c0_1 = arith.constant 0 : index
    %c0_2 = arith.constant 0 : index
    %1 = vector.load %arg3[%c0_1, %c0_2] : memref<256x128xbf16, #tpu.memory_space<vmem>>, vector<256x128xbf16>
    %cst = arith.constant dense<0.000000e+00> : vector<128x128xf32>
    %2 = tpu.matmul %0, %1, %cst {dimension_numbers = #tpu.dot_dimension_numbers<[1], [0], [0], [1], [0, 0, 1, 1], [], []>} : vector<128x256xbf16>, vector<256x128xbf16>, vector<128x128xf32> -> vector<128x128xf32>
    %c0_3 = arith.constant 0 : index
    %c0_4 = arith.constant 0 : index
    %3 = vector.load %arg4[%c0_3, %c0_4] : memref<1x128xf32, #tpu.memory_space<vmem>>, vector<1x128xf32>
    %4 = vector.broadcast %3 : vector<1x128xf32> to vector<128x128xf32>
    %5 = arith.mulf %2, %4 : vector<128x128xf32>
    %c0_5 = arith.constant 0 : index
    %c0_6 = arith.constant 0 : index
    %6 = vector.load %arg5[%c0_5, %c0_6] : memref<1x128xf32, #tpu.memory_space<vmem>>, vector<1x128xf32>
    %7 = vector.broadcast %6 : vector<1x128xf32> to vector<128x128xf32>
    %8 = arith.addf %5, %7 : vector<128x128xf32>
    %cst_7 = arith.constant 0.000000e+00 : f32
    %9 = vector.broadcast %cst_7 : f32 to vector<128x128xf32>
    %10 = arith.cmpf oge, %8, %9 : vector<128x128xf32>
    %cst_8 = arith.constant 2.000000e-01 : f32
    %11 = vector.broadcast %cst_8 : f32 to vector<128x128xf32>
    %12 = arith.mulf %11, %8 : vector<128x128xf32>
    %13 = arith.select %10, %8, %12 : vector<128x128xi1>, vector<128x128xf32>
    %c0_9 = arith.constant 0 : index
    %c0_10 = arith.constant 0 : index
    %14 = vector.load %arg6[%c0_9, %c0_10] : memref<128x128xf32, #tpu.memory_space<vmem>>, vector<128x128xf32>
    tpu.vector_store %arg6[%c0_9, %c0_10], %13 {strides = array<i32>} : memref<128x128xf32, #tpu.memory_space<vmem>>, vector<128x128xf32>,
    return
  }
  func.func @transform_0(%arg0: i32, %arg1: i32) -> (i32, i32) {
    %c0_i32 = arith.constant 0 : i32
    %c0_i32_0 = arith.constant 0 : i32
    return %arg0, %c0_i32 : i32, i32
  }
  func.func @transform_1(%arg0: i32, %arg1: i32) -> (i32, i32) {
    %c0_i32 = arith.constant 0 : i32
    %c0_i32_0 = arith.constant 0 : i32
    return %c0_i32, %arg1 : i32, i32
  }
  func.func @transform_2(%arg0: i32, %arg1: i32) -> (i32, i32) {
    %c0_i32 = arith.constant 0 : i32
    %c0_i32_0 = arith.constant 0 : i32
    return %c0_i32, %arg1 : i32, i32
  }
  func.func @transform_3(%arg0: i32, %arg1: i32) -> (i32, i32) {
    %c0_i32 = arith.constant 0 : i32
    %c0_i32_0 = arith.constant 0 : i32
    return %c0_i32, %arg1 : i32, i32
  }
  func.func @transform_4(%arg0: i32, %arg1: i32) -> (i32, i32) {
    %c0_i32 = arith.constant 0 : i32
    return %arg0, %arg1 : i32, i32
  }
}

module attributes {stable_mosaic.version = 11 : i64} {
  func.func @_mm_kernel(%arg0: i32, %arg1: i32, %arg2: memref<64x256xbf16, #tpu.memory_space<vmem>>, %arg3: memref<256x128xbf16, #tpu.memory_space<vmem>>, %arg4: memref<1x128xf32, #tpu.memory_space<vmem>>, %arg5: memref<1x128xf32, #tpu.memory_space<vmem>>, %arg6: memref<64x128xf32, #tpu.memory_space<vmem>>) attributes {dimension_semantics = [#tpu.dimension_semantics<parallel>, #tpu.dimension_semantics<parallel>], iteration_bounds = array<i64: 1, 1>, scalar_prefetch = 0 : i64, scratch_operands = 0 : i64, tpu.core_type = #tpu.core_type<tc>, window_params = [{transform_indices = @transform_0, window_bounds = array<i64: 64, 256>}, {transform_indices = @transform_1, window_bounds = array<i64: 256, 128>}, {transform_indices = @transform_2, window_bounds = array<i64: 1, 128>}, {transform_indices = @transform_3, window_bounds = array<i64: 1, 128>}, {transform_indices = @transform_4, window_bounds = array<i64: 64, 128>}]} {
    %c0 = arith.constant 0 : index
    %c0_0 = arith.constant 0 : index
    %0 = vector.load %arg2[%c0, %c0_0] : memref<64x256xbf16, #tpu.memory_space<vmem>>, vector<64x256xbf16>
    %c0_1 = arith.constant 0 : index
    %c0_2 = arith.constant 0 : index
    %1 = vector.load %arg3[%c0_1, %c0_2] : memref<256x128xbf16, #tpu.memory_space<vmem>>, vector<256x128xbf16>
    %cst = arith.constant dense<0.000000e+00> : vector<64x128xf32>
    %2 = tpu.matmul %0, %1, %cst {dimension_numbers = #tpu.dot_dimension_numbers<[1], [0], [0], [1], [0, 0, 1, 1], [], []>} : vector<64x256xbf16>, vector<256x128xbf16>, vector<64x128xf32> -> vector<64x128xf32>
    %c0_3 = arith.constant 0 : index
    %c0_4 = arith.constant 0 : index
    %3 = vector.load %arg4[%c0_3, %c0_4] : memref<1x128xf32, #tpu.memory_space<vmem>>, vector<1x128xf32>
    %4 = vector.broadcast %3 : vector<1x128xf32> to vector<64x128xf32>
    %5 = arith.mulf %2, %4 : vector<64x128xf32>
    %c0_5 = arith.constant 0 : index
    %c0_6 = arith.constant 0 : index
    %6 = vector.load %arg5[%c0_5, %c0_6] : memref<1x128xf32, #tpu.memory_space<vmem>>, vector<1x128xf32>
    %7 = vector.broadcast %6 : vector<1x128xf32> to vector<64x128xf32>
    %8 = arith.addf %5, %7 : vector<64x128xf32>
    %cst_7 = arith.constant 0.000000e+00 : f32
    %9 = vector.broadcast %cst_7 : f32 to vector<64x128xf32>
    %10 = arith.cmpf oge, %8, %9 : vector<64x128xf32>
    %cst_8 = arith.constant 2.000000e-01 : f32
    %11 = vector.broadcast %cst_8 : f32 to vector<64x128xf32>
    %12 = arith.mulf %11, %8 : vector<64x128xf32>
    %13 = arith.select %10, %8, %12 : vector<64x128xi1>, vector<64x128xf32>
    %c0_9 = arith.constant 0 : index
    %c0_10 = arith.constant 0 : index
    %14 = vector.load %arg6[%c0_9, %c0_10] : memref<64x128xf32, #tpu.memory_space<vmem>>, vector<64x128xf32>
    tpu.vector_store %arg6[%c0_9, %c0_10], %13 {strides = array<i32>} : memref<64x128xf32, #tpu.memory_space<vmem>>, vector<64x128xf32>,
    return
  }
  func.func @transform_0(%arg0: i32, %arg1: i32) -> (i32, i32) {
    %c0_i32 = arith.constant 0 : i32
    %c0_i32_0 = arith.constant 0 : i32
    return %arg0, %c0_i32 : i32, i32
  }
  func.func @transform_1(%arg0: i32, %arg1: i32) -> (i32, i32) {
    %c0_i32 = arith.constant 0 : i32
    %c0_i32_0 = arith.constant 0 : i32
    return %c0_i32, %arg1 : i32, i32
  }
  func.func @transform_2(%arg0: i32, %arg1: i32) -> (i32, i32) {
    %c0_i32 = arith.constant 0 : i32
    %c0_i32_0 = arith.constant 0 : i32
    return %c0_i32, %arg1 : i32, i32
  }
  func.func @transform_3(%arg0: i32, %arg1: i32) -> (i32, i32) {
    %c0_i32 = arith.constant 0 : i32
    %c0_i32_0 = arith.constant 0 : i32
    return %c0_i32, %arg1 : i32, i32
  }
  func.func @transform_4(%arg0: i32, %arg1: i32) -> (i32, i32) {
    %c0_i32 = arith.constant 0 : i32
    return %arg0, %arg1 : i32, i32
  }
}

module attributes {stable_mosaic.version = 11 : i64} {
  func.func @_mm_kernel(%arg0: i32, %arg1: i32, %arg2: memref<256x256xbf16, #tpu.memory_space<vmem>>, %arg3: memref<256x128xbf16, #tpu.memory_space<vmem>>, %arg4: memref<1x128xf32, #tpu.memory_space<vmem>>, %arg5: memref<1x128xf32, #tpu.memory_space<vmem>>, %arg6: memref<256x128xf32, #tpu.memory_space<vmem>>) attributes {dimension_semantics = [#tpu.dimension_semantics<parallel>, #tpu.dimension_semantics<parallel>], iteration_bounds = array<i64: 1, 1>, scalar_prefetch = 0 : i64, scratch_operands = 0 : i64, tpu.core_type = #tpu.core_type<tc>, window_params = [{transform_indices = @transform_0, window_bounds = array<i64: 256, 256>}, {transform_indices = @transform_1, window_bounds = array<i64: 256, 128>}, {transform_indices = @transform_2, window_bounds = array<i64: 1, 128>}, {transform_indices = @transform_3, window_bounds = array<i64: 1, 128>}, {transform_indices = @transform_4, window_bounds = array<i64: 256, 128>}]} {
    %c0 = arith.constant 0 : index
    %c0_0 = arith.constant 0 : index
    %0 = vector.load %arg2[%c0, %c0_0] : memref<256x256xbf16, #tpu.memory_space<vmem>>, vector<256x256xbf16>
    %c0_1 = arith.constant 0 : index
    %c0_2 = arith.constant 0 : index
    %1 = vector.load %arg3[%c0_1, %c0_2] : memref<256x128xbf16, #tpu.memory_space<vmem>>, vector<256x128xbf16>
    %cst = arith.constant dense<0.000000e+00> : vector<256x128xf32>
    %2 = tpu.matmul %0, %1, %cst {dimension_numbers = #tpu.dot_dimension_numbers<[1], [0], [0], [1], [0, 0, 1, 1], [], []>} : vector<256x256xbf16>, vector<256x128xbf16>, vector<256x128xf32> -> vector<256x128xf32>
    %c0_3 = arith.constant 0 : index
    %c0_4 = arith.constant 0 : index
    %3 = vector.load %arg4[%c0_3, %c0_4] : memref<1x128xf32, #tpu.memory_space<vmem>>, vector<1x128xf32>
    %4 = vector.broadcast %3 : vector<1x128xf32> to vector<256x128xf32>
    %5 = arith.mulf %2, %4 : vector<256x128xf32>
    %c0_5 = arith.constant 0 : index
    %c0_6 = arith.constant 0 : index
    %6 = vector.load %arg5[%c0_5, %c0_6] : memref<1x128xf32, #tpu.memory_space<vmem>>, vector<1x128xf32>
    %7 = vector.broadcast %6 : vector<1x128xf32> to vector<256x128xf32>
    %8 = arith.addf %5, %7 : vector<256x128xf32>
    %cst_7 = arith.constant 0.000000e+00 : f32
    %9 = vector.broadcast %cst_7 : f32 to vector<256x128xf32>
    %10 = arith.cmpf oge, %8, %9 : vector<256x128xf32>
    %cst_8 = arith.constant 2.000000e-01 : f32
    %11 = vector.broadcast %cst_8 : f32 to vector<256x128xf32>
    %12 = arith.mulf %11, %8 : vector<256x128xf32>
    %13 = arith.select %10, %8, %12 : vector<256x128xi1>, vector<256x128xf32>
    %c0_9 = arith.constant 0 : index
    %c0_10 = arith.constant 0 : index
    %14 = vector.load %arg6[%c0_9, %c0_10] : memref<256x128xf32, #tpu.memory_space<vmem>>, vector<256x128xf32>
    tpu.vector_store %arg6[%c0_9, %c0_10], %13 {strides = array<i32>} : memref<256x128xf32, #tpu.memory_space<vmem>>, vector<256x128xf32>,
    return
  }
  func.func @transform_0(%arg0: i32, %arg1: i32) -> (i32, i32) {
    %c0_i32 = arith.constant 0 : i32
    %c0_i32_0 = arith.constant 0 : i32
    return %arg0, %c0_i32 : i32, i32
  }
  func.func @transform_1(%arg0: i32, %arg1: i32) -> (i32, i32) {
    %c0_i32 = arith.constant 0 : i32
    %c0_i32_0 = arith.constant 0 : i32
    return %c0_i32, %arg1 : i32, i32
  }
  func.func @transform_2(%arg0: i32, %arg1: i32) -> (i32, i32) {
    %c0_i32 = arith.constant 0 : i32
    %c0_i32_0 = arith.constant 0 : i32
    return %c0_i32, %arg1 : i32, i32
  }
  func.func @transform_3(%arg0: i32, %arg1: i32) -> (i32, i32) {
    %c0_i32 = arith.constant 0 : i32
    %c0_i32_0 = arith.constant 0 : i32
    return %c0_i32, %arg1 : i32, i32
  }
  func.func @transform_4(%arg0: i32, %arg1: i32) -> (i32, i32) {
    %c0_i32 = arith.constant 0 : i32
    return %arg0, %arg1 : i32, i32
  }
}

module attributes {stable_mosaic.version = 11 : i64} {
  func.func @_mm_kernel(%arg0: i32, %arg1: i32, %arg2: memref<512x256xbf16, #tpu.memory_space<vmem>>, %arg3: memref<256x128xbf16, #tpu.memory_space<vmem>>, %arg4: memref<1x128xf32, #tpu.memory_space<vmem>>, %arg5: memref<1x128xf32, #tpu.memory_space<vmem>>, %arg6: memref<512x128xf32, #tpu.memory_space<vmem>>) attributes {dimension_semantics = [#tpu.dimension_semantics<parallel>, #tpu.dimension_semantics<parallel>], iteration_bounds = array<i64: 1, 1>, scalar_prefetch = 0 : i64, scratch_operands = 0 : i64, tpu.core_type = #tpu.core_type<tc>, window_params = [{transform_indices = @transform_0, window_bounds = array<i64: 512, 256>}, {transform_indices = @transform_1, window_bounds = array<i64: 256, 128>}, {transform_indices = @transform_2, window_bounds = array<i64: 1, 128>}, {transform_indices = @transform_3, window_bounds = array<i64: 1, 128>}, {transform_indices = @transform_4, window_bounds = array<i64: 512, 128>}]} {
    %c0 = arith.constant 0 : index
    %c0_0 = arith.constant 0 : index
    %0 = vector.load %arg2[%c0, %c0_0] : memref<512x256xbf16, #tpu.memory_space<vmem>>, vector<512x256xbf16>
    %c0_1 = arith.constant 0 : index
    %c0_2 = arith.constant 0 : index
    %1 = vector.load %arg3[%c0_1, %c0_2] : memref<256x128xbf16, #tpu.memory_space<vmem>>, vector<256x128xbf16>
    %cst = arith.constant dense<0.000000e+00> : vector<512x128xf32>
    %2 = tpu.matmul %0, %1, %cst {dimension_numbers = #tpu.dot_dimension_numbers<[1], [0], [0], [1], [0, 0, 1, 1], [], []>} : vector<512x256xbf16>, vector<256x128xbf16>, vector<512x128xf32> -> vector<512x128xf32>
    %c0_3 = arith.constant 0 : index
    %c0_4 = arith.constant 0 : index
    %3 = vector.load %arg4[%c0_3, %c0_4] : memref<1x128xf32, #tpu.memory_space<vmem>>, vector<1x128xf32>
    %4 = vector.broadcast %3 : vector<1x128xf32> to vector<512x128xf32>
    %5 = arith.mulf %2, %4 : vector<512x128xf32>
    %c0_5 = arith.constant 0 : index
    %c0_6 = arith.constant 0 : index
    %6 = vector.load %arg5[%c0_5, %c0_6] : memref<1x128xf32, #tpu.memory_space<vmem>>, vector<1x128xf32>
    %7 = vector.broadcast %6 : vector<1x128xf32> to vector<512x128xf32>
    %8 = arith.addf %5, %7 : vector<512x128xf32>
    %cst_7 = arith.constant 0.000000e+00 : f32
    %9 = vector.broadcast %cst_7 : f32 to vector<512x128xf32>
    %10 = arith.cmpf oge, %8, %9 : vector<512x128xf32>
    %cst_8 = arith.constant 2.000000e-01 : f32
    %11 = vector.broadcast %cst_8 : f32 to vector<512x128xf32>
    %12 = arith.mulf %11, %8 : vector<512x128xf32>
    %13 = arith.select %10, %8, %12 : vector<512x128xi1>, vector<512x128xf32>
    %c0_9 = arith.constant 0 : index
    %c0_10 = arith.constant 0 : index
    %14 = vector.load %arg6[%c0_9, %c0_10] : memref<512x128xf32, #tpu.memory_space<vmem>>, vector<512x128xf32>
    tpu.vector_store %arg6[%c0_9, %c0_10], %13 {strides = array<i32>} : memref<512x128xf32, #tpu.memory_space<vmem>>, vector<512x128xf32>,
    return
  }
  func.func @transform_0(%arg0: i32, %arg1: i32) -> (i32, i32) {
    %c0_i32 = arith.constant 0 : i32
    %c0_i32_0 = arith.constant 0 : i32
    return %arg0, %c0_i32 : i32, i32
  }
  func.func @transform_1(%arg0: i32, %arg1: i32) -> (i32, i32) {
    %c0_i32 = arith.constant 0 : i32
    %c0_i32_0 = arith.constant 0 : i32
    return %c0_i32, %arg1 : i32, i32
  }
  func.func @transform_2(%arg0: i32, %arg1: i32) -> (i32, i32) {
    %c0_i32 = arith.constant 0 : i32
    %c0_i32_0 = arith.constant 0 : i32
    return %c0_i32, %arg1 : i32, i32
  }
  func.func @transform_3(%arg0: i32, %arg1: i32) -> (i32, i32) {
    %c0_i32 = arith.constant 0 : i32
    %c0_i32_0 = arith.constant 0 : i32
    return %c0_i32, %arg1 : i32, i32
  }
  func.func @transform_4(%arg0: i32, %arg1: i32) -> (i32, i32) {
    %c0_i32 = arith.constant 0 : i32
    return %arg0, %arg1 : i32, i32
  }
}

module attributes {stable_mosaic.version = 11 : i64} {
  func.func @_mm_kernel(%arg0: i32, %arg1: i32, %arg2: memref<8x512xbf16, #tpu.memory_space<vmem>>, %arg3: memref<512x256xbf16, #tpu.memory_space<vmem>>, %arg4: memref<1x256xf32, #tpu.memory_space<vmem>>, %arg5: memref<1x256xf32, #tpu.memory_space<vmem>>, %arg6: memref<8x256xf32, #tpu.memory_space<vmem>>) attributes {dimension_semantics = [#tpu.dimension_semantics<parallel>, #tpu.dimension_semantics<parallel>], iteration_bounds = array<i64: 1, 4>, scalar_prefetch = 0 : i64, scratch_operands = 0 : i64, tpu.core_type = #tpu.core_type<tc>, window_params = [{transform_indices = @transform_0, window_bounds = array<i64: 8, 512>}, {transform_indices = @transform_1, window_bounds = array<i64: 512, 256>}, {transform_indices = @transform_2, window_bounds = array<i64: 1, 256>}, {transform_indices = @transform_3, window_bounds = array<i64: 1, 256>}, {transform_indices = @transform_4, window_bounds = array<i64: 8, 256>}]} {
    %c0 = arith.constant 0 : index
    %c0_0 = arith.constant 0 : index
    %0 = vector.load %arg2[%c0, %c0_0] : memref<8x512xbf16, #tpu.memory_space<vmem>>, vector<8x512xbf16>
    %c0_1 = arith.constant 0 : index
    %c0_2 = arith.constant 0 : index
    %1 = vector.load %arg3[%c0_1, %c0_2] : memref<512x256xbf16, #tpu.memory_space<vmem>>, vector<512x256xbf16>
    %cst = arith.constant dense<0.000000e+00> : vector<8x256xf32>
    %2 = tpu.matmul %0, %1, %cst {dimension_numbers = #tpu.dot_dimension_numbers<[1], [0], [0], [1], [0, 0, 1, 1], [], []>} : vector<8x512xbf16>, vector<512x256xbf16>, vector<8x256xf32> -> vector<8x256xf32>
    %c0_3 = arith.constant 0 : index
    %c0_4 = arith.constant 0 : index
    %3 = vector.load %arg4[%c0_3, %c0_4] : memref<1x256xf32, #tpu.memory_space<vmem>>, vector<1x256xf32>
    %4 = vector.broadcast %3 : vector<1x256xf32> to vector<8x256xf32>
    %5 = arith.mulf %2, %4 : vector<8x256xf32>
    %c0_5 = arith.constant 0 : index
    %c0_6 = arith.constant 0 : index
    %6 = vector.load %arg5[%c0_5, %c0_6] : memref<1x256xf32, #tpu.memory_space<vmem>>, vector<1x256xf32>
    %7 = vector.broadcast %6 : vector<1x256xf32> to vector<8x256xf32>
    %8 = arith.addf %5, %7 : vector<8x256xf32>
    %c0_7 = arith.constant 0 : index
    %c0_8 = arith.constant 0 : index
    %9 = vector.load %arg6[%c0_7, %c0_8] : memref<8x256xf32, #tpu.memory_space<vmem>>, vector<8x256xf32>
    tpu.vector_store %arg6[%c0_7, %c0_8], %8 {strides = array<i32>} : memref<8x256xf32, #tpu.memory_space<vmem>>, vector<8x256xf32>,
    return
  }
  func.func @transform_0(%arg0: i32, %arg1: i32) -> (i32, i32) {
    %c0_i32 = arith.constant 0 : i32
    %c0_i32_0 = arith.constant 0 : i32
    return %arg0, %c0_i32 : i32, i32
  }
  func.func @transform_1(%arg0: i32, %arg1: i32) -> (i32, i32) {
    %c0_i32 = arith.constant 0 : i32
    %c0_i32_0 = arith.constant 0 : i32
    return %c0_i32, %arg1 : i32, i32
  }
  func.func @transform_2(%arg0: i32, %arg1: i32) -> (i32, i32) {
    %c0_i32 = arith.constant 0 : i32
    %c0_i32_0 = arith.constant 0 : i32
    return %c0_i32, %arg1 : i32, i32
  }
  func.func @transform_3(%arg0: i32, %arg1: i32) -> (i32, i32) {
    %c0_i32 = arith.constant 0 : i32
    %c0_i32_0 = arith.constant 0 : i32
    return %c0_i32, %arg1 : i32, i32
  }
  func.func @transform_4(%arg0: i32, %arg1: i32) -> (i32, i32) {
    %c0_i32 = arith.constant 0 : i32
    return %arg0, %arg1 : i32, i32
  }
}

module attributes {stable_mosaic.version = 11 : i64} {
  func.func @_mm_kernel(%arg0: i32, %arg1: i32, %arg2: memref<256x128xbf16, #tpu.memory_space<vmem>>, %arg3: memref<128x128xbf16, #tpu.memory_space<vmem>>, %arg4: memref<1x128xf32, #tpu.memory_space<vmem>>, %arg5: memref<1x128xf32, #tpu.memory_space<vmem>>, %arg6: memref<256x128xf32, #tpu.memory_space<vmem>>) attributes {dimension_semantics = [#tpu.dimension_semantics<parallel>, #tpu.dimension_semantics<parallel>], iteration_bounds = array<i64: 1, 1>, scalar_prefetch = 0 : i64, scratch_operands = 0 : i64, tpu.core_type = #tpu.core_type<tc>, window_params = [{transform_indices = @transform_0, window_bounds = array<i64: 256, 128>}, {transform_indices = @transform_1, window_bounds = array<i64: 128, 128>}, {transform_indices = @transform_2, window_bounds = array<i64: 1, 128>}, {transform_indices = @transform_3, window_bounds = array<i64: 1, 128>}, {transform_indices = @transform_4, window_bounds = array<i64: 256, 128>}]} {
    %c0 = arith.constant 0 : index
    %c0_0 = arith.constant 0 : index
    %0 = vector.load %arg2[%c0, %c0_0] : memref<256x128xbf16, #tpu.memory_space<vmem>>, vector<256x128xbf16>
    %c0_1 = arith.constant 0 : index
    %c0_2 = arith.constant 0 : index
    %1 = vector.load %arg3[%c0_1, %c0_2] : memref<128x128xbf16, #tpu.memory_space<vmem>>, vector<128x128xbf16>
    %cst = arith.constant dense<0.000000e+00> : vector<256x128xf32>
    %2 = tpu.matmul %0, %1, %cst {dimension_numbers = #tpu.dot_dimension_numbers<[1], [0], [0], [1], [0, 0, 1, 1], [], []>} : vector<256x128xbf16>, vector<128x128xbf16>, vector<256x128xf32> -> vector<256x128xf32>
    %c0_3 = arith.constant 0 : index
    %c0_4 = arith.constant 0 : index
    %3 = vector.load %arg4[%c0_3, %c0_4] : memref<1x128xf32, #tpu.memory_space<vmem>>, vector<1x128xf32>
    %4 = vector.broadcast %3 : vector<1x128xf32> to vector<256x128xf32>
    %5 = arith.mulf %2, %4 : vector<256x128xf32>
    %c0_5 = arith.constant 0 : index
    %c0_6 = arith.constant 0 : index
    %6 = vector.load %arg5[%c0_5, %c0_6] : memref<1x128xf32, #tpu.memory_space<vmem>>, vector<1x128xf32>
    %7 = vector.broadcast %6 : vector<1x128xf32> to vector<256x128xf32>
    %8 = arith.addf %5, %7 : vector<256x128xf32>
    %cst_7 = arith.constant 0.000000e+00 : f32
    %9 = vector.broadcast %cst_7 : f32 to vector<256x128xf32>
    %10 = arith.maximumf %8, %9 : vector<256x128xf32>
    %c0_8 = arith.constant 0 : index
    %c0_9 = arith.constant 0 : index
    %11 = vector.load %arg6[%c0_8, %c0_9] : memref<256x128xf32, #tpu.memory_space<vmem>>, vector<256x128xf32>
    tpu.vector_store %arg6[%c0_8, %c0_9], %10 {strides = array<i32>} : memref<256x128xf32, #tpu.memory_space<vmem>>, vector<256x128xf32>,
    return
  }
  func.func @transform_0(%arg0: i32, %arg1: i32) -> (i32, i32) {
    %c0_i32 = arith.constant 0 : i32
    %c0_i32_0 = arith.constant 0 : i32
    return %arg0, %c0_i32 : i32, i32
  }
  func.func @transform_1(%arg0: i32, %arg1: i32) -> (i32, i32) {
    %c0_i32 = arith.constant 0 : i32
    %c0_i32_0 = arith.constant 0 : i32
    return %c0_i32, %arg1 : i32, i32
  }
  func.func @transform_2(%arg0: i32, %arg1: i32) -> (i32, i32) {
    %c0_i32 = arith.constant 0 : i32
    %c0_i32_0 = arith.constant 0 : i32
    return %c0_i32, %arg1 : i32, i32
  }
  func.func @transform_3(%arg0: i32, %arg1: i32) -> (i32, i32) {
    %c0_i32 = arith.constant 0 : i32
    %c0_i32_0 = arith.constant 0 : i32
    return %c0_i32, %arg1 : i32, i32
  }
  func.func @transform_4(%arg0: i32, %arg1: i32) -> (i32, i32) {
    %c0_i32 = arith.constant 0 : i32
    return %arg0, %arg1 : i32, i32
  }
}

module attributes {stable_mosaic.version = 11 : i64} {
  func.func @_mm_kernel(%arg0: i32, %arg1: i32, %arg2: memref<128x128xbf16, #tpu.memory_space<vmem>>, %arg3: memref<128x128xbf16, #tpu.memory_space<vmem>>, %arg4: memref<1x128xf32, #tpu.memory_space<vmem>>, %arg5: memref<1x128xf32, #tpu.memory_space<vmem>>, %arg6: memref<128x128xf32, #tpu.memory_space<vmem>>) attributes {dimension_semantics = [#tpu.dimension_semantics<parallel>, #tpu.dimension_semantics<parallel>], iteration_bounds = array<i64: 1, 1>, scalar_prefetch = 0 : i64, scratch_operands = 0 : i64, tpu.core_type = #tpu.core_type<tc>, window_params = [{transform_indices = @transform_0, window_bounds = array<i64: 128, 128>}, {transform_indices = @transform_1, window_bounds = array<i64: 128, 128>}, {transform_indices = @transform_2, window_bounds = array<i64: 1, 128>}, {transform_indices = @transform_3, window_bounds = array<i64: 1, 128>}, {transform_indices = @transform_4, window_bounds = array<i64: 128, 128>}]} {
    %c0 = arith.constant 0 : index
    %c0_0 = arith.constant 0 : index
    %0 = vector.load %arg2[%c0, %c0_0] : memref<128x128xbf16, #tpu.memory_space<vmem>>, vector<128x128xbf16>
    %c0_1 = arith.constant 0 : index
    %c0_2 = arith.constant 0 : index
    %1 = vector.load %arg3[%c0_1, %c0_2] : memref<128x128xbf16, #tpu.memory_space<vmem>>, vector<128x128xbf16>
    %cst = arith.constant dense<0.000000e+00> : vector<128x128xf32>
    %2 = tpu.matmul %0, %1, %cst {dimension_numbers = #tpu.dot_dimension_numbers<[1], [0], [0], [1], [0, 0, 1, 1], [], []>} : vector<128x128xbf16>, vector<128x128xbf16>, vector<128x128xf32> -> vector<128x128xf32>
    %c0_3 = arith.constant 0 : index
    %c0_4 = arith.constant 0 : index
    %3 = vector.load %arg4[%c0_3, %c0_4] : memref<1x128xf32, #tpu.memory_space<vmem>>, vector<1x128xf32>
    %4 = vector.broadcast %3 : vector<1x128xf32> to vector<128x128xf32>
    %5 = arith.mulf %2, %4 : vector<128x128xf32>
    %c0_5 = arith.constant 0 : index
    %c0_6 = arith.constant 0 : index
    %6 = vector.load %arg5[%c0_5, %c0_6] : memref<1x128xf32, #tpu.memory_space<vmem>>, vector<1x128xf32>
    %7 = vector.broadcast %6 : vector<1x128xf32> to vector<128x128xf32>
    %8 = arith.addf %5, %7 : vector<128x128xf32>
    %cst_7 = arith.constant 0.000000e+00 : f32
    %9 = vector.broadcast %cst_7 : f32 to vector<128x128xf32>
    %10 = arith.maximumf %8, %9 : vector<128x128xf32>
    %c0_8 = arith.constant 0 : index
    %c0_9 = arith.constant 0 : index
    %11 = vector.load %arg6[%c0_8, %c0_9] : memref<128x128xf32, #tpu.memory_space<vmem>>, vector<128x128xf32>
    tpu.vector_store %arg6[%c0_8, %c0_9], %10 {strides = array<i32>} : memref<128x128xf32, #tpu.memory_space<vmem>>, vector<128x128xf32>,
    return
  }
  func.func @transform_0(%arg0: i32, %arg1: i32) -> (i32, i32) {
    %c0_i32 = arith.constant 0 : i32
    %c0_i32_0 = arith.constant 0 : i32
    return %arg0, %c0_i32 : i32, i32
  }
  func.func @transform_1(%arg0: i32, %arg1: i32) -> (i32, i32) {
    %c0_i32 = arith.constant 0 : i32
    %c0_i32_0 = arith.constant 0 : i32
    return %c0_i32, %arg1 : i32, i32
  }
  func.func @transform_2(%arg0: i32, %arg1: i32) -> (i32, i32) {
    %c0_i32 = arith.constant 0 : i32
    %c0_i32_0 = arith.constant 0 : i32
    return %c0_i32, %arg1 : i32, i32
  }
  func.func @transform_3(%arg0: i32, %arg1: i32) -> (i32, i32) {
    %c0_i32 = arith.constant 0 : i32
    %c0_i32_0 = arith.constant 0 : i32
    return %c0_i32, %arg1 : i32, i32
  }
  func.func @transform_4(%arg0: i32, %arg1: i32) -> (i32, i32) {
    %c0_i32 = arith.constant 0 : i32
    return %arg0, %arg1 : i32, i32
  }
}

module attributes {stable_mosaic.version = 11 : i64} {
  func.func @_mm_kernel(%arg0: i32, %arg1: i32, %arg2: memref<64x128xbf16, #tpu.memory_space<vmem>>, %arg3: memref<128x128xbf16, #tpu.memory_space<vmem>>, %arg4: memref<1x128xf32, #tpu.memory_space<vmem>>, %arg5: memref<1x128xf32, #tpu.memory_space<vmem>>, %arg6: memref<64x128xf32, #tpu.memory_space<vmem>>) attributes {dimension_semantics = [#tpu.dimension_semantics<parallel>, #tpu.dimension_semantics<parallel>], iteration_bounds = array<i64: 1, 1>, scalar_prefetch = 0 : i64, scratch_operands = 0 : i64, tpu.core_type = #tpu.core_type<tc>, window_params = [{transform_indices = @transform_0, window_bounds = array<i64: 64, 128>}, {transform_indices = @transform_1, window_bounds = array<i64: 128, 128>}, {transform_indices = @transform_2, window_bounds = array<i64: 1, 128>}, {transform_indices = @transform_3, window_bounds = array<i64: 1, 128>}, {transform_indices = @transform_4, window_bounds = array<i64: 64, 128>}]} {
    %c0 = arith.constant 0 : index
    %c0_0 = arith.constant 0 : index
    %0 = vector.load %arg2[%c0, %c0_0] : memref<64x128xbf16, #tpu.memory_space<vmem>>, vector<64x128xbf16>
    %c0_1 = arith.constant 0 : index
    %c0_2 = arith.constant 0 : index
    %1 = vector.load %arg3[%c0_1, %c0_2] : memref<128x128xbf16, #tpu.memory_space<vmem>>, vector<128x128xbf16>
    %cst = arith.constant dense<0.000000e+00> : vector<64x128xf32>
    %2 = tpu.matmul %0, %1, %cst {dimension_numbers = #tpu.dot_dimension_numbers<[1], [0], [0], [1], [0, 0, 1, 1], [], []>} : vector<64x128xbf16>, vector<128x128xbf16>, vector<64x128xf32> -> vector<64x128xf32>
    %c0_3 = arith.constant 0 : index
    %c0_4 = arith.constant 0 : index
    %3 = vector.load %arg4[%c0_3, %c0_4] : memref<1x128xf32, #tpu.memory_space<vmem>>, vector<1x128xf32>
    %4 = vector.broadcast %3 : vector<1x128xf32> to vector<64x128xf32>
    %5 = arith.mulf %2, %4 : vector<64x128xf32>
    %c0_5 = arith.constant 0 : index
    %c0_6 = arith.constant 0 : index
    %6 = vector.load %arg5[%c0_5, %c0_6] : memref<1x128xf32, #tpu.memory_space<vmem>>, vector<1x128xf32>
    %7 = vector.broadcast %6 : vector<1x128xf32> to vector<64x128xf32>
    %8 = arith.addf %5, %7 : vector<64x128xf32>
    %cst_7 = arith.constant 0.000000e+00 : f32
    %9 = vector.broadcast %cst_7 : f32 to vector<64x128xf32>
    %10 = arith.maximumf %8, %9 : vector<64x128xf32>
    %c0_8 = arith.constant 0 : index
    %c0_9 = arith.constant 0 : index
    %11 = vector.load %arg6[%c0_8, %c0_9] : memref<64x128xf32, #tpu.memory_space<vmem>>, vector<64x128xf32>
    tpu.vector_store %arg6[%c0_8, %c0_9], %10 {strides = array<i32>} : memref<64x128xf32, #tpu.memory_space<vmem>>, vector<64x128xf32>,
    return
  }
  func.func @transform_0(%arg0: i32, %arg1: i32) -> (i32, i32) {
    %c0_i32 = arith.constant 0 : i32
    %c0_i32_0 = arith.constant 0 : i32
    return %arg0, %c0_i32 : i32, i32
  }
  func.func @transform_1(%arg0: i32, %arg1: i32) -> (i32, i32) {
    %c0_i32 = arith.constant 0 : i32
    %c0_i32_0 = arith.constant 0 : i32
    return %c0_i32, %arg1 : i32, i32
  }
  func.func @transform_2(%arg0: i32, %arg1: i32) -> (i32, i32) {
    %c0_i32 = arith.constant 0 : i32
    %c0_i32_0 = arith.constant 0 : i32
    return %c0_i32, %arg1 : i32, i32
  }
  func.func @transform_3(%arg0: i32, %arg1: i32) -> (i32, i32) {
    %c0_i32 = arith.constant 0 : i32
    %c0_i32_0 = arith.constant 0 : i32
    return %c0_i32, %arg1 : i32, i32
  }
  func.func @transform_4(%arg0: i32, %arg1: i32) -> (i32, i32) {
    %c0_i32 = arith.constant 0 : i32
    return %arg0, %arg1 : i32, i32
  }
}

module attributes {stable_mosaic.version = 11 : i64} {
  func.func @_mm_kernel(%arg0: i32, %arg1: i32, %arg2: memref<32x256xbf16, #tpu.memory_space<vmem>>, %arg3: memref<256x128xbf16, #tpu.memory_space<vmem>>, %arg4: memref<1x128xf32, #tpu.memory_space<vmem>>, %arg5: memref<1x128xf32, #tpu.memory_space<vmem>>, %arg6: memref<32x128xf32, #tpu.memory_space<vmem>>) attributes {dimension_semantics = [#tpu.dimension_semantics<parallel>, #tpu.dimension_semantics<parallel>], iteration_bounds = array<i64: 1, 1>, scalar_prefetch = 0 : i64, scratch_operands = 0 : i64, tpu.core_type = #tpu.core_type<tc>, window_params = [{transform_indices = @transform_0, window_bounds = array<i64: 32, 256>}, {transform_indices = @transform_1, window_bounds = array<i64: 256, 128>}, {transform_indices = @transform_2, window_bounds = array<i64: 1, 128>}, {transform_indices = @transform_3, window_bounds = array<i64: 1, 128>}, {transform_indices = @transform_4, window_bounds = array<i64: 32, 128>}]} {
    %c0 = arith.constant 0 : index
    %c0_0 = arith.constant 0 : index
    %0 = vector.load %arg2[%c0, %c0_0] : memref<32x256xbf16, #tpu.memory_space<vmem>>, vector<32x256xbf16>
    %c0_1 = arith.constant 0 : index
    %c0_2 = arith.constant 0 : index
    %1 = vector.load %arg3[%c0_1, %c0_2] : memref<256x128xbf16, #tpu.memory_space<vmem>>, vector<256x128xbf16>
    %cst = arith.constant dense<0.000000e+00> : vector<32x128xf32>
    %2 = tpu.matmul %0, %1, %cst {dimension_numbers = #tpu.dot_dimension_numbers<[1], [0], [0], [1], [0, 0, 1, 1], [], []>} : vector<32x256xbf16>, vector<256x128xbf16>, vector<32x128xf32> -> vector<32x128xf32>
    %c0_3 = arith.constant 0 : index
    %c0_4 = arith.constant 0 : index
    %3 = vector.load %arg4[%c0_3, %c0_4] : memref<1x128xf32, #tpu.memory_space<vmem>>, vector<1x128xf32>
    %4 = vector.broadcast %3 : vector<1x128xf32> to vector<32x128xf32>
    %5 = arith.mulf %2, %4 : vector<32x128xf32>
    %c0_5 = arith.constant 0 : index
    %c0_6 = arith.constant 0 : index
    %6 = vector.load %arg5[%c0_5, %c0_6] : memref<1x128xf32, #tpu.memory_space<vmem>>, vector<1x128xf32>
    %7 = vector.broadcast %6 : vector<1x128xf32> to vector<32x128xf32>
    %8 = arith.addf %5, %7 : vector<32x128xf32>
    %cst_7 = arith.constant 0.000000e+00 : f32
    %9 = vector.broadcast %cst_7 : f32 to vector<32x128xf32>
    %10 = arith.maximumf %8, %9 : vector<32x128xf32>
    %c0_8 = arith.constant 0 : index
    %c0_9 = arith.constant 0 : index
    %11 = vector.load %arg6[%c0_8, %c0_9] : memref<32x128xf32, #tpu.memory_space<vmem>>, vector<32x128xf32>
    tpu.vector_store %arg6[%c0_8, %c0_9], %10 {strides = array<i32>} : memref<32x128xf32, #tpu.memory_space<vmem>>, vector<32x128xf32>,
    return
  }
  func.func @transform_0(%arg0: i32, %arg1: i32) -> (i32, i32) {
    %c0_i32 = arith.constant 0 : i32
    %c0_i32_0 = arith.constant 0 : i32
    return %arg0, %c0_i32 : i32, i32
  }
  func.func @transform_1(%arg0: i32, %arg1: i32) -> (i32, i32) {
    %c0_i32 = arith.constant 0 : i32
    %c0_i32_0 = arith.constant 0 : i32
    return %c0_i32, %arg1 : i32, i32
  }
  func.func @transform_2(%arg0: i32, %arg1: i32) -> (i32, i32) {
    %c0_i32 = arith.constant 0 : i32
    %c0_i32_0 = arith.constant 0 : i32
    return %c0_i32, %arg1 : i32, i32
  }
  func.func @transform_3(%arg0: i32, %arg1: i32) -> (i32, i32) {
    %c0_i32 = arith.constant 0 : i32
    %c0_i32_0 = arith.constant 0 : i32
    return %c0_i32, %arg1 : i32, i32
  }
  func.func @transform_4(%arg0: i32, %arg1: i32) -> (i32, i32) {
    %c0_i32 = arith.constant 0 : i32
    return %arg0, %arg1 : i32, i32
  }
}

module attributes {stable_mosaic.version = 11 : i64} {
  func.func @_mm_kernel(%arg0: i32, %arg1: i32, %arg2: memref<32x384xbf16, #tpu.memory_space<vmem>>, %arg3: memref<384x256xbf16, #tpu.memory_space<vmem>>, %arg4: memref<1x256xf32, #tpu.memory_space<vmem>>, %arg5: memref<1x256xf32, #tpu.memory_space<vmem>>, %arg6: memref<32x256xf32, #tpu.memory_space<vmem>>) attributes {dimension_semantics = [#tpu.dimension_semantics<parallel>, #tpu.dimension_semantics<parallel>], iteration_bounds = array<i64: 1, 1>, scalar_prefetch = 0 : i64, scratch_operands = 0 : i64, tpu.core_type = #tpu.core_type<tc>, window_params = [{transform_indices = @transform_0, window_bounds = array<i64: 32, 384>}, {transform_indices = @transform_1, window_bounds = array<i64: 384, 256>}, {transform_indices = @transform_2, window_bounds = array<i64: 1, 256>}, {transform_indices = @transform_3, window_bounds = array<i64: 1, 256>}, {transform_indices = @transform_4, window_bounds = array<i64: 32, 256>}]} {
    %c0 = arith.constant 0 : index
    %c0_0 = arith.constant 0 : index
    %0 = vector.load %arg2[%c0, %c0_0] : memref<32x384xbf16, #tpu.memory_space<vmem>>, vector<32x384xbf16>
    %c0_1 = arith.constant 0 : index
    %c0_2 = arith.constant 0 : index
    %1 = vector.load %arg3[%c0_1, %c0_2] : memref<384x256xbf16, #tpu.memory_space<vmem>>, vector<384x256xbf16>
    %cst = arith.constant dense<0.000000e+00> : vector<32x256xf32>
    %2 = tpu.matmul %0, %1, %cst {dimension_numbers = #tpu.dot_dimension_numbers<[1], [0], [0], [1], [0, 0, 1, 1], [], []>} : vector<32x384xbf16>, vector<384x256xbf16>, vector<32x256xf32> -> vector<32x256xf32>
    %c0_3 = arith.constant 0 : index
    %c0_4 = arith.constant 0 : index
    %3 = vector.load %arg4[%c0_3, %c0_4] : memref<1x256xf32, #tpu.memory_space<vmem>>, vector<1x256xf32>
    %4 = vector.broadcast %3 : vector<1x256xf32> to vector<32x256xf32>
    %5 = arith.mulf %2, %4 : vector<32x256xf32>
    %c0_5 = arith.constant 0 : index
    %c0_6 = arith.constant 0 : index
    %6 = vector.load %arg5[%c0_5, %c0_6] : memref<1x256xf32, #tpu.memory_space<vmem>>, vector<1x256xf32>
    %7 = vector.broadcast %6 : vector<1x256xf32> to vector<32x256xf32>
    %8 = arith.addf %5, %7 : vector<32x256xf32>
    %cst_7 = arith.constant 0.000000e+00 : f32
    %9 = vector.broadcast %cst_7 : f32 to vector<32x256xf32>
    %10 = arith.maximumf %8, %9 : vector<32x256xf32>
    %c0_8 = arith.constant 0 : index
    %c0_9 = arith.constant 0 : index
    %11 = vector.load %arg6[%c0_8, %c0_9] : memref<32x256xf32, #tpu.memory_space<vmem>>, vector<32x256xf32>
    tpu.vector_store %arg6[%c0_8, %c0_9], %10 {strides = array<i32>} : memref<32x256xf32, #tpu.memory_space<vmem>>, vector<32x256xf32>,
    return
  }
  func.func @transform_0(%arg0: i32, %arg1: i32) -> (i32, i32) {
    %c0_i32 = arith.constant 0 : i32
    %c0_i32_0 = arith.constant 0 : i32
    return %arg0, %c0_i32 : i32, i32
  }
  func.func @transform_1(%arg0: i32, %arg1: i32) -> (i32, i32) {
    %c0_i32 = arith.constant 0 : i32
    %c0_i32_0 = arith.constant 0 : i32
    return %c0_i32, %arg1 : i32, i32
  }
  func.func @transform_2(%arg0: i32, %arg1: i32) -> (i32, i32) {
    %c0_i32 = arith.constant 0 : i32
    %c0_i32_0 = arith.constant 0 : i32
    return %c0_i32, %arg1 : i32, i32
  }
  func.func @transform_3(%arg0: i32, %arg1: i32) -> (i32, i32) {
    %c0_i32 = arith.constant 0 : i32
    %c0_i32_0 = arith.constant 0 : i32
    return %c0_i32, %arg1 : i32, i32
  }
  func.func @transform_4(%arg0: i32, %arg1: i32) -> (i32, i32) {
    %c0_i32 = arith.constant 0 : i32
    return %arg0, %arg1 : i32, i32
  }
}

module attributes {stable_mosaic.version = 11 : i64} {
  func.func @_mm_kernel(%arg0: i32, %arg1: i32, %arg2: memref<32x768xbf16, #tpu.memory_space<vmem>>, %arg3: memref<768x128xbf16, #tpu.memory_space<vmem>>, %arg4: memref<1x128xf32, #tpu.memory_space<vmem>>, %arg5: memref<1x128xf32, #tpu.memory_space<vmem>>, %arg6: memref<32x128xf32, #tpu.memory_space<vmem>>) attributes {dimension_semantics = [#tpu.dimension_semantics<parallel>, #tpu.dimension_semantics<parallel>], iteration_bounds = array<i64: 1, 1>, scalar_prefetch = 0 : i64, scratch_operands = 0 : i64, tpu.core_type = #tpu.core_type<tc>, window_params = [{transform_indices = @transform_0, window_bounds = array<i64: 32, 768>}, {transform_indices = @transform_1, window_bounds = array<i64: 768, 128>}, {transform_indices = @transform_2, window_bounds = array<i64: 1, 128>}, {transform_indices = @transform_3, window_bounds = array<i64: 1, 128>}, {transform_indices = @transform_4, window_bounds = array<i64: 32, 128>}]} {
    %c0 = arith.constant 0 : index
    %c0_0 = arith.constant 0 : index
    %0 = vector.load %arg2[%c0, %c0_0] : memref<32x768xbf16, #tpu.memory_space<vmem>>, vector<32x768xbf16>
    %c0_1 = arith.constant 0 : index
    %c0_2 = arith.constant 0 : index
    %1 = vector.load %arg3[%c0_1, %c0_2] : memref<768x128xbf16, #tpu.memory_space<vmem>>, vector<768x128xbf16>
    %cst = arith.constant dense<0.000000e+00> : vector<32x128xf32>
    %2 = tpu.matmul %0, %1, %cst {dimension_numbers = #tpu.dot_dimension_numbers<[1], [0], [0], [1], [0, 0, 1, 1], [], []>} : vector<32x768xbf16>, vector<768x128xbf16>, vector<32x128xf32> -> vector<32x128xf32>
    %c0_3 = arith.constant 0 : index
    %c0_4 = arith.constant 0 : index
    %3 = vector.load %arg4[%c0_3, %c0_4] : memref<1x128xf32, #tpu.memory_space<vmem>>, vector<1x128xf32>
    %4 = vector.broadcast %3 : vector<1x128xf32> to vector<32x128xf32>
    %5 = arith.mulf %2, %4 : vector<32x128xf32>
    %c0_5 = arith.constant 0 : index
    %c0_6 = arith.constant 0 : index
    %6 = vector.load %arg5[%c0_5, %c0_6] : memref<1x128xf32, #tpu.memory_space<vmem>>, vector<1x128xf32>
    %7 = vector.broadcast %6 : vector<1x128xf32> to vector<32x128xf32>
    %8 = arith.addf %5, %7 : vector<32x128xf32>
    %cst_7 = arith.constant 0.000000e+00 : f32
    %9 = vector.broadcast %cst_7 : f32 to vector<32x128xf32>
    %10 = arith.maximumf %8, %9 : vector<32x128xf32>
    %c0_8 = arith.constant 0 : index
    %c0_9 = arith.constant 0 : index
    %11 = vector.load %arg6[%c0_8, %c0_9] : memref<32x128xf32, #tpu.memory_space<vmem>>, vector<32x128xf32>
    tpu.vector_store %arg6[%c0_8, %c0_9], %10 {strides = array<i32>} : memref<32x128xf32, #tpu.memory_space<vmem>>, vector<32x128xf32>,
    return
  }
  func.func @transform_0(%arg0: i32, %arg1: i32) -> (i32, i32) {
    %c0_i32 = arith.constant 0 : i32
    %c0_i32_0 = arith.constant 0 : i32
    return %arg0, %c0_i32 : i32, i32
  }
  func.func @transform_1(%arg0: i32, %arg1: i32) -> (i32, i32) {
    %c0_i32 = arith.constant 0 : i32
    %c0_i32_0 = arith.constant 0 : i32
    return %c0_i32, %arg1 : i32, i32
  }
  func.func @transform_2(%arg0: i32, %arg1: i32) -> (i32, i32) {
    %c0_i32 = arith.constant 0 : i32
    %c0_i32_0 = arith.constant 0 : i32
    return %c0_i32, %arg1 : i32, i32
  }
  func.func @transform_3(%arg0: i32, %arg1: i32) -> (i32, i32) {
    %c0_i32 = arith.constant 0 : i32
    %c0_i32_0 = arith.constant 0 : i32
    return %c0_i32, %arg1 : i32, i32
  }
  func.func @transform_4(%arg0: i32, %arg1: i32) -> (i32, i32) {
    %c0_i32 = arith.constant 0 : i32
    return %arg0, %arg1 : i32, i32
  }
}

module attributes {stable_mosaic.version = 11 : i64} {
  func.func @_mm_kernel(%arg0: i32, %arg1: i32, %arg2: memref<64x384xbf16, #tpu.memory_space<vmem>>, %arg3: memref<384x128xbf16, #tpu.memory_space<vmem>>, %arg4: memref<1x128xf32, #tpu.memory_space<vmem>>, %arg5: memref<1x128xf32, #tpu.memory_space<vmem>>, %arg6: memref<64x128xf32, #tpu.memory_space<vmem>>) attributes {dimension_semantics = [#tpu.dimension_semantics<parallel>, #tpu.dimension_semantics<parallel>], iteration_bounds = array<i64: 1, 1>, scalar_prefetch = 0 : i64, scratch_operands = 0 : i64, tpu.core_type = #tpu.core_type<tc>, window_params = [{transform_indices = @transform_0, window_bounds = array<i64: 64, 384>}, {transform_indices = @transform_1, window_bounds = array<i64: 384, 128>}, {transform_indices = @transform_2, window_bounds = array<i64: 1, 128>}, {transform_indices = @transform_3, window_bounds = array<i64: 1, 128>}, {transform_indices = @transform_4, window_bounds = array<i64: 64, 128>}]} {
    %c0 = arith.constant 0 : index
    %c0_0 = arith.constant 0 : index
    %0 = vector.load %arg2[%c0, %c0_0] : memref<64x384xbf16, #tpu.memory_space<vmem>>, vector<64x384xbf16>
    %c0_1 = arith.constant 0 : index
    %c0_2 = arith.constant 0 : index
    %1 = vector.load %arg3[%c0_1, %c0_2] : memref<384x128xbf16, #tpu.memory_space<vmem>>, vector<384x128xbf16>
    %cst = arith.constant dense<0.000000e+00> : vector<64x128xf32>
    %2 = tpu.matmul %0, %1, %cst {dimension_numbers = #tpu.dot_dimension_numbers<[1], [0], [0], [1], [0, 0, 1, 1], [], []>} : vector<64x384xbf16>, vector<384x128xbf16>, vector<64x128xf32> -> vector<64x128xf32>
    %c0_3 = arith.constant 0 : index
    %c0_4 = arith.constant 0 : index
    %3 = vector.load %arg4[%c0_3, %c0_4] : memref<1x128xf32, #tpu.memory_space<vmem>>, vector<1x128xf32>
    %4 = vector.broadcast %3 : vector<1x128xf32> to vector<64x128xf32>
    %5 = arith.mulf %2, %4 : vector<64x128xf32>
    %c0_5 = arith.constant 0 : index
    %c0_6 = arith.constant 0 : index
    %6 = vector.load %arg5[%c0_5, %c0_6] : memref<1x128xf32, #tpu.memory_space<vmem>>, vector<1x128xf32>
    %7 = vector.broadcast %6 : vector<1x128xf32> to vector<64x128xf32>
    %8 = arith.addf %5, %7 : vector<64x128xf32>
    %cst_7 = arith.constant 0.000000e+00 : f32
    %9 = vector.broadcast %cst_7 : f32 to vector<64x128xf32>
    %10 = arith.maximumf %8, %9 : vector<64x128xf32>
    %c0_8 = arith.constant 0 : index
    %c0_9 = arith.constant 0 : index
    %11 = vector.load %arg6[%c0_8, %c0_9] : memref<64x128xf32, #tpu.memory_space<vmem>>, vector<64x128xf32>
    tpu.vector_store %arg6[%c0_8, %c0_9], %10 {strides = array<i32>} : memref<64x128xf32, #tpu.memory_space<vmem>>, vector<64x128xf32>,
    return
  }
  func.func @transform_0(%arg0: i32, %arg1: i32) -> (i32, i32) {
    %c0_i32 = arith.constant 0 : i32
    %c0_i32_0 = arith.constant 0 : i32
    return %arg0, %c0_i32 : i32, i32
  }
  func.func @transform_1(%arg0: i32, %arg1: i32) -> (i32, i32) {
    %c0_i32 = arith.constant 0 : i32
    %c0_i32_0 = arith.constant 0 : i32
    return %c0_i32, %arg1 : i32, i32
  }
  func.func @transform_2(%arg0: i32, %arg1: i32) -> (i32, i32) {
    %c0_i32 = arith.constant 0 : i32
    %c0_i32_0 = arith.constant 0 : i32
    return %c0_i32, %arg1 : i32, i32
  }
  func.func @transform_3(%arg0: i32, %arg1: i32) -> (i32, i32) {
    %c0_i32 = arith.constant 0 : i32
    %c0_i32_0 = arith.constant 0 : i32
    return %c0_i32, %arg1 : i32, i32
  }
  func.func @transform_4(%arg0: i32, %arg1: i32) -> (i32, i32) {
    %c0_i32 = arith.constant 0 : i32
    return %arg0, %arg1 : i32, i32
  }
}

module attributes {stable_mosaic.version = 11 : i64} {
  func.func @_mm_kernel(%arg0: i32, %arg1: i32, %arg2: memref<128x256xbf16, #tpu.memory_space<vmem>>, %arg3: memref<256x128xbf16, #tpu.memory_space<vmem>>, %arg4: memref<1x128xf32, #tpu.memory_space<vmem>>, %arg5: memref<1x128xf32, #tpu.memory_space<vmem>>, %arg6: memref<128x128xf32, #tpu.memory_space<vmem>>) attributes {dimension_semantics = [#tpu.dimension_semantics<parallel>, #tpu.dimension_semantics<parallel>], iteration_bounds = array<i64: 1, 1>, scalar_prefetch = 0 : i64, scratch_operands = 0 : i64, tpu.core_type = #tpu.core_type<tc>, window_params = [{transform_indices = @transform_0, window_bounds = array<i64: 128, 256>}, {transform_indices = @transform_1, window_bounds = array<i64: 256, 128>}, {transform_indices = @transform_2, window_bounds = array<i64: 1, 128>}, {transform_indices = @transform_3, window_bounds = array<i64: 1, 128>}, {transform_indices = @transform_4, window_bounds = array<i64: 128, 128>}]} {
    %c0 = arith.constant 0 : index
    %c0_0 = arith.constant 0 : index
    %0 = vector.load %arg2[%c0, %c0_0] : memref<128x256xbf16, #tpu.memory_space<vmem>>, vector<128x256xbf16>
    %c0_1 = arith.constant 0 : index
    %c0_2 = arith.constant 0 : index
    %1 = vector.load %arg3[%c0_1, %c0_2] : memref<256x128xbf16, #tpu.memory_space<vmem>>, vector<256x128xbf16>
    %cst = arith.constant dense<0.000000e+00> : vector<128x128xf32>
    %2 = tpu.matmul %0, %1, %cst {dimension_numbers = #tpu.dot_dimension_numbers<[1], [0], [0], [1], [0, 0, 1, 1], [], []>} : vector<128x256xbf16>, vector<256x128xbf16>, vector<128x128xf32> -> vector<128x128xf32>
    %c0_3 = arith.constant 0 : index
    %c0_4 = arith.constant 0 : index
    %3 = vector.load %arg4[%c0_3, %c0_4] : memref<1x128xf32, #tpu.memory_space<vmem>>, vector<1x128xf32>
    %4 = vector.broadcast %3 : vector<1x128xf32> to vector<128x128xf32>
    %5 = arith.mulf %2, %4 : vector<128x128xf32>
    %c0_5 = arith.constant 0 : index
    %c0_6 = arith.constant 0 : index
    %6 = vector.load %arg5[%c0_5, %c0_6] : memref<1x128xf32, #tpu.memory_space<vmem>>, vector<1x128xf32>
    %7 = vector.broadcast %6 : vector<1x128xf32> to vector<128x128xf32>
    %8 = arith.addf %5, %7 : vector<128x128xf32>
    %cst_7 = arith.constant 0.000000e+00 : f32
    %9 = vector.broadcast %cst_7 : f32 to vector<128x128xf32>
    %10 = arith.maximumf %8, %9 : vector<128x128xf32>
    %c0_8 = arith.constant 0 : index
    %c0_9 = arith.constant 0 : index
    %11 = vector.load %arg6[%c0_8, %c0_9] : memref<128x128xf32, #tpu.memory_space<vmem>>, vector<128x128xf32>
    tpu.vector_store %arg6[%c0_8, %c0_9], %10 {strides = array<i32>} : memref<128x128xf32, #tpu.memory_space<vmem>>, vector<128x128xf32>,
    return
  }
  func.func @transform_0(%arg0: i32, %arg1: i32) -> (i32, i32) {
    %c0_i32 = arith.constant 0 : i32
    %c0_i32_0 = arith.constant 0 : i32
    return %arg0, %c0_i32 : i32, i32
  }
  func.func @transform_1(%arg0: i32, %arg1: i32) -> (i32, i32) {
    %c0_i32 = arith.constant 0 : i32
    %c0_i32_0 = arith.constant 0 : i32
    return %c0_i32, %arg1 : i32, i32
  }
  func.func @transform_2(%arg0: i32, %arg1: i32) -> (i32, i32) {
    %c0_i32 = arith.constant 0 : i32
    %c0_i32_0 = arith.constant 0 : i32
    return %c0_i32, %arg1 : i32, i32
  }
  func.func @transform_3(%arg0: i32, %arg1: i32) -> (i32, i32) {
    %c0_i32 = arith.constant 0 : i32
    %c0_i32_0 = arith.constant 0 : i32
    return %c0_i32, %arg1 : i32, i32
  }
  func.func @transform_4(%arg0: i32, %arg1: i32) -> (i32, i32) {
    %c0_i32 = arith.constant 0 : i32
    return %arg0, %arg1 : i32, i32
  }
}

module attributes {stable_mosaic.version = 11 : i64} {
  func.func @_mm_kernel(%arg0: i32, %arg1: i32, %arg2: memref<512x256xbf16, #tpu.memory_space<vmem>>, %arg3: memref<256x128xbf16, #tpu.memory_space<vmem>>, %arg4: memref<1x128xf32, #tpu.memory_space<vmem>>, %arg5: memref<1x128xf32, #tpu.memory_space<vmem>>, %arg6: memref<512x128xf32, #tpu.memory_space<vmem>>) attributes {dimension_semantics = [#tpu.dimension_semantics<parallel>, #tpu.dimension_semantics<parallel>], iteration_bounds = array<i64: 4, 1>, scalar_prefetch = 0 : i64, scratch_operands = 0 : i64, tpu.core_type = #tpu.core_type<tc>, window_params = [{transform_indices = @transform_0, window_bounds = array<i64: 512, 256>}, {transform_indices = @transform_1, window_bounds = array<i64: 256, 128>}, {transform_indices = @transform_2, window_bounds = array<i64: 1, 128>}, {transform_indices = @transform_3, window_bounds = array<i64: 1, 128>}, {transform_indices = @transform_4, window_bounds = array<i64: 512, 128>}]} {
    %c0 = arith.constant 0 : index
    %c0_0 = arith.constant 0 : index
    %0 = vector.load %arg2[%c0, %c0_0] : memref<512x256xbf16, #tpu.memory_space<vmem>>, vector<512x256xbf16>
    %c0_1 = arith.constant 0 : index
    %c0_2 = arith.constant 0 : index
    %1 = vector.load %arg3[%c0_1, %c0_2] : memref<256x128xbf16, #tpu.memory_space<vmem>>, vector<256x128xbf16>
    %cst = arith.constant dense<0.000000e+00> : vector<512x128xf32>
    %2 = tpu.matmul %0, %1, %cst {dimension_numbers = #tpu.dot_dimension_numbers<[1], [0], [0], [1], [0, 0, 1, 1], [], []>} : vector<512x256xbf16>, vector<256x128xbf16>, vector<512x128xf32> -> vector<512x128xf32>
    %c0_3 = arith.constant 0 : index
    %c0_4 = arith.constant 0 : index
    %3 = vector.load %arg4[%c0_3, %c0_4] : memref<1x128xf32, #tpu.memory_space<vmem>>, vector<1x128xf32>
    %4 = vector.broadcast %3 : vector<1x128xf32> to vector<512x128xf32>
    %5 = arith.mulf %2, %4 : vector<512x128xf32>
    %c0_5 = arith.constant 0 : index
    %c0_6 = arith.constant 0 : index
    %6 = vector.load %arg5[%c0_5, %c0_6] : memref<1x128xf32, #tpu.memory_space<vmem>>, vector<1x128xf32>
    %7 = vector.broadcast %6 : vector<1x128xf32> to vector<512x128xf32>
    %8 = arith.addf %5, %7 : vector<512x128xf32>
    %c0_7 = arith.constant 0 : index
    %c0_8 = arith.constant 0 : index
    %9 = vector.load %arg6[%c0_7, %c0_8] : memref<512x128xf32, #tpu.memory_space<vmem>>, vector<512x128xf32>
    tpu.vector_store %arg6[%c0_7, %c0_8], %8 {strides = array<i32>} : memref<512x128xf32, #tpu.memory_space<vmem>>, vector<512x128xf32>,
    return
  }
  func.func @transform_0(%arg0: i32, %arg1: i32) -> (i32, i32) {
    %c0_i32 = arith.constant 0 : i32
    %c0_i32_0 = arith.constant 0 : i32
    return %arg0, %c0_i32 : i32, i32
  }
  func.func @transform_1(%arg0: i32, %arg1: i32) -> (i32, i32) {
    %c0_i32 = arith.constant 0 : i32
    %c0_i32_0 = arith.constant 0 : i32
    return %c0_i32, %arg1 : i32, i32
  }
  func.func @transform_2(%arg0: i32, %arg1: i32) -> (i32, i32) {
    %c0_i32 = arith.constant 0 : i32
    %c0_i32_0 = arith.constant 0 : i32
    return %c0_i32, %arg1 : i32, i32
  }
  func.func @transform_3(%arg0: i32, %arg1: i32) -> (i32, i32) {
    %c0_i32 = arith.constant 0 : i32
    %c0_i32_0 = arith.constant 0 : i32
    return %c0_i32, %arg1 : i32, i32
  }
  func.func @transform_4(%arg0: i32, %arg1: i32) -> (i32, i32) {
    %c0_i32 = arith.constant 0 : i32
    return %arg0, %arg1 : i32, i32
  }
}

</mosaic_0001>

<bundles_post_ra>
// kernel: forward.21
= control target key start
LH: loop header
LB: loop body
LE: loop exit
PB: predicated region body
PF: predicated region fallthrough
CT: control target
= control target key end

     0   :  { %s986_s1 = inlined_call_operand.vmem [shape: bf16[128,128], index: 1, kind: input, shape index: {}]   ;;  %s987_s0 = inlined_call_operand.vmem [shape: bf16[256,128], index: 0, kind: input, shape index: {}]   ;;  %s988_s2 = inlined_call_operand.vmem [shape: f32[1,128], index: 2, kind: input, shape index: {}]   ;;  %s989_s3 = inlined_call_operand.vmem [shape: f32[1,128], index: 3, kind: input, shape index: {}]   ;;  %s990_s4 = inlined_call_operand.vmem [shape: f32[256,128], index: 4, kind: output, shape index: {}]  }
   0x1   :  { %v695_v0 = vld [vmem:[%s986_s1 + $0x38] sm:$0xff]   ;;  %v696_v1 = vld [vmem:[%s986_s1 + $0x30] sm:$0xff]   ;;  %v697_v2 = vld [vmem:[%s986_s1 + $0x28] sm:$0xff]  }
   0x2   :  { %631 = vmatprep.subr.bf16.mxu0 %v695_v0  ;;  %679 = vmatprep.subr.bf16.mxu1 %v695_v0  ;;  %v698_v3 = vld [vmem:[%s986_s1 + $0x20] sm:$0xff]   ;;  %v699_v6 = vld [vmem:[%s986_s1 + $0x18] sm:$0xff]   ;;  %v700_v7 = vld [vmem:[%s986_s1 + $0x10] sm:$0xff]  }
   0x3   :  { %632 = vmatpush3.bf16.msra.mxu0 %v695_v0  ;;  %687 = vmatpush3.bf16.msra.mxu1 %v695_v0  ;;  %v703_v4 = vld [vmem:[%s987_s0] sm:$0xff]   ;;  %v701_v8 = vld [vmem:[%s986_s1 + $0x8] sm:$0xff]   ;;  %v707_v12 = vld [vmem:[%s987_s0 + $0x10] sm:$0xff]  }
   0x4   :  { %633 = vmatprep.subr.bf16.mxu0 %v696_v1  ;;  %680 = vmatprep.subr.bf16.mxu1 %v696_v1  ;;  %v704_v5 = vld [vmem:[%s987_s0 + $0x40] sm:$0xff]   ;;  %v705_v10 = vld [vmem:[%s987_s0 + $0x8] sm:$0xff]   ;;  %v708_v13 = vld [vmem:[%s987_s0 + $0x50] sm:$0xff]  }
   0x5   :  { %647 = vmatprep.mubr.bf16.mxu0 %v703_v4  ;;  %663 = vmatprep.mubr.bf16.mxu1 %v704_v5  ;;  %v702_v9 = vld [vmem:[%s986_s1] sm:$0xff]   ;;  %v706_v11 = vld [vmem:[%s987_s0 + $0x48] sm:$0xff]   ;;  %v709_v14 = vld [vmem:[%s987_s0 + $0x18] sm:$0xff]  }
   0x6   :  { %v710_v15 = vld [vmem:[%s987_s0 + $0x58] sm:$0xff]   ;;  %v711_v16 = vld [vmem:[%s987_s0 + $0x20] sm:$0xff]   ;;  %v713_v18 = vld [vmem:[%s987_s0 + $0x28] sm:$0xff]  }
   0x7   :  { %634 = vmatpush3.bf16.msra.mxu0 %v696_v1  ;;  %688 = vmatpush3.bf16.msra.mxu1 %v696_v1  ;;  %v712_v17 = vld [vmem:[%s987_s0 + $0x60] sm:$0xff]   ;;  %v714_v19 = vld [vmem:[%s987_s0 + $0x68] sm:$0xff]   ;;  %v715_v20 = vld [vmem:[%s987_s0 + $0x30] sm:$0xff]  }
   0x8   :  { %635 = vmatprep.subr.bf16.mxu0 %v697_v2  ;;  %681 = vmatprep.subr.bf16.mxu1 %v697_v2  ;;  %v716_v21 = vld [vmem:[%s987_s0 + $0x70] sm:$0xff]   ;;  %v717_v22 = vld [vmem:[%s987_s0 + $0x38] sm:$0xff]   ;;  %v819_v24 = vld [vmem:[%s988_s2] ss:$0 sm:$0xff] }
   0x9   :  { %v718_v23 = vld [vmem:[%s987_s0 + $0x78] sm:$0xff]   ;;  %v824_v26 = vld [vmem:[%s989_s3] ss:$0 sm:$0xff] }
   0xb   :  { %636 = vmatpush3.bf16.msra.mxu0 %v697_v2  ;;  %689 = vmatpush3.bf16.msra.mxu1 %v697_v2 }
   0xc   :  { %637 = vmatprep.subr.bf16.mxu0 %v698_v3  ;;  %682 = vmatprep.subr.bf16.mxu1 %v698_v3 }
   0xf   :  { %638 = vmatpush3.bf16.msra.mxu0 %v698_v3  ;;  %690 = vmatpush3.bf16.msra.mxu1 %v698_v3 }
  0x10   :  { %639 = vmatprep.subr.bf16.mxu0 %v699_v6  ;;  %683 = vmatprep.subr.bf16.mxu1 %v699_v6 }
  0x13   :  { %640 = vmatpush3.bf16.msra.mxu0 %v699_v6  ;;  %691 = vmatpush3.bf16.msra.mxu1 %v699_v6 }
  0x14   :  { %641 = vmatprep.subr.bf16.mxu0 %v700_v7  ;;  %684 = vmatprep.subr.bf16.mxu1 %v700_v7 }
  0x17   :  { %642 = vmatpush3.bf16.msra.mxu0 %v700_v7  ;;  %692 = vmatpush3.bf16.msra.mxu1 %v700_v7 }
  0x18   :  { %643 = vmatprep.subr.bf16.mxu0 %v701_v8  ;;  %685 = vmatprep.subr.bf16.mxu1 %v701_v8 }
  0x1b   :  { %644 = vmatpush3.bf16.msra.mxu0 %v701_v8  ;;  %693 = vmatpush3.bf16.msra.mxu1 %v701_v8 }
  0x1c   :  { %645 = vmatprep.subr.bf16.mxu0 %v702_v9  ;;  %686 = vmatprep.subr.bf16.mxu1 %v702_v9 }
  0x1f   :  { %646 = vmatpush3.bf16.msra.mxu0 %v702_v9  ;;  %694 = vmatpush3.bf16.msra.mxu1 %v702_v9 }
  0x22   :  { %648 = vmatmul.mubr.bf16.vlgmr.msra.gmra.mxu0 %v705_v10  ;;  %664 = vmatmul.mubr.bf16.vlgmr.msra.gmra.mxu1 %v706_v11 }
  0x23   :  { %651 = vmatprep.mubr.bf16.mxu0 %v707_v12  ;;  %667 = vmatprep.mubr.bf16.mxu1 %v708_v13 }
  0x2a   :  { %652 = vmatmul.mubr.bf16.gmra.mxu0 %v709_v14  ;;  %668 = vmatmul.mubr.bf16.gmra.mxu1 %v710_v15 }
  0x2b   :  { %655 = vmatprep.mubr.bf16.mxu0 %v711_v16  ;;  %671 = vmatprep.mubr.bf16.mxu1 %v712_v17 }
  0x32   :  { %656 = vmatmul.mubr.bf16.gmra.mxu0 %v713_v18  ;;  %672 = vmatmul.mubr.bf16.gmra.mxu1 %v714_v19 }
  0x33   :  { %659 = vmatprep.mubr.bf16.mxu0 %v715_v20  ;;  %675 = vmatprep.mubr.bf16.mxu1 %v716_v21 }
  0x3a   :  { %660 = vmatmul.mubr.bf16.gmra.mxu0 %v717_v22  ;;  %676 = vmatmul.mubr.bf16.gmra.mxu1 %v718_v23 }
  0xe2   :  { %v649_v25 = vpop.f32.mrf.mxu0  ;;  %v665_v27 = vpop.f32.mrf.mxu1 }
  0xe3   :  { %v380_v28 = vmul.f32 %v649_v25, %v819_v24  ;;  %v396_v29 = vmul.f32 %v665_v27, %v819_v24 }
  0xe4   :  { %v244_v30 = vpop.f32.mrf.mxu0  ;;  %v308_v31 = vpop.f32.mrf.mxu1 }
  0xe5   :  { %v419_v32 = vadd.f32 %v824_v26, %v380_v28  ;;  %v435_v33 = vadd.f32 %v824_v26, %v396_v29  ;;  %v378_v34 = vmul.f32 %v819_v24, %v244_v30  ;;  %v394_v35 = vmul.f32 %v819_v24, %v308_v31 }
  0xe6   :  { %v650_v36 = vpop.f32.mrf.mxu0  ;;  %v666_v37 = vpop.f32.mrf.mxu1 }
  0xe7   :  { %vm451_vm0 = vcmp.ge.f32.partialorder %v419_v32, 0.0  ;;  %v483_v38 = vmul.f32 0.2, %v419_v32  ;;  %vm467_vm1 = vcmp.ge.f32.partialorder %v435_v33, 0.0  ;;  %v499_v39 = vmul.f32 0.2, %v435_v33 }
  0xe8   :  { %v417_v40 = vadd.f32 %v824_v26, %v378_v34  ;;  %v433_v41 = vadd.f32 %v824_v26, %v394_v35  ;;  %v381_v42 = vmul.f32 %v650_v36, %v819_v24  ;;  %v397_v43 = vmul.f32 %v666_v37, %v819_v24  ;;  %v247_v44 = vpop.f32.mrf.mxu0  ;;  %v311_v45 = vpop.f32.mrf.mxu1 }
  0xe9   :  { %v515_v46 = vsel %vm451_vm0, %v419_v32, %v483_v38  ;;  %v531_v47 = vsel %vm467_vm1, %v435_v33, %v499_v39  ;;  %v379_v48 = vmul.f32 %v819_v24, %v247_v44  ;;  %v395_v49 = vmul.f32 %v819_v24, %v311_v45 }
  0xea   :  { %547 = vst [vmem:[%s990_s4 + $0x10] sm:$0xff] %v515_v46  ;;  %563 = vst [vmem:[%s990_s4 + $0x90] sm:$0xff] %v531_v47  ;;  %vm449_vm2 = vcmp.ge.f32.partialorder %v417_v40, 0.0  ;;  %v481_v50 = vmul.f32 0.2, %v417_v40  ;;  %vm465_vm3 = vcmp.ge.f32.partialorder %v433_v41, 0.0  ;;  %v653_v52 = vpop.f32.mrf.mxu0  ;;  %v669_v53 = vpop.f32.mrf.mxu1  ;;  %v420_v54 = vadd.f32 %v824_v26, %v381_v42 }
  0xeb   :  { %v497_v51 = vmul.f32 0.2, %v433_v41  ;;  %v436_v55 = vadd.f32 %v824_v26, %v397_v43  ;;  %v418_v56 = vadd.f32 %v824_v26, %v379_v48  ;;  %v434_v57 = vadd.f32 %v824_v26, %v395_v49 }
  0xec   :  { %v513_v58 = vsel %vm449_vm2, %v417_v40, %v481_v50  ;;  %v384_v60 = vmul.f32 %v653_v52, %v819_v24  ;;  %v400_v61 = vmul.f32 %v669_v53, %v819_v24  ;;  %v260_v62 = vpop.f32.mrf.mxu0  ;;  %v324_v63 = vpop.f32.mrf.mxu1  ;;  %vm452_vm4 = vcmp.ge.f32.partialorder %v420_v54, 0.0 }
  0xed   :  { %v529_v59 = vsel %vm465_vm3, %v433_v41, %v497_v51  ;;  %545 = vst [vmem:[%s990_s4] sm:$0xff] %v513_v58  ;;  %v484_v0 = vmul.f32 0.2, %v420_v54  ;;  %vm468_vm5 = vcmp.ge.f32.partialorder %v436_v55, 0.0  ;;  %v500_v1 = vmul.f32 0.2, %v436_v55 }
  0xee   :  { %561 = vst [vmem:[%s990_s4 + $0x80] sm:$0xff] %v529_v59  ;;  %vm450_vm6 = vcmp.ge.f32.partialorder %v418_v56, 0.0  ;;  %v482_v2 = vmul.f32 0.2, %v418_v56  ;;  %vm466_vm7 = vcmp.ge.f32.partialorder %v434_v57, 0.0  ;;  %v654_v4 = vpop.f32.mrf.mxu0  ;;  %v670_v5 = vpop.f32.mrf.mxu1  ;;  %v423_v8 = vadd.f32 %v824_v26, %v384_v60 }
  0xef   :  { %v498_v3 = vmul.f32 0.2, %v434_v57  ;;  %v516_v6 = vsel %vm452_vm4, %v420_v54, %v484_v0  ;;  %v532_v7 = vsel %vm468_vm5, %v436_v55, %v500_v1  ;;  %v439_v9 = vadd.f32 %v824_v26, %v400_v61 }
  0xf0   :  { %548 = vst [vmem:[%s990_s4 + $0x18] sm:$0xff] %v516_v6  ;;  %564 = vst [vmem:[%s990_s4 + $0x98] sm:$0xff] %v532_v7  ;;  %v514_v10 = vsel %vm450_vm6, %v418_v56, %v482_v2  ;;  %v382_v12 = vmul.f32 %v819_v24, %v260_v62  ;;  %v398_v13 = vmul.f32 %v819_v24, %v324_v63  ;;  %v263_v14 = vpop.f32.mrf.mxu0  ;;  %v327_v15 = vpop.f32.mrf.mxu1  ;;  %vm455_vm8 = vcmp.ge.f32.partialorder %v423_v8, 0.0 }
  0xf1   :  { %v530_v11 = vsel %vm466_vm7, %v434_v57, %v498_v3  ;;  %546 = vst [vmem:[%s990_s4 + $0x8] sm:$0xff] %v514_v10  ;;  %v487_v16 = vmul.f32 0.2, %v423_v8  ;;  %vm471_vm9 = vcmp.ge.f32.partialorder %v439_v9, 0.0  ;;  %v503_v17 = vmul.f32 0.2, %v439_v9 }
  0xf2   :  { %562 = vst [vmem:[%s990_s4 + $0x88] sm:$0xff] %v530_v11  ;;  %v421_v18 = vadd.f32 %v824_v26, %v382_v12  ;;  %v437_v19 = vadd.f32 %v824_v26, %v398_v13  ;;  %v385_v20 = vmul.f32 %v654_v4, %v819_v24  ;;  %v401_v21 = vmul.f32 %v670_v5, %v819_v24  ;;  %v657_v22 = vpop.f32.mrf.mxu0  ;;  %v673_v23 = vpop.f32.mrf.mxu1 }
  0xf3   :  { %v519_v25 = vsel %vm455_vm8, %v423_v8, %v487_v16  ;;  %v535_v27 = vsel %vm471_vm9, %v439_v9, %v503_v17  ;;  %v383_v28 = vmul.f32 %v819_v24, %v263_v14  ;;  %v399_v29 = vmul.f32 %v819_v24, %v327_v15 }
  0xf4   :  { %551 = vst [vmem:[%s990_s4 + $0x30] sm:$0xff] %v519_v25  ;;  %567 = vst [vmem:[%s990_s4 + $0xb0] sm:$0xff] %v535_v27  ;;  %vm453_vm10 = vcmp.ge.f32.partialorder %v421_v18, 0.0  ;;  %v485_v30 = vmul.f32 0.2, %v421_v18  ;;  %vm469_vm11 = vcmp.ge.f32.partialorder %v437_v19, 0.0  ;;  %v276_v32 = vpop.f32.mrf.mxu0  ;;  %v340_v33 = vpop.f32.mrf.mxu1  ;;  %v424_v34 = vadd.f32 %v824_v26, %v385_v20 }
  0xf5   :  { %v501_v31 = vmul.f32 0.2, %v437_v19  ;;  %v440_v35 = vadd.f32 %v824_v26, %v401_v21  ;;  %v422_v36 = vadd.f32 %v824_v26, %v383_v28  ;;  %v438_v37 = vadd.f32 %v824_v26, %v399_v29 }
  0xf6   :  { %v517_v38 = vsel %vm453_vm10, %v421_v18, %v485_v30  ;;  %v388_v40 = vmul.f32 %v657_v22, %v819_v24  ;;  %v404_v41 = vmul.f32 %v673_v23, %v819_v24  ;;  %v658_v42 = vpop.f32.mrf.mxu0  ;;  %v674_v43 = vpop.f32.mrf.mxu1  ;;  %vm456_vm12 = vcmp.ge.f32.partialorder %v424_v34, 0.0 }
  0xf7   :  { %v533_v39 = vsel %vm469_vm11, %v437_v19, %v501_v31  ;;  %549 = vst [vmem:[%s990_s4 + $0x20] sm:$0xff] %v517_v38  ;;  %v488_v44 = vmul.f32 0.2, %v424_v34  ;;  %vm472_vm13 = vcmp.ge.f32.partialorder %v440_v35, 0.0  ;;  %v504_v45 = vmul.f32 0.2, %v440_v35 }
  0xf8   :  { %565 = vst [vmem:[%s990_s4 + $0xa0] sm:$0xff] %v533_v39  ;;  %vm454_vm14 = vcmp.ge.f32.partialorder %v422_v36, 0.0  ;;  %v486_v46 = vmul.f32 0.2, %v422_v36  ;;  %vm470_vm15 = vcmp.ge.f32.partialorder %v438_v37, 0.0  ;;  %v279_v48 = vpop.f32.mrf.mxu0  ;;  %v343_v49 = vpop.f32.mrf.mxu1  ;;  %v427_v52 = vadd.f32 %v824_v26, %v388_v40 }
  0xf9   :  { %v502_v47 = vmul.f32 0.2, %v438_v37  ;;  %v520_v50 = vsel %vm456_vm12, %v424_v34, %v488_v44  ;;  %v536_v51 = vsel %vm472_vm13, %v440_v35, %v504_v45  ;;  %v443_v53 = vadd.f32 %v824_v26, %v404_v41 }
  0xfa   :  { %552 = vst [vmem:[%s990_s4 + $0x38] sm:$0xff] %v520_v50  ;;  %568 = vst [vmem:[%s990_s4 + $0xb8] sm:$0xff] %v536_v51  ;;  %v518_v54 = vsel %vm454_vm14, %v422_v36, %v486_v46  ;;  %v386_v56 = vmul.f32 %v819_v24, %v276_v32  ;;  %v402_v57 = vmul.f32 %v819_v24, %v340_v33  ;;  %v661_v58 = vpop.f32.mrf.mxu0  ;;  %v677_v59 = vpop.f32.mrf.mxu1  ;;  %vm459_vm0 = vcmp.ge.f32.partialorder %v427_v52, 0.0 }
  0xfb   :  { %v534_v55 = vsel %vm470_vm15, %v438_v37, %v502_v47  ;;  %550 = vst [vmem:[%s990_s4 + $0x28] sm:$0xff] %v518_v54  ;;  %v491_v60 = vmul.f32 0.2, %v427_v52  ;;  %vm475_vm1 = vcmp.ge.f32.partialorder %v443_v53, 0.0  ;;  %v507_v61 = vmul.f32 0.2, %v443_v53 }
  0xfc   :  { %566 = vst [vmem:[%s990_s4 + $0xa8] sm:$0xff] %v534_v55  ;;  %v425_v62 = vadd.f32 %v824_v26, %v386_v56  ;;  %v441_v63 = vadd.f32 %v824_v26, %v402_v57  ;;  %v389_v0 = vmul.f32 %v658_v42, %v819_v24  ;;  %v405_v1 = vmul.f32 %v674_v43, %v819_v24  ;;  %v292_v2 = vpop.f32.mrf.mxu0  ;;  %v356_v3 = vpop.f32.mrf.mxu1 }
  0xfd   :  { %v523_v4 = vsel %vm459_vm0, %v427_v52, %v491_v60  ;;  %v539_v5 = vsel %vm475_vm1, %v443_v53, %v507_v61  ;;  %v387_v6 = vmul.f32 %v819_v24, %v279_v48  ;;  %v403_v7 = vmul.f32 %v819_v24, %v343_v49 }
  0xfe   :  { %555 = vst [vmem:[%s990_s4 + $0x50] sm:$0xff] %v523_v4  ;;  %571 = vst [vmem:[%s990_s4 + $0xd0] sm:$0xff] %v539_v5  ;;  %vm457_vm2 = vcmp.ge.f32.partialorder %v425_v62, 0.0  ;;  %v489_v8 = vmul.f32 0.2, %v425_v62  ;;  %vm473_vm3 = vcmp.ge.f32.partialorder %v441_v63, 0.0  ;;  %v428_v10 = vadd.f32 %v824_v26, %v389_v0  ;;  %v662_v18 = vpop.f32.mrf.mxu0  ;;  %v678_v19 = vpop.f32.mrf.mxu1 }
  0xff   :  { %v505_v9 = vmul.f32 0.2, %v441_v63  ;;  %v444_v11 = vadd.f32 %v824_v26, %v405_v1  ;;  %v426_v12 = vadd.f32 %v824_v26, %v387_v6  ;;  %v442_v13 = vadd.f32 %v824_v26, %v403_v7 }
 0x100   :  { %v521_v14 = vsel %vm457_vm2, %v425_v62, %v489_v8  ;;  %v392_v16 = vmul.f32 %v661_v58, %v819_v24  ;;  %v408_v17 = vmul.f32 %v677_v59, %v819_v24  ;;  %vm460_vm4 = vcmp.ge.f32.partialorder %v428_v10, 0.0  ;;  %v295_v34 = vpop.f32.mrf.mxu0  ;;  %v359_v35 = vpop.f32.mrf.mxu1 }
 0x101   :  { %v537_v15 = vsel %vm473_vm3, %v441_v63, %v505_v9  ;;  %553 = vst [vmem:[%s990_s4 + $0x40] sm:$0xff] %v521_v14  ;;  %v492_v20 = vmul.f32 0.2, %v428_v10  ;;  %vm476_vm5 = vcmp.ge.f32.partialorder %v444_v11, 0.0  ;;  %v508_v21 = vmul.f32 0.2, %v444_v11 }
 0x102   :  { %569 = vst [vmem:[%s990_s4 + $0xc0] sm:$0xff] %v537_v15  ;;  %vm458_vm6 = vcmp.ge.f32.partialorder %v426_v12, 0.0  ;;  %v490_v22 = vmul.f32 0.2, %v426_v12  ;;  %vm474_vm7 = vcmp.ge.f32.partialorder %v442_v13, 0.0  ;;  %v431_v28 = vadd.f32 %v824_v26, %v392_v16 }
 0x103   :  { %v506_v23 = vmul.f32 0.2, %v442_v13  ;;  %v524_v25 = vsel %vm460_vm4, %v428_v10, %v492_v20  ;;  %v540_v27 = vsel %vm476_vm5, %v444_v11, %v508_v21  ;;  %v447_v29 = vadd.f32 %v824_v26, %v408_v17 }
 0x104   :  { %556 = vst [vmem:[%s990_s4 + $0x58] sm:$0xff] %v524_v25  ;;  %572 = vst [vmem:[%s990_s4 + $0xd8] sm:$0xff] %v540_v27  ;;  %v522_v30 = vsel %vm458_vm6, %v426_v12, %v490_v22  ;;  %v390_v32 = vmul.f32 %v819_v24, %v292_v2  ;;  %v406_v33 = vmul.f32 %v819_v24, %v356_v3  ;;  %vm463_vm8 = vcmp.ge.f32.partialorder %v431_v28, 0.0 }
 0x105   :  { %v538_v31 = vsel %vm474_vm7, %v442_v13, %v506_v23  ;;  %554 = vst [vmem:[%s990_s4 + $0x48] sm:$0xff] %v522_v30  ;;  %v495_v36 = vmul.f32 0.2, %v431_v28  ;;  %vm479_vm9 = vcmp.ge.f32.partialorder %v447_v29, 0.0  ;;  %v511_v37 = vmul.f32 0.2, %v447_v29 }
 0x106   :  { %570 = vst [vmem:[%s990_s4 + $0xc8] sm:$0xff] %v538_v31  ;;  %v429_v38 = vadd.f32 %v824_v26, %v390_v32  ;;  %v445_v39 = vadd.f32 %v824_v26, %v406_v33  ;;  %v393_v40 = vmul.f32 %v662_v18, %v819_v24  ;;  %v409_v41 = vmul.f32 %v678_v19, %v819_v24 }
 0x107   :  { %v527_v42 = vsel %vm463_vm8, %v431_v28, %v495_v36  ;;  %v543_v43 = vsel %vm479_vm9, %v447_v29, %v511_v37  ;;  %v391_v44 = vmul.f32 %v819_v24, %v295_v34  ;;  %v407_v45 = vmul.f32 %v819_v24, %v359_v35 }
 0x108   :  { %559 = vst [vmem:[%s990_s4 + $0x70] sm:$0xff] %v527_v42  ;;  %575 = vst [vmem:[%s990_s4 + $0xf0] sm:$0xff] %v543_v43  ;;  %vm461_vm10 = vcmp.ge.f32.partialorder %v429_v38, 0.0  ;;  %v493_v46 = vmul.f32 0.2, %v429_v38  ;;  %vm477_vm11 = vcmp.ge.f32.partialorder %v445_v39, 0.0  ;;  %v432_v48 = vadd.f32 %v824_v26, %v393_v40 }
 0x109   :  { %v509_v47 = vmul.f32 0.2, %v445_v39  ;;  %v448_v49 = vadd.f32 %v824_v26, %v409_v41  ;;  %v430_v50 = vadd.f32 %v824_v26, %v391_v44  ;;  %v446_v24 = vadd.f32 %v824_v26, %v407_v45 }
 0x10a   :  { %v525_v51 = vsel %vm461_vm10, %v429_v38, %v493_v46  ;;  %vm464_vm12 = vcmp.ge.f32.partialorder %v432_v48, 0.0  ;;  %v496_v53 = vmul.f32 0.2, %v432_v48 }
 0x10b   :  { %v541_v52 = vsel %vm477_vm11, %v445_v39, %v509_v47  ;;  %557 = vst [vmem:[%s990_s4 + $0x60] sm:$0xff] %v525_v51  ;;  %vm480_vm13 = vcmp.ge.f32.partialorder %v448_v49, 0.0  ;;  %v512_v54 = vmul.f32 0.2, %v448_v49  ;;  %vm462_vm14 = vcmp.ge.f32.partialorder %v430_v50, 0.0 }
 0x10c   :  { %573 = vst [vmem:[%s990_s4 + $0xe0] sm:$0xff] %v541_v52  ;;  %v494_v55 = vmul.f32 0.2, %v430_v50  ;;  %vm478_vm15 = vcmp.ge.f32.partialorder %v446_v24, 0.0  ;;  %v510_v56 = vmul.f32 0.2, %v446_v24  ;;  %v528_v57 = vsel %vm464_vm12, %v432_v48, %v496_v53 }
 0x10d   :  { %v544_v26 = vsel %vm480_vm13, %v448_v49, %v512_v54  ;;  %560 = vst [vmem:[%s990_s4 + $0x78] sm:$0xff] %v528_v57 }
 0x10e   :  { %576 = vst [vmem:[%s990_s4 + $0xf8] sm:$0xff] %v544_v26  ;;  %v526_v58 = vsel %vm462_vm14, %v430_v50, %v494_v55  ;;  %v542_v59 = vsel %vm478_vm15, %v446_v24, %v510_v56 }
 0x10f   :  { %558 = vst [vmem:[%s990_s4 + $0x68] sm:$0xff] %v526_v58  ;;  %574 = vst [vmem:[%s990_s4 + $0xe8] sm:$0xff] %v542_v59 }

// kernel: forward.22
= control target key start
LH: loop header
LB: loop body
LE: loop exit
PB: predicated region body
PF: predicated region fallthrough
CT: control target
= control target key end

     0   :  { %s818_s1 = inlined_call_operand.vmem [shape: bf16[256,128], index: 1, kind: input, shape index: {}]   ;;  %s819_s0 = inlined_call_operand.vmem [shape: bf16[128,256], index: 0, kind: input, shape index: {}]   ;;  %s820_s2 = inlined_call_operand.vmem [shape: f32[1,128], index: 2, kind: input, shape index: {}]   ;;  %s821_s3 = inlined_call_operand.vmem [shape: f32[1,128], index: 3, kind: input, shape index: {}]   ;;  %s822_s4 = inlined_call_operand.vmem [shape: f32[128,128], index: 4, kind: output, shape index: {}]  }
   0x1   :  { %v567_v0 = vld [vmem:[%s818_s1 + $0x78] sm:$0xff]   ;;  %v569_v2 = vld [vmem:[%s818_s1 + $0x70] sm:$0xff]   ;;  %v571_v4 = vld [vmem:[%s818_s1 + $0x68] sm:$0xff]  }
   0x2   :  { %v568_v1 = vld [vmem:[%s818_s1 + $0x38] sm:$0xff]   ;;  %487 = vmatprep.subr.bf16.mxu0 %v567_v0  ;;  %551 = vmatprep.subr.bf16.mxu1 %v567_v0  ;;  %v570_v3 = vld [vmem:[%s818_s1 + $0x30] sm:$0xff]   ;;  %v572_v5 = vld [vmem:[%s818_s1 + $0x28] sm:$0xff]  }
   0x3   :  { %488 = vmatpush3.bf16.msra.mxu0 %v568_v1  ;;  %559 = vmatpush3.bf16.msra.mxu1 %v568_v1  ;;  %v573_v6 = vld [vmem:[%s818_s1 + $0x60] sm:$0xff]   ;;  %v575_v8 = vld [vmem:[%s818_s1 + $0x58] sm:$0xff]   ;;  %v577_v10 = vld [vmem:[%s818_s1 + $0x50] sm:$0xff]  }
   0x4   :  { %489 = vmatprep.subr.bf16.mxu0 %v569_v2  ;;  %552 = vmatprep.subr.bf16.mxu1 %v569_v2  ;;  %v574_v7 = vld [vmem:[%s818_s1 + $0x20] sm:$0xff]   ;;  %v576_v9 = vld [vmem:[%s818_s1 + $0x18] sm:$0xff]   ;;  %v578_v13 = vld [vmem:[%s818_s1 + $0x10] sm:$0xff]  }
   0x5   :  { %v585_v11 = vld [vmem:[%s819_s0 + $0x4] ss:$8 sps:$4 sm:$0xff]   ;;  %v583_v18 = vld [vmem:[%s819_s0] ss:$8 sps:$4 sm:$0xff]   ;;  %v589_v20 = vld [vmem:[%s819_s0 + $0x14] ss:$8 sps:$4 sm:$0xff]  }
   0x6   :  { %v588_v12 = vld [vmem:[%s819_s0 + $0x44] ss:$8 sps:$4 sm:$0xff]   ;;  %274 = vmatprep.mubr.bf16.mxu0 %v585_v11  ;;  %v586_v19 = vld [vmem:[%s819_s0 + $0x40] ss:$8 sps:$4 sm:$0xff]   ;;  %v591_v21 = vld [vmem:[%s819_s0 + $0x54] ss:$8 sps:$4 sm:$0xff]  }
   0x7   :  { %490 = vmatpush3.bf16.msra.mxu0 %v570_v3  ;;  %560 = vmatpush3.bf16.msra.mxu1 %v570_v3  ;;  %v579_v14 = vld [vmem:[%s818_s1 + $0x48] sm:$0xff]   ;;  %v581_v16 = vld [vmem:[%s818_s1 + $0x40] sm:$0xff]   ;;  %v593_v22 = vld [vmem:[%s819_s0 + $0x10] ss:$8 sps:$4 sm:$0xff]  }
   0x8   :  { %491 = vmatprep.subr.bf16.mxu0 %v571_v4  ;;  %553 = vmatprep.subr.bf16.mxu1 %v571_v4  ;;  %v580_v15 = vld [vmem:[%s818_s1 + $0x8] sm:$0xff]   ;;  %v582_v17 = vld [vmem:[%s818_s1] sm:$0xff]   ;;  %v594_v23 = vld [vmem:[%s819_s0 + $0x50] ss:$8 sps:$4 sm:$0xff]  }
   0x9   :  { %306 = vmatprep.mubr.bf16.mxu1 %v588_v12  ;;  %v595_v24 = vld [vmem:[%s819_s0 + $0x24] ss:$8 sps:$4 sm:$0xff]   ;;  %v599_v26 = vld [vmem:[%s819_s0 + $0x20] ss:$8 sps:$4 sm:$0xff]   ;;  %v601_v28 = vld [vmem:[%s819_s0 + $0x34] ss:$8 sps:$4 sm:$0xff]  }
   0xa   :  { %v597_v25 = vld [vmem:[%s819_s0 + $0x64] ss:$8 sps:$4 sm:$0xff]   ;;  %v600_v27 = vld [vmem:[%s819_s0 + $0x60] ss:$8 sps:$4 sm:$0xff]   ;;  %v603_v29 = vld [vmem:[%s819_s0 + $0x74] ss:$8 sps:$4 sm:$0xff]  }
   0xb   :  { %492 = vmatpush3.bf16.msra.mxu0 %v572_v5  ;;  %561 = vmatpush3.bf16.msra.mxu1 %v572_v5  ;;  %v605_v30 = vld [vmem:[%s819_s0 + $0x30] ss:$8 sps:$4 sm:$0xff]   ;;  %v731_v35 = vld [vmem:[%s820_s2] ss:$0 sm:$0xff] }
   0xc   :  { %493 = vmatprep.subr.bf16.mxu0 %v573_v6  ;;  %554 = vmatprep.subr.bf16.mxu1 %v573_v6  ;;  %v606_v31 = vld [vmem:[%s819_s0 + $0x70] ss:$8 sps:$4 sm:$0xff]   ;;  %v736_v39 = vld [vmem:[%s821_s3] ss:$0 sm:$0xff] }
   0xf   :  { %494 = vmatpush3.bf16.msra.mxu0 %v574_v7  ;;  %562 = vmatpush3.bf16.msra.mxu1 %v574_v7 }
  0x10   :  { %495 = vmatprep.subr.bf16.mxu0 %v575_v8  ;;  %555 = vmatprep.subr.bf16.mxu1 %v575_v8 }
  0x13   :  { %496 = vmatpush3.bf16.msra.mxu0 %v576_v9  ;;  %563 = vmatpush3.bf16.msra.mxu1 %v576_v9 }
  0x14   :  { %497 = vmatprep.subr.bf16.mxu0 %v577_v10  ;;  %556 = vmatprep.subr.bf16.mxu1 %v577_v10 }
  0x17   :  { %498 = vmatpush3.bf16.msra.mxu0 %v578_v13  ;;  %564 = vmatpush3.bf16.msra.mxu1 %v578_v13 }
  0x18   :  { %499 = vmatprep.subr.bf16.mxu0 %v579_v14  ;;  %557 = vmatprep.subr.bf16.mxu1 %v579_v14 }
  0x1b   :  { %500 = vmatpush3.bf16.msra.mxu0 %v580_v15  ;;  %565 = vmatpush3.bf16.msra.mxu1 %v580_v15 }
  0x1c   :  { %501 = vmatprep.subr.bf16.mxu0 %v581_v16  ;;  %558 = vmatprep.subr.bf16.mxu1 %v581_v16 }
  0x1f   :  { %502 = vmatpush3.bf16.msra.mxu0 %v582_v17  ;;  %566 = vmatpush3.bf16.msra.mxu1 %v582_v17 }
  0x22   :  { %275 = vmatmul.mubr.bf16.vlgmr.msra.gmra.mxu0 %v583_v18  ;;  %307 = vmatmul.mubr.bf16.vlgmr.msra.gmra.mxu1 %v586_v19 }
  0x23   :  { %282 = vmatprep.mubr.bf16.mxu0 %v589_v20  ;;  %314 = vmatprep.mubr.bf16.mxu1 %v591_v21 }
  0x2a   :  { %283 = vmatmul.mubr.bf16.gmra.mxu0 %v593_v22  ;;  %315 = vmatmul.mubr.bf16.gmra.mxu1 %v594_v23 }
  0x2b   :  { %290 = vmatprep.mubr.bf16.mxu0 %v595_v24  ;;  %322 = vmatprep.mubr.bf16.mxu1 %v597_v25 }
  0x32   :  { %291 = vmatmul.mubr.bf16.gmra.mxu0 %v599_v26  ;;  %323 = vmatmul.mubr.bf16.gmra.mxu1 %v600_v27 }
  0x33   :  { %298 = vmatprep.mubr.bf16.mxu0 %v601_v28  ;;  %330 = vmatprep.mubr.bf16.mxu1 %v603_v29 }
  0x3a   :  { %299 = vmatmul.mubr.bf16.gmra.mxu0 %v605_v30  ;;  %331 = vmatmul.mubr.bf16.gmra.mxu1 %v606_v31 }
  0xe2   :  { %v503_v32 = vpop.f32.mrf.mxu0  ;;  %v527_v33 = vpop.f32.mrf.mxu1 }
  0xe4   :  { %v504_v34 = vpop.f32.mrf.mxu0  ;;  %v528_v36 = vpop.f32.mrf.mxu1 }
  0xe5   :  { %v505_v37 = vadd.f32 %v504_v34, %v503_v32  ;;  %v529_v38 = vadd.f32 %v528_v36, %v527_v33 }
  0xe6   :  { %v506_v40 = vpop.f32.mrf.mxu0  ;;  %v530_v41 = vpop.f32.mrf.mxu1 }
  0xe7   :  { %v346_v42 = vmul.f32 %v505_v37, %v731_v35  ;;  %v354_v43 = vmul.f32 %v529_v38, %v731_v35 }
  0xe8   :  { %v507_v44 = vpop.f32.mrf.mxu0  ;;  %v531_v45 = vpop.f32.mrf.mxu1 }
  0xe9   :  { %v369_v46 = vadd.f32 %v736_v39, %v346_v42  ;;  %v377_v47 = vadd.f32 %v736_v39, %v354_v43  ;;  %v508_v48 = vadd.f32 %v507_v44, %v506_v40  ;;  %v532_v49 = vadd.f32 %v531_v45, %v530_v41 }
  0xea   :  { %v509_v50 = vpop.f32.mrf.mxu0  ;;  %v533_v51 = vpop.f32.mrf.mxu1 }
  0xeb   :  { %vm385_vm0 = vcmp.ge.f32.partialorder %v369_v46, 0.0  ;;  %v401_v52 = vmul.f32 0.2, %v369_v46  ;;  %vm393_vm1 = vcmp.ge.f32.partialorder %v377_v47, 0.0  ;;  %v409_v53 = vmul.f32 0.2, %v377_v47 }
  0xec   :  { %v347_v54 = vmul.f32 %v508_v48, %v731_v35  ;;  %v355_v55 = vmul.f32 %v532_v49, %v731_v35  ;;  %v510_v56 = vpop.f32.mrf.mxu0  ;;  %v534_v57 = vpop.f32.mrf.mxu1 }
  0xed   :  { %v417_v58 = vsel %vm385_vm0, %v369_v46, %v401_v52  ;;  %v425_v59 = vsel %vm393_vm1, %v377_v47, %v409_v53  ;;  %v511_v60 = vadd.f32 %v510_v56, %v509_v50  ;;  %v535_v61 = vadd.f32 %v534_v57, %v533_v51 }
  0xee   :  { %433 = vst [vmem:[%s822_s4] sm:$0xff] %v417_v58  ;;  %441 = vst [vmem:[%s822_s4 + $0x40] sm:$0xff] %v425_v59  ;;  %v370_v62 = vadd.f32 %v736_v39, %v347_v54  ;;  %v378_v63 = vadd.f32 %v736_v39, %v355_v55  ;;  %v512_v0 = vpop.f32.mrf.mxu0  ;;  %v536_v1 = vpop.f32.mrf.mxu1 }
  0xef   :  { %v348_v2 = vmul.f32 %v511_v60, %v731_v35  ;;  %v356_v3 = vmul.f32 %v535_v61, %v731_v35 }
  0xf0   :  { %vm386_vm2 = vcmp.ge.f32.partialorder %v370_v62, 0.0  ;;  %v402_v4 = vmul.f32 0.2, %v370_v62  ;;  %vm394_vm3 = vcmp.ge.f32.partialorder %v378_v63, 0.0  ;;  %v410_v5 = vmul.f32 0.2, %v378_v63  ;;  %v513_v6 = vpop.f32.mrf.mxu0  ;;  %v537_v7 = vpop.f32.mrf.mxu1 }
  0xf1   :  { %v371_v8 = vadd.f32 %v736_v39, %v348_v2  ;;  %v379_v9 = vadd.f32 %v736_v39, %v356_v3  ;;  %v514_v10 = vadd.f32 %v513_v6, %v512_v0  ;;  %v538_v11 = vadd.f32 %v537_v7, %v536_v1 }
  0xf2   :  { %v418_v12 = vsel %vm386_vm2, %v370_v62, %v402_v4  ;;  %v426_v13 = vsel %vm394_vm3, %v378_v63, %v410_v5  ;;  %v515_v14 = vpop.f32.mrf.mxu0  ;;  %v539_v15 = vpop.f32.mrf.mxu1 }
  0xf3   :  { %434 = vst [vmem:[%s822_s4 + $0x8] sm:$0xff] %v418_v12  ;;  %442 = vst [vmem:[%s822_s4 + $0x48] sm:$0xff] %v426_v13  ;;  %vm387_vm4 = vcmp.ge.f32.partialorder %v371_v8, 0.0  ;;  %v403_v16 = vmul.f32 0.2, %v371_v8  ;;  %vm395_vm5 = vcmp.ge.f32.partialorder %v379_v9, 0.0  ;;  %v349_v18 = vmul.f32 %v514_v10, %v731_v35 }
  0xf4   :  { %v411_v17 = vmul.f32 0.2, %v379_v9  ;;  %v357_v19 = vmul.f32 %v538_v11, %v731_v35  ;;  %v516_v20 = vpop.f32.mrf.mxu0  ;;  %v540_v21 = vpop.f32.mrf.mxu1 }
  0xf5   :  { %v419_v22 = vsel %vm387_vm4, %v371_v8, %v403_v16  ;;  %v517_v24 = vadd.f32 %v516_v20, %v515_v14  ;;  %v541_v25 = vadd.f32 %v540_v21, %v539_v15  ;;  %v372_v26 = vadd.f32 %v736_v39, %v349_v18 }
  0xf6   :  { %v427_v23 = vsel %vm395_vm5, %v379_v9, %v411_v17  ;;  %435 = vst [vmem:[%s822_s4 + $0x10] sm:$0xff] %v419_v22  ;;  %v380_v27 = vadd.f32 %v736_v39, %v357_v19  ;;  %v518_v28 = vpop.f32.mrf.mxu0  ;;  %v542_v29 = vpop.f32.mrf.mxu1 }
  0xf7   :  { %443 = vst [vmem:[%s822_s4 + $0x50] sm:$0xff] %v427_v23  ;;  %v350_v30 = vmul.f32 %v517_v24, %v731_v35  ;;  %v358_v31 = vmul.f32 %v541_v25, %v731_v35  ;;  %vm388_vm6 = vcmp.ge.f32.partialorder %v372_v26, 0.0  ;;  %v404_v32 = vmul.f32 0.2, %v372_v26 }
  0xf8   :  { %vm396_vm7 = vcmp.ge.f32.partialorder %v380_v27, 0.0  ;;  %v412_v33 = vmul.f32 0.2, %v380_v27  ;;  %v519_v34 = vpop.f32.mrf.mxu0  ;;  %v543_v36 = vpop.f32.mrf.mxu1 }
  0xf9   :  { %v373_v37 = vadd.f32 %v736_v39, %v350_v30  ;;  %v381_v38 = vadd.f32 %v736_v39, %v358_v31  ;;  %v520_v40 = vadd.f32 %v519_v34, %v518_v28  ;;  %v544_v41 = vadd.f32 %v543_v36, %v542_v29 }
  0xfa   :  { %v420_v42 = vsel %vm388_vm6, %v372_v26, %v404_v32  ;;  %v428_v43 = vsel %vm396_vm7, %v380_v27, %v412_v33  ;;  %v521_v44 = vpop.f32.mrf.mxu0  ;;  %v545_v45 = vpop.f32.mrf.mxu1 }
  0xfb   :  { %436 = vst [vmem:[%s822_s4 + $0x18] sm:$0xff] %v420_v42  ;;  %444 = vst [vmem:[%s822_s4 + $0x58] sm:$0xff] %v428_v43  ;;  %vm389_vm8 = vcmp.ge.f32.partialorder %v373_v37, 0.0  ;;  %v405_v46 = vmul.f32 0.2, %v373_v37  ;;  %vm397_vm9 = vcmp.ge.f32.partialorder %v381_v38, 0.0  ;;  %v351_v48 = vmul.f32 %v520_v40, %v731_v35 }
  0xfc   :  { %v413_v47 = vmul.f32 0.2, %v381_v38  ;;  %v359_v49 = vmul.f32 %v544_v41, %v731_v35  ;;  %v522_v50 = vpop.f32.mrf.mxu0  ;;  %v546_v51 = vpop.f32.mrf.mxu1 }
  0xfd   :  { %v421_v52 = vsel %vm389_vm8, %v373_v37, %v405_v46  ;;  %v523_v54 = vadd.f32 %v522_v50, %v521_v44  ;;  %v547_v55 = vadd.f32 %v546_v51, %v545_v45  ;;  %v374_v56 = vadd.f32 %v736_v39, %v351_v48 }
  0xfe   :  { %v429_v53 = vsel %vm397_vm9, %v381_v38, %v413_v47  ;;  %437 = vst [vmem:[%s822_s4 + $0x20] sm:$0xff] %v421_v52  ;;  %v382_v57 = vadd.f32 %v736_v39, %v359_v49  ;;  %v524_v58 = vpop.f32.mrf.mxu0  ;;  %v548_v59 = vpop.f32.mrf.mxu1 }
  0xff   :  { %445 = vst [vmem:[%s822_s4 + $0x60] sm:$0xff] %v429_v53  ;;  %v352_v60 = vmul.f32 %v523_v54, %v731_v35  ;;  %v360_v61 = vmul.f32 %v547_v55, %v731_v35  ;;  %vm390_vm10 = vcmp.ge.f32.partialorder %v374_v56, 0.0  ;;  %v406_v62 = vmul.f32 0.2, %v374_v56 }
 0x100   :  { %vm398_vm11 = vcmp.ge.f32.partialorder %v382_v57, 0.0  ;;  %v414_v63 = vmul.f32 0.2, %v382_v57  ;;  %v525_v0 = vpop.f32.mrf.mxu0  ;;  %v549_v1 = vpop.f32.mrf.mxu1 }
 0x101   :  { %v375_v2 = vadd.f32 %v736_v39, %v352_v60  ;;  %v383_v3 = vadd.f32 %v736_v39, %v360_v61  ;;  %v526_v4 = vadd.f32 %v525_v0, %v524_v58  ;;  %v550_v5 = vadd.f32 %v549_v1, %v548_v59 }
 0x102   :  { %v422_v6 = vsel %vm390_vm10, %v374_v56, %v406_v62  ;;  %v430_v7 = vsel %vm398_vm11, %v382_v57, %v414_v63 }
 0x103   :  { %438 = vst [vmem:[%s822_s4 + $0x28] sm:$0xff] %v422_v6  ;;  %446 = vst [vmem:[%s822_s4 + $0x68] sm:$0xff] %v430_v7  ;;  %vm391_vm12 = vcmp.ge.f32.partialorder %v375_v2, 0.0  ;;  %v407_v8 = vmul.f32 0.2, %v375_v2  ;;  %vm399_vm13 = vcmp.ge.f32.partialorder %v383_v3, 0.0  ;;  %v353_v10 = vmul.f32 %v526_v4, %v731_v35 }
 0x104   :  { %v415_v9 = vmul.f32 0.2, %v383_v3  ;;  %v361_v11 = vmul.f32 %v550_v5, %v731_v35 }
 0x105   :  { %v423_v12 = vsel %vm391_vm12, %v375_v2, %v407_v8  ;;  %v376_v14 = vadd.f32 %v736_v39, %v353_v10 }
 0x106   :  { %v431_v13 = vsel %vm399_vm13, %v383_v3, %v415_v9  ;;  %439 = vst [vmem:[%s822_s4 + $0x30] sm:$0xff] %v423_v12  ;;  %v384_v15 = vadd.f32 %v736_v39, %v361_v11 }
 0x107   :  { %447 = vst [vmem:[%s822_s4 + $0x70] sm:$0xff] %v431_v13  ;;  %vm392_vm14 = vcmp.ge.f32.partialorder %v376_v14, 0.0  ;;  %v408_v16 = vmul.f32 0.2, %v376_v14 }
 0x108   :  { %vm400_vm15 = vcmp.ge.f32.partialorder %v384_v15, 0.0  ;;  %v416_v17 = vmul.f32 0.2, %v384_v15 }
 0x109   :  { %v424_v18 = vsel %vm392_vm14, %v376_v14, %v408_v16 }
 0x10a   :  { %v432_v35 = vsel %vm400_vm15, %v384_v15, %v416_v17  ;;  %440 = vst [vmem:[%s822_s4 + $0x38] sm:$0xff] %v424_v18 }
 0x10b   :  { %448 = vst [vmem:[%s822_s4 + $0x78] sm:$0xff] %v432_v35 }

// kernel: forward.23
= control target key start
LH: loop header
LB: loop body
LE: loop exit
PB: predicated region body
PF: predicated region fallthrough
CT: control target
= control target key end

     0   :  { %s562_s1 = inlined_call_operand.vmem [shape: bf16[256,128], index: 1, kind: input, shape index: {}]   ;;  %s563_s0 = inlined_call_operand.vmem [shape: bf16[64,256], index: 0, kind: input, shape index: {}]   ;;  %s564_s2 = inlined_call_operand.vmem [shape: f32[1,128], index: 2, kind: input, shape index: {}]   ;;  %s565_s3 = inlined_call_operand.vmem [shape: f32[1,128], index: 3, kind: input, shape index: {}]   ;;  %s566_s4 = inlined_call_operand.vmem [shape: f32[64,128], index: 4, kind: output, shape index: {}]  }
   0x1   :  { %v407_v0 = vld [vmem:[%s562_s1 + $0x78] sm:$0xff]   ;;  %v409_v2 = vld [vmem:[%s562_s1 + $0x70] sm:$0xff]   ;;  %v411_v4 = vld [vmem:[%s562_s1 + $0x68] sm:$0xff]  }
   0x2   :  { %v408_v1 = vld [vmem:[%s562_s1 + $0x38] sm:$0xff]   ;;  %351 = vmatprep.subr.bf16.mxu0 %v407_v0  ;;  %391 = vmatprep.subr.bf16.mxu1 %v407_v0  ;;  %v410_v3 = vld [vmem:[%s562_s1 + $0x30] sm:$0xff]   ;;  %v412_v5 = vld [vmem:[%s562_s1 + $0x28] sm:$0xff]  }
   0x3   :  { %352 = vmatpush3.bf16.msra.mxu0 %v408_v1  ;;  %399 = vmatpush3.bf16.msra.mxu1 %v408_v1  ;;  %v413_v6 = vld [vmem:[%s562_s1 + $0x60] sm:$0xff]   ;;  %v415_v8 = vld [vmem:[%s562_s1 + $0x58] sm:$0xff]   ;;  %v417_v10 = vld [vmem:[%s562_s1 + $0x50] sm:$0xff]  }
   0x4   :  { %353 = vmatprep.subr.bf16.mxu0 %v409_v2  ;;  %392 = vmatprep.subr.bf16.mxu1 %v409_v2  ;;  %v414_v7 = vld [vmem:[%s562_s1 + $0x20] sm:$0xff]   ;;  %v416_v9 = vld [vmem:[%s562_s1 + $0x18] sm:$0xff]   ;;  %v418_v13 = vld [vmem:[%s562_s1 + $0x10] sm:$0xff]  }
   0x5   :  { %v425_v11 = vld [vmem:[%s563_s0 + $0x4] ss:$8 sps:$4 sm:$0xff]   ;;  %v423_v18 = vld [vmem:[%s563_s0] ss:$8 sps:$4 sm:$0xff]   ;;  %v429_v20 = vld [vmem:[%s563_s0 + $0x14] ss:$8 sps:$4 sm:$0xff]  }
   0x6   :  { %v428_v12 = vld [vmem:[%s563_s0 + $0x24] ss:$8 sps:$4 sm:$0xff]   ;;  %226 = vmatprep.mubr.bf16.mxu0 %v425_v11  ;;  %v426_v19 = vld [vmem:[%s563_s0 + $0x20] ss:$8 sps:$4 sm:$0xff]   ;;  %v431_v21 = vld [vmem:[%s563_s0 + $0x34] ss:$8 sps:$4 sm:$0xff]  }
   0x7   :  { %354 = vmatpush3.bf16.msra.mxu0 %v410_v3  ;;  %400 = vmatpush3.bf16.msra.mxu1 %v410_v3  ;;  %v419_v14 = vld [vmem:[%s562_s1 + $0x48] sm:$0xff]   ;;  %v421_v16 = vld [vmem:[%s562_s1 + $0x40] sm:$0xff]   ;;  %v433_v22 = vld [vmem:[%s563_s0 + $0x10] ss:$8 sps:$4 sm:$0xff]  }
   0x8   :  { %355 = vmatprep.subr.bf16.mxu0 %v411_v4  ;;  %393 = vmatprep.subr.bf16.mxu1 %v411_v4  ;;  %v420_v15 = vld [vmem:[%s562_s1 + $0x8] sm:$0xff]   ;;  %v422_v17 = vld [vmem:[%s562_s1] sm:$0xff]   ;;  %v434_v23 = vld [vmem:[%s563_s0 + $0x30] ss:$8 sps:$4 sm:$0xff]  }
   0x9   :  { %242 = vmatprep.mubr.bf16.mxu1 %v428_v12  ;;  %v349_v27 = vld [vmem:[%s564_s2] ss:$0 sm:$0xff] }
   0xa   :  { %v350_v31 = vld [vmem:[%s565_s3] ss:$0 sm:$0xff] }
   0xb   :  { %356 = vmatpush3.bf16.msra.mxu0 %v412_v5  ;;  %401 = vmatpush3.bf16.msra.mxu1 %v412_v5 }
   0xc   :  { %357 = vmatprep.subr.bf16.mxu0 %v413_v6  ;;  %394 = vmatprep.subr.bf16.mxu1 %v413_v6 }
   0xf   :  { %358 = vmatpush3.bf16.msra.mxu0 %v414_v7  ;;  %402 = vmatpush3.bf16.msra.mxu1 %v414_v7 }
  0x10   :  { %359 = vmatprep.subr.bf16.mxu0 %v415_v8  ;;  %395 = vmatprep.subr.bf16.mxu1 %v415_v8 }
  0x13   :  { %360 = vmatpush3.bf16.msra.mxu0 %v416_v9  ;;  %403 = vmatpush3.bf16.msra.mxu1 %v416_v9 }
  0x14   :  { %361 = vmatprep.subr.bf16.mxu0 %v417_v10  ;;  %396 = vmatprep.subr.bf16.mxu1 %v417_v10 }
  0x17   :  { %362 = vmatpush3.bf16.msra.mxu0 %v418_v13  ;;  %404 = vmatpush3.bf16.msra.mxu1 %v418_v13 }
  0x18   :  { %363 = vmatprep.subr.bf16.mxu0 %v419_v14  ;;  %397 = vmatprep.subr.bf16.mxu1 %v419_v14 }
  0x1b   :  { %364 = vmatpush3.bf16.msra.mxu0 %v420_v15  ;;  %405 = vmatpush3.bf16.msra.mxu1 %v420_v15 }
  0x1c   :  { %365 = vmatprep.subr.bf16.mxu0 %v421_v16  ;;  %398 = vmatprep.subr.bf16.mxu1 %v421_v16 }
  0x1f   :  { %366 = vmatpush3.bf16.msra.mxu0 %v422_v17  ;;  %406 = vmatpush3.bf16.msra.mxu1 %v422_v17 }
  0x22   :  { %227 = vmatmul.mubr.bf16.vlgmr.msra.gmra.mxu0 %v423_v18  ;;  %243 = vmatmul.mubr.bf16.vlgmr.msra.gmra.mxu1 %v426_v19 }
  0x23   :  { %234 = vmatprep.mubr.bf16.mxu0 %v429_v20  ;;  %250 = vmatprep.mubr.bf16.mxu1 %v431_v21 }
  0x2a   :  { %235 = vmatmul.mubr.bf16.gmra.mxu0 %v433_v22  ;;  %251 = vmatmul.mubr.bf16.gmra.mxu1 %v434_v23 }
  0xe2   :  { %v367_v24 = vpop.f32.mrf.mxu0  ;;  %v379_v25 = vpop.f32.mrf.mxu1 }
  0xe4   :  { %v368_v26 = vpop.f32.mrf.mxu0  ;;  %v380_v28 = vpop.f32.mrf.mxu1 }
  0xe5   :  { %v369_v29 = vadd.f32 %v368_v26, %v367_v24  ;;  %v381_v30 = vadd.f32 %v380_v28, %v379_v25 }
  0xe6   :  { %v370_v32 = vpop.f32.mrf.mxu0  ;;  %v382_v33 = vpop.f32.mrf.mxu1 }
  0xe7   :  { %v266_v34 = vmul.f32 %v369_v29, %v349_v27  ;;  %v270_v35 = vmul.f32 %v381_v30, %v349_v27 }
  0xe8   :  { %v371_v36 = vpop.f32.mrf.mxu0  ;;  %v383_v37 = vpop.f32.mrf.mxu1 }
  0xe9   :  { %v281_v38 = vadd.f32 %v350_v31, %v266_v34  ;;  %v285_v39 = vadd.f32 %v350_v31, %v270_v35  ;;  %v372_v40 = vadd.f32 %v371_v36, %v370_v32  ;;  %v384_v41 = vadd.f32 %v383_v37, %v382_v33 }
  0xea   :  { %v373_v42 = vpop.f32.mrf.mxu0  ;;  %v385_v43 = vpop.f32.mrf.mxu1 }
  0xeb   :  { %vm289_vm0 = vcmp.ge.f32.partialorder %v281_v38, 0.0  ;;  %v297_v44 = vmul.f32 0.2, %v281_v38  ;;  %vm293_vm1 = vcmp.ge.f32.partialorder %v285_v39, 0.0  ;;  %v301_v45 = vmul.f32 0.2, %v285_v39 }
  0xec   :  { %v267_v46 = vmul.f32 %v372_v40, %v349_v27  ;;  %v271_v47 = vmul.f32 %v384_v41, %v349_v27  ;;  %v374_v48 = vpop.f32.mrf.mxu0  ;;  %v386_v49 = vpop.f32.mrf.mxu1 }
  0xed   :  { %v305_v50 = vsel %vm289_vm0, %v281_v38, %v297_v44  ;;  %v309_v51 = vsel %vm293_vm1, %v285_v39, %v301_v45  ;;  %v375_v52 = vadd.f32 %v374_v48, %v373_v42  ;;  %v387_v53 = vadd.f32 %v386_v49, %v385_v43 }
  0xee   :  { %313 = vst [vmem:[%s566_s4] sm:$0xff] %v305_v50  ;;  %317 = vst [vmem:[%s566_s4 + $0x20] sm:$0xff] %v309_v51  ;;  %v282_v54 = vadd.f32 %v350_v31, %v267_v46  ;;  %v286_v55 = vadd.f32 %v350_v31, %v271_v47  ;;  %v376_v56 = vpop.f32.mrf.mxu0  ;;  %v388_v57 = vpop.f32.mrf.mxu1 }
  0xef   :  { %v268_v58 = vmul.f32 %v375_v52, %v349_v27  ;;  %v272_v59 = vmul.f32 %v387_v53, %v349_v27 }
  0xf0   :  { %vm290_vm2 = vcmp.ge.f32.partialorder %v282_v54, 0.0  ;;  %v298_v60 = vmul.f32 0.2, %v282_v54  ;;  %vm294_vm3 = vcmp.ge.f32.partialorder %v286_v55, 0.0  ;;  %v302_v61 = vmul.f32 0.2, %v286_v55  ;;  %v377_v62 = vpop.f32.mrf.mxu0  ;;  %v389_v63 = vpop.f32.mrf.mxu1 }
  0xf1   :  { %v283_v0 = vadd.f32 %v350_v31, %v268_v58  ;;  %v287_v1 = vadd.f32 %v350_v31, %v272_v59  ;;  %v378_v2 = vadd.f32 %v377_v62, %v376_v56  ;;  %v390_v3 = vadd.f32 %v389_v63, %v388_v57 }
  0xf2   :  { %v306_v4 = vsel %vm290_vm2, %v282_v54, %v298_v60  ;;  %v310_v5 = vsel %vm294_vm3, %v286_v55, %v302_v61 }
  0xf3   :  { %314 = vst [vmem:[%s566_s4 + $0x8] sm:$0xff] %v306_v4  ;;  %318 = vst [vmem:[%s566_s4 + $0x28] sm:$0xff] %v310_v5  ;;  %vm291_vm4 = vcmp.ge.f32.partialorder %v283_v0, 0.0  ;;  %v299_v6 = vmul.f32 0.2, %v283_v0  ;;  %vm295_vm5 = vcmp.ge.f32.partialorder %v287_v1, 0.0  ;;  %v269_v8 = vmul.f32 %v378_v2, %v349_v27 }
  0xf4   :  { %v303_v7 = vmul.f32 0.2, %v287_v1  ;;  %v273_v9 = vmul.f32 %v390_v3, %v349_v27 }
  0xf5   :  { %v307_v10 = vsel %vm291_vm4, %v283_v0, %v299_v6  ;;  %v284_v12 = vadd.f32 %v350_v31, %v269_v8 }
  0xf6   :  { %v311_v11 = vsel %vm295_vm5, %v287_v1, %v303_v7  ;;  %315 = vst [vmem:[%s566_s4 + $0x10] sm:$0xff] %v307_v10  ;;  %v288_v13 = vadd.f32 %v350_v31, %v273_v9 }
  0xf7   :  { %319 = vst [vmem:[%s566_s4 + $0x30] sm:$0xff] %v311_v11  ;;  %vm292_vm6 = vcmp.ge.f32.partialorder %v284_v12, 0.0  ;;  %v300_v14 = vmul.f32 0.2, %v284_v12 }
  0xf8   :  { %vm296_vm7 = vcmp.ge.f32.partialorder %v288_v13, 0.0  ;;  %v304_v15 = vmul.f32 0.2, %v288_v13 }
  0xf9   :  { %v308_v16 = vsel %vm292_vm6, %v284_v12, %v300_v14 }
  0xfa   :  { %v312_v17 = vsel %vm296_vm7, %v288_v13, %v304_v15  ;;  %316 = vst [vmem:[%s566_s4 + $0x18] sm:$0xff] %v308_v16 }
  0xfb   :  { %320 = vst [vmem:[%s566_s4 + $0x38] sm:$0xff] %v312_v17 }

// kernel: forward.25
= control target key start
LH: loop header
LB: loop body
LE: loop exit
PB: predicated region body
PF: predicated region fallthrough
CT: control target
= control target key end

     0   :  { %s1290_s1 = inlined_call_operand.vmem [shape: bf16[256,128], index: 1, kind: input, shape index: {}]   ;;  %s1291_s0 = inlined_call_operand.vmem [shape: bf16[256,256], index: 0, kind: input, shape index: {}]   ;;  %s1292_s2 = inlined_call_operand.vmem [shape: f32[1,128], index: 2, kind: input, shape index: {}]   ;;  %s1293_s3 = inlined_call_operand.vmem [shape: f32[1,128], index: 3, kind: input, shape index: {}]   ;;  %s1294_s4 = inlined_call_operand.vmem [shape: f32[256,128], index: 4, kind: output, shape index: {}]  }
   0x1   :  { %v887_v0 = vld [vmem:[%s1290_s1 + $0x78] sm:$0xff]   ;;  %v889_v2 = vld [vmem:[%s1290_s1 + $0x70] sm:$0xff]   ;;  %v891_v4 = vld [vmem:[%s1290_s1 + $0x68] sm:$0xff]  }
   0x2   :  { %v888_v1 = vld [vmem:[%s1290_s1 + $0x38] sm:$0xff]   ;;  %759 = vmatprep.subr.bf16.mxu0 %v887_v0  ;;  %871 = vmatprep.subr.bf16.mxu1 %v887_v0  ;;  %v890_v3 = vld [vmem:[%s1290_s1 + $0x30] sm:$0xff]   ;;  %v892_v5 = vld [vmem:[%s1290_s1 + $0x28] sm:$0xff]  }
   0x3   :  { %760 = vmatpush3.bf16.msra.mxu0 %v888_v1  ;;  %879 = vmatpush3.bf16.msra.mxu1 %v888_v1  ;;  %v893_v6 = vld [vmem:[%s1290_s1 + $0x60] sm:$0xff]   ;;  %v895_v8 = vld [vmem:[%s1290_s1 + $0x58] sm:$0xff]   ;;  %v897_v10 = vld [vmem:[%s1290_s1 + $0x50] sm:$0xff]  }
   0x4   :  { %761 = vmatprep.subr.bf16.mxu0 %v889_v2  ;;  %872 = vmatprep.subr.bf16.mxu1 %v889_v2  ;;  %v894_v7 = vld [vmem:[%s1290_s1 + $0x20] sm:$0xff]   ;;  %v896_v9 = vld [vmem:[%s1290_s1 + $0x18] sm:$0xff]   ;;  %v898_v13 = vld [vmem:[%s1290_s1 + $0x10] sm:$0xff]  }
   0x5   :  { %v905_v11 = vld [vmem:[%s1291_s0 + $0x4] ss:$8 sps:$4 sm:$0xff]   ;;  %v903_v18 = vld [vmem:[%s1291_s0] ss:$8 sps:$4 sm:$0xff]   ;;  %v909_v20 = vld [vmem:[%s1291_s0 + $0x14] ss:$8 sps:$4 sm:$0xff]  }
   0x6   :  { %v908_v12 = vld [vmem:[%s1291_s0 + $0x84] ss:$8 sps:$4 sm:$0xff]   ;;  %370 = vmatprep.mubr.bf16.mxu0 %v905_v11  ;;  %v906_v19 = vld [vmem:[%s1291_s0 + $0x80] ss:$8 sps:$4 sm:$0xff]   ;;  %v911_v21 = vld [vmem:[%s1291_s0 + $0x94] ss:$8 sps:$4 sm:$0xff]  }
   0x7   :  { %762 = vmatpush3.bf16.msra.mxu0 %v890_v3  ;;  %880 = vmatpush3.bf16.msra.mxu1 %v890_v3  ;;  %v899_v14 = vld [vmem:[%s1290_s1 + $0x48] sm:$0xff]   ;;  %v901_v16 = vld [vmem:[%s1290_s1 + $0x40] sm:$0xff]   ;;  %v913_v22 = vld [vmem:[%s1291_s0 + $0x10] ss:$8 sps:$4 sm:$0xff]  }
   0x8   :  { %763 = vmatprep.subr.bf16.mxu0 %v891_v4  ;;  %873 = vmatprep.subr.bf16.mxu1 %v891_v4  ;;  %v900_v15 = vld [vmem:[%s1290_s1 + $0x8] sm:$0xff]   ;;  %v902_v17 = vld [vmem:[%s1290_s1] sm:$0xff]   ;;  %v914_v23 = vld [vmem:[%s1291_s0 + $0x90] ss:$8 sps:$4 sm:$0xff]  }
   0x9   :  { %434 = vmatprep.mubr.bf16.mxu1 %v908_v12  ;;  %v915_v24 = vld [vmem:[%s1291_s0 + $0x24] ss:$8 sps:$4 sm:$0xff]   ;;  %v919_v26 = vld [vmem:[%s1291_s0 + $0x20] ss:$8 sps:$4 sm:$0xff]   ;;  %v921_v28 = vld [vmem:[%s1291_s0 + $0x34] ss:$8 sps:$4 sm:$0xff]  }
   0xa   :  { %v917_v25 = vld [vmem:[%s1291_s0 + $0xa4] ss:$8 sps:$4 sm:$0xff]   ;;  %v920_v27 = vld [vmem:[%s1291_s0 + $0xa0] ss:$8 sps:$4 sm:$0xff]   ;;  %v923_v29 = vld [vmem:[%s1291_s0 + $0xb4] ss:$8 sps:$4 sm:$0xff]  }
   0xb   :  { %764 = vmatpush3.bf16.msra.mxu0 %v892_v5  ;;  %881 = vmatpush3.bf16.msra.mxu1 %v892_v5  ;;  %v925_v30 = vld [vmem:[%s1291_s0 + $0x30] ss:$8 sps:$4 sm:$0xff]   ;;  %v927_v32 = vld [vmem:[%s1291_s0 + $0x44] ss:$8 sps:$4 sm:$0xff]   ;;  %v931_v34 = vld [vmem:[%s1291_s0 + $0x40] ss:$8 sps:$4 sm:$0xff]  }
   0xc   :  { %765 = vmatprep.subr.bf16.mxu0 %v893_v6  ;;  %874 = vmatprep.subr.bf16.mxu1 %v893_v6  ;;  %v926_v31 = vld [vmem:[%s1291_s0 + $0xb0] ss:$8 sps:$4 sm:$0xff]   ;;  %v929_v33 = vld [vmem:[%s1291_s0 + $0xc4] ss:$8 sps:$4 sm:$0xff]   ;;  %v932_v35 = vld [vmem:[%s1291_s0 + $0xc0] ss:$8 sps:$4 sm:$0xff]  }
   0xd   :  { %v933_v36 = vld [vmem:[%s1291_s0 + $0x54] ss:$8 sps:$4 sm:$0xff]   ;;  %v937_v38 = vld [vmem:[%s1291_s0 + $0x50] ss:$8 sps:$4 sm:$0xff]   ;;  %v939_v40 = vld [vmem:[%s1291_s0 + $0x64] ss:$8 sps:$4 sm:$0xff]  }
   0xe   :  { %v935_v37 = vld [vmem:[%s1291_s0 + $0xd4] ss:$8 sps:$4 sm:$0xff]   ;;  %v938_v39 = vld [vmem:[%s1291_s0 + $0xd0] ss:$8 sps:$4 sm:$0xff]   ;;  %v941_v41 = vld [vmem:[%s1291_s0 + $0xe4] ss:$8 sps:$4 sm:$0xff]  }
   0xf   :  { %766 = vmatpush3.bf16.msra.mxu0 %v894_v7  ;;  %882 = vmatpush3.bf16.msra.mxu1 %v894_v7  ;;  %v943_v42 = vld [vmem:[%s1291_s0 + $0x60] ss:$8 sps:$4 sm:$0xff]   ;;  %v945_v44 = vld [vmem:[%s1291_s0 + $0x74] ss:$8 sps:$4 sm:$0xff]   ;;  %v949_v46 = vld [vmem:[%s1291_s0 + $0x70] ss:$8 sps:$4 sm:$0xff]  }
  0x10   :  { %767 = vmatprep.subr.bf16.mxu0 %v895_v8  ;;  %875 = vmatprep.subr.bf16.mxu1 %v895_v8  ;;  %v944_v43 = vld [vmem:[%s1291_s0 + $0xe0] ss:$8 sps:$4 sm:$0xff]   ;;  %v947_v45 = vld [vmem:[%s1291_s0 + $0xf4] ss:$8 sps:$4 sm:$0xff]   ;;  %v950_v47 = vld [vmem:[%s1291_s0 + $0xf0] ss:$8 sps:$4 sm:$0xff]  }
  0x11   :  { %v1123_v51 = vld [vmem:[%s1292_s2] ss:$0 sm:$0xff] }
  0x12   :  { %v1128_v55 = vld [vmem:[%s1293_s3] ss:$0 sm:$0xff] }
  0x13   :  { %768 = vmatpush3.bf16.msra.mxu0 %v896_v9  ;;  %883 = vmatpush3.bf16.msra.mxu1 %v896_v9 }
  0x14   :  { %769 = vmatprep.subr.bf16.mxu0 %v897_v10  ;;  %876 = vmatprep.subr.bf16.mxu1 %v897_v10 }
  0x17   :  { %770 = vmatpush3.bf16.msra.mxu0 %v898_v13  ;;  %884 = vmatpush3.bf16.msra.mxu1 %v898_v13 }
  0x18   :  { %771 = vmatprep.subr.bf16.mxu0 %v899_v14  ;;  %877 = vmatprep.subr.bf16.mxu1 %v899_v14 }
  0x1b   :  { %772 = vmatpush3.bf16.msra.mxu0 %v900_v15  ;;  %885 = vmatpush3.bf16.msra.mxu1 %v900_v15 }
  0x1c   :  { %773 = vmatprep.subr.bf16.mxu0 %v901_v16  ;;  %878 = vmatprep.subr.bf16.mxu1 %v901_v16 }
  0x1f   :  { %774 = vmatpush3.bf16.msra.mxu0 %v902_v17  ;;  %886 = vmatpush3.bf16.msra.mxu1 %v902_v17 }
  0x22   :  { %371 = vmatmul.mubr.bf16.vlgmr.msra.gmra.mxu0 %v903_v18  ;;  %435 = vmatmul.mubr.bf16.vlgmr.msra.gmra.mxu1 %v906_v19 }
  0x23   :  { %378 = vmatprep.mubr.bf16.mxu0 %v909_v20  ;;  %442 = vmatprep.mubr.bf16.mxu1 %v911_v21 }
  0x2a   :  { %379 = vmatmul.mubr.bf16.gmra.mxu0 %v913_v22  ;;  %443 = vmatmul.mubr.bf16.gmra.mxu1 %v914_v23 }
  0x2b   :  { %386 = vmatprep.mubr.bf16.mxu0 %v915_v24  ;;  %450 = vmatprep.mubr.bf16.mxu1 %v917_v25 }
  0x32   :  { %387 = vmatmul.mubr.bf16.gmra.mxu0 %v919_v26  ;;  %451 = vmatmul.mubr.bf16.gmra.mxu1 %v920_v27 }
  0x33   :  { %394 = vmatprep.mubr.bf16.mxu0 %v921_v28  ;;  %458 = vmatprep.mubr.bf16.mxu1 %v923_v29 }
  0x3a   :  { %395 = vmatmul.mubr.bf16.gmra.mxu0 %v925_v30  ;;  %459 = vmatmul.mubr.bf16.gmra.mxu1 %v926_v31 }
  0x3b   :  { %402 = vmatprep.mubr.bf16.mxu0 %v927_v32  ;;  %466 = vmatprep.mubr.bf16.mxu1 %v929_v33 }
  0x42   :  { %403 = vmatmul.mubr.bf16.gmra.mxu0 %v931_v34  ;;  %467 = vmatmul.mubr.bf16.gmra.mxu1 %v932_v35 }
  0x43   :  { %410 = vmatprep.mubr.bf16.mxu0 %v933_v36  ;;  %474 = vmatprep.mubr.bf16.mxu1 %v935_v37 }
  0x4a   :  { %411 = vmatmul.mubr.bf16.gmra.mxu0 %v937_v38  ;;  %475 = vmatmul.mubr.bf16.gmra.mxu1 %v938_v39 }
  0x4b   :  { %418 = vmatprep.mubr.bf16.mxu0 %v939_v40  ;;  %482 = vmatprep.mubr.bf16.mxu1 %v941_v41 }
  0x52   :  { %419 = vmatmul.mubr.bf16.gmra.mxu0 %v943_v42  ;;  %483 = vmatmul.mubr.bf16.gmra.mxu1 %v944_v43 }
  0x53   :  { %426 = vmatprep.mubr.bf16.mxu0 %v945_v44  ;;  %490 = vmatprep.mubr.bf16.mxu1 %v947_v45 }
  0x5a   :  { %427 = vmatmul.mubr.bf16.gmra.mxu0 %v949_v46  ;;  %491 = vmatmul.mubr.bf16.gmra.mxu1 %v950_v47 }
  0xe2   :  { %v775_v48 = vpop.f32.mrf.mxu0  ;;  %v823_v49 = vpop.f32.mrf.mxu1 }
  0xe4   :  { %v776_v50 = vpop.f32.mrf.mxu0  ;;  %v824_v52 = vpop.f32.mrf.mxu1 }
  0xe5   :  { %v777_v53 = vadd.f32 %v776_v50, %v775_v48  ;;  %v825_v54 = vadd.f32 %v824_v52, %v823_v49 }
  0xe6   :  { %v778_v56 = vpop.f32.mrf.mxu0  ;;  %v826_v57 = vpop.f32.mrf.mxu1 }
  0xe7   :  { %v506_v58 = vmul.f32 %v777_v53, %v1123_v51  ;;  %v522_v59 = vmul.f32 %v825_v54, %v1123_v51 }
  0xe8   :  { %v779_v60 = vpop.f32.mrf.mxu0  ;;  %v827_v61 = vpop.f32.mrf.mxu1 }
  0xe9   :  { %v545_v62 = vadd.f32 %v1128_v55, %v506_v58  ;;  %v561_v63 = vadd.f32 %v1128_v55, %v522_v59  ;;  %v780_v0 = vadd.f32 %v779_v60, %v778_v56  ;;  %v828_v1 = vadd.f32 %v827_v61, %v826_v57 }
  0xea   :  { %v781_v2 = vpop.f32.mrf.mxu0  ;;  %v829_v3 = vpop.f32.mrf.mxu1 }
  0xeb   :  { %vm577_vm0 = vcmp.ge.f32.partialorder %v545_v62, 0.0  ;;  %v609_v4 = vmul.f32 0.2, %v545_v62  ;;  %vm593_vm1 = vcmp.ge.f32.partialorder %v561_v63, 0.0  ;;  %v625_v5 = vmul.f32 0.2, %v561_v63 }
  0xec   :  { %v507_v6 = vmul.f32 %v780_v0, %v1123_v51  ;;  %v523_v7 = vmul.f32 %v828_v1, %v1123_v51  ;;  %v782_v8 = vpop.f32.mrf.mxu0  ;;  %v830_v9 = vpop.f32.mrf.mxu1 }
  0xed   :  { %v641_v10 = vsel %vm577_vm0, %v545_v62, %v609_v4  ;;  %v657_v11 = vsel %vm593_vm1, %v561_v63, %v625_v5  ;;  %v783_v12 = vadd.f32 %v782_v8, %v781_v2  ;;  %v831_v13 = vadd.f32 %v830_v9, %v829_v3 }
  0xee   :  { %673 = vst [vmem:[%s1294_s4] sm:$0xff] %v641_v10  ;;  %689 = vst [vmem:[%s1294_s4 + $0x80] sm:$0xff] %v657_v11  ;;  %v546_v14 = vadd.f32 %v1128_v55, %v507_v6  ;;  %v562_v15 = vadd.f32 %v1128_v55, %v523_v7  ;;  %v784_v16 = vpop.f32.mrf.mxu0  ;;  %v832_v17 = vpop.f32.mrf.mxu1 }
  0xef   :  { %v508_v18 = vmul.f32 %v783_v12, %v1123_v51  ;;  %v524_v19 = vmul.f32 %v831_v13, %v1123_v51 }
  0xf0   :  { %vm578_vm2 = vcmp.ge.f32.partialorder %v546_v14, 0.0  ;;  %v610_v20 = vmul.f32 0.2, %v546_v14  ;;  %vm594_vm3 = vcmp.ge.f32.partialorder %v562_v15, 0.0  ;;  %v626_v21 = vmul.f32 0.2, %v562_v15  ;;  %v785_v22 = vpop.f32.mrf.mxu0  ;;  %v833_v23 = vpop.f32.mrf.mxu1 }
  0xf1   :  { %v547_v24 = vadd.f32 %v1128_v55, %v508_v18  ;;  %v563_v25 = vadd.f32 %v1128_v55, %v524_v19  ;;  %v786_v26 = vadd.f32 %v785_v22, %v784_v16  ;;  %v834_v27 = vadd.f32 %v833_v23, %v832_v17 }
  0xf2   :  { %v642_v28 = vsel %vm578_vm2, %v546_v14, %v610_v20  ;;  %v658_v29 = vsel %vm594_vm3, %v562_v15, %v626_v21  ;;  %v787_v30 = vpop.f32.mrf.mxu0  ;;  %v835_v31 = vpop.f32.mrf.mxu1 }
  0xf3   :  { %674 = vst [vmem:[%s1294_s4 + $0x8] sm:$0xff] %v642_v28  ;;  %690 = vst [vmem:[%s1294_s4 + $0x88] sm:$0xff] %v658_v29  ;;  %vm579_vm4 = vcmp.ge.f32.partialorder %v547_v24, 0.0  ;;  %v611_v32 = vmul.f32 0.2, %v547_v24  ;;  %vm595_vm5 = vcmp.ge.f32.partialorder %v563_v25, 0.0  ;;  %v509_v34 = vmul.f32 %v786_v26, %v1123_v51 }
  0xf4   :  { %v627_v33 = vmul.f32 0.2, %v563_v25  ;;  %v525_v35 = vmul.f32 %v834_v27, %v1123_v51  ;;  %v788_v36 = vpop.f32.mrf.mxu0  ;;  %v836_v37 = vpop.f32.mrf.mxu1 }
  0xf5   :  { %v643_v38 = vsel %vm579_vm4, %v547_v24, %v611_v32  ;;  %v789_v40 = vadd.f32 %v788_v36, %v787_v30  ;;  %v837_v41 = vadd.f32 %v836_v37, %v835_v31  ;;  %v548_v42 = vadd.f32 %v1128_v55, %v509_v34 }
  0xf6   :  { %v659_v39 = vsel %vm595_vm5, %v563_v25, %v627_v33  ;;  %675 = vst [vmem:[%s1294_s4 + $0x10] sm:$0xff] %v643_v38  ;;  %v564_v43 = vadd.f32 %v1128_v55, %v525_v35  ;;  %v790_v44 = vpop.f32.mrf.mxu0  ;;  %v838_v45 = vpop.f32.mrf.mxu1 }
  0xf7   :  { %691 = vst [vmem:[%s1294_s4 + $0x90] sm:$0xff] %v659_v39  ;;  %v510_v46 = vmul.f32 %v789_v40, %v1123_v51  ;;  %v526_v47 = vmul.f32 %v837_v41, %v1123_v51  ;;  %vm580_vm6 = vcmp.ge.f32.partialorder %v548_v42, 0.0  ;;  %v612_v48 = vmul.f32 0.2, %v548_v42 }
  0xf8   :  { %vm596_vm7 = vcmp.ge.f32.partialorder %v564_v43, 0.0  ;;  %v628_v49 = vmul.f32 0.2, %v564_v43  ;;  %v791_v50 = vpop.f32.mrf.mxu0  ;;  %v839_v52 = vpop.f32.mrf.mxu1 }
  0xf9   :  { %v549_v53 = vadd.f32 %v1128_v55, %v510_v46  ;;  %v565_v54 = vadd.f32 %v1128_v55, %v526_v47  ;;  %v792_v56 = vadd.f32 %v791_v50, %v790_v44  ;;  %v840_v57 = vadd.f32 %v839_v52, %v838_v45 }
  0xfa   :  { %v644_v58 = vsel %vm580_vm6, %v548_v42, %v612_v48  ;;  %v660_v59 = vsel %vm596_vm7, %v564_v43, %v628_v49  ;;  %v793_v60 = vpop.f32.mrf.mxu0  ;;  %v841_v61 = vpop.f32.mrf.mxu1 }
  0xfb   :  { %676 = vst [vmem:[%s1294_s4 + $0x18] sm:$0xff] %v644_v58  ;;  %692 = vst [vmem:[%s1294_s4 + $0x98] sm:$0xff] %v660_v59  ;;  %vm581_vm8 = vcmp.ge.f32.partialorder %v549_v53, 0.0  ;;  %v613_v62 = vmul.f32 0.2, %v549_v53  ;;  %vm597_vm9 = vcmp.ge.f32.partialorder %v565_v54, 0.0  ;;  %v511_v0 = vmul.f32 %v792_v56, %v1123_v51 }
  0xfc   :  { %v629_v63 = vmul.f32 0.2, %v565_v54  ;;  %v527_v1 = vmul.f32 %v840_v57, %v1123_v51  ;;  %v794_v2 = vpop.f32.mrf.mxu0  ;;  %v842_v3 = vpop.f32.mrf.mxu1 }
  0xfd   :  { %v645_v4 = vsel %vm581_vm8, %v549_v53, %v613_v62  ;;  %v795_v6 = vadd.f32 %v794_v2, %v793_v60  ;;  %v843_v7 = vadd.f32 %v842_v3, %v841_v61  ;;  %v550_v8 = vadd.f32 %v1128_v55, %v511_v0 }
  0xfe   :  { %v661_v5 = vsel %vm597_vm9, %v565_v54, %v629_v63  ;;  %677 = vst [vmem:[%s1294_s4 + $0x20] sm:$0xff] %v645_v4  ;;  %v566_v9 = vadd.f32 %v1128_v55, %v527_v1  ;;  %v796_v10 = vpop.f32.mrf.mxu0  ;;  %v844_v11 = vpop.f32.mrf.mxu1 }
  0xff   :  { %693 = vst [vmem:[%s1294_s4 + $0xa0] sm:$0xff] %v661_v5  ;;  %v512_v12 = vmul.f32 %v795_v6, %v1123_v51  ;;  %v528_v13 = vmul.f32 %v843_v7, %v1123_v51  ;;  %vm582_vm10 = vcmp.ge.f32.partialorder %v550_v8, 0.0  ;;  %v614_v14 = vmul.f32 0.2, %v550_v8 }
 0x100   :  { %vm598_vm11 = vcmp.ge.f32.partialorder %v566_v9, 0.0  ;;  %v630_v15 = vmul.f32 0.2, %v566_v9  ;;  %v797_v16 = vpop.f32.mrf.mxu0  ;;  %v845_v17 = vpop.f32.mrf.mxu1 }
 0x101   :  { %v551_v18 = vadd.f32 %v1128_v55, %v512_v12  ;;  %v567_v19 = vadd.f32 %v1128_v55, %v528_v13  ;;  %v798_v20 = vadd.f32 %v797_v16, %v796_v10  ;;  %v846_v21 = vadd.f32 %v845_v17, %v844_v11 }
 0x102   :  { %v646_v22 = vsel %vm582_vm10, %v550_v8, %v614_v14  ;;  %v662_v23 = vsel %vm598_vm11, %v566_v9, %v630_v15  ;;  %v799_v24 = vpop.f32.mrf.mxu0  ;;  %v847_v25 = vpop.f32.mrf.mxu1 }
 0x103   :  { %678 = vst [vmem:[%s1294_s4 + $0x28] sm:$0xff] %v646_v22  ;;  %694 = vst [vmem:[%s1294_s4 + $0xa8] sm:$0xff] %v662_v23  ;;  %vm583_vm12 = vcmp.ge.f32.partialorder %v551_v18, 0.0  ;;  %v615_v26 = vmul.f32 0.2, %v551_v18  ;;  %vm599_vm13 = vcmp.ge.f32.partialorder %v567_v19, 0.0  ;;  %v513_v28 = vmul.f32 %v798_v20, %v1123_v51 }
 0x104   :  { %v631_v27 = vmul.f32 0.2, %v567_v19  ;;  %v529_v29 = vmul.f32 %v846_v21, %v1123_v51  ;;  %v800_v30 = vpop.f32.mrf.mxu0  ;;  %v848_v31 = vpop.f32.mrf.mxu1 }
 0x105   :  { %v647_v32 = vsel %vm583_vm12, %v551_v18, %v615_v26  ;;  %v801_v34 = vadd.f32 %v800_v30, %v799_v24  ;;  %v849_v35 = vadd.f32 %v848_v31, %v847_v25  ;;  %v552_v36 = vadd.f32 %v1128_v55, %v513_v28 }
 0x106   :  { %v663_v33 = vsel %vm599_vm13, %v567_v19, %v631_v27  ;;  %679 = vst [vmem:[%s1294_s4 + $0x30] sm:$0xff] %v647_v32  ;;  %v568_v37 = vadd.f32 %v1128_v55, %v529_v29  ;;  %v802_v38 = vpop.f32.mrf.mxu0  ;;  %v850_v39 = vpop.f32.mrf.mxu1 }
 0x107   :  { %695 = vst [vmem:[%s1294_s4 + $0xb0] sm:$0xff] %v663_v33  ;;  %v514_v40 = vmul.f32 %v801_v34, %v1123_v51  ;;  %v530_v41 = vmul.f32 %v849_v35, %v1123_v51  ;;  %vm584_vm14 = vcmp.ge.f32.partialorder %v552_v36, 0.0  ;;  %v616_v42 = vmul.f32 0.2, %v552_v36 }
 0x108   :  { %vm600_vm15 = vcmp.ge.f32.partialorder %v568_v37, 0.0  ;;  %v632_v43 = vmul.f32 0.2, %v568_v37  ;;  %v803_v44 = vpop.f32.mrf.mxu0  ;;  %v851_v45 = vpop.f32.mrf.mxu1 }
 0x109   :  { %v553_v46 = vadd.f32 %v1128_v55, %v514_v40  ;;  %v569_v47 = vadd.f32 %v1128_v55, %v530_v41  ;;  %v804_v48 = vadd.f32 %v803_v44, %v802_v38  ;;  %v852_v49 = vadd.f32 %v851_v45, %v850_v39 }
 0x10a   :  { %v648_v50 = vsel %vm584_vm14, %v552_v36, %v616_v42  ;;  %v664_v52 = vsel %vm600_vm15, %v568_v37, %v632_v43  ;;  %v805_v53 = vpop.f32.mrf.mxu0  ;;  %v853_v54 = vpop.f32.mrf.mxu1 }
 0x10b   :  { %680 = vst [vmem:[%s1294_s4 + $0x38] sm:$0xff] %v648_v50  ;;  %696 = vst [vmem:[%s1294_s4 + $0xb8] sm:$0xff] %v664_v52  ;;  %vm585_vm0 = vcmp.ge.f32.partialorder %v553_v46, 0.0  ;;  %v617_v56 = vmul.f32 0.2, %v553_v46  ;;  %vm601_vm1 = vcmp.ge.f32.partialorder %v569_v47, 0.0  ;;  %v515_v58 = vmul.f32 %v804_v48, %v1123_v51 }
 0x10c   :  { %v633_v57 = vmul.f32 0.2, %v569_v47  ;;  %v531_v59 = vmul.f32 %v852_v49, %v1123_v51  ;;  %v806_v60 = vpop.f32.mrf.mxu0  ;;  %v854_v61 = vpop.f32.mrf.mxu1 }
 0x10d   :  { %v649_v62 = vsel %vm585_vm0, %v553_v46, %v617_v56  ;;  %v807_v0 = vadd.f32 %v806_v60, %v805_v53  ;;  %v855_v1 = vadd.f32 %v854_v61, %v853_v54  ;;  %v554_v2 = vadd.f32 %v1128_v55, %v515_v58 }
 0x10e   :  { %v665_v63 = vsel %vm601_vm1, %v569_v47, %v633_v57  ;;  %681 = vst [vmem:[%s1294_s4 + $0x40] sm:$0xff] %v649_v62  ;;  %v570_v3 = vadd.f32 %v1128_v55, %v531_v59  ;;  %v808_v4 = vpop.f32.mrf.mxu0  ;;  %v856_v5 = vpop.f32.mrf.mxu1 }
 0x10f   :  { %697 = vst [vmem:[%s1294_s4 + $0xc0] sm:$0xff] %v665_v63  ;;  %v516_v6 = vmul.f32 %v807_v0, %v1123_v51  ;;  %v532_v7 = vmul.f32 %v855_v1, %v1123_v51  ;;  %vm586_vm2 = vcmp.ge.f32.partialorder %v554_v2, 0.0  ;;  %v618_v8 = vmul.f32 0.2, %v554_v2 }
 0x110   :  { %vm602_vm3 = vcmp.ge.f32.partialorder %v570_v3, 0.0  ;;  %v634_v9 = vmul.f32 0.2, %v570_v3  ;;  %v809_v10 = vpop.f32.mrf.mxu0  ;;  %v857_v11 = vpop.f32.mrf.mxu1 }
 0x111   :  { %v555_v12 = vadd.f32 %v1128_v55, %v516_v6  ;;  %v571_v13 = vadd.f32 %v1128_v55, %v532_v7  ;;  %v810_v14 = vadd.f32 %v809_v10, %v808_v4  ;;  %v858_v15 = vadd.f32 %v857_v11, %v856_v5 }
 0x112   :  { %v650_v16 = vsel %vm586_vm2, %v554_v2, %v618_v8  ;;  %v666_v17 = vsel %vm602_vm3, %v570_v3, %v634_v9  ;;  %v811_v18 = vpop.f32.mrf.mxu0  ;;  %v859_v19 = vpop.f32.mrf.mxu1 }
 0x113   :  { %682 = vst [vmem:[%s1294_s4 + $0x48] sm:$0xff] %v650_v16  ;;  %698 = vst [vmem:[%s1294_s4 + $0xc8] sm:$0xff] %v666_v17  ;;  %vm587_vm4 = vcmp.ge.f32.partialorder %v555_v12, 0.0  ;;  %v619_v20 = vmul.f32 0.2, %v555_v12  ;;  %vm603_vm5 = vcmp.ge.f32.partialorder %v571_v13, 0.0  ;;  %v517_v22 = vmul.f32 %v810_v14, %v1123_v51 }
 0x114   :  { %v635_v21 = vmul.f32 0.2, %v571_v13  ;;  %v533_v23 = vmul.f32 %v858_v15, %v1123_v51  ;;  %v812_v24 = vpop.f32.mrf.mxu0  ;;  %v860_v25 = vpop.f32.mrf.mxu1 }
 0x115   :  { %v651_v26 = vsel %vm587_vm4, %v555_v12, %v619_v20  ;;  %v813_v28 = vadd.f32 %v812_v24, %v811_v18  ;;  %v861_v29 = vadd.f32 %v860_v25, %v859_v19  ;;  %v556_v30 = vadd.f32 %v1128_v55, %v517_v22 }
 0x116   :  { %v667_v27 = vsel %vm603_vm5, %v571_v13, %v635_v21  ;;  %683 = vst [vmem:[%s1294_s4 + $0x50] sm:$0xff] %v651_v26  ;;  %v572_v31 = vadd.f32 %v1128_v55, %v533_v23  ;;  %v814_v32 = vpop.f32.mrf.mxu0  ;;  %v862_v33 = vpop.f32.mrf.mxu1 }
 0x117   :  { %699 = vst [vmem:[%s1294_s4 + $0xd0] sm:$0xff] %v667_v27  ;;  %v518_v34 = vmul.f32 %v813_v28, %v1123_v51  ;;  %v534_v35 = vmul.f32 %v861_v29, %v1123_v51  ;;  %vm588_vm6 = vcmp.ge.f32.partialorder %v556_v30, 0.0  ;;  %v620_v36 = vmul.f32 0.2, %v556_v30 }
 0x118   :  { %vm604_vm7 = vcmp.ge.f32.partialorder %v572_v31, 0.0  ;;  %v636_v37 = vmul.f32 0.2, %v572_v31  ;;  %v815_v38 = vpop.f32.mrf.mxu0  ;;  %v863_v39 = vpop.f32.mrf.mxu1 }
 0x119   :  { %v557_v40 = vadd.f32 %v1128_v55, %v518_v34  ;;  %v573_v41 = vadd.f32 %v1128_v55, %v534_v35  ;;  %v816_v42 = vadd.f32 %v815_v38, %v814_v32  ;;  %v864_v43 = vadd.f32 %v863_v39, %v862_v33 }
 0x11a   :  { %v652_v44 = vsel %vm588_vm6, %v556_v30, %v620_v36  ;;  %v668_v45 = vsel %vm604_vm7, %v572_v31, %v636_v37  ;;  %v817_v46 = vpop.f32.mrf.mxu0  ;;  %v865_v47 = vpop.f32.mrf.mxu1 }
 0x11b   :  { %684 = vst [vmem:[%s1294_s4 + $0x58] sm:$0xff] %v652_v44  ;;  %700 = vst [vmem:[%s1294_s4 + $0xd8] sm:$0xff] %v668_v45  ;;  %vm589_vm8 = vcmp.ge.f32.partialorder %v557_v40, 0.0  ;;  %v621_v48 = vmul.f32 0.2, %v557_v40  ;;  %vm605_vm9 = vcmp.ge.f32.partialorder %v573_v41, 0.0  ;;  %v519_v50 = vmul.f32 %v816_v42, %v1123_v51 }
 0x11c   :  { %v637_v49 = vmul.f32 0.2, %v573_v41  ;;  %v535_v52 = vmul.f32 %v864_v43, %v1123_v51  ;;  %v818_v53 = vpop.f32.mrf.mxu0  ;;  %v866_v54 = vpop.f32.mrf.mxu1 }
 0x11d   :  { %v653_v56 = vsel %vm589_vm8, %v557_v40, %v621_v48  ;;  %v819_v58 = vadd.f32 %v818_v53, %v817_v46  ;;  %v867_v59 = vadd.f32 %v866_v54, %v865_v47  ;;  %v558_v60 = vadd.f32 %v1128_v55, %v519_v50 }
 0x11e   :  { %v669_v57 = vsel %vm605_vm9, %v573_v41, %v637_v49  ;;  %685 = vst [vmem:[%s1294_s4 + $0x60] sm:$0xff] %v653_v56  ;;  %v574_v61 = vadd.f32 %v1128_v55, %v535_v52  ;;  %v820_v62 = vpop.f32.mrf.mxu0  ;;  %v868_v63 = vpop.f32.mrf.mxu1 }
 0x11f   :  { %701 = vst [vmem:[%s1294_s4 + $0xe0] sm:$0xff] %v669_v57  ;;  %v520_v0 = vmul.f32 %v819_v58, %v1123_v51  ;;  %v536_v1 = vmul.f32 %v867_v59, %v1123_v51  ;;  %vm590_vm10 = vcmp.ge.f32.partialorder %v558_v60, 0.0  ;;  %v622_v2 = vmul.f32 0.2, %v558_v60 }
 0x120   :  { %vm606_vm11 = vcmp.ge.f32.partialorder %v574_v61, 0.0  ;;  %v638_v3 = vmul.f32 0.2, %v574_v61  ;;  %v821_v4 = vpop.f32.mrf.mxu0  ;;  %v869_v5 = vpop.f32.mrf.mxu1 }
 0x121   :  { %v559_v6 = vadd.f32 %v1128_v55, %v520_v0  ;;  %v575_v7 = vadd.f32 %v1128_v55, %v536_v1  ;;  %v822_v8 = vadd.f32 %v821_v4, %v820_v62  ;;  %v870_v9 = vadd.f32 %v869_v5, %v868_v63 }
 0x122   :  { %v654_v10 = vsel %vm590_vm10, %v558_v60, %v622_v2  ;;  %v670_v11 = vsel %vm606_vm11, %v574_v61, %v638_v3 }
 0x123   :  { %686 = vst [vmem:[%s1294_s4 + $0x68] sm:$0xff] %v654_v10  ;;  %702 = vst [vmem:[%s1294_s4 + $0xe8] sm:$0xff] %v670_v11  ;;  %vm591_vm12 = vcmp.ge.f32.partialorder %v559_v6, 0.0  ;;  %v623_v12 = vmul.f32 0.2, %v559_v6  ;;  %vm607_vm13 = vcmp.ge.f32.partialorder %v575_v7, 0.0  ;;  %v521_v14 = vmul.f32 %v822_v8, %v1123_v51 }
 0x124   :  { %v639_v13 = vmul.f32 0.2, %v575_v7  ;;  %v537_v15 = vmul.f32 %v870_v9, %v1123_v51 }
 0x125   :  { %v655_v16 = vsel %vm591_vm12, %v559_v6, %v623_v12  ;;  %v560_v18 = vadd.f32 %v1128_v55, %v521_v14 }
 0x126   :  { %v671_v17 = vsel %vm607_vm13, %v575_v7, %v639_v13  ;;  %687 = vst [vmem:[%s1294_s4 + $0x70] sm:$0xff] %v655_v16  ;;  %v576_v19 = vadd.f32 %v1128_v55, %v537_v15 }
 0x127   :  { %703 = vst [vmem:[%s1294_s4 + $0xf0] sm:$0xff] %v671_v17  ;;  %vm592_vm14 = vcmp.ge.f32.partialorder %v560_v18, 0.0  ;;  %v624_v20 = vmul.f32 0.2, %v560_v18 }
 0x128   :  { %vm608_vm15 = vcmp.ge.f32.partialorder %v576_v19, 0.0  ;;  %v640_v21 = vmul.f32 0.2, %v576_v19 }
 0x129   :  { %v656_v22 = vsel %vm592_vm14, %v560_v18, %v624_v20 }
 0x12a   :  { %v672_v51 = vsel %vm608_vm15, %v576_v19, %v640_v21  ;;  %688 = vst [vmem:[%s1294_s4 + $0x78] sm:$0xff] %v656_v22 }
 0x12b   :  { %704 = vst [vmem:[%s1294_s4 + $0xf8] sm:$0xff] %v672_v51 }

// kernel: forward.26
= control target key start
LH: loop header
LB: loop body
LE: loop exit
PB: predicated region body
PF: predicated region fallthrough
CT: control target
= control target key end

     0   :  { %v1448_v0 = vmov 0   ;;  %s2076_s1 = inlined_call_operand.vmem [shape: bf16[256,128], index: 1, kind: input, shape index: {}]   ;;  %s2077_s0 = inlined_call_operand.vmem [shape: bf16[512,256], index: 0, kind: input, shape index: {}]   ;;  %s2078_s2 = inlined_call_operand.vmem [shape: f32[1,128], index: 2, kind: input, shape index: {}]   ;;  %s2079_s3 = inlined_call_operand.vmem [shape: f32[1,128], index: 3, kind: input, shape index: {}]   ;;  %s2080_s4 = inlined_call_operand.vmem [shape: f32[512,128], index: 4, kind: output, shape index: {}]  }
   0x1   :  { %530 = vmatprep.subr.bf16.mxu0 %v1448_v0  ;;  %1303 = vmatprep.subr.bf16.mxu1 %v1448_v0  ;;  %v1336_v1 = vld [vmem:[%s2076_s1 + $0x38] sm:$0xff]   ;;  %v1337_v2 = vld [vmem:[%s2076_s1 + $0x30] sm:$0xff]   ;;  %v1338_v3 = vld [vmem:[%s2076_s1 + $0x28] sm:$0xff]  }
   0x2   :  { %531 = vmatpush1.bf16.msra.mxu0 %v1336_v1  ;;  %1319 = vmatpush1.bf16.msra.mxu1 %v1336_v1  ;;  %v1339_v4 = vld [vmem:[%s2076_s1 + $0x20] sm:$0xff]   ;;  %v1340_v5 = vld [vmem:[%s2076_s1 + $0x18] sm:$0xff]   ;;  %v1341_v7 = vld [vmem:[%s2076_s1 + $0x10] sm:$0xff]  }
   0x3   :  { %532 = vmatprep.subr.bf16.mxu0 %v1448_v0  ;;  %1304 = vmatprep.subr.bf16.mxu1 %v1448_v0  ;;  %v1354_v6 = vld [vmem:[%s2077_s0 + $0x4] ss:$8 sps:$4 sm:$0xff]   ;;  %v1344_v11 = vld [vmem:[%s2076_s1 + $0x78] sm:$0xff]   ;;  %v1345_v12 = vld [vmem:[%s2076_s1 + $0x70] sm:$0xff]  }
   0x4   :  { %v1357_v8 = vld [vmem:[%s2077_s0 + $0x104] ss:$8 sps:$4 sm:$0xff]   ;;  %562 = vmatprep.mubr.bf16.mxu0 %v1354_v6  ;;  %v1348_v15 = vld [vmem:[%s2076_s1 + $0x58] sm:$0xff]   ;;  %v1349_v16 = vld [vmem:[%s2076_s1 + $0x50] sm:$0xff]  }
   0x5   :  { %690 = vmatprep.mubr.bf16.mxu1 %v1357_v8  ;;  %v1342_v9 = vld [vmem:[%s2076_s1 + $0x8] sm:$0xff]   ;;  %v1343_v10 = vld [vmem:[%s2076_s1] sm:$0xff]   ;;  %v1358_v21 = vld [vmem:[%s2077_s0 + $0x14] ss:$8 sps:$4 sm:$0xff]  }
   0x6   :  { %533 = vmatpush1.bf16.msra.mxu0 %v1337_v2  ;;  %1320 = vmatpush1.bf16.msra.mxu1 %v1337_v2  ;;  %v1346_v13 = vld [vmem:[%s2076_s1 + $0x68] sm:$0xff]   ;;  %v1347_v14 = vld [vmem:[%s2076_s1 + $0x60] sm:$0xff]   ;;  %v1360_v22 = vld [vmem:[%s2077_s0 + $0x114] ss:$8 sps:$4 sm:$0xff]  }
   0x7   :  { %534 = vmatprep.subr.bf16.mxu0 %v1448_v0  ;;  %1305 = vmatprep.subr.bf16.mxu1 %v1448_v0  ;;  %v1350_v17 = vld [vmem:[%s2076_s1 + $0x48] sm:$0xff]   ;;  %v1351_v18 = vld [vmem:[%s2076_s1 + $0x40] sm:$0xff]   ;;  %v1362_v23 = vld [vmem:[%s2077_s0 + $0x10] ss:$8 sps:$4 sm:$0xff]  }
   0x8   :  { %v1352_v19 = vld [vmem:[%s2077_s0] ss:$8 sps:$4 sm:$0xff]   ;;  %v1363_v24 = vld [vmem:[%s2077_s0 + $0x110] ss:$8 sps:$4 sm:$0xff]   ;;  %v1364_v25 = vld [vmem:[%s2077_s0 + $0x24] ss:$8 sps:$4 sm:$0xff]  }
   0x9   :  { %v1355_v20 = vld [vmem:[%s2077_s0 + $0x100] ss:$8 sps:$4 sm:$0xff]   ;;  %v1366_v26 = vld [vmem:[%s2077_s0 + $0x124] ss:$8 sps:$4 sm:$0xff]   ;;  %v1370_v29 = vld [vmem:[%s2077_s0 + $0x34] ss:$8 sps:$4 sm:$0xff]  }
   0xa   :  { %535 = vmatpush1.bf16.msra.mxu0 %v1338_v3  ;;  %1321 = vmatpush1.bf16.msra.mxu1 %v1338_v3  ;;  %v1368_v27 = vld [vmem:[%s2077_s0 + $0x20] ss:$8 sps:$4 sm:$0xff]   ;;  %v1372_v30 = vld [vmem:[%s2077_s0 + $0x134] ss:$8 sps:$4 sm:$0xff]   ;;  %v1374_v31 = vld [vmem:[%s2077_s0 + $0x30] ss:$8 sps:$4 sm:$0xff]  }
   0xb   :  { %536 = vmatprep.subr.bf16.mxu0 %v1448_v0  ;;  %1306 = vmatprep.subr.bf16.mxu1 %v1448_v0  ;;  %v1369_v28 = vld [vmem:[%s2077_s0 + $0x120] ss:$8 sps:$4 sm:$0xff]   ;;  %v1375_v32 = vld [vmem:[%s2077_s0 + $0x130] ss:$8 sps:$4 sm:$0xff]   ;;  %v1376_v33 = vld [vmem:[%s2077_s0 + $0x44] ss:$8 sps:$4 sm:$0xff]  }
   0xc   :  { %v1378_v34 = vld [vmem:[%s2077_s0 + $0x144] ss:$8 sps:$4 sm:$0xff]   ;;  %v1380_v35 = vld [vmem:[%s2077_s0 + $0x40] ss:$8 sps:$4 sm:$0xff]   ;;  %v1382_v37 = vld [vmem:[%s2077_s0 + $0x54] ss:$8 sps:$4 sm:$0xff]  }
   0xd   :  { %v1381_v36 = vld [vmem:[%s2077_s0 + $0x140] ss:$8 sps:$4 sm:$0xff]   ;;  %v1384_v38 = vld [vmem:[%s2077_s0 + $0x154] ss:$8 sps:$4 sm:$0xff]   ;;  %v1386_v39 = vld [vmem:[%s2077_s0 + $0x50] ss:$8 sps:$4 sm:$0xff]  }
   0xe   :  { %537 = vmatpush1.bf16.msra.mxu0 %v1339_v4  ;;  %1322 = vmatpush1.bf16.msra.mxu1 %v1339_v4  ;;  %v1387_v40 = vld [vmem:[%s2077_s0 + $0x150] ss:$8 sps:$4 sm:$0xff]   ;;  %v1388_v41 = vld [vmem:[%s2077_s0 + $0x64] ss:$8 sps:$4 sm:$0xff]   ;;  %v1392_v43 = vld [vmem:[%s2077_s0 + $0x60] ss:$8 sps:$4 sm:$0xff]  }
   0xf   :  { %538 = vmatprep.subr.bf16.mxu0 %v1448_v0  ;;  %1307 = vmatprep.subr.bf16.mxu1 %v1448_v0  ;;  %v1390_v42 = vld [vmem:[%s2077_s0 + $0x164] ss:$8 sps:$4 sm:$0xff]   ;;  %v1393_v44 = vld [vmem:[%s2077_s0 + $0x160] ss:$8 sps:$4 sm:$0xff]   ;;  %v1394_v45 = vld [vmem:[%s2077_s0 + $0x74] ss:$8 sps:$4 sm:$0xff]  }
  0x10   :  { %v1396_v46 = vld [vmem:[%s2077_s0 + $0x174] ss:$8 sps:$4 sm:$0xff]   ;;  %v1398_v47 = vld [vmem:[%s2077_s0 + $0x70] ss:$8 sps:$4 sm:$0xff]   ;;  %v1400_v49 = vld [vmem:[%s2077_s0 + $0x84] ss:$8 sps:$4 sm:$0xff]  }
  0x11   :  { %v1399_v48 = vld [vmem:[%s2077_s0 + $0x170] ss:$8 sps:$4 sm:$0xff]   ;;  %v1402_v50 = vld [vmem:[%s2077_s0 + $0x184] ss:$8 sps:$4 sm:$0xff]   ;;  %v1404_v51 = vld [vmem:[%s2077_s0 + $0x80] ss:$8 sps:$4 sm:$0xff]  }
  0x12   :  { %539 = vmatpush1.bf16.msra.mxu0 %v1340_v5  ;;  %1323 = vmatpush1.bf16.msra.mxu1 %v1340_v5  ;;  %v1405_v52 = vld [vmem:[%s2077_s0 + $0x180] ss:$8 sps:$4 sm:$0xff]   ;;  %v1406_v53 = vld [vmem:[%s2077_s0 + $0x94] ss:$8 sps:$4 sm:$0xff]   ;;  %v1410_v55 = vld [vmem:[%s2077_s0 + $0x90] ss:$8 sps:$4 sm:$0xff]  }
  0x13   :  { %540 = vmatprep.subr.bf16.mxu0 %v1448_v0  ;;  %1308 = vmatprep.subr.bf16.mxu1 %v1448_v0  ;;  %v1408_v54 = vld [vmem:[%s2077_s0 + $0x194] ss:$8 sps:$4 sm:$0xff]   ;;  %v1411_v56 = vld [vmem:[%s2077_s0 + $0x190] ss:$8 sps:$4 sm:$0xff]   ;;  %v1412_v57 = vld [vmem:[%s2077_s0 + $0xa4] ss:$8 sps:$4 sm:$0xff]  }
  0x14   :  { %v1414_v58 = vld [vmem:[%s2077_s0 + $0x1a4] ss:$8 sps:$4 sm:$0xff]   ;;  %v1416_v59 = vld [vmem:[%s2077_s0 + $0xa0] ss:$8 sps:$4 sm:$0xff]   ;;  %v1418_v61 = vld [vmem:[%s2077_s0 + $0xb4] ss:$8 sps:$4 sm:$0xff]  }
  0x15   :  { %v1417_v60 = vld [vmem:[%s2077_s0 + $0x1a0] ss:$8 sps:$4 sm:$0xff]   ;;  %v1420_v62 = vld [vmem:[%s2077_s0 + $0x1b4] ss:$8 sps:$4 sm:$0xff]   ;;  %v1422_v63 = vld [vmem:[%s2077_s0 + $0xb0] ss:$8 sps:$4 sm:$0xff]  }
  0x16   :  { %541 = vmatpush1.bf16.msra.mxu0 %v1341_v7  ;;  %1324 = vmatpush1.bf16.msra.mxu1 %v1341_v7  ;;  %v1424_v1 = vld [vmem:[%s2077_s0 + $0xc4] ss:$8 sps:$4 sm:$0xff]   ;;  %v1428_v3 = vld [vmem:[%s2077_s0 + $0xc0] ss:$8 sps:$4 sm:$0xff]   ;;  %v1430_v5 = vld [vmem:[%s2077_s0 + $0xd4] ss:$8 sps:$4 sm:$0xff]  }
  0x17   :  { %542 = vmatprep.subr.bf16.mxu0 %v1448_v0  ;;  %1309 = vmatprep.subr.bf16.mxu1 %v1448_v0  ;;  %v1426_v2 = vld [vmem:[%s2077_s0 + $0x1c4] ss:$8 sps:$4 sm:$0xff]   ;;  %v1429_v4 = vld [vmem:[%s2077_s0 + $0x1c0] ss:$8 sps:$4 sm:$0xff]   ;;  %v1432_v6 = vld [vmem:[%s2077_s0 + $0x1d4] ss:$8 sps:$4 sm:$0xff]  }
  0x18   :  { %v1434_v7 = vld [vmem:[%s2077_s0 + $0xd0] ss:$8 sps:$4 sm:$0xff]  }
  0x19   :  { %v1435_v8 = vld [vmem:[%s2077_s0 + $0x1d0] ss:$8 sps:$4 sm:$0xff]  }
  0x1a   :  { %543 = vmatpush1.bf16.msra.mxu0 %v1342_v9  ;;  %1325 = vmatpush1.bf16.msra.mxu1 %v1342_v9  ;;  %v1436_v9 = vld [vmem:[%s2077_s0 + $0xe4] ss:$8 sps:$4 sm:$0xff]  }
  0x1b   :  { %544 = vmatprep.subr.bf16.mxu0 %v1448_v0  ;;  %1310 = vmatprep.subr.bf16.mxu1 %v1448_v0 }
  0x1e   :  { %545 = vmatpush1.bf16.msra.mxu0 %v1343_v10  ;;  %1326 = vmatpush1.bf16.msra.mxu1 %v1343_v10  ;;  %v1438_v10 = vld [vmem:[%s2077_s0 + $0x1e4] ss:$8 sps:$4 sm:$0xff]  }
  0x1f   :  { %546 = vmatprep.subr.bf16.mxu0 %v1448_v0  ;;  %1311 = vmatprep.subr.bf16.mxu1 %v1448_v0 }
  0x22   :  { %547 = vmatpush2.bf16.msra.mxu0 %v1344_v11  ;;  %1327 = vmatpush2.bf16.msra.mxu1 %v1344_v11  ;;  %v1440_v11 = vld [vmem:[%s2077_s0 + $0xe0] ss:$8 sps:$4 sm:$0xff]  }
  0x23   :  { %548 = vmatprep.subr.bf16.mxu0 %v1448_v0  ;;  %1312 = vmatprep.subr.bf16.mxu1 %v1448_v0 }
  0x26   :  { %549 = vmatpush2.bf16.msra.mxu0 %v1345_v12  ;;  %1328 = vmatpush2.bf16.msra.mxu1 %v1345_v12  ;;  %v1441_v12 = vld [vmem:[%s2077_s0 + $0x1e0] ss:$8 sps:$4 sm:$0xff]  }
  0x27   :  { %550 = vmatprep.subr.bf16.mxu0 %v1448_v0  ;;  %1313 = vmatprep.subr.bf16.mxu1 %v1448_v0 }
  0x2a   :  { %551 = vmatpush2.bf16.msra.mxu0 %v1346_v13  ;;  %1329 = vmatpush2.bf16.msra.mxu1 %v1346_v13  ;;  %v1442_v13 = vld [vmem:[%s2077_s0 + $0xf4] ss:$8 sps:$4 sm:$0xff]  }
  0x2b   :  { %552 = vmatprep.subr.bf16.mxu0 %v1448_v0  ;;  %1314 = vmatprep.subr.bf16.mxu1 %v1448_v0 }
  0x2e   :  { %553 = vmatpush2.bf16.msra.mxu0 %v1347_v14  ;;  %1330 = vmatpush2.bf16.msra.mxu1 %v1347_v14  ;;  %v1444_v14 = vld [vmem:[%s2077_s0 + $0x1f4] ss:$8 sps:$4 sm:$0xff]  }
  0x2f   :  { %554 = vmatprep.subr.bf16.mxu0 %v1448_v0  ;;  %1315 = vmatprep.subr.bf16.mxu1 %v1448_v0 }
  0x32   :  { %555 = vmatpush2.bf16.msra.mxu0 %v1348_v15  ;;  %1331 = vmatpush2.bf16.msra.mxu1 %v1348_v15  ;;  %v1446_v15 = vld [vmem:[%s2077_s0 + $0xf0] ss:$8 sps:$4 sm:$0xff]  }
  0x33   :  { %556 = vmatprep.subr.bf16.mxu0 %v1448_v0  ;;  %1316 = vmatprep.subr.bf16.mxu1 %v1448_v0 }
  0x36   :  { %557 = vmatpush2.bf16.msra.mxu0 %v1349_v16  ;;  %1332 = vmatpush2.bf16.msra.mxu1 %v1349_v16  ;;  %v1447_v16 = vld [vmem:[%s2077_s0 + $0x1f0] ss:$8 sps:$4 sm:$0xff]  }
  0x37   :  { %558 = vmatprep.subr.bf16.mxu0 %v1448_v0  ;;  %1317 = vmatprep.subr.bf16.mxu1 %v1448_v0 }
  0x3a   :  { %559 = vmatpush2.bf16.msra.mxu0 %v1350_v17  ;;  %1333 = vmatpush2.bf16.msra.mxu1 %v1350_v17  ;;  %v1749_v17 = vld [vmem:[%s2078_s2] ss:$0 sm:$0xff] }
  0x3b   :  { %560 = vmatprep.subr.bf16.mxu0 %v1448_v0  ;;  %1318 = vmatprep.subr.bf16.mxu1 %v1448_v0  ;;  %v1423_v0 = vld [vmem:[%s2077_s0 + $0x1b0] ss:$8 sps:$4 sm:$0xff]  }
  0x3e   :  { %561 = vmatpush2.bf16.msra.mxu0 %v1351_v18  ;;  %1334 = vmatpush2.bf16.msra.mxu1 %v1351_v18 }
  0x41   :  { %563 = vmatmul.mubr.bf16.vlgmr.msra.gmra.mxu0 %v1352_v19  ;;  %691 = vmatmul.mubr.bf16.vlgmr.msra.gmra.mxu1 %v1355_v20  ;;  %v1754_v19 = vld [vmem:[%s2079_s3] ss:$0 sm:$0xff] }
  0x42   :  { %570 = vmatprep.mubr.bf16.mxu0 %v1358_v21  ;;  %698 = vmatprep.mubr.bf16.mxu1 %v1360_v22 }
  0x49   :  { %571 = vmatmul.mubr.bf16.gmra.mxu0 %v1362_v23  ;;  %699 = vmatmul.mubr.bf16.gmra.mxu1 %v1363_v24 }
  0x4a   :  { %578 = vmatprep.mubr.bf16.mxu0 %v1364_v25  ;;  %706 = vmatprep.mubr.bf16.mxu1 %v1366_v26 }
  0x51   :  { %579 = vmatmul.mubr.bf16.gmra.mxu0 %v1368_v27  ;;  %707 = vmatmul.mubr.bf16.gmra.mxu1 %v1369_v28 }
  0x52   :  { %586 = vmatprep.mubr.bf16.mxu0 %v1370_v29  ;;  %714 = vmatprep.mubr.bf16.mxu1 %v1372_v30 }
  0x59   :  { %587 = vmatmul.mubr.bf16.gmra.mxu0 %v1374_v31  ;;  %715 = vmatmul.mubr.bf16.gmra.mxu1 %v1375_v32 }
  0x5a   :  { %594 = vmatprep.mubr.bf16.mxu0 %v1376_v33  ;;  %722 = vmatprep.mubr.bf16.mxu1 %v1378_v34 }
  0x61   :  { %595 = vmatmul.mubr.bf16.gmra.mxu0 %v1380_v35  ;;  %723 = vmatmul.mubr.bf16.gmra.mxu1 %v1381_v36 }
  0x62   :  { %602 = vmatprep.mubr.bf16.mxu0 %v1382_v37  ;;  %730 = vmatprep.mubr.bf16.mxu1 %v1384_v38 }
  0x69   :  { %603 = vmatmul.mubr.bf16.gmra.mxu0 %v1386_v39  ;;  %731 = vmatmul.mubr.bf16.gmra.mxu1 %v1387_v40 }
  0x6a   :  { %610 = vmatprep.mubr.bf16.mxu0 %v1388_v41  ;;  %738 = vmatprep.mubr.bf16.mxu1 %v1390_v42 }
  0x71   :  { %611 = vmatmul.mubr.bf16.gmra.mxu0 %v1392_v43  ;;  %739 = vmatmul.mubr.bf16.gmra.mxu1 %v1393_v44 }
  0x72   :  { %618 = vmatprep.mubr.bf16.mxu0 %v1394_v45  ;;  %746 = vmatprep.mubr.bf16.mxu1 %v1396_v46 }
  0x79   :  { %619 = vmatmul.mubr.bf16.gmra.mxu0 %v1398_v47  ;;  %747 = vmatmul.mubr.bf16.gmra.mxu1 %v1399_v48 }
  0x7a   :  { %626 = vmatprep.mubr.bf16.mxu0 %v1400_v49  ;;  %754 = vmatprep.mubr.bf16.mxu1 %v1402_v50 }
  0x81   :  { %627 = vmatmul.mubr.bf16.gmra.mxu0 %v1404_v51  ;;  %755 = vmatmul.mubr.bf16.gmra.mxu1 %v1405_v52 }
  0x82   :  { %634 = vmatprep.mubr.bf16.mxu0 %v1406_v53  ;;  %762 = vmatprep.mubr.bf16.mxu1 %v1408_v54 }
  0x89   :  { %635 = vmatmul.mubr.bf16.gmra.mxu0 %v1410_v55  ;;  %763 = vmatmul.mubr.bf16.gmra.mxu1 %v1411_v56 }
  0x8a   :  { %642 = vmatprep.mubr.bf16.mxu0 %v1412_v57  ;;  %770 = vmatprep.mubr.bf16.mxu1 %v1414_v58 }
  0x91   :  { %643 = vmatmul.mubr.bf16.gmra.mxu0 %v1416_v59  ;;  %771 = vmatmul.mubr.bf16.gmra.mxu1 %v1417_v60 }
  0x92   :  { %650 = vmatprep.mubr.bf16.mxu0 %v1418_v61  ;;  %778 = vmatprep.mubr.bf16.mxu1 %v1420_v62 }
  0x99   :  { %651 = vmatmul.mubr.bf16.gmra.mxu0 %v1422_v63  ;;  %779 = vmatmul.mubr.bf16.gmra.mxu1 %v1423_v0 }
  0x9a   :  { %658 = vmatprep.mubr.bf16.mxu0 %v1424_v1  ;;  %786 = vmatprep.mubr.bf16.mxu1 %v1426_v2 }
  0xa1   :  { %659 = vmatmul.mubr.bf16.gmra.mxu0 %v1428_v3  ;;  %787 = vmatmul.mubr.bf16.gmra.mxu1 %v1429_v4 }
  0xa2   :  { %666 = vmatprep.mubr.bf16.mxu0 %v1430_v5  ;;  %794 = vmatprep.mubr.bf16.mxu1 %v1432_v6 }
  0xa9   :  { %667 = vmatmul.mubr.bf16.gmra.mxu0 %v1434_v7  ;;  %795 = vmatmul.mubr.bf16.gmra.mxu1 %v1435_v8 }
  0xaa   :  { %674 = vmatprep.mubr.bf16.mxu0 %v1436_v9  ;;  %802 = vmatprep.mubr.bf16.mxu1 %v1438_v10 }
  0xb1   :  { %675 = vmatmul.mubr.bf16.gmra.mxu0 %v1440_v11  ;;  %803 = vmatmul.mubr.bf16.gmra.mxu1 %v1441_v12 }
  0xb2   :  { %682 = vmatprep.mubr.bf16.mxu0 %v1442_v13  ;;  %810 = vmatprep.mubr.bf16.mxu1 %v1444_v14 }
  0xb9   :  { %683 = vmatmul.mubr.bf16.gmra.mxu0 %v1446_v15  ;;  %811 = vmatmul.mubr.bf16.gmra.mxu1 %v1447_v16 }
 0x101   :  { %v564_v18 = vpop.f32.mrf.mxu0  ;;  %v692_v20 = vpop.f32.mrf.mxu1 }
 0x102   :  { %v826_v21 = vmul.f32 %v1749_v17, %v564_v18  ;;  %v858_v22 = vmul.f32 %v1749_v17, %v692_v20 }
 0x103   :  { %v566_v23 = vpop.f32.mrf.mxu0  ;;  %v694_v24 = vpop.f32.mrf.mxu1 }
 0x104   :  { %v897_v25 = vadd.f32 %v1754_v19, %v826_v21  ;;  %v929_v26 = vadd.f32 %v1754_v19, %v858_v22 }
 0x105   :  { %v567_v27 = vpop.f32.mrf.mxu0  ;;  %v695_v28 = vpop.f32.mrf.mxu1 }
 0x106   :  { %vm961_vm0 = vcmp.ge.f32.partialorder %v897_v25, 0.0  ;;  %v1025_v29 = vmul.f32 0.2, %v897_v25  ;;  %vm993_vm1 = vcmp.ge.f32.partialorder %v929_v26, 0.0  ;;  %v1057_v30 = vmul.f32 0.2, %v929_v26 }
 0x107   :  { %v827_v31 = vmul.f32 %v1749_v17, %v567_v27  ;;  %v859_v32 = vmul.f32 %v1749_v17, %v695_v28  ;;  %v569_v33 = vpop.f32.mrf.mxu0  ;;  %v697_v34 = vpop.f32.mrf.mxu1 }
 0x108   :  { %v1089_v35 = vsel %vm961_vm0, %v897_v25, %v1025_v29  ;;  %v1121_v36 = vsel %vm993_vm1, %v929_v26, %v1057_v30 }
 0x109   :  { %1153 = vst [vmem:[%s2080_s4] sm:$0xff] %v1089_v35  ;;  %1185 = vst [vmem:[%s2080_s4 + $0x100] sm:$0xff] %v1121_v36  ;;  %v898_v37 = vadd.f32 %v1754_v19, %v827_v31  ;;  %v930_v38 = vadd.f32 %v1754_v19, %v859_v32  ;;  %v572_v39 = vpop.f32.mrf.mxu0  ;;  %v700_v40 = vpop.f32.mrf.mxu1 }
 0x10a   :  { %v828_v41 = vmul.f32 %v1749_v17, %v572_v39  ;;  %v860_v42 = vmul.f32 %v1749_v17, %v700_v40 }
 0x10b   :  { %vm962_vm2 = vcmp.ge.f32.partialorder %v898_v37, 0.0  ;;  %v1026_v43 = vmul.f32 0.2, %v898_v37  ;;  %vm994_vm3 = vcmp.ge.f32.partialorder %v930_v38, 0.0  ;;  %v1058_v44 = vmul.f32 0.2, %v930_v38  ;;  %v574_v45 = vpop.f32.mrf.mxu0  ;;  %v702_v46 = vpop.f32.mrf.mxu1 }
 0x10c   :  { %v899_v47 = vadd.f32 %v1754_v19, %v828_v41  ;;  %v931_v48 = vadd.f32 %v1754_v19, %v860_v42 }
 0x10d   :  { %v1090_v49 = vsel %vm962_vm2, %v898_v37, %v1026_v43  ;;  %v1122_v50 = vsel %vm994_vm3, %v930_v38, %v1058_v44  ;;  %v575_v51 = vpop.f32.mrf.mxu0  ;;  %v703_v52 = vpop.f32.mrf.mxu1 }
 0x10e   :  { %1154 = vst [vmem:[%s2080_s4 + $0x8] sm:$0xff] %v1090_v49  ;;  %1186 = vst [vmem:[%s2080_s4 + $0x108] sm:$0xff] %v1122_v50  ;;  %vm963_vm4 = vcmp.ge.f32.partialorder %v899_v47, 0.0  ;;  %v1027_v53 = vmul.f32 0.2, %v899_v47  ;;  %vm995_vm5 = vcmp.ge.f32.partialorder %v931_v48, 0.0  ;;  %v829_v55 = vmul.f32 %v1749_v17, %v575_v51 }
 0x10f   :  { %v1059_v54 = vmul.f32 0.2, %v931_v48  ;;  %v861_v56 = vmul.f32 %v1749_v17, %v703_v52  ;;  %v577_v57 = vpop.f32.mrf.mxu0  ;;  %v705_v58 = vpop.f32.mrf.mxu1 }
 0x110   :  { %v1091_v59 = vsel %vm963_vm4, %v899_v47, %v1027_v53  ;;  %v900_v61 = vadd.f32 %v1754_v19, %v829_v55 }
 0x111   :  { %v1123_v60 = vsel %vm995_vm5, %v931_v48, %v1059_v54  ;;  %1155 = vst [vmem:[%s2080_s4 + $0x10] sm:$0xff] %v1091_v59  ;;  %v932_v62 = vadd.f32 %v1754_v19, %v861_v56  ;;  %v580_v63 = vpop.f32.mrf.mxu0  ;;  %v708_v0 = vpop.f32.mrf.mxu1 }
 0x112   :  { %1187 = vst [vmem:[%s2080_s4 + $0x110] sm:$0xff] %v1123_v60  ;;  %v830_v1 = vmul.f32 %v1749_v17, %v580_v63  ;;  %v862_v2 = vmul.f32 %v1749_v17, %v708_v0  ;;  %vm964_vm6 = vcmp.ge.f32.partialorder %v900_v61, 0.0  ;;  %v1028_v3 = vmul.f32 0.2, %v900_v61 }
 0x113   :  { %vm996_vm7 = vcmp.ge.f32.partialorder %v932_v62, 0.0  ;;  %v1060_v4 = vmul.f32 0.2, %v932_v62  ;;  %v582_v5 = vpop.f32.mrf.mxu0  ;;  %v710_v6 = vpop.f32.mrf.mxu1 }
 0x114   :  { %v901_v7 = vadd.f32 %v1754_v19, %v830_v1  ;;  %v933_v8 = vadd.f32 %v1754_v19, %v862_v2  ;;  %v1092_v9 = vsel %vm964_vm6, %v900_v61, %v1028_v3 }
 0x115   :  { %v1124_v10 = vsel %vm996_vm7, %v932_v62, %v1060_v4  ;;  %v583_v11 = vpop.f32.mrf.mxu0  ;;  %v711_v12 = vpop.f32.mrf.mxu1  ;;  %1156 = vst [vmem:[%s2080_s4 + $0x18] sm:$0xff] %v1092_v9 }
 0x116   :  { %1188 = vst [vmem:[%s2080_s4 + $0x118] sm:$0xff] %v1124_v10  ;;  %vm965_vm8 = vcmp.ge.f32.partialorder %v901_v7, 0.0  ;;  %v1029_v13 = vmul.f32 0.2, %v901_v7  ;;  %vm997_vm9 = vcmp.ge.f32.partialorder %v933_v8, 0.0  ;;  %v831_v15 = vmul.f32 %v1749_v17, %v583_v11 }
 0x117   :  { %v1061_v14 = vmul.f32 0.2, %v933_v8  ;;  %v863_v16 = vmul.f32 %v1749_v17, %v711_v12  ;;  %v585_v18 = vpop.f32.mrf.mxu0  ;;  %v713_v20 = vpop.f32.mrf.mxu1 }
 0x118   :  { %v1093_v21 = vsel %vm965_vm8, %v901_v7, %v1029_v13  ;;  %v902_v23 = vadd.f32 %v1754_v19, %v831_v15 }
 0x119   :  { %v1125_v22 = vsel %vm997_vm9, %v933_v8, %v1061_v14  ;;  %1157 = vst [vmem:[%s2080_s4 + $0x20] sm:$0xff] %v1093_v21  ;;  %v934_v24 = vadd.f32 %v1754_v19, %v863_v16  ;;  %v588_v25 = vpop.f32.mrf.mxu0  ;;  %v716_v26 = vpop.f32.mrf.mxu1 }
 0x11a   :  { %1189 = vst [vmem:[%s2080_s4 + $0x120] sm:$0xff] %v1125_v22  ;;  %v832_v27 = vmul.f32 %v1749_v17, %v588_v25  ;;  %v864_v28 = vmul.f32 %v1749_v17, %v716_v26  ;;  %vm966_vm10 = vcmp.ge.f32.partialorder %v902_v23, 0.0  ;;  %v1030_v29 = vmul.f32 0.2, %v902_v23 }
 0x11b   :  { %vm998_vm11 = vcmp.ge.f32.partialorder %v934_v24, 0.0  ;;  %v1062_v30 = vmul.f32 0.2, %v934_v24  ;;  %v590_v31 = vpop.f32.mrf.mxu0  ;;  %v718_v32 = vpop.f32.mrf.mxu1 }
 0x11c   :  { %v903_v33 = vadd.f32 %v1754_v19, %v832_v27  ;;  %v935_v34 = vadd.f32 %v1754_v19, %v864_v28  ;;  %v1094_v35 = vsel %vm966_vm10, %v902_v23, %v1030_v29 }
 0x11d   :  { %v1126_v36 = vsel %vm998_vm11, %v934_v24, %v1062_v30  ;;  %v591_v37 = vpop.f32.mrf.mxu0  ;;  %v719_v38 = vpop.f32.mrf.mxu1  ;;  %1158 = vst [vmem:[%s2080_s4 + $0x28] sm:$0xff] %v1094_v35 }
 0x11e   :  { %1190 = vst [vmem:[%s2080_s4 + $0x128] sm:$0xff] %v1126_v36  ;;  %vm967_vm12 = vcmp.ge.f32.partialorder %v903_v33, 0.0  ;;  %v1031_v39 = vmul.f32 0.2, %v903_v33  ;;  %vm999_vm13 = vcmp.ge.f32.partialorder %v935_v34, 0.0  ;;  %v833_v41 = vmul.f32 %v1749_v17, %v591_v37 }
 0x11f   :  { %v1063_v40 = vmul.f32 0.2, %v935_v34  ;;  %v865_v42 = vmul.f32 %v1749_v17, %v719_v38  ;;  %v593_v43 = vpop.f32.mrf.mxu0  ;;  %v721_v44 = vpop.f32.mrf.mxu1 }
 0x120   :  { %v1095_v45 = vsel %vm967_vm12, %v903_v33, %v1031_v39  ;;  %v904_v47 = vadd.f32 %v1754_v19, %v833_v41 }
 0x121   :  { %v1127_v46 = vsel %vm999_vm13, %v935_v34, %v1063_v40  ;;  %1159 = vst [vmem:[%s2080_s4 + $0x30] sm:$0xff] %v1095_v45  ;;  %v936_v48 = vadd.f32 %v1754_v19, %v865_v42  ;;  %v596_v49 = vpop.f32.mrf.mxu0  ;;  %v724_v50 = vpop.f32.mrf.mxu1 }
 0x122   :  { %1191 = vst [vmem:[%s2080_s4 + $0x130] sm:$0xff] %v1127_v46  ;;  %v834_v51 = vmul.f32 %v1749_v17, %v596_v49  ;;  %v866_v52 = vmul.f32 %v1749_v17, %v724_v50  ;;  %vm968_vm14 = vcmp.ge.f32.partialorder %v904_v47, 0.0  ;;  %v1032_v53 = vmul.f32 0.2, %v904_v47 }
 0x123   :  { %vm1000_vm15 = vcmp.ge.f32.partialorder %v936_v48, 0.0  ;;  %v1064_v54 = vmul.f32 0.2, %v936_v48  ;;  %v598_v55 = vpop.f32.mrf.mxu0  ;;  %v726_v56 = vpop.f32.mrf.mxu1 }
 0x124   :  { %v905_v57 = vadd.f32 %v1754_v19, %v834_v51  ;;  %v937_v58 = vadd.f32 %v1754_v19, %v866_v52  ;;  %v1096_v59 = vsel %vm968_vm14, %v904_v47, %v1032_v53 }
 0x125   :  { %v1128_v60 = vsel %vm1000_vm15, %v936_v48, %v1064_v54  ;;  %v599_v61 = vpop.f32.mrf.mxu0  ;;  %v727_v62 = vpop.f32.mrf.mxu1  ;;  %1160 = vst [vmem:[%s2080_s4 + $0x38] sm:$0xff] %v1096_v59 }
 0x126   :  { %1192 = vst [vmem:[%s2080_s4 + $0x138] sm:$0xff] %v1128_v60  ;;  %vm969_vm0 = vcmp.ge.f32.partialorder %v905_v57, 0.0  ;;  %v1033_v63 = vmul.f32 0.2, %v905_v57  ;;  %vm1001_vm1 = vcmp.ge.f32.partialorder %v937_v58, 0.0  ;;  %v835_v1 = vmul.f32 %v1749_v17, %v599_v61 }
 0x127   :  { %v1065_v0 = vmul.f32 0.2, %v937_v58  ;;  %v867_v2 = vmul.f32 %v1749_v17, %v727_v62  ;;  %v601_v3 = vpop.f32.mrf.mxu0  ;;  %v729_v4 = vpop.f32.mrf.mxu1 }
 0x128   :  { %v1097_v5 = vsel %vm969_vm0, %v905_v57, %v1033_v63  ;;  %v906_v7 = vadd.f32 %v1754_v19, %v835_v1 }
 0x129   :  { %v1129_v6 = vsel %vm1001_vm1, %v937_v58, %v1065_v0  ;;  %1161 = vst [vmem:[%s2080_s4 + $0x40] sm:$0xff] %v1097_v5  ;;  %v938_v8 = vadd.f32 %v1754_v19, %v867_v2  ;;  %v604_v9 = vpop.f32.mrf.mxu0  ;;  %v732_v10 = vpop.f32.mrf.mxu1 }
 0x12a   :  { %1193 = vst [vmem:[%s2080_s4 + $0x140] sm:$0xff] %v1129_v6  ;;  %v836_v11 = vmul.f32 %v1749_v17, %v604_v9  ;;  %v868_v12 = vmul.f32 %v1749_v17, %v732_v10  ;;  %vm970_vm2 = vcmp.ge.f32.partialorder %v906_v7, 0.0  ;;  %v1034_v13 = vmul.f32 0.2, %v906_v7 }
 0x12b   :  { %vm1002_vm3 = vcmp.ge.f32.partialorder %v938_v8, 0.0  ;;  %v1066_v14 = vmul.f32 0.2, %v938_v8  ;;  %v606_v15 = vpop.f32.mrf.mxu0  ;;  %v734_v16 = vpop.f32.mrf.mxu1 }
 0x12c   :  { %v907_v18 = vadd.f32 %v1754_v19, %v836_v11  ;;  %v939_v20 = vadd.f32 %v1754_v19, %v868_v12  ;;  %v1098_v21 = vsel %vm970_vm2, %v906_v7, %v1034_v13 }
 0x12d   :  { %v1130_v22 = vsel %vm1002_vm3, %v938_v8, %v1066_v14  ;;  %v607_v23 = vpop.f32.mrf.mxu0  ;;  %v735_v24 = vpop.f32.mrf.mxu1  ;;  %1162 = vst [vmem:[%s2080_s4 + $0x48] sm:$0xff] %v1098_v21 }
 0x12e   :  { %1194 = vst [vmem:[%s2080_s4 + $0x148] sm:$0xff] %v1130_v22  ;;  %vm971_vm4 = vcmp.ge.f32.partialorder %v907_v18, 0.0  ;;  %v1035_v25 = vmul.f32 0.2, %v907_v18  ;;  %vm1003_vm5 = vcmp.ge.f32.partialorder %v939_v20, 0.0  ;;  %v837_v27 = vmul.f32 %v1749_v17, %v607_v23 }
 0x12f   :  { %v1067_v26 = vmul.f32 0.2, %v939_v20  ;;  %v869_v28 = vmul.f32 %v1749_v17, %v735_v24  ;;  %v609_v29 = vpop.f32.mrf.mxu0  ;;  %v737_v30 = vpop.f32.mrf.mxu1 }
 0x130   :  { %v1099_v31 = vsel %vm971_vm4, %v907_v18, %v1035_v25  ;;  %v908_v33 = vadd.f32 %v1754_v19, %v837_v27 }
 0x131   :  { %v1131_v32 = vsel %vm1003_vm5, %v939_v20, %v1067_v26  ;;  %1163 = vst [vmem:[%s2080_s4 + $0x50] sm:$0xff] %v1099_v31  ;;  %v940_v34 = vadd.f32 %v1754_v19, %v869_v28  ;;  %v612_v35 = vpop.f32.mrf.mxu0  ;;  %v740_v36 = vpop.f32.mrf.mxu1 }
 0x132   :  { %1195 = vst [vmem:[%s2080_s4 + $0x150] sm:$0xff] %v1131_v32  ;;  %v838_v37 = vmul.f32 %v1749_v17, %v612_v35  ;;  %v870_v38 = vmul.f32 %v1749_v17, %v740_v36  ;;  %vm972_vm6 = vcmp.ge.f32.partialorder %v908_v33, 0.0  ;;  %v1036_v39 = vmul.f32 0.2, %v908_v33 }
 0x133   :  { %vm1004_vm7 = vcmp.ge.f32.partialorder %v940_v34, 0.0  ;;  %v1068_v40 = vmul.f32 0.2, %v940_v34  ;;  %v614_v41 = vpop.f32.mrf.mxu0  ;;  %v742_v42 = vpop.f32.mrf.mxu1 }
 0x134   :  { %v909_v43 = vadd.f32 %v1754_v19, %v838_v37  ;;  %v941_v44 = vadd.f32 %v1754_v19, %v870_v38  ;;  %v1100_v45 = vsel %vm972_vm6, %v908_v33, %v1036_v39 }
 0x135   :  { %v1132_v46 = vsel %vm1004_vm7, %v940_v34, %v1068_v40  ;;  %v615_v47 = vpop.f32.mrf.mxu0  ;;  %v743_v48 = vpop.f32.mrf.mxu1  ;;  %1164 = vst [vmem:[%s2080_s4 + $0x58] sm:$0xff] %v1100_v45 }
 0x136   :  { %1196 = vst [vmem:[%s2080_s4 + $0x158] sm:$0xff] %v1132_v46  ;;  %vm973_vm8 = vcmp.ge.f32.partialorder %v909_v43, 0.0  ;;  %v1037_v49 = vmul.f32 0.2, %v909_v43  ;;  %vm1005_vm9 = vcmp.ge.f32.partialorder %v941_v44, 0.0  ;;  %v839_v51 = vmul.f32 %v1749_v17, %v615_v47 }
 0x137   :  { %v1069_v50 = vmul.f32 0.2, %v941_v44  ;;  %v871_v52 = vmul.f32 %v1749_v17, %v743_v48  ;;  %v617_v53 = vpop.f32.mrf.mxu0  ;;  %v745_v54 = vpop.f32.mrf.mxu1 }
 0x138   :  { %v1101_v55 = vsel %vm973_vm8, %v909_v43, %v1037_v49  ;;  %v910_v57 = vadd.f32 %v1754_v19, %v839_v51 }
 0x139   :  { %v1133_v56 = vsel %vm1005_vm9, %v941_v44, %v1069_v50  ;;  %1165 = vst [vmem:[%s2080_s4 + $0x60] sm:$0xff] %v1101_v55  ;;  %v942_v58 = vadd.f32 %v1754_v19, %v871_v52  ;;  %v620_v59 = vpop.f32.mrf.mxu0  ;;  %v748_v60 = vpop.f32.mrf.mxu1 }
 0x13a   :  { %1197 = vst [vmem:[%s2080_s4 + $0x160] sm:$0xff] %v1133_v56  ;;  %v840_v61 = vmul.f32 %v1749_v17, %v620_v59  ;;  %v872_v62 = vmul.f32 %v1749_v17, %v748_v60  ;;  %vm974_vm10 = vcmp.ge.f32.partialorder %v910_v57, 0.0  ;;  %v1038_v63 = vmul.f32 0.2, %v910_v57 }
 0x13b   :  { %vm1006_vm11 = vcmp.ge.f32.partialorder %v942_v58, 0.0  ;;  %v1070_v0 = vmul.f32 0.2, %v942_v58  ;;  %v622_v1 = vpop.f32.mrf.mxu0  ;;  %v750_v2 = vpop.f32.mrf.mxu1 }
 0x13c   :  { %v911_v3 = vadd.f32 %v1754_v19, %v840_v61  ;;  %v943_v4 = vadd.f32 %v1754_v19, %v872_v62  ;;  %v1102_v5 = vsel %vm974_vm10, %v910_v57, %v1038_v63 }
 0x13d   :  { %v1134_v6 = vsel %vm1006_vm11, %v942_v58, %v1070_v0  ;;  %v623_v7 = vpop.f32.mrf.mxu0  ;;  %v751_v8 = vpop.f32.mrf.mxu1  ;;  %1166 = vst [vmem:[%s2080_s4 + $0x68] sm:$0xff] %v1102_v5 }
 0x13e   :  { %1198 = vst [vmem:[%s2080_s4 + $0x168] sm:$0xff] %v1134_v6  ;;  %vm975_vm12 = vcmp.ge.f32.partialorder %v911_v3, 0.0  ;;  %v1039_v9 = vmul.f32 0.2, %v911_v3  ;;  %vm1007_vm13 = vcmp.ge.f32.partialorder %v943_v4, 0.0  ;;  %v841_v11 = vmul.f32 %v1749_v17, %v623_v7 }
 0x13f   :  { %v1071_v10 = vmul.f32 0.2, %v943_v4  ;;  %v873_v12 = vmul.f32 %v1749_v17, %v751_v8  ;;  %v625_v13 = vpop.f32.mrf.mxu0  ;;  %v753_v14 = vpop.f32.mrf.mxu1 }
 0x140   :  { %v1103_v15 = vsel %vm975_vm12, %v911_v3, %v1039_v9  ;;  %v912_v18 = vadd.f32 %v1754_v19, %v841_v11 }
 0x141   :  { %v1135_v16 = vsel %vm1007_vm13, %v943_v4, %v1071_v10  ;;  %1167 = vst [vmem:[%s2080_s4 + $0x70] sm:$0xff] %v1103_v15  ;;  %v944_v20 = vadd.f32 %v1754_v19, %v873_v12  ;;  %v628_v21 = vpop.f32.mrf.mxu0  ;;  %v756_v22 = vpop.f32.mrf.mxu1 }
 0x142   :  { %1199 = vst [vmem:[%s2080_s4 + $0x170] sm:$0xff] %v1135_v16  ;;  %v842_v23 = vmul.f32 %v1749_v17, %v628_v21  ;;  %v874_v24 = vmul.f32 %v1749_v17, %v756_v22  ;;  %vm976_vm14 = vcmp.ge.f32.partialorder %v912_v18, 0.0  ;;  %v1040_v25 = vmul.f32 0.2, %v912_v18 }
 0x143   :  { %vm1008_vm15 = vcmp.ge.f32.partialorder %v944_v20, 0.0  ;;  %v1072_v26 = vmul.f32 0.2, %v944_v20  ;;  %v630_v27 = vpop.f32.mrf.mxu0  ;;  %v758_v28 = vpop.f32.mrf.mxu1 }
 0x144   :  { %v913_v29 = vadd.f32 %v1754_v19, %v842_v23  ;;  %v945_v30 = vadd.f32 %v1754_v19, %v874_v24  ;;  %v1104_v31 = vsel %vm976_vm14, %v912_v18, %v1040_v25 }
 0x145   :  { %v1136_v32 = vsel %vm1008_vm15, %v944_v20, %v1072_v26  ;;  %v631_v33 = vpop.f32.mrf.mxu0  ;;  %v759_v34 = vpop.f32.mrf.mxu1  ;;  %1168 = vst [vmem:[%s2080_s4 + $0x78] sm:$0xff] %v1104_v31 }
 0x146   :  { %1200 = vst [vmem:[%s2080_s4 + $0x178] sm:$0xff] %v1136_v32  ;;  %vm977_vm0 = vcmp.ge.f32.partialorder %v913_v29, 0.0  ;;  %v1041_v35 = vmul.f32 0.2, %v913_v29  ;;  %vm1009_vm1 = vcmp.ge.f32.partialorder %v945_v30, 0.0  ;;  %v843_v37 = vmul.f32 %v1749_v17, %v631_v33 }
 0x147   :  { %v1073_v36 = vmul.f32 0.2, %v945_v30  ;;  %v875_v38 = vmul.f32 %v1749_v17, %v759_v34  ;;  %v633_v39 = vpop.f32.mrf.mxu0  ;;  %v761_v40 = vpop.f32.mrf.mxu1 }
 0x148   :  { %v1105_v41 = vsel %vm977_vm0, %v913_v29, %v1041_v35  ;;  %v914_v43 = vadd.f32 %v1754_v19, %v843_v37 }
 0x149   :  { %v1137_v42 = vsel %vm1009_vm1, %v945_v30, %v1073_v36  ;;  %1169 = vst [vmem:[%s2080_s4 + $0x80] sm:$0xff] %v1105_v41  ;;  %v946_v44 = vadd.f32 %v1754_v19, %v875_v38  ;;  %v636_v45 = vpop.f32.mrf.mxu0  ;;  %v764_v46 = vpop.f32.mrf.mxu1 }
 0x14a   :  { %1201 = vst [vmem:[%s2080_s4 + $0x180] sm:$0xff] %v1137_v42  ;;  %v844_v47 = vmul.f32 %v1749_v17, %v636_v45  ;;  %v876_v48 = vmul.f32 %v1749_v17, %v764_v46  ;;  %vm978_vm2 = vcmp.ge.f32.partialorder %v914_v43, 0.0  ;;  %v1042_v49 = vmul.f32 0.2, %v914_v43 }
 0x14b   :  { %vm1010_vm3 = vcmp.ge.f32.partialorder %v946_v44, 0.0  ;;  %v1074_v50 = vmul.f32 0.2, %v946_v44  ;;  %v638_v51 = vpop.f32.mrf.mxu0  ;;  %v766_v52 = vpop.f32.mrf.mxu1 }
 0x14c   :  { %v915_v53 = vadd.f32 %v1754_v19, %v844_v47  ;;  %v947_v54 = vadd.f32 %v1754_v19, %v876_v48  ;;  %v1106_v55 = vsel %vm978_vm2, %v914_v43, %v1042_v49 }
 0x14d   :  { %v1138_v56 = vsel %vm1010_vm3, %v946_v44, %v1074_v50  ;;  %v639_v57 = vpop.f32.mrf.mxu0  ;;  %v767_v58 = vpop.f32.mrf.mxu1  ;;  %1170 = vst [vmem:[%s2080_s4 + $0x88] sm:$0xff] %v1106_v55 }
 0x14e   :  { %1202 = vst [vmem:[%s2080_s4 + $0x188] sm:$0xff] %v1138_v56  ;;  %vm979_vm4 = vcmp.ge.f32.partialorder %v915_v53, 0.0  ;;  %v1043_v59 = vmul.f32 0.2, %v915_v53  ;;  %vm1011_vm5 = vcmp.ge.f32.partialorder %v947_v54, 0.0  ;;  %v845_v61 = vmul.f32 %v1749_v17, %v639_v57 }
 0x14f   :  { %v1075_v60 = vmul.f32 0.2, %v947_v54  ;;  %v877_v62 = vmul.f32 %v1749_v17, %v767_v58  ;;  %v641_v63 = vpop.f32.mrf.mxu0  ;;  %v769_v0 = vpop.f32.mrf.mxu1 }
 0x150   :  { %v1107_v1 = vsel %vm979_vm4, %v915_v53, %v1043_v59  ;;  %v916_v3 = vadd.f32 %v1754_v19, %v845_v61 }
 0x151   :  { %v1139_v2 = vsel %vm1011_vm5, %v947_v54, %v1075_v60  ;;  %1171 = vst [vmem:[%s2080_s4 + $0x90] sm:$0xff] %v1107_v1  ;;  %v948_v4 = vadd.f32 %v1754_v19, %v877_v62  ;;  %v644_v5 = vpop.f32.mrf.mxu0  ;;  %v772_v6 = vpop.f32.mrf.mxu1 }
 0x152   :  { %1203 = vst [vmem:[%s2080_s4 + $0x190] sm:$0xff] %v1139_v2  ;;  %v846_v7 = vmul.f32 %v1749_v17, %v644_v5  ;;  %v878_v8 = vmul.f32 %v1749_v17, %v772_v6  ;;  %vm980_vm6 = vcmp.ge.f32.partialorder %v916_v3, 0.0  ;;  %v1044_v9 = vmul.f32 0.2, %v916_v3 }
 0x153   :  { %vm1012_vm7 = vcmp.ge.f32.partialorder %v948_v4, 0.0  ;;  %v1076_v10 = vmul.f32 0.2, %v948_v4  ;;  %v646_v11 = vpop.f32.mrf.mxu0  ;;  %v774_v12 = vpop.f32.mrf.mxu1 }
 0x154   :  { %v917_v13 = vadd.f32 %v1754_v19, %v846_v7  ;;  %v949_v14 = vadd.f32 %v1754_v19, %v878_v8  ;;  %v1108_v15 = vsel %vm980_vm6, %v916_v3, %v1044_v9 }
 0x155   :  { %v1140_v16 = vsel %vm1012_vm7, %v948_v4, %v1076_v10  ;;  %v647_v18 = vpop.f32.mrf.mxu0  ;;  %v775_v20 = vpop.f32.mrf.mxu1  ;;  %1172 = vst [vmem:[%s2080_s4 + $0x98] sm:$0xff] %v1108_v15 }
 0x156   :  { %1204 = vst [vmem:[%s2080_s4 + $0x198] sm:$0xff] %v1140_v16  ;;  %vm981_vm8 = vcmp.ge.f32.partialorder %v917_v13, 0.0  ;;  %v1045_v21 = vmul.f32 0.2, %v917_v13  ;;  %vm1013_vm9 = vcmp.ge.f32.partialorder %v949_v14, 0.0  ;;  %v847_v23 = vmul.f32 %v1749_v17, %v647_v18 }
 0x157   :  { %v1077_v22 = vmul.f32 0.2, %v949_v14  ;;  %v879_v24 = vmul.f32 %v1749_v17, %v775_v20  ;;  %v649_v25 = vpop.f32.mrf.mxu0  ;;  %v777_v26 = vpop.f32.mrf.mxu1 }
 0x158   :  { %v1109_v27 = vsel %vm981_vm8, %v917_v13, %v1045_v21  ;;  %v918_v29 = vadd.f32 %v1754_v19, %v847_v23 }
 0x159   :  { %v1141_v28 = vsel %vm1013_vm9, %v949_v14, %v1077_v22  ;;  %1173 = vst [vmem:[%s2080_s4 + $0xa0] sm:$0xff] %v1109_v27  ;;  %v950_v30 = vadd.f32 %v1754_v19, %v879_v24  ;;  %v652_v31 = vpop.f32.mrf.mxu0  ;;  %v780_v32 = vpop.f32.mrf.mxu1 }
 0x15a   :  { %1205 = vst [vmem:[%s2080_s4 + $0x1a0] sm:$0xff] %v1141_v28  ;;  %v848_v33 = vmul.f32 %v1749_v17, %v652_v31  ;;  %v880_v34 = vmul.f32 %v1749_v17, %v780_v32  ;;  %vm982_vm10 = vcmp.ge.f32.partialorder %v918_v29, 0.0  ;;  %v1046_v35 = vmul.f32 0.2, %v918_v29 }
 0x15b   :  { %vm1014_vm11 = vcmp.ge.f32.partialorder %v950_v30, 0.0  ;;  %v1078_v36 = vmul.f32 0.2, %v950_v30  ;;  %v654_v37 = vpop.f32.mrf.mxu0  ;;  %v782_v38 = vpop.f32.mrf.mxu1 }
 0x15c   :  { %v919_v39 = vadd.f32 %v1754_v19, %v848_v33  ;;  %v951_v40 = vadd.f32 %v1754_v19, %v880_v34  ;;  %v1110_v41 = vsel %vm982_vm10, %v918_v29, %v1046_v35 }
 0x15d   :  { %v1142_v42 = vsel %vm1014_vm11, %v950_v30, %v1078_v36  ;;  %v655_v43 = vpop.f32.mrf.mxu0  ;;  %v783_v44 = vpop.f32.mrf.mxu1  ;;  %1174 = vst [vmem:[%s2080_s4 + $0xa8] sm:$0xff] %v1110_v41 }
 0x15e   :  { %1206 = vst [vmem:[%s2080_s4 + $0x1a8] sm:$0xff] %v1142_v42  ;;  %vm983_vm12 = vcmp.ge.f32.partialorder %v919_v39, 0.0  ;;  %v1047_v45 = vmul.f32 0.2, %v919_v39  ;;  %vm1015_vm13 = vcmp.ge.f32.partialorder %v951_v40, 0.0  ;;  %v849_v47 = vmul.f32 %v1749_v17, %v655_v43 }
 0x15f   :  { %v1079_v46 = vmul.f32 0.2, %v951_v40  ;;  %v881_v48 = vmul.f32 %v1749_v17, %v783_v44  ;;  %v657_v49 = vpop.f32.mrf.mxu0  ;;  %v785_v50 = vpop.f32.mrf.mxu1 }
 0x160   :  { %v1111_v51 = vsel %vm983_vm12, %v919_v39, %v1047_v45  ;;  %v920_v53 = vadd.f32 %v1754_v19, %v849_v47 }
 0x161   :  { %v1143_v52 = vsel %vm1015_vm13, %v951_v40, %v1079_v46  ;;  %1175 = vst [vmem:[%s2080_s4 + $0xb0] sm:$0xff] %v1111_v51  ;;  %v952_v54 = vadd.f32 %v1754_v19, %v881_v48  ;;  %v660_v55 = vpop.f32.mrf.mxu0  ;;  %v788_v56 = vpop.f32.mrf.mxu1 }
 0x162   :  { %1207 = vst [vmem:[%s2080_s4 + $0x1b0] sm:$0xff] %v1143_v52  ;;  %v850_v57 = vmul.f32 %v1749_v17, %v660_v55  ;;  %v882_v58 = vmul.f32 %v1749_v17, %v788_v56  ;;  %vm984_vm14 = vcmp.ge.f32.partialorder %v920_v53, 0.0  ;;  %v1048_v59 = vmul.f32 0.2, %v920_v53 }
 0x163   :  { %vm1016_vm15 = vcmp.ge.f32.partialorder %v952_v54, 0.0  ;;  %v1080_v60 = vmul.f32 0.2, %v952_v54  ;;  %v662_v61 = vpop.f32.mrf.mxu0  ;;  %v790_v62 = vpop.f32.mrf.mxu1 }
 0x164   :  { %v921_v63 = vadd.f32 %v1754_v19, %v850_v57  ;;  %v953_v0 = vadd.f32 %v1754_v19, %v882_v58  ;;  %v1112_v1 = vsel %vm984_vm14, %v920_v53, %v1048_v59 }
 0x165   :  { %v1144_v2 = vsel %vm1016_vm15, %v952_v54, %v1080_v60  ;;  %v663_v3 = vpop.f32.mrf.mxu0  ;;  %v791_v4 = vpop.f32.mrf.mxu1  ;;  %1176 = vst [vmem:[%s2080_s4 + $0xb8] sm:$0xff] %v1112_v1 }
 0x166   :  { %1208 = vst [vmem:[%s2080_s4 + $0x1b8] sm:$0xff] %v1144_v2  ;;  %vm985_vm0 = vcmp.ge.f32.partialorder %v921_v63, 0.0  ;;  %v1049_v5 = vmul.f32 0.2, %v921_v63  ;;  %vm1017_vm1 = vcmp.ge.f32.partialorder %v953_v0, 0.0  ;;  %v851_v7 = vmul.f32 %v1749_v17, %v663_v3 }
 0x167   :  { %v1081_v6 = vmul.f32 0.2, %v953_v0  ;;  %v883_v8 = vmul.f32 %v1749_v17, %v791_v4  ;;  %v665_v9 = vpop.f32.mrf.mxu0  ;;  %v793_v10 = vpop.f32.mrf.mxu1 }
 0x168   :  { %v1113_v11 = vsel %vm985_vm0, %v921_v63, %v1049_v5  ;;  %v922_v13 = vadd.f32 %v1754_v19, %v851_v7 }
 0x169   :  { %v1145_v12 = vsel %vm1017_vm1, %v953_v0, %v1081_v6  ;;  %1177 = vst [vmem:[%s2080_s4 + $0xc0] sm:$0xff] %v1113_v11  ;;  %v954_v14 = vadd.f32 %v1754_v19, %v883_v8  ;;  %v668_v15 = vpop.f32.mrf.mxu0  ;;  %v796_v16 = vpop.f32.mrf.mxu1 }
 0x16a   :  { %1209 = vst [vmem:[%s2080_s4 + $0x1c0] sm:$0xff] %v1145_v12  ;;  %v852_v18 = vmul.f32 %v1749_v17, %v668_v15  ;;  %v884_v20 = vmul.f32 %v1749_v17, %v796_v16  ;;  %vm986_vm2 = vcmp.ge.f32.partialorder %v922_v13, 0.0  ;;  %v1050_v21 = vmul.f32 0.2, %v922_v13 }
 0x16b   :  { %vm1018_vm3 = vcmp.ge.f32.partialorder %v954_v14, 0.0  ;;  %v1082_v22 = vmul.f32 0.2, %v954_v14  ;;  %v670_v23 = vpop.f32.mrf.mxu0  ;;  %v798_v24 = vpop.f32.mrf.mxu1 }
 0x16c   :  { %v923_v25 = vadd.f32 %v1754_v19, %v852_v18  ;;  %v955_v26 = vadd.f32 %v1754_v19, %v884_v20  ;;  %v1114_v27 = vsel %vm986_vm2, %v922_v13, %v1050_v21 }
 0x16d   :  { %v1146_v28 = vsel %vm1018_vm3, %v954_v14, %v1082_v22  ;;  %v671_v29 = vpop.f32.mrf.mxu0  ;;  %v799_v30 = vpop.f32.mrf.mxu1  ;;  %1178 = vst [vmem:[%s2080_s4 + $0xc8] sm:$0xff] %v1114_v27 }
 0x16e   :  { %1210 = vst [vmem:[%s2080_s4 + $0x1c8] sm:$0xff] %v1146_v28  ;;  %vm987_vm4 = vcmp.ge.f32.partialorder %v923_v25, 0.0  ;;  %v1051_v31 = vmul.f32 0.2, %v923_v25  ;;  %vm1019_vm5 = vcmp.ge.f32.partialorder %v955_v26, 0.0  ;;  %v853_v33 = vmul.f32 %v1749_v17, %v671_v29 }
 0x16f   :  { %v1083_v32 = vmul.f32 0.2, %v955_v26  ;;  %v885_v34 = vmul.f32 %v1749_v17, %v799_v30  ;;  %v673_v35 = vpop.f32.mrf.mxu0  ;;  %v801_v36 = vpop.f32.mrf.mxu1 }
 0x170   :  { %v1115_v37 = vsel %vm987_vm4, %v923_v25, %v1051_v31  ;;  %v924_v39 = vadd.f32 %v1754_v19, %v853_v33 }
 0x171   :  { %v1147_v38 = vsel %vm1019_vm5, %v955_v26, %v1083_v32  ;;  %1179 = vst [vmem:[%s2080_s4 + $0xd0] sm:$0xff] %v1115_v37  ;;  %v956_v40 = vadd.f32 %v1754_v19, %v885_v34  ;;  %v676_v41 = vpop.f32.mrf.mxu0  ;;  %v804_v42 = vpop.f32.mrf.mxu1 }
 0x172   :  { %1211 = vst [vmem:[%s2080_s4 + $0x1d0] sm:$0xff] %v1147_v38  ;;  %v854_v43 = vmul.f32 %v1749_v17, %v676_v41  ;;  %v886_v44 = vmul.f32 %v1749_v17, %v804_v42  ;;  %vm988_vm6 = vcmp.ge.f32.partialorder %v924_v39, 0.0  ;;  %v1052_v45 = vmul.f32 0.2, %v924_v39 }
 0x173   :  { %vm1020_vm7 = vcmp.ge.f32.partialorder %v956_v40, 0.0  ;;  %v1084_v46 = vmul.f32 0.2, %v956_v40  ;;  %v678_v47 = vpop.f32.mrf.mxu0  ;;  %v806_v48 = vpop.f32.mrf.mxu1 }
 0x174   :  { %v925_v49 = vadd.f32 %v1754_v19, %v854_v43  ;;  %v957_v50 = vadd.f32 %v1754_v19, %v886_v44  ;;  %v1116_v51 = vsel %vm988_vm6, %v924_v39, %v1052_v45 }
 0x175   :  { %v1148_v52 = vsel %vm1020_vm7, %v956_v40, %v1084_v46  ;;  %v679_v53 = vpop.f32.mrf.mxu0  ;;  %v807_v54 = vpop.f32.mrf.mxu1  ;;  %1180 = vst [vmem:[%s2080_s4 + $0xd8] sm:$0xff] %v1116_v51 }
 0x176   :  { %1212 = vst [vmem:[%s2080_s4 + $0x1d8] sm:$0xff] %v1148_v52  ;;  %vm989_vm8 = vcmp.ge.f32.partialorder %v925_v49, 0.0  ;;  %v1053_v55 = vmul.f32 0.2, %v925_v49  ;;  %vm1021_vm9 = vcmp.ge.f32.partialorder %v957_v50, 0.0  ;;  %v855_v57 = vmul.f32 %v1749_v17, %v679_v53 }
 0x177   :  { %v1085_v56 = vmul.f32 0.2, %v957_v50  ;;  %v887_v58 = vmul.f32 %v1749_v17, %v807_v54  ;;  %v681_v59 = vpop.f32.mrf.mxu0  ;;  %v809_v60 = vpop.f32.mrf.mxu1 }
 0x178   :  { %v1117_v61 = vsel %vm989_vm8, %v925_v49, %v1053_v55  ;;  %v926_v63 = vadd.f32 %v1754_v19, %v855_v57 }
 0x179   :  { %v1149_v62 = vsel %vm1021_vm9, %v957_v50, %v1085_v56  ;;  %1181 = vst [vmem:[%s2080_s4 + $0xe0] sm:$0xff] %v1117_v61  ;;  %v958_v0 = vadd.f32 %v1754_v19, %v887_v58  ;;  %v684_v1 = vpop.f32.mrf.mxu0  ;;  %v812_v2 = vpop.f32.mrf.mxu1 }
 0x17a   :  { %1213 = vst [vmem:[%s2080_s4 + $0x1e0] sm:$0xff] %v1149_v62  ;;  %v856_v3 = vmul.f32 %v1749_v17, %v684_v1  ;;  %v888_v4 = vmul.f32 %v1749_v17, %v812_v2  ;;  %vm990_vm10 = vcmp.ge.f32.partialorder %v926_v63, 0.0  ;;  %v1054_v5 = vmul.f32 0.2, %v926_v63 }
 0x17b   :  { %vm1022_vm11 = vcmp.ge.f32.partialorder %v958_v0, 0.0  ;;  %v1086_v6 = vmul.f32 0.2, %v958_v0  ;;  %v686_v7 = vpop.f32.mrf.mxu0  ;;  %v814_v8 = vpop.f32.mrf.mxu1 }
 0x17c   :  { %v927_v9 = vadd.f32 %v1754_v19, %v856_v3  ;;  %v959_v10 = vadd.f32 %v1754_v19, %v888_v4  ;;  %v1118_v11 = vsel %vm990_vm10, %v926_v63, %v1054_v5 }
 0x17d   :  { %v1150_v12 = vsel %vm1022_vm11, %v958_v0, %v1086_v6  ;;  %v687_v13 = vpop.f32.mrf.mxu0  ;;  %v815_v14 = vpop.f32.mrf.mxu1  ;;  %1182 = vst [vmem:[%s2080_s4 + $0xe8] sm:$0xff] %v1118_v11 }
 0x17e   :  { %1214 = vst [vmem:[%s2080_s4 + $0x1e8] sm:$0xff] %v1150_v12  ;;  %vm991_vm12 = vcmp.ge.f32.partialorder %v927_v9, 0.0  ;;  %v1055_v15 = vmul.f32 0.2, %v927_v9  ;;  %vm1023_vm13 = vcmp.ge.f32.partialorder %v959_v10, 0.0  ;;  %v857_v18 = vmul.f32 %v1749_v17, %v687_v13 }
 0x17f   :  { %v1087_v16 = vmul.f32 0.2, %v959_v10  ;;  %v889_v20 = vmul.f32 %v1749_v17, %v815_v14  ;;  %v689_v21 = vpop.f32.mrf.mxu0  ;;  %v817_v22 = vpop.f32.mrf.mxu1 }
 0x180   :  { %v1119_v23 = vsel %vm991_vm12, %v927_v9, %v1055_v15  ;;  %v928_v25 = vadd.f32 %v1754_v19, %v857_v18 }
 0x181   :  { %v1151_v24 = vsel %vm1023_vm13, %v959_v10, %v1087_v16  ;;  %1183 = vst [vmem:[%s2080_s4 + $0xf0] sm:$0xff] %v1119_v23  ;;  %v960_v26 = vadd.f32 %v1754_v19, %v889_v20 }
 0x182   :  { %1215 = vst [vmem:[%s2080_s4 + $0x1f0] sm:$0xff] %v1151_v24  ;;  %vm992_vm14 = vcmp.ge.f32.partialorder %v928_v25, 0.0  ;;  %v1056_v27 = vmul.f32 0.2, %v928_v25 }
 0x183   :  { %vm1024_vm15 = vcmp.ge.f32.partialorder %v960_v26, 0.0  ;;  %v1088_v17 = vmul.f32 0.2, %v960_v26 }
 0x184   :  { %v1120_v28 = vsel %vm992_vm14, %v928_v25, %v1056_v27 }
 0x185   :  { %v1152_v29 = vsel %vm1024_vm15, %v960_v26, %v1088_v17  ;;  %1184 = vst [vmem:[%s2080_s4 + $0xf8] sm:$0xff] %v1120_v28 }
 0x186   :  { %1216 = vst [vmem:[%s2080_s4 + $0x1f8] sm:$0xff] %v1152_v29 }

// kernel: forward.27
= control target key start
LH: loop header
LB: loop body
LE: loop exit
PB: predicated region body
PF: predicated region fallthrough
CT: control target
= control target key end

     0   :  { %s1490_s15 = smov 0   ;;  %s1492_s16 = smov 0   ;;  %s1777_s0 = inlined_call_operand.vmem [shape: bf16[8,512], index: 0, kind: input, shape index: {}]   ;;  %s1778_s1 = inlined_call_operand.vmem [shape: bf16[512,1024], index: 1, kind: input, shape index: {}]   ;;  %s1779_s2 = inlined_call_operand.vmem [shape: f32[1,1024], index: 2, kind: input, shape index: {}]   ;;  %s1780_s3 = inlined_call_operand.vmem [shape: f32[1,1024], index: 3, kind: input, shape index: {}]   ;;  %s1781_s4 = inlined_call_operand.vmem [shape: f32[8,1024], index: 4, kind: output, shape index: {}]  }
   0x1   :  { %s1494_s17 = smov 0   ;;  %s1496_s18 = smov 0  }
   0x2   :  { %s1498_s19 = smov 0  }
   0x3 LB: > { %s23_s20 = sadd.s32 1, %s1459_s18  ;;  %p66_p1 = scmp.ne.s32.totalorder %s1451_s16, %s1447_s15  ;;  %s1463_s19 = sphi %s1498_s19, %s14_s19   ;;  %s1459_s18 = sphi %s1496_s18, %s1785_s18   ;;  %s1455_s17 = sphi %s1494_s17, %s1784_s17   ;;  %s1451_s16 = sphi %s1492_s16, %s1783_s16   ;;  %s1447_s15 = sphi %s1490_s15, %s1782_s15  }
   0x4   : > { %p24_p0 = scmp.ge.s32.totalorder %s23_s20, 4  ;;  %p67_p2 = scmp.eq.s32.totalorder %s1463_s19, 0 }
   0x5   : > { %s59_s22 = sadd.s32 1, %s1451_s16  ;;  %p1204_p5 = scmp.ge.s32.totalorder %s1463_s19, 4 }
   0x6   : > { %s1787_s20 = smov (%p24_p0, %s23_s20), 0  ;;  %p68_p3 = por %p67_p2, %p66_p1 }
   0x7   : > { %s56_s21 = ssub.s32 %s1459_s18, %s1787_s20  ;;  %180 = sbr.rel (%p1204_p5) target bundleno = 80 (0x50), region = 20 }
   0x8   : > { %p57_p4 = scmp.eq.s32.totalorder %s56_s21, 0 }
   0xa   : > { %s1525_s23 = scalar_select %p57_p4, %s1451_s16, %s59_s22  }
   0xc   : > { %183 = sbr.rel (!%p68_p3) target bundleno = 80 (0x50), region = 24  ;;  %s185_s24 = sand.u32 (%p68_p3), 1, %s1451_s16  }
   0xd   : > { %s1284_s25 = sshll.u32 (%p68_p3), %s1459_s18, 3  ;;  %s1205_s26 = sshll.u32 (%p68_p3), %s185_s24, 9 }
   0xe   : > { %s1533_s29 = scalar_lea.vmem (%p68_p3), %s1778_s1, %s1284_s25  ;;  %s1538_s30 = scalar_lea.vmem (%p68_p3), [#allocation2], %s1205_s26 }
   0xf   : > { %v345_v0 = vld [vmem:[%s1533_s29] sm:$0xff] (%p68_p3) }
  0x10   : > { %v347_v1 = vld [vmem:[%s1533_s29 + $0x20] sm:$0xff] (%p68_p3)  ;;  %346 = vst [vmem:[%s1538_s30] sm:$0xff] (%p68_p3), %v345_v0 }
  0x11   : > { %v349_v2 = vld [vmem:[%s1533_s29 + $0x40] sm:$0xff]  ;;  %348 = vst [vmem:[%s1538_s30 + $0x8] sm:$0xff] %v347_v1 }
  0x12   : > { %350 = vst [vmem:[%s1538_s30 + $0x10] sm:$0xff] %v349_v2  ;;  %v351_v3 = vld [vmem:[%s1533_s29 + $0x60] sm:$0xff] }
  0x13   : > { %v353_v4 = vld [vmem:[%s1533_s29 + $0x80] sm:$0xff]  ;;  %352 = vst [vmem:[%s1538_s30 + $0x18] sm:$0xff] %v351_v3 }
  0x14   : > { %v355_v5 = vld [vmem:[%s1533_s29 + $0xa0] sm:$0xff]  ;;  %354 = vst [vmem:[%s1538_s30 + $0x20] sm:$0xff] %v353_v4 }
  0x15   : > { %356 = vst [vmem:[%s1538_s30 + $0x28] sm:$0xff] %v355_v5  ;;  %v357_v6 = vld [vmem:[%s1533_s29 + $0xc0] sm:$0xff] }
  0x16   : > { %v359_v7 = vld [vmem:[%s1533_s29 + $0xe0] sm:$0xff]  ;;  %358 = vst [vmem:[%s1538_s30 + $0x30] sm:$0xff] %v357_v6 }
  0x17   : > { %v361_v8 = vld [vmem:[%s1533_s29 + $0x100] sm:$0xff]  ;;  %360 = vst [vmem:[%s1538_s30 + $0x38] sm:$0xff] %v359_v7 }
  0x18   : > { %362 = vst [vmem:[%s1538_s30 + $0x40] sm:$0xff] %v361_v8  ;;  %v363_v9 = vld [vmem:[%s1533_s29 + $0x120] sm:$0xff] }
  0x19   : > { %v365_v10 = vld [vmem:[%s1533_s29 + $0x140] sm:$0xff]  ;;  %364 = vst [vmem:[%s1538_s30 + $0x48] sm:$0xff] %v363_v9 }
  0x1a   : > { %v367_v11 = vld [vmem:[%s1533_s29 + $0x160] sm:$0xff]  ;;  %366 = vst [vmem:[%s1538_s30 + $0x50] sm:$0xff] %v365_v10 }
  0x1b   : > { %368 = vst [vmem:[%s1538_s30 + $0x58] sm:$0xff] %v367_v11  ;;  %v369_v12 = vld [vmem:[%s1533_s29 + $0x180] sm:$0xff] }
  0x1c   : > { %v371_v13 = vld [vmem:[%s1533_s29 + $0x1a0] sm:$0xff]  ;;  %370 = vst [vmem:[%s1538_s30 + $0x60] sm:$0xff] %v369_v12 }
  0x1d   : > { %v373_v14 = vld [vmem:[%s1533_s29 + $0x1c0] sm:$0xff]  ;;  %372 = vst [vmem:[%s1538_s30 + $0x68] sm:$0xff] %v371_v13 }
  0x1e   : > { %374 = vst [vmem:[%s1538_s30 + $0x70] sm:$0xff] %v373_v14  ;;  %v375_v15 = vld [vmem:[%s1533_s29 + $0x1e0] sm:$0xff] }
  0x1f   : > { %v377_v16 = vld [vmem:[%s1533_s29 + $0x200] sm:$0xff]  ;;  %376 = vst [vmem:[%s1538_s30 + $0x78] sm:$0xff] %v375_v15 }
  0x20   : > { %v379_v17 = vld [vmem:[%s1533_s29 + $0x220] sm:$0xff]  ;;  %378 = vst [vmem:[%s1538_s30 + $0x80] sm:$0xff] %v377_v16 }
  0x21   : > { %380 = vst [vmem:[%s1538_s30 + $0x88] sm:$0xff] %v379_v17  ;;  %v381_v18 = vld [vmem:[%s1533_s29 + $0x240] sm:$0xff] }
  0x22   : > { %v383_v19 = vld [vmem:[%s1533_s29 + $0x260] sm:$0xff]  ;;  %382 = vst [vmem:[%s1538_s30 + $0x90] sm:$0xff] %v381_v18 }
  0x23   : > { %v385_v20 = vld [vmem:[%s1533_s29 + $0x280] sm:$0xff]  ;;  %384 = vst [vmem:[%s1538_s30 + $0x98] sm:$0xff] %v383_v19 }
  0x24   : > { %386 = vst [vmem:[%s1538_s30 + $0xa0] sm:$0xff] %v385_v20  ;;  %v387_v21 = vld [vmem:[%s1533_s29 + $0x2a0] sm:$0xff] }
  0x25   : > { %v389_v22 = vld [vmem:[%s1533_s29 + $0x2c0] sm:$0xff]  ;;  %388 = vst [vmem:[%s1538_s30 + $0xa8] sm:$0xff] %v387_v21 }
  0x26   : > { %v391_v23 = vld [vmem:[%s1533_s29 + $0x2e0] sm:$0xff]  ;;  %390 = vst [vmem:[%s1538_s30 + $0xb0] sm:$0xff] %v389_v22 }
  0x27   : > { %392 = vst [vmem:[%s1538_s30 + $0xb8] sm:$0xff] %v391_v23  ;;  %v393_v24 = vld [vmem:[%s1533_s29 + $0x300] sm:$0xff] }
  0x28   : > { %v395_v25 = vld [vmem:[%s1533_s29 + $0x320] sm:$0xff]  ;;  %394 = vst [vmem:[%s1538_s30 + $0xc0] sm:$0xff] %v393_v24 }
  0x29   : > { %v397_v26 = vld [vmem:[%s1533_s29 + $0x340] sm:$0xff]  ;;  %396 = vst [vmem:[%s1538_s30 + $0xc8] sm:$0xff] %v395_v25 }
  0x2a   : > { %398 = vst [vmem:[%s1538_s30 + $0xd0] sm:$0xff] %v397_v26  ;;  %v399_v27 = vld [vmem:[%s1533_s29 + $0x360] sm:$0xff] }
  0x2b   : > { %v401_v28 = vld [vmem:[%s1533_s29 + $0x380] sm:$0xff]  ;;  %400 = vst [vmem:[%s1538_s30 + $0xd8] sm:$0xff] %v399_v27 }
  0x2c   : > { %v403_v29 = vld [vmem:[%s1533_s29 + $0x3a0] sm:$0xff]  ;;  %402 = vst [vmem:[%s1538_s30 + $0xe0] sm:$0xff] %v401_v28 }
  0x2d   : > { %404 = vst [vmem:[%s1538_s30 + $0xe8] sm:$0xff] %v403_v29  ;;  %v405_v30 = vld [vmem:[%s1533_s29 + $0x3c0] sm:$0xff] }
  0x2e   : > { %v407_v31 = vld [vmem:[%s1533_s29 + $0x3e0] sm:$0xff]  ;;  %406 = vst [vmem:[%s1538_s30 + $0xf0] sm:$0xff] %v405_v30 }
  0x2f   : > { %v409_v32 = vld [vmem:[%s1533_s29 + $0x400] sm:$0xff]  ;;  %408 = vst [vmem:[%s1538_s30 + $0xf8] sm:$0xff] %v407_v31 }
  0x30   : > { %410 = vst [vmem:[%s1538_s30 + $0x100] sm:$0xff] %v409_v32  ;;  %v411_v33 = vld [vmem:[%s1533_s29 + $0x420] sm:$0xff] }
  0x31   : > { %v413_v34 = vld [vmem:[%s1533_s29 + $0x440] sm:$0xff]  ;;  %412 = vst [vmem:[%s1538_s30 + $0x108] sm:$0xff] %v411_v33 }
  0x32   : > { %v415_v35 = vld [vmem:[%s1533_s29 + $0x460] sm:$0xff]  ;;  %414 = vst [vmem:[%s1538_s30 + $0x110] sm:$0xff] %v413_v34 }
  0x33   : > { %416 = vst [vmem:[%s1538_s30 + $0x118] sm:$0xff] %v415_v35  ;;  %v417_v36 = vld [vmem:[%s1533_s29 + $0x480] sm:$0xff] }
  0x34   : > { %v419_v37 = vld [vmem:[%s1533_s29 + $0x4a0] sm:$0xff]  ;;  %418 = vst [vmem:[%s1538_s30 + $0x120] sm:$0xff] %v417_v36 }
  0x35   : > { %v421_v38 = vld [vmem:[%s1533_s29 + $0x4c0] sm:$0xff]  ;;  %420 = vst [vmem:[%s1538_s30 + $0x128] sm:$0xff] %v419_v37 }
  0x36   : > { %422 = vst [vmem:[%s1538_s30 + $0x130] sm:$0xff] %v421_v38  ;;  %v423_v39 = vld [vmem:[%s1533_s29 + $0x4e0] sm:$0xff] }
  0x37   : > { %v425_v40 = vld [vmem:[%s1533_s29 + $0x500] sm:$0xff]  ;;  %424 = vst [vmem:[%s1538_s30 + $0x138] sm:$0xff] %v423_v39 }
  0x38   : > { %v427_v41 = vld [vmem:[%s1533_s29 + $0x520] sm:$0xff]  ;;  %426 = vst [vmem:[%s1538_s30 + $0x140] sm:$0xff] %v425_v40 }
  0x39   : > { %428 = vst [vmem:[%s1538_s30 + $0x148] sm:$0xff] %v427_v41  ;;  %v429_v42 = vld [vmem:[%s1533_s29 + $0x540] sm:$0xff] }
  0x3a   : > { %v431_v43 = vld [vmem:[%s1533_s29 + $0x560] sm:$0xff]  ;;  %430 = vst [vmem:[%s1538_s30 + $0x150] sm:$0xff] %v429_v42 }
  0x3b   : > { %v433_v44 = vld [vmem:[%s1533_s29 + $0x580] sm:$0xff]  ;;  %432 = vst [vmem:[%s1538_s30 + $0x158] sm:$0xff] %v431_v43 }
  0x3c   : > { %434 = vst [vmem:[%s1538_s30 + $0x160] sm:$0xff] %v433_v44  ;;  %v435_v45 = vld [vmem:[%s1533_s29 + $0x5a0] sm:$0xff] }
  0x3d   : > { %v437_v46 = vld [vmem:[%s1533_s29 + $0x5c0] sm:$0xff]  ;;  %436 = vst [vmem:[%s1538_s30 + $0x168] sm:$0xff] %v435_v45 }
  0x3e   : > { %v439_v47 = vld [vmem:[%s1533_s29 + $0x5e0] sm:$0xff]  ;;  %438 = vst [vmem:[%s1538_s30 + $0x170] sm:$0xff] %v437_v46 }
  0x3f   : > { %440 = vst [vmem:[%s1538_s30 + $0x178] sm:$0xff] %v439_v47  ;;  %v441_v48 = vld [vmem:[%s1533_s29 + $0x600] sm:$0xff] }
  0x40   : > { %v443_v49 = vld [vmem:[%s1533_s29 + $0x620] sm:$0xff]  ;;  %442 = vst [vmem:[%s1538_s30 + $0x180] sm:$0xff] %v441_v48 }
  0x41   : > { %v445_v50 = vld [vmem:[%s1533_s29 + $0x640] sm:$0xff]  ;;  %444 = vst [vmem:[%s1538_s30 + $0x188] sm:$0xff] %v443_v49 }
  0x42   : > { %446 = vst [vmem:[%s1538_s30 + $0x190] sm:$0xff] %v445_v50  ;;  %v447_v51 = vld [vmem:[%s1533_s29 + $0x660] sm:$0xff] }
  0x43   : > { %v449_v52 = vld [vmem:[%s1533_s29 + $0x680] sm:$0xff]  ;;  %448 = vst [vmem:[%s1538_s30 + $0x198] sm:$0xff] %v447_v51 }
  0x44   : > { %v451_v53 = vld [vmem:[%s1533_s29 + $0x6a0] sm:$0xff]  ;;  %450 = vst [vmem:[%s1538_s30 + $0x1a0] sm:$0xff] %v449_v52 }
  0x45   : > { %452 = vst [vmem:[%s1538_s30 + $0x1a8] sm:$0xff] %v451_v53  ;;  %v453_v54 = vld [vmem:[%s1533_s29 + $0x6c0] sm:$0xff] }
  0x46   : > { %v455_v55 = vld [vmem:[%s1533_s29 + $0x6e0] sm:$0xff]  ;;  %454 = vst [vmem:[%s1538_s30 + $0x1b0] sm:$0xff] %v453_v54 }
  0x47   : > { %v457_v56 = vld [vmem:[%s1533_s29 + $0x700] sm:$0xff]  ;;  %456 = vst [vmem:[%s1538_s30 + $0x1b8] sm:$0xff] %v455_v55 }
  0x48   : > { %458 = vst [vmem:[%s1538_s30 + $0x1c0] sm:$0xff] %v457_v56  ;;  %v459_v57 = vld [vmem:[%s1533_s29 + $0x720] sm:$0xff] }
  0x49   : > { %v461_v58 = vld [vmem:[%s1533_s29 + $0x740] sm:$0xff]  ;;  %460 = vst [vmem:[%s1538_s30 + $0x1c8] sm:$0xff] %v459_v57 }
  0x4a   : > { %v463_v59 = vld [vmem:[%s1533_s29 + $0x760] sm:$0xff]  ;;  %462 = vst [vmem:[%s1538_s30 + $0x1d0] sm:$0xff] %v461_v58 }
  0x4b   : > { %464 = vst [vmem:[%s1538_s30 + $0x1d8] sm:$0xff] %v463_v59  ;;  %v465_v60 = vld [vmem:[%s1533_s29 + $0x780] sm:$0xff] }
  0x4c   : > { %v467_v61 = vld [vmem:[%s1533_s29 + $0x7a0] sm:$0xff]  ;;  %466 = vst [vmem:[%s1538_s30 + $0x1e0] sm:$0xff] %v465_v60 }
  0x4d   : > { %v469_v62 = vld [vmem:[%s1533_s29 + $0x7c0] sm:$0xff]  ;;  %468 = vst [vmem:[%s1538_s30 + $0x1e8] sm:$0xff] %v467_v61 }
  0x4e   : > { %470 = vst [vmem:[%s1538_s30 + $0x1f0] sm:$0xff] %v469_v62  ;;  %v471_v63 = vld [vmem:[%s1533_s29 + $0x7e0] sm:$0xff] }
  0x4f   : > { %472 = vst [vmem:[%s1538_s30 + $0x1f8] sm:$0xff] %v471_v63 }
  0x50 PF: > { %p1208_p6 = scmp.ge.s32.totalorder %s1463_s19, 1  ;;  %p493_p7 = scmp.lt.s32.totalorder %s1463_s19, 5 }
  0x52   : > { %p494_p8 = pnand %p1208_p6, %p493_p7 }
  0x53   : > { %s500_s5 = sand.u32 (!%p494_p8), 1, %s1447_s15   ;;  %s1210_s12 = sshll.u32 (!%p494_p8), %s1455_s17, 1 }
  0x54   : > { %497 = sbr.rel (%p494_p8) target bundleno = 358 (0x166), region = 70  ;;  %s1209_s10 = sshll.u32 (!%p494_p8), %s500_s5, 9 }
  0x55   : > { %s1682_s11 = scalar_lea.vmem (!%p494_p8), [#allocation2], %s1209_s10  ;;  %p549_p9 = scmp.lt.s32.totalorder (!%p494_p8), %s1210_s12, 7 }
  0x59   : > { %v1671_v0 = vld [vmem:[%s1777_s0] sm:$0xff]  ;;  %v1676_v1 = vld [vmem:[%s1777_s0 + $0x8] sm:$0xff]  ;;  %v1325_v4 = vld [vmem:[%s1682_s11 + $0x74] ss:$8 sps:$4 sm:$0xff]   ;;  %s1789_s12 = smov (!%p549_p9, %s1210_s12), 7 }
  0x5a   : > { %v1215_v2 = vcombine.high %v1671_v0, %v1671_v0  ;;  %v1217_v3 = vcombine.high %v1676_v1, %v1676_v1  ;;  %v1327_v5 = vld [vmem:[%s1682_s11 + $0x174] ss:$8 sps:$4 sm:$0xff]   ;;  %968 = vmatprep.subr.bf16.mxu0 %v1325_v4  ;;  %v1329_v6 = vld [vmem:[%s1682_s11 + $0x70] ss:$8 sps:$4 sm:$0xff]   ;;  %v1331_v8 = vld [vmem:[%s1682_s11 + $0x64] ss:$8 sps:$4 sm:$0xff]   ;;  %s551_s15 = scalar_lea.vmem %s1779_s2, %s1789_s12  ;;  %s556_s24 = scalar_lea.vmem %s1780_s3, %s1789_s12 }
  0x5b   : > { %v1330_v7 = vld [vmem:[%s1682_s11 + $0x170] ss:$8 sps:$4 sm:$0xff]   ;;  %1009 = vmatprep.subr.bf16.mxu1 %v1327_v5  ;;  %969 = vmatpush1.bf16.msra.mxu0 %v1329_v6  ;;  %v1333_v9 = vld [vmem:[%s1682_s11 + $0x164] ss:$8 sps:$4 sm:$0xff]   ;;  %v1335_v10 = vld [vmem:[%s1682_s11 + $0x60] ss:$8 sps:$4 sm:$0xff]   ;;  %v1214_v6 = vcombine.low %v1671_v0, %v1671_v0 }
  0x5c   : > { %1000 = vmatprep.mubr.bf16.mxu0 %v1215_v2  ;;  %1041 = vmatprep.mubr.bf16.mxu1 %v1217_v3  ;;  %v1336_v11 = vld [vmem:[%s1682_s11 + $0x160] ss:$8 sps:$4 sm:$0xff]   ;;  %v1337_v12 = vld [vmem:[%s1682_s11 + $0x54] ss:$8 sps:$4 sm:$0xff]   ;;  %v1341_v14 = vld [vmem:[%s1682_s11 + $0x50] ss:$8 sps:$4 sm:$0xff]  }
  0x5d   : > { %1010 = vmatpush1.bf16.msra.mxu1 %v1330_v7  ;;  %970 = vmatprep.subr.bf16.mxu0 %v1331_v8  ;;  %v1339_v13 = vld [vmem:[%s1682_s11 + $0x154] ss:$8 sps:$4 sm:$0xff]   ;;  %v1342_v15 = vld [vmem:[%s1682_s11 + $0x150] ss:$8 sps:$4 sm:$0xff]   ;;  %v1343_v16 = vld [vmem:[%s1682_s11 + $0x44] ss:$8 sps:$4 sm:$0xff]   ;;  %v1216_v7 = vcombine.low %v1676_v1, %v1676_v1  ;;  %v1052_v8 = vlaneseq }
  0x5e   : > { %1011 = vmatprep.subr.bf16.mxu1 %v1333_v9  ;;  %v1345_v17 = vld [vmem:[%s1682_s11 + $0x144] ss:$8 sps:$4 sm:$0xff]   ;;  %v1347_v18 = vld [vmem:[%s1682_s11 + $0x40] ss:$8 sps:$4 sm:$0xff]   ;;  %v1349_v20 = vld [vmem:[%s1682_s11 + $0x34] ss:$8 sps:$4 sm:$0xff]  }
  0x5f   : > { %971 = vmatpush1.bf16.msra.mxu0 %v1335_v10  ;;  %v1348_v19 = vld [vmem:[%s1682_s11 + $0x140] ss:$8 sps:$4 sm:$0xff]   ;;  %v1351_v21 = vld [vmem:[%s1682_s11 + $0x134] ss:$8 sps:$4 sm:$0xff]   ;;  %v1353_v22 = vld [vmem:[%s1682_s11 + $0x30] ss:$8 sps:$4 sm:$0xff]  }
  0x60   : > { %972 = vmatprep.subr.bf16.mxu0 %v1337_v12  ;;  %v1354_v23 = vld [vmem:[%s1682_s11 + $0x130] ss:$8 sps:$4 sm:$0xff]   ;;  %v1355_v24 = vld [vmem:[%s1682_s11 + $0x24] ss:$8 sps:$4 sm:$0xff]   ;;  %v1359_v26 = vld [vmem:[%s1682_s11 + $0x20] ss:$8 sps:$4 sm:$0xff]  }
  0x61   : > { %1012 = vmatpush1.bf16.msra.mxu1 %v1336_v11  ;;  %v1357_v25 = vld [vmem:[%s1682_s11 + $0x124] ss:$8 sps:$4 sm:$0xff]   ;;  %v1360_v27 = vld [vmem:[%s1682_s11 + $0x120] ss:$8 sps:$4 sm:$0xff]   ;;  %v1361_v28 = vld [vmem:[%s1682_s11 + $0x14] ss:$8 sps:$4 sm:$0xff]  }
  0x62   : > { %1013 = vmatprep.subr.bf16.mxu1 %v1339_v13  ;;  %v1363_v29 = vld [vmem:[%s1682_s11 + $0x114] ss:$8 sps:$4 sm:$0xff]   ;;  %v1365_v30 = vld [vmem:[%s1682_s11 + $0x10] ss:$8 sps:$4 sm:$0xff]   ;;  %v1367_v32 = vld [vmem:[%s1682_s11 + $0x4] ss:$8 sps:$4 sm:$0xff]  }
  0x63   : > { %973 = vmatpush1.bf16.msra.mxu0 %v1341_v14  ;;  %v1366_v31 = vld [vmem:[%s1682_s11 + $0x110] ss:$8 sps:$4 sm:$0xff]   ;;  %v1369_v33 = vld [vmem:[%s1682_s11 + $0x104] ss:$8 sps:$4 sm:$0xff]   ;;  %v1371_v34 = vld [vmem:[%s1682_s11] ss:$8 sps:$4 sm:$0xff]  }
  0x64   : > { %974 = vmatprep.subr.bf16.mxu0 %v1343_v16  ;;  %v1372_v35 = vld [vmem:[%s1682_s11 + $0x100] ss:$8 sps:$4 sm:$0xff]   ;;  %v1373_v36 = vld [vmem:[%s1682_s11 + $0xf4] ss:$8 sps:$4 sm:$0xff]   ;;  %v1377_v38 = vld [vmem:[%s1682_s11 + $0xf0] ss:$8 sps:$4 sm:$0xff]  }
  0x65   : > { %1014 = vmatpush1.bf16.msra.mxu1 %v1342_v15  ;;  %v1375_v37 = vld [vmem:[%s1682_s11 + $0x1f4] ss:$8 sps:$4 sm:$0xff]   ;;  %v1378_v39 = vld [vmem:[%s1682_s11 + $0x1f0] ss:$8 sps:$4 sm:$0xff]   ;;  %v1379_v40 = vld [vmem:[%s1682_s11 + $0xe4] ss:$8 sps:$4 sm:$0xff]  }
  0x66   : > { %1015 = vmatprep.subr.bf16.mxu1 %v1345_v17  ;;  %v1381_v41 = vld [vmem:[%s1682_s11 + $0x1e4] ss:$8 sps:$4 sm:$0xff]   ;;  %v1383_v42 = vld [vmem:[%s1682_s11 + $0xe0] ss:$8 sps:$4 sm:$0xff]   ;;  %v1385_v44 = vld [vmem:[%s1682_s11 + $0xd4] ss:$8 sps:$4 sm:$0xff]  }
  0x67   : > { %975 = vmatpush1.bf16.msra.mxu0 %v1347_v18  ;;  %v1384_v43 = vld [vmem:[%s1682_s11 + $0x1e0] ss:$8 sps:$4 sm:$0xff]   ;;  %v1387_v45 = vld [vmem:[%s1682_s11 + $0x1d4] ss:$8 sps:$4 sm:$0xff]   ;;  %v1389_v46 = vld [vmem:[%s1682_s11 + $0xd0] ss:$8 sps:$4 sm:$0xff]  }
  0x68   : > { %976 = vmatprep.subr.bf16.mxu0 %v1349_v20  ;;  %v1390_v47 = vld [vmem:[%s1682_s11 + $0x1d0] ss:$8 sps:$4 sm:$0xff]   ;;  %v1391_v48 = vld [vmem:[%s1682_s11 + $0xc4] ss:$8 sps:$4 sm:$0xff]   ;;  %v1395_v50 = vld [vmem:[%s1682_s11 + $0xc0] ss:$8 sps:$4 sm:$0xff]  }
  0x69   : > { %1016 = vmatpush1.bf16.msra.mxu1 %v1348_v19  ;;  %v1393_v49 = vld [vmem:[%s1682_s11 + $0x1c4] ss:$8 sps:$4 sm:$0xff]   ;;  %v1396_v51 = vld [vmem:[%s1682_s11 + $0x1c0] ss:$8 sps:$4 sm:$0xff]   ;;  %v1397_v52 = vld [vmem:[%s1682_s11 + $0xb4] ss:$8 sps:$4 sm:$0xff]  }
  0x6a   : > { %1017 = vmatprep.subr.bf16.mxu1 %v1351_v21  ;;  %v1399_v53 = vld [vmem:[%s1682_s11 + $0x1b4] ss:$8 sps:$4 sm:$0xff]   ;;  %v1401_v54 = vld [vmem:[%s1682_s11 + $0xb0] ss:$8 sps:$4 sm:$0xff]   ;;  %v1403_v56 = vld [vmem:[%s1682_s11 + $0xa4] ss:$8 sps:$4 sm:$0xff]  }
  0x6b   : > { %977 = vmatpush1.bf16.msra.mxu0 %v1353_v22  ;;  %v1402_v55 = vld [vmem:[%s1682_s11 + $0x1b0] ss:$8 sps:$4 sm:$0xff]   ;;  %v1405_v57 = vld [vmem:[%s1682_s11 + $0x1a4] ss:$8 sps:$4 sm:$0xff]   ;;  %v1407_v58 = vld [vmem:[%s1682_s11 + $0xa0] ss:$8 sps:$4 sm:$0xff]  }
  0x6c   : > { %978 = vmatprep.subr.bf16.mxu0 %v1355_v24  ;;  %v1408_v59 = vld [vmem:[%s1682_s11 + $0x1a0] ss:$8 sps:$4 sm:$0xff]   ;;  %v1409_v60 = vld [vmem:[%s1682_s11 + $0x94] ss:$8 sps:$4 sm:$0xff]   ;;  %v1413_v62 = vld [vmem:[%s1682_s11 + $0x90] ss:$8 sps:$4 sm:$0xff]  }
  0x6d   : > { %1018 = vmatpush1.bf16.msra.mxu1 %v1354_v23  ;;  %v1411_v61 = vld [vmem:[%s1682_s11 + $0x194] ss:$8 sps:$4 sm:$0xff]   ;;  %v1414_v63 = vld [vmem:[%s1682_s11 + $0x190] ss:$8 sps:$4 sm:$0xff]   ;;  %v1415_v2 = vld [vmem:[%s1682_s11 + $0x84] ss:$8 sps:$4 sm:$0xff]  }
  0x6e   : > { %1019 = vmatprep.subr.bf16.mxu1 %v1357_v25  ;;  %v1417_v3 = vld [vmem:[%s1682_s11 + $0x184] ss:$8 sps:$4 sm:$0xff]   ;;  %v1419_v4 = vld [vmem:[%s1682_s11 + $0x80] ss:$8 sps:$4 sm:$0xff]   ;;  %v1053_v9 = vshrl.u32 %v1052_v8, 7  ;;  %s1213_s17 = sshll.u32 %s1789_s12, 3 }
  0x6f   : > { %979 = vmatpush1.bf16.msra.mxu0 %v1359_v26  ;;  %v1420_v5 = vld [vmem:[%s1682_s11 + $0x180] ss:$8 sps:$4 sm:$0xff]   ;;  %s566_s27 = scalar_lea.vmem %s1781_s4, %s1213_s17 }
  0x70   : > { %980 = vmatprep.subr.bf16.mxu0 %v1361_v28  ;;  %v1054_v0 = vsub.s32 0, %v1053_v9  ;;  %v1050_v10 = vld [vmem:[%s551_s15] sm:$0x3]  ;;  %v1058_v1 = vsub.s32 1, %v1053_v9 }
  0x71   : > { %1020 = vmatpush1.bf16.msra.mxu1 %v1360_v27  ;;  %v1064_v11 = vld [vmem:[%s556_s24] sm:$0x3] }
  0x72   : > { %1021 = vmatprep.subr.bf16.mxu1 %v1363_v29  ;;  %v1055_v12 = vrot.slane %v1050_v10, %v1054_v0  ;;  %v1069_v16 = vrot.slane %v1064_v11, %v1054_v0  ;;  %v1059_v17 = vrot.slane %v1050_v10, %v1058_v1  ;;  %v1073_v22 = vrot.slane %v1064_v11, %v1058_v1 }
  0x73   : > { %981 = vmatpush1.bf16.msra.mxu0 %v1365_v30 }
  0x74   : > { %982 = vmatprep.subr.bf16.mxu0 %v1367_v32 }
  0x75   : > { %1022 = vmatpush1.bf16.msra.mxu1 %v1366_v31 }
  0x76   : > { %1023 = vmatprep.subr.bf16.mxu1 %v1369_v33 }
  0x77   : > { %983 = vmatpush1.bf16.msra.mxu0 %v1371_v34 }
  0x78   : > { %984 = vmatprep.subr.bf16.mxu0 %v1373_v36 }
  0x79   : > { %1024 = vmatpush1.bf16.msra.mxu1 %v1372_v35 }
  0x7a   : > { %1025 = vmatprep.subr.bf16.mxu1 %v1375_v37 }
  0x7b   : > { %985 = vmatpush2.bf16.msra.mxu0 %v1377_v38 }
  0x7c   : > { %986 = vmatprep.subr.bf16.mxu0 %v1379_v40 }
  0x7d   : > { %1026 = vmatpush2.bf16.msra.mxu1 %v1378_v39 }
  0x7e   : > { %1027 = vmatprep.subr.bf16.mxu1 %v1381_v41 }
  0x7f   : > { %987 = vmatpush2.bf16.msra.mxu0 %v1383_v42 }
  0x80   : > { %988 = vmatprep.subr.bf16.mxu0 %v1385_v44 }
  0x81   : > { %1028 = vmatpush2.bf16.msra.mxu1 %v1384_v43 }
  0x82   : > { %1029 = vmatprep.subr.bf16.mxu1 %v1387_v45 }
  0x83   : > { %989 = vmatpush2.bf16.msra.mxu0 %v1389_v46 }
  0x84   : > { %990 = vmatprep.subr.bf16.mxu0 %v1391_v48 }
  0x85   : > { %1030 = vmatpush2.bf16.msra.mxu1 %v1390_v47 }
  0x86   : > { %1031 = vmatprep.subr.bf16.mxu1 %v1393_v49 }
  0x87   : > { %991 = vmatpush2.bf16.msra.mxu0 %v1395_v50 }
  0x88   : > { %992 = vmatprep.subr.bf16.mxu0 %v1397_v52 }
  0x89   : > { %1032 = vmatpush2.bf16.msra.mxu1 %v1396_v51 }
  0x8a   : > { %1033 = vmatprep.subr.bf16.mxu1 %v1399_v53 }
  0x8b   : > { %993 = vmatpush2.bf16.msra.mxu0 %v1401_v54 }
  0x8c   : > { %994 = vmatprep.subr.bf16.mxu0 %v1403_v56 }
  0x8d   : > { %1034 = vmatpush2.bf16.msra.mxu1 %v1402_v55 }
  0x8e   : > { %1035 = vmatprep.subr.bf16.mxu1 %v1405_v57 }
  0x8f   : > { %995 = vmatpush2.bf16.msra.mxu0 %v1407_v58 }
  0x90   : > { %996 = vmatprep.subr.bf16.mxu0 %v1409_v60 }
  0x91   : > { %1036 = vmatpush2.bf16.msra.mxu1 %v1408_v59 }
  0x92   : > { %1037 = vmatprep.subr.bf16.mxu1 %v1411_v61 }
  0x93   : > { %997 = vmatpush2.bf16.msra.mxu0 %v1413_v62 }
  0x94   : > { %998 = vmatprep.subr.bf16.mxu0 %v1415_v2 }
  0x95   : > { %1038 = vmatpush2.bf16.msra.mxu1 %v1414_v63 }
  0x96   : > { %1039 = vmatprep.subr.bf16.mxu1 %v1417_v3 }
  0x97   : > { %999 = vmatpush2.bf16.msra.mxu0 %v1419_v4 }
  0x99   : > { %1040 = vmatpush2.bf16.msra.mxu1 %v1420_v5 }
  0x9a   : > { %1001 = vmatmul.mubr.bf16.vlgmr.msra.gmra.mxu0 %v1214_v6 }
  0x9c   : > { %1042 = vmatmul.mubr.bf16.vlgmr.msra.gmra.mxu1 %v1216_v7 }
 0x15a   : > { %v1002_v13 = vpop.f32.mrf.mxu0 }
 0x15c   : > { %v1043_v14 = vpop.f32.mrf.mxu1  ;;  %v1004_v18 = vpop.f32.mrf.mxu0 }
 0x15d   : > { %v1044_v15 = vadd.f32 %v1043_v14, %v1002_v13 }
 0x15e   : > { %v1045_v19 = vpop.f32.mrf.mxu1  ;;  %v1006_v23 = vpop.f32.mrf.mxu0 }
 0x15f   : > { %v1062_v20 = vmul.f32 %v1055_v12, %v1044_v15  ;;  %v1046_v21 = vadd.f32 %v1045_v19, %v1004_v18 }
 0x160   : > { %v1047_v24 = vpop.f32.mrf.mxu1  ;;  %v1007_v27 = vpop.f32.mrf.mxu0 }
 0x161   : > { %v1076_v25 = vadd.f32 %v1069_v16, %v1062_v20  ;;  %v1063_v26 = vmul.f32 %v1059_v17, %v1046_v21 }
 0x162   : > { %v1048_v28 = vpop.f32.mrf.mxu1 }
 0x163   : > { %1078 = vst [vmem:[%s566_s27] sm:$0xff] %v1076_v25  ;;  %v1077_v29 = vadd.f32 %v1073_v22, %v1063_v26 }
 0x165   : > { %1079 = vst [vmem:[%s566_s27 + $0x8] sm:$0xff] %v1077_v29 }
 0x166 PF: > { %s14_s19 = sadd.s32 1, %s1463_s19   ;;  %s1782_s15 = smov %s1451_s16 }
 0x167   : > { %p11_p10 = scmp.ge.s32.totalorder %s14_s19, 6   ;;  %s1783_s16 = smov %s1525_s23 }
 0x168   : > { %s1784_s17 = smov %s1459_s18  ;;  %s1785_s18 = smov %s1787_s20 }
 0x169   :  { %13 = sbr.rel (!%p11_p10) target bundleno = 3 (0x3), region = 118 }

// kernel: forward.28
= control target key start
LH: loop header
LB: loop body
LE: loop exit
PB: predicated region body
PF: predicated region fallthrough
CT: control target
= control target key end

     0   :  { %s922_s1 = inlined_call_operand.vmem [shape: bf16[128,128], index: 1, kind: input, shape index: {}]   ;;  %s923_s0 = inlined_call_operand.vmem [shape: bf16[256,128], index: 0, kind: input, shape index: {}]   ;;  %s924_s2 = inlined_call_operand.vmem [shape: f32[1,128], index: 2, kind: input, shape index: {}]   ;;  %s925_s3 = inlined_call_operand.vmem [shape: f32[1,128], index: 3, kind: input, shape index: {}]   ;;  %s926_s4 = inlined_call_operand.vmem [shape: f32[256,128], index: 4, kind: output, shape index: {}]  }
   0x1   :  { %v631_v0 = vld [vmem:[%s922_s1 + $0x38] sm:$0xff]   ;;  %v632_v1 = vld [vmem:[%s922_s1 + $0x30] sm:$0xff]   ;;  %v633_v2 = vld [vmem:[%s922_s1 + $0x28] sm:$0xff]  }
   0x2   :  { %567 = vmatprep.subr.bf16.mxu0 %v631_v0  ;;  %615 = vmatprep.subr.bf16.mxu1 %v631_v0  ;;  %v634_v3 = vld [vmem:[%s922_s1 + $0x20] sm:$0xff]   ;;  %v635_v6 = vld [vmem:[%s922_s1 + $0x18] sm:$0xff]   ;;  %v636_v7 = vld [vmem:[%s922_s1 + $0x10] sm:$0xff]  }
   0x3   :  { %568 = vmatpush3.bf16.msra.mxu0 %v631_v0  ;;  %623 = vmatpush3.bf16.msra.mxu1 %v631_v0  ;;  %v639_v4 = vld [vmem:[%s923_s0] sm:$0xff]   ;;  %v637_v8 = vld [vmem:[%s922_s1 + $0x8] sm:$0xff]   ;;  %v643_v12 = vld [vmem:[%s923_s0 + $0x10] sm:$0xff]  }
   0x4   :  { %569 = vmatprep.subr.bf16.mxu0 %v632_v1  ;;  %616 = vmatprep.subr.bf16.mxu1 %v632_v1  ;;  %v640_v5 = vld [vmem:[%s923_s0 + $0x40] sm:$0xff]   ;;  %v641_v10 = vld [vmem:[%s923_s0 + $0x8] sm:$0xff]   ;;  %v644_v13 = vld [vmem:[%s923_s0 + $0x50] sm:$0xff]  }
   0x5   :  { %583 = vmatprep.mubr.bf16.mxu0 %v639_v4  ;;  %599 = vmatprep.mubr.bf16.mxu1 %v640_v5  ;;  %v638_v9 = vld [vmem:[%s922_s1] sm:$0xff]   ;;  %v642_v11 = vld [vmem:[%s923_s0 + $0x48] sm:$0xff]   ;;  %v645_v14 = vld [vmem:[%s923_s0 + $0x18] sm:$0xff]  }
   0x6   :  { %v646_v15 = vld [vmem:[%s923_s0 + $0x58] sm:$0xff]   ;;  %v647_v16 = vld [vmem:[%s923_s0 + $0x20] sm:$0xff]   ;;  %v649_v18 = vld [vmem:[%s923_s0 + $0x28] sm:$0xff]  }
   0x7   :  { %570 = vmatpush3.bf16.msra.mxu0 %v632_v1  ;;  %624 = vmatpush3.bf16.msra.mxu1 %v632_v1  ;;  %v648_v17 = vld [vmem:[%s923_s0 + $0x60] sm:$0xff]   ;;  %v650_v19 = vld [vmem:[%s923_s0 + $0x68] sm:$0xff]   ;;  %v651_v20 = vld [vmem:[%s923_s0 + $0x30] sm:$0xff]  }
   0x8   :  { %571 = vmatprep.subr.bf16.mxu0 %v633_v2  ;;  %617 = vmatprep.subr.bf16.mxu1 %v633_v2  ;;  %v652_v21 = vld [vmem:[%s923_s0 + $0x70] sm:$0xff]   ;;  %v653_v22 = vld [vmem:[%s923_s0 + $0x38] sm:$0xff]   ;;  %v755_v24 = vld [vmem:[%s924_s2] ss:$0 sm:$0xff] }
   0x9   :  { %v654_v23 = vld [vmem:[%s923_s0 + $0x78] sm:$0xff]   ;;  %v760_v26 = vld [vmem:[%s925_s3] ss:$0 sm:$0xff] }
   0xb   :  { %572 = vmatpush3.bf16.msra.mxu0 %v633_v2  ;;  %625 = vmatpush3.bf16.msra.mxu1 %v633_v2 }
   0xc   :  { %573 = vmatprep.subr.bf16.mxu0 %v634_v3  ;;  %618 = vmatprep.subr.bf16.mxu1 %v634_v3 }
   0xf   :  { %574 = vmatpush3.bf16.msra.mxu0 %v634_v3  ;;  %626 = vmatpush3.bf16.msra.mxu1 %v634_v3 }
  0x10   :  { %575 = vmatprep.subr.bf16.mxu0 %v635_v6  ;;  %619 = vmatprep.subr.bf16.mxu1 %v635_v6 }
  0x13   :  { %576 = vmatpush3.bf16.msra.mxu0 %v635_v6  ;;  %627 = vmatpush3.bf16.msra.mxu1 %v635_v6 }
  0x14   :  { %577 = vmatprep.subr.bf16.mxu0 %v636_v7  ;;  %620 = vmatprep.subr.bf16.mxu1 %v636_v7 }
  0x17   :  { %578 = vmatpush3.bf16.msra.mxu0 %v636_v7  ;;  %628 = vmatpush3.bf16.msra.mxu1 %v636_v7 }
  0x18   :  { %579 = vmatprep.subr.bf16.mxu0 %v637_v8  ;;  %621 = vmatprep.subr.bf16.mxu1 %v637_v8 }
  0x1b   :  { %580 = vmatpush3.bf16.msra.mxu0 %v637_v8  ;;  %629 = vmatpush3.bf16.msra.mxu1 %v637_v8 }
  0x1c   :  { %581 = vmatprep.subr.bf16.mxu0 %v638_v9  ;;  %622 = vmatprep.subr.bf16.mxu1 %v638_v9 }
  0x1f   :  { %582 = vmatpush3.bf16.msra.mxu0 %v638_v9  ;;  %630 = vmatpush3.bf16.msra.mxu1 %v638_v9 }
  0x22   :  { %584 = vmatmul.mubr.bf16.vlgmr.msra.gmra.mxu0 %v641_v10  ;;  %600 = vmatmul.mubr.bf16.vlgmr.msra.gmra.mxu1 %v642_v11 }
  0x23   :  { %587 = vmatprep.mubr.bf16.mxu0 %v643_v12  ;;  %603 = vmatprep.mubr.bf16.mxu1 %v644_v13 }
  0x2a   :  { %588 = vmatmul.mubr.bf16.gmra.mxu0 %v645_v14  ;;  %604 = vmatmul.mubr.bf16.gmra.mxu1 %v646_v15 }
  0x2b   :  { %591 = vmatprep.mubr.bf16.mxu0 %v647_v16  ;;  %607 = vmatprep.mubr.bf16.mxu1 %v648_v17 }
  0x32   :  { %592 = vmatmul.mubr.bf16.gmra.mxu0 %v649_v18  ;;  %608 = vmatmul.mubr.bf16.gmra.mxu1 %v650_v19 }
  0x33   :  { %595 = vmatprep.mubr.bf16.mxu0 %v651_v20  ;;  %611 = vmatprep.mubr.bf16.mxu1 %v652_v21 }
  0x3a   :  { %596 = vmatmul.mubr.bf16.gmra.mxu0 %v653_v22  ;;  %612 = vmatmul.mubr.bf16.gmra.mxu1 %v654_v23 }
  0xe2   :  { %v585_v25 = vpop.f32.mrf.mxu0  ;;  %v601_v27 = vpop.f32.mrf.mxu1 }
  0xe3   :  { %v380_v28 = vmul.f32 %v585_v25, %v755_v24  ;;  %v396_v29 = vmul.f32 %v601_v27, %v755_v24 }
  0xe4   :  { %v244_v30 = vpop.f32.mrf.mxu0  ;;  %v308_v31 = vpop.f32.mrf.mxu1 }
  0xe5   :  { %v419_v32 = vadd.f32 %v760_v26, %v380_v28  ;;  %v435_v33 = vadd.f32 %v760_v26, %v396_v29  ;;  %v378_v34 = vmul.f32 %v755_v24, %v244_v30  ;;  %v394_v35 = vmul.f32 %v755_v24, %v308_v31 }
  0xe6   :  { %v586_v36 = vpop.f32.mrf.mxu0  ;;  %v602_v37 = vpop.f32.mrf.mxu1 }
  0xe7   :  { %v451_v38 = vmax.f32 %v419_v32, 0.0  ;;  %v467_v39 = vmax.f32 %v435_v33, 0.0  ;;  %v417_v40 = vadd.f32 %v760_v26, %v378_v34  ;;  %v433_v41 = vadd.f32 %v760_v26, %v394_v35 }
  0xe8   :  { %v381_v42 = vmul.f32 %v586_v36, %v755_v24  ;;  %v397_v43 = vmul.f32 %v602_v37, %v755_v24  ;;  %v247_v44 = vpop.f32.mrf.mxu0  ;;  %v311_v45 = vpop.f32.mrf.mxu1 }
  0xe9   :  { %483 = vst [vmem:[%s926_s4 + $0x10] sm:$0xff] %v451_v38  ;;  %499 = vst [vmem:[%s926_s4 + $0x90] sm:$0xff] %v467_v39  ;;  %v449_v46 = vmax.f32 %v417_v40, 0.0  ;;  %v465_v47 = vmax.f32 %v433_v41, 0.0  ;;  %v379_v48 = vmul.f32 %v755_v24, %v247_v44  ;;  %v395_v49 = vmul.f32 %v755_v24, %v311_v45 }
  0xea   :  { %v420_v50 = vadd.f32 %v760_v26, %v381_v42  ;;  %v436_v51 = vadd.f32 %v760_v26, %v397_v43  ;;  %v589_v52 = vpop.f32.mrf.mxu0  ;;  %v605_v53 = vpop.f32.mrf.mxu1 }
  0xeb   :  { %481 = vst [vmem:[%s926_s4] sm:$0xff] %v449_v46  ;;  %497 = vst [vmem:[%s926_s4 + $0x80] sm:$0xff] %v465_v47  ;;  %v418_v54 = vadd.f32 %v760_v26, %v379_v48  ;;  %v434_v55 = vadd.f32 %v760_v26, %v395_v49  ;;  %v384_v56 = vmul.f32 %v589_v52, %v755_v24 }
  0xec   :  { %v400_v57 = vmul.f32 %v605_v53, %v755_v24  ;;  %v452_v58 = vmax.f32 %v420_v50, 0.0  ;;  %v468_v59 = vmax.f32 %v436_v51, 0.0  ;;  %v260_v60 = vpop.f32.mrf.mxu0  ;;  %v324_v61 = vpop.f32.mrf.mxu1 }
  0xed   :  { %v450_v62 = vmax.f32 %v418_v54, 0.0  ;;  %v466_v63 = vmax.f32 %v434_v55, 0.0  ;;  %v423_v0 = vadd.f32 %v760_v26, %v384_v56  ;;  %v382_v2 = vmul.f32 %v755_v24, %v260_v60 }
  0xee   :  { %v439_v1 = vadd.f32 %v760_v26, %v400_v57  ;;  %484 = vst [vmem:[%s926_s4 + $0x18] sm:$0xff] %v452_v58  ;;  %500 = vst [vmem:[%s926_s4 + $0x98] sm:$0xff] %v468_v59  ;;  %v398_v3 = vmul.f32 %v755_v24, %v324_v61  ;;  %v590_v4 = vpop.f32.mrf.mxu0  ;;  %v606_v5 = vpop.f32.mrf.mxu1 }
  0xef   :  { %482 = vst [vmem:[%s926_s4 + $0x8] sm:$0xff] %v450_v62  ;;  %498 = vst [vmem:[%s926_s4 + $0x88] sm:$0xff] %v466_v63  ;;  %v455_v6 = vmax.f32 %v423_v0, 0.0  ;;  %v385_v8 = vmul.f32 %v590_v4, %v755_v24  ;;  %v401_v9 = vmul.f32 %v606_v5, %v755_v24  ;;  %v421_v10 = vadd.f32 %v760_v26, %v382_v2 }
  0xf0   :  { %v471_v7 = vmax.f32 %v439_v1, 0.0  ;;  %v437_v11 = vadd.f32 %v760_v26, %v398_v3  ;;  %v263_v12 = vpop.f32.mrf.mxu0  ;;  %v327_v13 = vpop.f32.mrf.mxu1 }
  0xf1   :  { %487 = vst [vmem:[%s926_s4 + $0x30] sm:$0xff] %v455_v6  ;;  %v424_v14 = vadd.f32 %v760_v26, %v385_v8  ;;  %v440_v15 = vadd.f32 %v760_v26, %v401_v9  ;;  %v383_v16 = vmul.f32 %v755_v24, %v263_v12  ;;  %v399_v17 = vmul.f32 %v755_v24, %v327_v13 }
  0xf2   :  { %503 = vst [vmem:[%s926_s4 + $0xb0] sm:$0xff] %v471_v7  ;;  %v453_v18 = vmax.f32 %v421_v10, 0.0  ;;  %v469_v19 = vmax.f32 %v437_v11, 0.0  ;;  %v593_v20 = vpop.f32.mrf.mxu0  ;;  %v609_v21 = vpop.f32.mrf.mxu1 }
  0xf3   :  { %v456_v22 = vmax.f32 %v424_v14, 0.0  ;;  %v472_v23 = vmax.f32 %v440_v15, 0.0  ;;  %v422_v25 = vadd.f32 %v760_v26, %v383_v16  ;;  %v438_v27 = vadd.f32 %v760_v26, %v399_v17 }
  0xf4   :  { %485 = vst [vmem:[%s926_s4 + $0x20] sm:$0xff] %v453_v18  ;;  %501 = vst [vmem:[%s926_s4 + $0xa0] sm:$0xff] %v469_v19  ;;  %v388_v28 = vmul.f32 %v593_v20, %v755_v24  ;;  %v404_v29 = vmul.f32 %v609_v21, %v755_v24  ;;  %v276_v30 = vpop.f32.mrf.mxu0  ;;  %v340_v31 = vpop.f32.mrf.mxu1 }
  0xf5   :  { %488 = vst [vmem:[%s926_s4 + $0x38] sm:$0xff] %v456_v22  ;;  %504 = vst [vmem:[%s926_s4 + $0xb8] sm:$0xff] %v472_v23  ;;  %v454_v32 = vmax.f32 %v422_v25, 0.0  ;;  %v470_v33 = vmax.f32 %v438_v27, 0.0  ;;  %v386_v34 = vmul.f32 %v755_v24, %v276_v30  ;;  %v402_v35 = vmul.f32 %v755_v24, %v340_v31 }
  0xf6   :  { %v427_v36 = vadd.f32 %v760_v26, %v388_v28  ;;  %v443_v37 = vadd.f32 %v760_v26, %v404_v29  ;;  %v594_v38 = vpop.f32.mrf.mxu0  ;;  %v610_v39 = vpop.f32.mrf.mxu1 }
  0xf7   :  { %486 = vst [vmem:[%s926_s4 + $0x28] sm:$0xff] %v454_v32  ;;  %502 = vst [vmem:[%s926_s4 + $0xa8] sm:$0xff] %v470_v33  ;;  %v425_v40 = vadd.f32 %v760_v26, %v386_v34  ;;  %v441_v41 = vadd.f32 %v760_v26, %v402_v35  ;;  %v389_v42 = vmul.f32 %v594_v38, %v755_v24 }
  0xf8   :  { %v405_v43 = vmul.f32 %v610_v39, %v755_v24  ;;  %v459_v44 = vmax.f32 %v427_v36, 0.0  ;;  %v475_v45 = vmax.f32 %v443_v37, 0.0  ;;  %v279_v46 = vpop.f32.mrf.mxu0  ;;  %v343_v47 = vpop.f32.mrf.mxu1 }
  0xf9   :  { %v457_v48 = vmax.f32 %v425_v40, 0.0  ;;  %v473_v49 = vmax.f32 %v441_v41, 0.0  ;;  %v428_v50 = vadd.f32 %v760_v26, %v389_v42  ;;  %v387_v52 = vmul.f32 %v755_v24, %v279_v46 }
  0xfa   :  { %v444_v51 = vadd.f32 %v760_v26, %v405_v43  ;;  %491 = vst [vmem:[%s926_s4 + $0x50] sm:$0xff] %v459_v44  ;;  %507 = vst [vmem:[%s926_s4 + $0xd0] sm:$0xff] %v475_v45  ;;  %v403_v53 = vmul.f32 %v755_v24, %v343_v47  ;;  %v597_v54 = vpop.f32.mrf.mxu0  ;;  %v613_v55 = vpop.f32.mrf.mxu1 }
  0xfb   :  { %489 = vst [vmem:[%s926_s4 + $0x40] sm:$0xff] %v457_v48  ;;  %505 = vst [vmem:[%s926_s4 + $0xc0] sm:$0xff] %v473_v49  ;;  %v460_v56 = vmax.f32 %v428_v50, 0.0  ;;  %v392_v58 = vmul.f32 %v597_v54, %v755_v24  ;;  %v408_v59 = vmul.f32 %v613_v55, %v755_v24  ;;  %v426_v60 = vadd.f32 %v760_v26, %v387_v52 }
  0xfc   :  { %v476_v57 = vmax.f32 %v444_v51, 0.0  ;;  %v442_v61 = vadd.f32 %v760_v26, %v403_v53  ;;  %v292_v62 = vpop.f32.mrf.mxu0  ;;  %v356_v63 = vpop.f32.mrf.mxu1 }
  0xfd   :  { %492 = vst [vmem:[%s926_s4 + $0x58] sm:$0xff] %v460_v56  ;;  %v431_v0 = vadd.f32 %v760_v26, %v392_v58  ;;  %v447_v1 = vadd.f32 %v760_v26, %v408_v59  ;;  %v390_v2 = vmul.f32 %v755_v24, %v292_v62  ;;  %v406_v3 = vmul.f32 %v755_v24, %v356_v63 }
  0xfe   :  { %508 = vst [vmem:[%s926_s4 + $0xd8] sm:$0xff] %v476_v57  ;;  %v458_v4 = vmax.f32 %v426_v60, 0.0  ;;  %v474_v5 = vmax.f32 %v442_v61, 0.0  ;;  %v598_v6 = vpop.f32.mrf.mxu0  ;;  %v614_v7 = vpop.f32.mrf.mxu1 }
  0xff   :  { %v463_v8 = vmax.f32 %v431_v0, 0.0  ;;  %v479_v9 = vmax.f32 %v447_v1, 0.0  ;;  %v429_v10 = vadd.f32 %v760_v26, %v390_v2  ;;  %v445_v11 = vadd.f32 %v760_v26, %v406_v3 }
 0x100   :  { %490 = vst [vmem:[%s926_s4 + $0x48] sm:$0xff] %v458_v4  ;;  %506 = vst [vmem:[%s926_s4 + $0xc8] sm:$0xff] %v474_v5  ;;  %v393_v12 = vmul.f32 %v598_v6, %v755_v24  ;;  %v409_v13 = vmul.f32 %v614_v7, %v755_v24  ;;  %v295_v14 = vpop.f32.mrf.mxu0  ;;  %v359_v15 = vpop.f32.mrf.mxu1 }
 0x101   :  { %495 = vst [vmem:[%s926_s4 + $0x70] sm:$0xff] %v463_v8  ;;  %511 = vst [vmem:[%s926_s4 + $0xf0] sm:$0xff] %v479_v9  ;;  %v461_v16 = vmax.f32 %v429_v10, 0.0  ;;  %v477_v17 = vmax.f32 %v445_v11, 0.0  ;;  %v391_v18 = vmul.f32 %v755_v24, %v295_v14  ;;  %v407_v19 = vmul.f32 %v755_v24, %v359_v15 }
 0x102   :  { %v432_v20 = vadd.f32 %v760_v26, %v393_v12  ;;  %v448_v21 = vadd.f32 %v760_v26, %v409_v13 }
 0x103   :  { %493 = vst [vmem:[%s926_s4 + $0x60] sm:$0xff] %v461_v16  ;;  %509 = vst [vmem:[%s926_s4 + $0xe0] sm:$0xff] %v477_v17  ;;  %v430_v22 = vadd.f32 %v760_v26, %v391_v18  ;;  %v446_v23 = vadd.f32 %v760_v26, %v407_v19 }
 0x104   :  { %v464_v25 = vmax.f32 %v432_v20, 0.0  ;;  %v480_v27 = vmax.f32 %v448_v21, 0.0 }
 0x105   :  { %v462_v28 = vmax.f32 %v430_v22, 0.0  ;;  %v478_v24 = vmax.f32 %v446_v23, 0.0 }
 0x106   :  { %496 = vst [vmem:[%s926_s4 + $0x78] sm:$0xff] %v464_v25  ;;  %512 = vst [vmem:[%s926_s4 + $0xf8] sm:$0xff] %v480_v27 }
 0x107   :  { %494 = vst [vmem:[%s926_s4 + $0x68] sm:$0xff] %v462_v28  ;;  %510 = vst [vmem:[%s926_s4 + $0xe8] sm:$0xff] %v478_v24 }

// kernel: forward.29
= control target key start
LH: loop header
LB: loop body
LE: loop exit
PB: predicated region body
PF: predicated region fallthrough
CT: control target
= control target key end

     0   :  { %s586_s1 = inlined_call_operand.vmem [shape: bf16[128,128], index: 1, kind: input, shape index: {}]   ;;  %s587_s0 = inlined_call_operand.vmem [shape: bf16[128,128], index: 0, kind: input, shape index: {}]   ;;  %s588_s2 = inlined_call_operand.vmem [shape: f32[1,128], index: 2, kind: input, shape index: {}]   ;;  %s589_s3 = inlined_call_operand.vmem [shape: f32[1,128], index: 3, kind: input, shape index: {}]   ;;  %s590_s4 = inlined_call_operand.vmem [shape: f32[128,128], index: 4, kind: output, shape index: {}]  }
   0x1   :  { %v407_v0 = vld [vmem:[%s586_s1 + $0x38] sm:$0xff]   ;;  %v408_v1 = vld [vmem:[%s586_s1 + $0x30] sm:$0xff]   ;;  %v409_v2 = vld [vmem:[%s586_s1 + $0x28] sm:$0xff]  }
   0x2   :  { %359 = vmatprep.subr.bf16.mxu0 %v407_v0  ;;  %391 = vmatprep.subr.bf16.mxu1 %v407_v0  ;;  %v410_v3 = vld [vmem:[%s586_s1 + $0x20] sm:$0xff]   ;;  %v411_v6 = vld [vmem:[%s586_s1 + $0x18] sm:$0xff]   ;;  %v412_v7 = vld [vmem:[%s586_s1 + $0x10] sm:$0xff]  }
   0x3   :  { %360 = vmatpush3.bf16.msra.mxu0 %v407_v0  ;;  %399 = vmatpush3.bf16.msra.mxu1 %v407_v0  ;;  %v415_v4 = vld [vmem:[%s587_s0] sm:$0xff]   ;;  %v413_v8 = vld [vmem:[%s586_s1 + $0x8] sm:$0xff]   ;;  %v419_v12 = vld [vmem:[%s587_s0 + $0x10] sm:$0xff]  }
   0x4   :  { %361 = vmatprep.subr.bf16.mxu0 %v408_v1  ;;  %392 = vmatprep.subr.bf16.mxu1 %v408_v1  ;;  %v416_v5 = vld [vmem:[%s587_s0 + $0x20] sm:$0xff]   ;;  %v417_v10 = vld [vmem:[%s587_s0 + $0x8] sm:$0xff]   ;;  %v420_v13 = vld [vmem:[%s587_s0 + $0x30] sm:$0xff]  }
   0x5   :  { %375 = vmatprep.mubr.bf16.mxu0 %v415_v4  ;;  %383 = vmatprep.mubr.bf16.mxu1 %v416_v5  ;;  %v414_v9 = vld [vmem:[%s586_s1] sm:$0xff]   ;;  %v418_v11 = vld [vmem:[%s587_s0 + $0x28] sm:$0xff]   ;;  %v421_v14 = vld [vmem:[%s587_s0 + $0x18] sm:$0xff]  }
   0x6   :  { %v422_v15 = vld [vmem:[%s587_s0 + $0x38] sm:$0xff]   ;;  %v499_v16 = vld [vmem:[%s588_s2] ss:$0 sm:$0xff] }
   0x7   :  { %362 = vmatpush3.bf16.msra.mxu0 %v408_v1  ;;  %400 = vmatpush3.bf16.msra.mxu1 %v408_v1  ;;  %v504_v18 = vld [vmem:[%s589_s3] ss:$0 sm:$0xff] }
   0x8   :  { %363 = vmatprep.subr.bf16.mxu0 %v409_v2  ;;  %393 = vmatprep.subr.bf16.mxu1 %v409_v2 }
   0xb   :  { %364 = vmatpush3.bf16.msra.mxu0 %v409_v2  ;;  %401 = vmatpush3.bf16.msra.mxu1 %v409_v2 }
   0xc   :  { %365 = vmatprep.subr.bf16.mxu0 %v410_v3  ;;  %394 = vmatprep.subr.bf16.mxu1 %v410_v3 }
   0xf   :  { %366 = vmatpush3.bf16.msra.mxu0 %v410_v3  ;;  %402 = vmatpush3.bf16.msra.mxu1 %v410_v3 }
  0x10   :  { %367 = vmatprep.subr.bf16.mxu0 %v411_v6  ;;  %395 = vmatprep.subr.bf16.mxu1 %v411_v6 }
  0x13   :  { %368 = vmatpush3.bf16.msra.mxu0 %v411_v6  ;;  %403 = vmatpush3.bf16.msra.mxu1 %v411_v6 }
  0x14   :  { %369 = vmatprep.subr.bf16.mxu0 %v412_v7  ;;  %396 = vmatprep.subr.bf16.mxu1 %v412_v7 }
  0x17   :  { %370 = vmatpush3.bf16.msra.mxu0 %v412_v7  ;;  %404 = vmatpush3.bf16.msra.mxu1 %v412_v7 }
  0x18   :  { %371 = vmatprep.subr.bf16.mxu0 %v413_v8  ;;  %397 = vmatprep.subr.bf16.mxu1 %v413_v8 }
  0x1b   :  { %372 = vmatpush3.bf16.msra.mxu0 %v413_v8  ;;  %405 = vmatpush3.bf16.msra.mxu1 %v413_v8 }
  0x1c   :  { %373 = vmatprep.subr.bf16.mxu0 %v414_v9  ;;  %398 = vmatprep.subr.bf16.mxu1 %v414_v9 }
  0x1f   :  { %374 = vmatpush3.bf16.msra.mxu0 %v414_v9  ;;  %406 = vmatpush3.bf16.msra.mxu1 %v414_v9 }
  0x22   :  { %376 = vmatmul.mubr.bf16.vlgmr.msra.gmra.mxu0 %v417_v10  ;;  %384 = vmatmul.mubr.bf16.vlgmr.msra.gmra.mxu1 %v418_v11 }
  0x23   :  { %379 = vmatprep.mubr.bf16.mxu0 %v419_v12  ;;  %387 = vmatprep.mubr.bf16.mxu1 %v420_v13 }
  0x2a   :  { %380 = vmatmul.mubr.bf16.gmra.mxu0 %v421_v14  ;;  %388 = vmatmul.mubr.bf16.gmra.mxu1 %v422_v15 }
  0xe2   :  { %v377_v17 = vpop.f32.mrf.mxu0  ;;  %v385_v19 = vpop.f32.mrf.mxu1 }
  0xe3   :  { %v252_v20 = vmul.f32 %v377_v17, %v499_v16  ;;  %v260_v21 = vmul.f32 %v385_v19, %v499_v16 }
  0xe4   :  { %v180_v22 = vpop.f32.mrf.mxu0  ;;  %v212_v23 = vpop.f32.mrf.mxu1 }
  0xe5   :  { %v275_v24 = vadd.f32 %v504_v18, %v252_v20  ;;  %v283_v25 = vadd.f32 %v504_v18, %v260_v21  ;;  %v250_v26 = vmul.f32 %v499_v16, %v180_v22  ;;  %v258_v27 = vmul.f32 %v499_v16, %v212_v23 }
  0xe6   :  { %v378_v28 = vpop.f32.mrf.mxu0  ;;  %v386_v29 = vpop.f32.mrf.mxu1 }
  0xe7   :  { %v291_v30 = vmax.f32 %v275_v24, 0.0  ;;  %v299_v31 = vmax.f32 %v283_v25, 0.0  ;;  %v273_v32 = vadd.f32 %v504_v18, %v250_v26  ;;  %v281_v33 = vadd.f32 %v504_v18, %v258_v27 }
  0xe8   :  { %v253_v34 = vmul.f32 %v378_v28, %v499_v16  ;;  %v261_v35 = vmul.f32 %v386_v29, %v499_v16  ;;  %v183_v36 = vpop.f32.mrf.mxu0  ;;  %v215_v37 = vpop.f32.mrf.mxu1 }
  0xe9   :  { %307 = vst [vmem:[%s590_s4 + $0x10] sm:$0xff] %v291_v30  ;;  %315 = vst [vmem:[%s590_s4 + $0x50] sm:$0xff] %v299_v31  ;;  %v289_v38 = vmax.f32 %v273_v32, 0.0  ;;  %v297_v39 = vmax.f32 %v281_v33, 0.0  ;;  %v251_v40 = vmul.f32 %v499_v16, %v183_v36  ;;  %v259_v41 = vmul.f32 %v499_v16, %v215_v37 }
  0xea   :  { %v276_v42 = vadd.f32 %v504_v18, %v253_v34  ;;  %v284_v43 = vadd.f32 %v504_v18, %v261_v35  ;;  %v381_v44 = vpop.f32.mrf.mxu0  ;;  %v389_v45 = vpop.f32.mrf.mxu1 }
  0xeb   :  { %305 = vst [vmem:[%s590_s4] sm:$0xff] %v289_v38  ;;  %313 = vst [vmem:[%s590_s4 + $0x40] sm:$0xff] %v297_v39  ;;  %v274_v46 = vadd.f32 %v504_v18, %v251_v40  ;;  %v282_v47 = vadd.f32 %v504_v18, %v259_v41  ;;  %v256_v48 = vmul.f32 %v381_v44, %v499_v16 }
  0xec   :  { %v264_v49 = vmul.f32 %v389_v45, %v499_v16  ;;  %v292_v50 = vmax.f32 %v276_v42, 0.0  ;;  %v300_v51 = vmax.f32 %v284_v43, 0.0  ;;  %v196_v52 = vpop.f32.mrf.mxu0  ;;  %v228_v53 = vpop.f32.mrf.mxu1 }
  0xed   :  { %v290_v54 = vmax.f32 %v274_v46, 0.0  ;;  %v298_v55 = vmax.f32 %v282_v47, 0.0  ;;  %v279_v56 = vadd.f32 %v504_v18, %v256_v48  ;;  %v254_v58 = vmul.f32 %v499_v16, %v196_v52 }
  0xee   :  { %v287_v57 = vadd.f32 %v504_v18, %v264_v49  ;;  %308 = vst [vmem:[%s590_s4 + $0x18] sm:$0xff] %v292_v50  ;;  %316 = vst [vmem:[%s590_s4 + $0x58] sm:$0xff] %v300_v51  ;;  %v262_v59 = vmul.f32 %v499_v16, %v228_v53  ;;  %v382_v60 = vpop.f32.mrf.mxu0  ;;  %v390_v61 = vpop.f32.mrf.mxu1 }
  0xef   :  { %306 = vst [vmem:[%s590_s4 + $0x8] sm:$0xff] %v290_v54  ;;  %314 = vst [vmem:[%s590_s4 + $0x48] sm:$0xff] %v298_v55  ;;  %v295_v62 = vmax.f32 %v279_v56, 0.0  ;;  %v257_v0 = vmul.f32 %v382_v60, %v499_v16  ;;  %v265_v1 = vmul.f32 %v390_v61, %v499_v16  ;;  %v277_v2 = vadd.f32 %v504_v18, %v254_v58 }
  0xf0   :  { %v303_v63 = vmax.f32 %v287_v57, 0.0  ;;  %v285_v3 = vadd.f32 %v504_v18, %v262_v59  ;;  %v199_v4 = vpop.f32.mrf.mxu0  ;;  %v231_v5 = vpop.f32.mrf.mxu1 }
  0xf1   :  { %311 = vst [vmem:[%s590_s4 + $0x30] sm:$0xff] %v295_v62  ;;  %v280_v6 = vadd.f32 %v504_v18, %v257_v0  ;;  %v288_v7 = vadd.f32 %v504_v18, %v265_v1  ;;  %v255_v8 = vmul.f32 %v499_v16, %v199_v4  ;;  %v263_v9 = vmul.f32 %v499_v16, %v231_v5 }
  0xf2   :  { %319 = vst [vmem:[%s590_s4 + $0x70] sm:$0xff] %v303_v63  ;;  %v293_v10 = vmax.f32 %v277_v2, 0.0  ;;  %v301_v11 = vmax.f32 %v285_v3, 0.0 }
  0xf3   :  { %v296_v12 = vmax.f32 %v280_v6, 0.0  ;;  %v304_v13 = vmax.f32 %v288_v7, 0.0  ;;  %v278_v14 = vadd.f32 %v504_v18, %v255_v8  ;;  %v286_v15 = vadd.f32 %v504_v18, %v263_v9 }
  0xf4   :  { %309 = vst [vmem:[%s590_s4 + $0x20] sm:$0xff] %v293_v10  ;;  %317 = vst [vmem:[%s590_s4 + $0x60] sm:$0xff] %v301_v11 }
  0xf5   :  { %312 = vst [vmem:[%s590_s4 + $0x38] sm:$0xff] %v296_v12  ;;  %320 = vst [vmem:[%s590_s4 + $0x78] sm:$0xff] %v304_v13  ;;  %v294_v16 = vmax.f32 %v278_v14, 0.0  ;;  %v302_v17 = vmax.f32 %v286_v15, 0.0 }
  0xf7   :  { %310 = vst [vmem:[%s590_s4 + $0x28] sm:$0xff] %v294_v16  ;;  %318 = vst [vmem:[%s590_s4 + $0x68] sm:$0xff] %v302_v17 }

// kernel: forward.30
= control target key start
LH: loop header
LB: loop body
LE: loop exit
PB: predicated region body
PF: predicated region fallthrough
CT: control target
= control target key end

     0   :  { %s398_s1 = inlined_call_operand.vmem [shape: bf16[128,128], index: 1, kind: input, shape index: {}]   ;;  %s399_s0 = inlined_call_operand.vmem [shape: bf16[64,128], index: 0, kind: input, shape index: {}]   ;;  %s400_s2 = inlined_call_operand.vmem [shape: f32[1,128], index: 2, kind: input, shape index: {}]   ;;  %s401_s3 = inlined_call_operand.vmem [shape: f32[1,128], index: 3, kind: input, shape index: {}]   ;;  %s402_s4 = inlined_call_operand.vmem [shape: f32[64,128], index: 4, kind: output, shape index: {}]  }
   0x1   :  { %v295_v0 = vld [vmem:[%s398_s1 + $0x38] sm:$0xff]   ;;  %v296_v1 = vld [vmem:[%s398_s1 + $0x30] sm:$0xff]   ;;  %v297_v2 = vld [vmem:[%s398_s1 + $0x28] sm:$0xff]  }
   0x2   :  { %255 = vmatprep.subr.bf16.mxu0 %v295_v0  ;;  %279 = vmatprep.subr.bf16.mxu1 %v295_v0  ;;  %v298_v3 = vld [vmem:[%s398_s1 + $0x20] sm:$0xff]   ;;  %v304_v5 = vld [vmem:[%s399_s0 + $0x10] sm:$0xff]   ;;  %v299_v6 = vld [vmem:[%s398_s1 + $0x18] sm:$0xff]  }
   0x3   :  { %256 = vmatpush3.bf16.msra.mxu0 %v295_v0  ;;  %287 = vmatpush3.bf16.msra.mxu1 %v295_v0  ;;  %v303_v4 = vld [vmem:[%s399_s0] sm:$0xff]   ;;  %v300_v7 = vld [vmem:[%s398_s1 + $0x10] sm:$0xff]   ;;  %v301_v8 = vld [vmem:[%s398_s1 + $0x8] sm:$0xff]  }
   0x4   :  { %257 = vmatprep.subr.bf16.mxu0 %v296_v1  ;;  %280 = vmatprep.subr.bf16.mxu1 %v296_v1  ;;  %v302_v9 = vld [vmem:[%s398_s1] sm:$0xff]   ;;  %v305_v10 = vld [vmem:[%s399_s0 + $0x8] sm:$0xff]   ;;  %v306_v11 = vld [vmem:[%s399_s0 + $0x18] sm:$0xff]  }
   0x5   :  { %271 = vmatprep.mubr.bf16.mxu0 %v303_v4  ;;  %275 = vmatprep.mubr.bf16.mxu1 %v304_v5  ;;  %v241_v12 = vld [vmem:[%s400_s2] ss:$0 sm:$0xff] }
   0x6   :  { %v242_v14 = vld [vmem:[%s401_s3] ss:$0 sm:$0xff] }
   0x7   :  { %258 = vmatpush3.bf16.msra.mxu0 %v296_v1  ;;  %288 = vmatpush3.bf16.msra.mxu1 %v296_v1 }
   0x8   :  { %259 = vmatprep.subr.bf16.mxu0 %v297_v2  ;;  %281 = vmatprep.subr.bf16.mxu1 %v297_v2 }
   0xb   :  { %260 = vmatpush3.bf16.msra.mxu0 %v297_v2  ;;  %289 = vmatpush3.bf16.msra.mxu1 %v297_v2 }
   0xc   :  { %261 = vmatprep.subr.bf16.mxu0 %v298_v3  ;;  %282 = vmatprep.subr.bf16.mxu1 %v298_v3 }
   0xf   :  { %262 = vmatpush3.bf16.msra.mxu0 %v298_v3  ;;  %290 = vmatpush3.bf16.msra.mxu1 %v298_v3 }
  0x10   :  { %263 = vmatprep.subr.bf16.mxu0 %v299_v6  ;;  %283 = vmatprep.subr.bf16.mxu1 %v299_v6 }
  0x13   :  { %264 = vmatpush3.bf16.msra.mxu0 %v299_v6  ;;  %291 = vmatpush3.bf16.msra.mxu1 %v299_v6 }
  0x14   :  { %265 = vmatprep.subr.bf16.mxu0 %v300_v7  ;;  %284 = vmatprep.subr.bf16.mxu1 %v300_v7 }
  0x17   :  { %266 = vmatpush3.bf16.msra.mxu0 %v300_v7  ;;  %292 = vmatpush3.bf16.msra.mxu1 %v300_v7 }
  0x18   :  { %267 = vmatprep.subr.bf16.mxu0 %v301_v8  ;;  %285 = vmatprep.subr.bf16.mxu1 %v301_v8 }
  0x1b   :  { %268 = vmatpush3.bf16.msra.mxu0 %v301_v8  ;;  %293 = vmatpush3.bf16.msra.mxu1 %v301_v8 }
  0x1c   :  { %269 = vmatprep.subr.bf16.mxu0 %v302_v9  ;;  %286 = vmatprep.subr.bf16.mxu1 %v302_v9 }
  0x1f   :  { %270 = vmatpush3.bf16.msra.mxu0 %v302_v9  ;;  %294 = vmatpush3.bf16.msra.mxu1 %v302_v9 }
  0x22   :  { %272 = vmatmul.mubr.bf16.vlgmr.msra.gmra.mxu0 %v305_v10  ;;  %276 = vmatmul.mubr.bf16.vlgmr.msra.gmra.mxu1 %v306_v11 }
  0xe2   :  { %v273_v13 = vpop.f32.mrf.mxu0  ;;  %v277_v15 = vpop.f32.mrf.mxu1 }
  0xe3   :  { %v188_v16 = vmul.f32 %v273_v13, %v241_v12  ;;  %v192_v17 = vmul.f32 %v277_v15, %v241_v12 }
  0xe4   :  { %v148_v18 = vpop.f32.mrf.mxu0  ;;  %v164_v19 = vpop.f32.mrf.mxu1 }
  0xe5   :  { %v203_v20 = vadd.f32 %v242_v14, %v188_v16  ;;  %v207_v21 = vadd.f32 %v242_v14, %v192_v17  ;;  %v186_v22 = vmul.f32 %v241_v12, %v148_v18  ;;  %v190_v23 = vmul.f32 %v241_v12, %v164_v19 }
  0xe6   :  { %v274_v24 = vpop.f32.mrf.mxu0  ;;  %v278_v25 = vpop.f32.mrf.mxu1 }
  0xe7   :  { %v211_v26 = vmax.f32 %v203_v20, 0.0  ;;  %v215_v27 = vmax.f32 %v207_v21, 0.0  ;;  %v201_v28 = vadd.f32 %v242_v14, %v186_v22  ;;  %v205_v29 = vadd.f32 %v242_v14, %v190_v23 }
  0xe8   :  { %v189_v30 = vmul.f32 %v274_v24, %v241_v12  ;;  %v193_v31 = vmul.f32 %v278_v25, %v241_v12  ;;  %v151_v32 = vpop.f32.mrf.mxu0  ;;  %v167_v33 = vpop.f32.mrf.mxu1 }
  0xe9   :  { %219 = vst [vmem:[%s402_s4 + $0x10] sm:$0xff] %v211_v26  ;;  %223 = vst [vmem:[%s402_s4 + $0x30] sm:$0xff] %v215_v27  ;;  %v209_v34 = vmax.f32 %v201_v28, 0.0  ;;  %v213_v35 = vmax.f32 %v205_v29, 0.0  ;;  %v187_v36 = vmul.f32 %v241_v12, %v151_v32  ;;  %v191_v37 = vmul.f32 %v241_v12, %v167_v33 }
  0xea   :  { %v204_v38 = vadd.f32 %v242_v14, %v189_v30  ;;  %v208_v39 = vadd.f32 %v242_v14, %v193_v31 }
  0xeb   :  { %217 = vst [vmem:[%s402_s4] sm:$0xff] %v209_v34  ;;  %221 = vst [vmem:[%s402_s4 + $0x20] sm:$0xff] %v213_v35  ;;  %v202_v40 = vadd.f32 %v242_v14, %v187_v36  ;;  %v206_v41 = vadd.f32 %v242_v14, %v191_v37 }
  0xec   :  { %v212_v42 = vmax.f32 %v204_v38, 0.0  ;;  %v216_v43 = vmax.f32 %v208_v39, 0.0 }
  0xed   :  { %v210_v44 = vmax.f32 %v202_v40, 0.0  ;;  %v214_v45 = vmax.f32 %v206_v41, 0.0 }
  0xee   :  { %220 = vst [vmem:[%s402_s4 + $0x18] sm:$0xff] %v212_v42  ;;  %224 = vst [vmem:[%s402_s4 + $0x38] sm:$0xff] %v216_v43 }
  0xef   :  { %218 = vst [vmem:[%s402_s4 + $0x8] sm:$0xff] %v210_v44  ;;  %222 = vst [vmem:[%s402_s4 + $0x28] sm:$0xff] %v214_v45 }

// kernel: forward.31
= control target key start
LH: loop header
LB: loop body
LE: loop exit
PB: predicated region body
PF: predicated region fallthrough
CT: control target
= control target key end

     0   :  { %s444_s1 = inlined_call_operand.vmem [shape: bf16[256,128], index: 1, kind: input, shape index: {}]   ;;  %s445_s0 = inlined_call_operand.vmem [shape: bf16[32,256], index: 0, kind: input, shape index: {}]   ;;  %s446_s2 = inlined_call_operand.vmem [shape: f32[1,128], index: 2, kind: input, shape index: {}]   ;;  %s447_s3 = inlined_call_operand.vmem [shape: f32[1,128], index: 3, kind: input, shape index: {}]   ;;  %s448_s4 = inlined_call_operand.vmem [shape: f32[32,128], index: 4, kind: output, shape index: {}]  }
   0x1   :  { %v319_v0 = vld [vmem:[%s444_s1 + $0x78] sm:$0xff]   ;;  %v321_v2 = vld [vmem:[%s444_s1 + $0x70] sm:$0xff]   ;;  %v323_v4 = vld [vmem:[%s444_s1 + $0x68] sm:$0xff]  }
   0x2   :  { %v320_v1 = vld [vmem:[%s444_s1 + $0x38] sm:$0xff]   ;;  %275 = vmatprep.subr.bf16.mxu0 %v319_v0  ;;  %303 = vmatprep.subr.bf16.mxu1 %v319_v0  ;;  %v322_v3 = vld [vmem:[%s444_s1 + $0x30] sm:$0xff]   ;;  %v324_v5 = vld [vmem:[%s444_s1 + $0x28] sm:$0xff]  }
   0x3   :  { %276 = vmatpush3.bf16.msra.mxu0 %v320_v1  ;;  %311 = vmatpush3.bf16.msra.mxu1 %v320_v1  ;;  %v325_v6 = vld [vmem:[%s444_s1 + $0x60] sm:$0xff]   ;;  %v327_v8 = vld [vmem:[%s444_s1 + $0x58] sm:$0xff]   ;;  %v329_v10 = vld [vmem:[%s444_s1 + $0x50] sm:$0xff]  }
   0x4   :  { %277 = vmatprep.subr.bf16.mxu0 %v321_v2  ;;  %304 = vmatprep.subr.bf16.mxu1 %v321_v2  ;;  %v326_v7 = vld [vmem:[%s444_s1 + $0x20] sm:$0xff]   ;;  %v328_v9 = vld [vmem:[%s444_s1 + $0x18] sm:$0xff]   ;;  %v330_v13 = vld [vmem:[%s444_s1 + $0x10] sm:$0xff]  }
   0x5   :  { %v337_v11 = vld [vmem:[%s445_s0 + $0x4] ss:$8 sps:$4 sm:$0xff]   ;;  %v340_v12 = vld [vmem:[%s445_s0 + $0x14] ss:$8 sps:$4 sm:$0xff]   ;;  %v335_v18 = vld [vmem:[%s445_s0] ss:$8 sps:$4 sm:$0xff]  }
   0x6   :  { %v331_v14 = vld [vmem:[%s444_s1 + $0x48] sm:$0xff]   ;;  %202 = vmatprep.mubr.bf16.mxu0 %v337_v11  ;;  %210 = vmatprep.mubr.bf16.mxu1 %v340_v12  ;;  %v333_v16 = vld [vmem:[%s444_s1 + $0x40] sm:$0xff]   ;;  %v338_v19 = vld [vmem:[%s445_s0 + $0x10] ss:$8 sps:$4 sm:$0xff]  }
   0x7   :  { %278 = vmatpush3.bf16.msra.mxu0 %v322_v3  ;;  %312 = vmatpush3.bf16.msra.mxu1 %v322_v3  ;;  %v332_v15 = vld [vmem:[%s444_s1 + $0x8] sm:$0xff]   ;;  %v334_v17 = vld [vmem:[%s444_s1] sm:$0xff]  }
   0x8   :  { %279 = vmatprep.subr.bf16.mxu0 %v323_v4  ;;  %305 = vmatprep.subr.bf16.mxu1 %v323_v4  ;;  %v273_v23 = vld [vmem:[%s446_s2] ss:$0 sm:$0xff] }
   0x9   :  { %v274_v27 = vld [vmem:[%s447_s3] ss:$0 sm:$0xff] }
   0xb   :  { %280 = vmatpush3.bf16.msra.mxu0 %v324_v5  ;;  %313 = vmatpush3.bf16.msra.mxu1 %v324_v5 }
   0xc   :  { %281 = vmatprep.subr.bf16.mxu0 %v325_v6  ;;  %306 = vmatprep.subr.bf16.mxu1 %v325_v6 }
   0xf   :  { %282 = vmatpush3.bf16.msra.mxu0 %v326_v7  ;;  %314 = vmatpush3.bf16.msra.mxu1 %v326_v7 }
  0x10   :  { %283 = vmatprep.subr.bf16.mxu0 %v327_v8  ;;  %307 = vmatprep.subr.bf16.mxu1 %v327_v8 }
  0x13   :  { %284 = vmatpush3.bf16.msra.mxu0 %v328_v9  ;;  %315 = vmatpush3.bf16.msra.mxu1 %v328_v9 }
  0x14   :  { %285 = vmatprep.subr.bf16.mxu0 %v329_v10  ;;  %308 = vmatprep.subr.bf16.mxu1 %v329_v10 }
  0x17   :  { %286 = vmatpush3.bf16.msra.mxu0 %v330_v13  ;;  %316 = vmatpush3.bf16.msra.mxu1 %v330_v13 }
  0x18   :  { %287 = vmatprep.subr.bf16.mxu0 %v331_v14  ;;  %309 = vmatprep.subr.bf16.mxu1 %v331_v14 }
  0x1b   :  { %288 = vmatpush3.bf16.msra.mxu0 %v332_v15  ;;  %317 = vmatpush3.bf16.msra.mxu1 %v332_v15 }
  0x1c   :  { %289 = vmatprep.subr.bf16.mxu0 %v333_v16  ;;  %310 = vmatprep.subr.bf16.mxu1 %v333_v16 }
  0x1f   :  { %290 = vmatpush3.bf16.msra.mxu0 %v334_v17  ;;  %318 = vmatpush3.bf16.msra.mxu1 %v334_v17 }
  0x22   :  { %203 = vmatmul.mubr.bf16.vlgmr.msra.gmra.mxu0 %v335_v18  ;;  %211 = vmatmul.mubr.bf16.vlgmr.msra.gmra.mxu1 %v338_v19 }
  0xe2   :  { %v291_v20 = vpop.f32.mrf.mxu0  ;;  %v297_v21 = vpop.f32.mrf.mxu1 }
  0xe4   :  { %v292_v22 = vpop.f32.mrf.mxu0  ;;  %v298_v24 = vpop.f32.mrf.mxu1 }
  0xe5   :  { %v293_v25 = vadd.f32 %v292_v22, %v291_v20  ;;  %v299_v26 = vadd.f32 %v298_v24, %v297_v21 }
  0xe6   :  { %v294_v28 = vpop.f32.mrf.mxu0  ;;  %v300_v29 = vpop.f32.mrf.mxu1 }
  0xe7   :  { %v226_v30 = vmul.f32 %v293_v25, %v273_v23  ;;  %v228_v31 = vmul.f32 %v299_v26, %v273_v23 }
  0xe8   :  { %v295_v32 = vpop.f32.mrf.mxu0  ;;  %v301_v33 = vpop.f32.mrf.mxu1 }
  0xe9   :  { %v237_v34 = vadd.f32 %v274_v27, %v226_v30  ;;  %v239_v35 = vadd.f32 %v274_v27, %v228_v31  ;;  %v296_v36 = vadd.f32 %v295_v32, %v294_v28  ;;  %v302_v37 = vadd.f32 %v301_v33, %v300_v29 }
  0xeb   :  { %v241_v38 = vmax.f32 %v237_v34, 0.0  ;;  %v243_v39 = vmax.f32 %v239_v35, 0.0  ;;  %v227_v40 = vmul.f32 %v296_v36, %v273_v23  ;;  %v229_v41 = vmul.f32 %v302_v37, %v273_v23 }
  0xed   :  { %245 = vst [vmem:[%s448_s4] sm:$0xff] %v241_v38  ;;  %247 = vst [vmem:[%s448_s4 + $0x10] sm:$0xff] %v243_v39  ;;  %v238_v42 = vadd.f32 %v274_v27, %v227_v40  ;;  %v240_v43 = vadd.f32 %v274_v27, %v229_v41 }
  0xef   :  { %v242_v44 = vmax.f32 %v238_v42, 0.0  ;;  %v244_v45 = vmax.f32 %v240_v43, 0.0 }
  0xf1   :  { %246 = vst [vmem:[%s448_s4 + $0x8] sm:$0xff] %v242_v44  ;;  %248 = vst [vmem:[%s448_s4 + $0x18] sm:$0xff] %v244_v45 }

// kernel: forward.32
= control target key start
LH: loop header
LB: loop body
LE: loop exit
PB: predicated region body
PF: predicated region fallthrough
CT: control target
= control target key end

     0   :  { %v647_v1 = vmov 0   ;;  %v454_v56 = vlaneseq  ;;  %s867_s1 = inlined_call_operand.vmem [shape: bf16[384,256], index: 1, kind: input, shape index: {}]   ;;  %s868_s0 = inlined_call_operand.vmem [shape: bf16[32,384], index: 0, kind: input, shape index: {}]   ;;  %s869_s2 = inlined_call_operand.vmem [shape: f32[1,256], index: 2, kind: input, shape index: {}]   ;;  %s870_s3 = inlined_call_operand.vmem [shape: f32[1,256], index: 3, kind: input, shape index: {}]   ;;  %s871_s4 = inlined_call_operand.vmem [shape: f32[32,256], index: 4, kind: output, shape index: {}]  }
   0x1   :  { %v567_v0 = vld [vmem:[%s867_s1 + $0x74] ss:$8 sps:$4 sm:$0xff]   ;;  %431 = vmatprep.mubr.bf16.mxu1 %v647_v1  ;;  %v569_v2 = vld [vmem:[%s867_s1 + $0x70] ss:$8 sps:$4 sm:$0xff]   ;;  %v570_v3 = vld [vmem:[%s867_s1 + $0x64] ss:$8 sps:$4 sm:$0xff]  }
   0x2   :  { %346 = vmatprep.subr.bf16.mxu0 %v567_v0  ;;  %v572_v4 = vld [vmem:[%s867_s1 + $0x60] ss:$8 sps:$4 sm:$0xff]   ;;  %v573_v5 = vld [vmem:[%s867_s1 + $0x54] ss:$8 sps:$4 sm:$0xff]   ;;  %v575_v6 = vld [vmem:[%s867_s1 + $0x50] ss:$8 sps:$4 sm:$0xff]  }
   0x3   :  { %347 = vmatpush1.bf16.msra.mxu0 %v569_v2  ;;  %v576_v7 = vld [vmem:[%s867_s1 + $0x44] ss:$8 sps:$4 sm:$0xff]   ;;  %v588_v8 = vld [vmem:[%s867_s1 + $0x174] ss:$8 sps:$4 sm:$0xff]   ;;  %v590_v9 = vld [vmem:[%s867_s1 + $0x170] ss:$8 sps:$4 sm:$0xff]  }
   0x4   :  { %348 = vmatprep.subr.bf16.mxu0 %v570_v3  ;;  %v578_v10 = vld [vmem:[%s867_s1 + $0x40] ss:$8 sps:$4 sm:$0xff]   ;;  %v579_v11 = vld [vmem:[%s867_s1 + $0x34] ss:$8 sps:$4 sm:$0xff]   ;;  %399 = vmatprep.subr.bf16.mxu1 %v588_v8  ;;  %v594_v12 = vld [vmem:[%s867_s1 + $0x164] ss:$8 sps:$4 sm:$0xff]  }
   0x5   :  { %400 = vmatpush1.bf16.msra.mxu1 %v590_v9  ;;  %v596_v13 = vld [vmem:[%s867_s1 + $0x160] ss:$8 sps:$4 sm:$0xff]   ;;  %v581_v14 = vld [vmem:[%s867_s1 + $0x30] ss:$8 sps:$4 sm:$0xff]   ;;  %v600_v15 = vld [vmem:[%s867_s1 + $0x154] ss:$8 sps:$4 sm:$0xff]  }
   0x6   :  { %401 = vmatprep.subr.bf16.mxu1 %v594_v12  ;;  %v582_v16 = vld [vmem:[%s867_s1 + $0x24] ss:$8 sps:$4 sm:$0xff]   ;;  %v602_v17 = vld [vmem:[%s867_s1 + $0x150] ss:$8 sps:$4 sm:$0xff]   ;;  %v584_v19 = vld [vmem:[%s867_s1 + $0x20] ss:$8 sps:$4 sm:$0xff]  }
   0x7   :  { %349 = vmatpush1.bf16.msra.mxu0 %v572_v4  ;;  %v606_v18 = vld [vmem:[%s867_s1 + $0x144] ss:$8 sps:$4 sm:$0xff]   ;;  %v585_v20 = vld [vmem:[%s867_s1 + $0x14] ss:$8 sps:$4 sm:$0xff]   ;;  %v608_v21 = vld [vmem:[%s867_s1 + $0x140] ss:$8 sps:$4 sm:$0xff]  }
   0x8   :  { %350 = vmatprep.subr.bf16.mxu0 %v573_v5  ;;  %v612_v22 = vld [vmem:[%s867_s1 + $0x134] ss:$8 sps:$4 sm:$0xff]   ;;  %v587_v23 = vld [vmem:[%s867_s1 + $0x10] ss:$8 sps:$4 sm:$0xff]   ;;  %v591_v24 = vld [vmem:[%s867_s1 + $0x4] ss:$8 sps:$4 sm:$0xff]  }
   0x9   :  { %402 = vmatpush1.bf16.msra.mxu1 %v596_v13  ;;  %v614_v25 = vld [vmem:[%s867_s1 + $0x130] ss:$8 sps:$4 sm:$0xff]   ;;  %v618_v26 = vld [vmem:[%s867_s1 + $0x124] ss:$8 sps:$4 sm:$0xff]   ;;  %v593_v27 = vld [vmem:[%s867_s1] ss:$8 sps:$4 sm:$0xff]  }
   0xa   :  { %403 = vmatprep.subr.bf16.mxu1 %v600_v15  ;;  %v597_v28 = vld [vmem:[%s867_s1 + $0xf4] ss:$8 sps:$4 sm:$0xff]   ;;  %v620_v29 = vld [vmem:[%s867_s1 + $0x120] ss:$8 sps:$4 sm:$0xff]   ;;  %v599_v31 = vld [vmem:[%s867_s1 + $0xf0] ss:$8 sps:$4 sm:$0xff]  }
   0xb   :  { %351 = vmatpush1.bf16.msra.mxu0 %v575_v6  ;;  %v624_v30 = vld [vmem:[%s867_s1 + $0x114] ss:$8 sps:$4 sm:$0xff]   ;;  %v603_v32 = vld [vmem:[%s867_s1 + $0xe4] ss:$8 sps:$4 sm:$0xff]   ;;  %v626_v33 = vld [vmem:[%s867_s1 + $0x110] ss:$8 sps:$4 sm:$0xff]  }
   0xc   :  { %352 = vmatprep.subr.bf16.mxu0 %v576_v7  ;;  %v630_v34 = vld [vmem:[%s867_s1 + $0x104] ss:$8 sps:$4 sm:$0xff]   ;;  %v605_v36 = vld [vmem:[%s867_s1 + $0xe0] ss:$8 sps:$4 sm:$0xff]   ;;  %v609_v37 = vld [vmem:[%s867_s1 + $0xd4] ss:$8 sps:$4 sm:$0xff]  }
   0xd   :  { %404 = vmatpush1.bf16.msra.mxu1 %v602_v17  ;;  %v642_v35 = vld [vmem:[%s868_s0 + $0x4] ss:$12 sps:$4 sm:$0xff]   ;;  %v632_v38 = vld [vmem:[%s867_s1 + $0x100] ss:$8 sps:$4 sm:$0xff]   ;;  %v621_v43 = vld [vmem:[%s867_s1 + $0xb4] ss:$8 sps:$4 sm:$0xff]  }
   0xe   :  { %405 = vmatprep.subr.bf16.mxu1 %v606_v18  ;;  %378 = vmatprep.mubr.bf16.mxu0 %v642_v35  ;;  %v611_v39 = vld [vmem:[%s867_s1 + $0xd0] ss:$8 sps:$4 sm:$0xff]   ;;  %v615_v40 = vld [vmem:[%s867_s1 + $0xc4] ss:$8 sps:$4 sm:$0xff]   ;;  %v636_v41 = vld [vmem:[%s868_s0 + $0x8] ss:$12 sps:$4 sm:$0xff]  }
   0xf   :  { %353 = vmatpush1.bf16.msra.mxu0 %v578_v10  ;;  %v617_v42 = vld [vmem:[%s867_s1 + $0xc0] ss:$8 sps:$4 sm:$0xff]   ;;  %v623_v44 = vld [vmem:[%s867_s1 + $0xb0] ss:$8 sps:$4 sm:$0xff]   ;;  %v627_v45 = vld [vmem:[%s867_s1 + $0xa4] ss:$8 sps:$4 sm:$0xff]  }
  0x10   :  { %354 = vmatprep.subr.bf16.mxu0 %v579_v11  ;;  %v643_v46 = vld [vmem:[%s868_s0 + $0x20] ss:$12 sps:$4 sm:$0xff]   ;;  %v633_v48 = vld [vmem:[%s867_s1 + $0x94] ss:$8 sps:$4 sm:$0xff]   ;;  %v635_v49 = vld [vmem:[%s867_s1 + $0x90] ss:$8 sps:$4 sm:$0xff]  }
  0x11   :  { %406 = vmatpush1.bf16.msra.mxu1 %v608_v21  ;;  %v629_v47 = vld [vmem:[%s867_s1 + $0xa0] ss:$8 sps:$4 sm:$0xff]   ;;  %v637_v50 = vld [vmem:[%s867_s1 + $0x84] ss:$8 sps:$4 sm:$0xff]   ;;  %v455_v58 = vshrl.u32 %v454_v56, 7 }
  0x12   :  { %407 = vmatprep.subr.bf16.mxu1 %v612_v22  ;;  %v639_v51 = vld [vmem:[%s867_s1 + $0x80] ss:$8 sps:$4 sm:$0xff]   ;;  %v646_v54 = vld [vmem:[%s868_s0 + $0x18] ss:$12 sps:$4 sm:$0xff]  }
  0x13   :  { %355 = vmatpush1.bf16.msra.mxu0 %v581_v14  ;;  %v640_v52 = vld [vmem:[%s868_s0] ss:$12 sps:$4 sm:$0xff]   ;;  %v644_v53 = vld [vmem:[%s868_s0 + $0x1c] ss:$12 sps:$4 sm:$0xff]   ;;  %v456_v60 = vsub.s32 0, %v455_v58  ;;  %v460_v62 = vsub.s32 1, %v455_v58 }
  0x14   :  { %356 = vmatprep.subr.bf16.mxu0 %v582_v16  ;;  %v452_v61 = vld [vmem:[%s869_s2] sm:$0x3] }
  0x15   :  { %408 = vmatpush1.bf16.msra.mxu1 %v614_v25  ;;  %v472_v63 = vld [vmem:[%s870_s3] sm:$0x3]  ;;  %v461_v5 = vrot.slane %v452_v61, %v460_v62 }
  0x16   :  { %409 = vmatprep.subr.bf16.mxu1 %v618_v26  ;;  %v477_v4 = vrot.slane %v472_v63, %v456_v60  ;;  %v481_v10 = vrot.slane %v472_v63, %v460_v62 }
  0x17   :  { %357 = vmatpush1.bf16.msra.mxu0 %v584_v19 }
  0x18   :  { %358 = vmatprep.subr.bf16.mxu0 %v585_v20 }
  0x19   :  { %410 = vmatpush1.bf16.msra.mxu1 %v620_v29 }
  0x1a   :  { %411 = vmatprep.subr.bf16.mxu1 %v624_v30 }
  0x1b   :  { %359 = vmatpush1.bf16.msra.mxu0 %v587_v23 }
  0x1c   :  { %360 = vmatprep.subr.bf16.mxu0 %v591_v24 }
  0x1d   :  { %412 = vmatpush1.bf16.msra.mxu1 %v626_v33 }
  0x1e   :  { %413 = vmatprep.subr.bf16.mxu1 %v630_v34 }
  0x1f   :  { %361 = vmatpush1.bf16.msra.mxu0 %v593_v27 }
  0x20   :  { %362 = vmatprep.subr.bf16.mxu0 %v597_v28 }
  0x21   :  { %414 = vmatpush1.bf16.msra.mxu1 %v632_v38 }
  0x23   :  { %363 = vmatpush2.bf16.msra.mxu0 %v599_v31 }
  0x24   :  { %364 = vmatprep.subr.bf16.mxu0 %v603_v32  ;;  %432 = vmatmul.mubr.bf16.vlgmr.msra.gmra.mxu1 %v636_v41 }
  0x25   :  { %441 = vmatprep.mubr.bf16.mxu1 %v647_v1  ;;  %v457_v1 = vrot.slane %v452_v61, %v456_v60 }
  0x27   :  { %365 = vmatpush2.bf16.msra.mxu0 %v605_v36 }
  0x28   :  { %366 = vmatprep.subr.bf16.mxu0 %v609_v37 }
  0x2b   :  { %367 = vmatpush2.bf16.msra.mxu0 %v611_v39 }
  0x2c   :  { %368 = vmatprep.subr.bf16.mxu0 %v615_v40  ;;  %442 = vmatmul.mubr.bf16.gmra.mxu1 %v643_v46 }
  0x2f   :  { %369 = vmatpush2.bf16.msra.mxu0 %v617_v42 }
  0x30   :  { %370 = vmatprep.subr.bf16.mxu0 %v621_v43 }
  0x33   :  { %371 = vmatpush2.bf16.msra.mxu0 %v623_v44 }
  0x34   :  { %372 = vmatprep.subr.bf16.mxu0 %v627_v45 }
  0x37   :  { %373 = vmatpush2.bf16.msra.mxu0 %v629_v47 }
  0x38   :  { %374 = vmatprep.subr.bf16.mxu0 %v633_v48 }
  0x3b   :  { %375 = vmatpush2.bf16.msra.mxu0 %v635_v49 }
  0x3c   :  { %376 = vmatprep.subr.bf16.mxu0 %v637_v50 }
  0x3f   :  { %377 = vmatpush2.bf16.msra.mxu0 %v639_v51 }
  0x42   :  { %379 = vmatmul.mubr.bf16.vlgmr.msra.gmra.mxu0 %v640_v52 }
  0x43   :  { %388 = vmatprep.mubr.bf16.mxu0 %v644_v53 }
  0x4a   :  { %389 = vmatmul.mubr.bf16.gmra.mxu0 %v646_v54 }
  0xe4   :  { %v433_v55 = vpop.f32.mrf.mxu1 }
  0xe6   :  { %v435_v57 = vpop.f32.mrf.mxu1 }
  0xe8   :  { %v437_v59 = vpop.f32.mrf.mxu1 }
  0xea   :  { %v439_v0 = vpop.f32.mrf.mxu1 }
  0xec   :  { %v443_v7 = vpop.f32.mrf.mxu1 }
  0xee   :  { %v445_v15 = vpop.f32.mrf.mxu1 }
  0xf0   :  { %v447_v26 = vpop.f32.mrf.mxu1 }
  0xf2   :  { %v449_v37 = vpop.f32.mrf.mxu1 }
 0x102   :  { %v380_v2 = vpop.f32.mrf.mxu0 }
 0x103   :  { %v434_v3 = vadd.f32 %v433_v55, %v380_v2 }
 0x104   :  { %v382_v6 = vpop.f32.mrf.mxu0 }
 0x105   :  { %v464_v8 = vmul.f32 %v457_v1, %v434_v3  ;;  %v436_v9 = vadd.f32 %v435_v57, %v382_v6 }
 0x106   :  { %v384_v11 = vpop.f32.mrf.mxu0 }
 0x107   :  { %v484_v12 = vadd.f32 %v477_v4, %v464_v8  ;;  %v465_v13 = vmul.f32 %v461_v5, %v436_v9  ;;  %v438_v14 = vadd.f32 %v437_v59, %v384_v11 }
 0x108   :  { %v386_v16 = vpop.f32.mrf.mxu0 }
 0x109   :  { %v492_v17 = vmax.f32 %v484_v12, 0.0  ;;  %v485_v18 = vadd.f32 %v481_v10, %v465_v13  ;;  %v466_v19 = vmul.f32 %v457_v1, %v438_v14  ;;  %v440_v20 = vadd.f32 %v439_v0, %v386_v16 }
 0x10a   :  { %v390_v21 = vpop.f32.mrf.mxu0 }
 0x10b   :  { %500 = vst [vmem:[%s871_s4] sm:$0xff] %v492_v17  ;;  %v493_v22 = vmax.f32 %v485_v18, 0.0  ;;  %v486_v23 = vadd.f32 %v477_v4, %v466_v19  ;;  %v467_v24 = vmul.f32 %v461_v5, %v440_v20  ;;  %v444_v25 = vadd.f32 %v443_v7, %v390_v21 }
 0x10c   :  { %v392_v27 = vpop.f32.mrf.mxu0 }
 0x10d   :  { %501 = vst [vmem:[%s871_s4 + $0x8] sm:$0xff] %v493_v22  ;;  %v494_v28 = vmax.f32 %v486_v23, 0.0  ;;  %v487_v29 = vadd.f32 %v481_v10, %v467_v24  ;;  %v468_v30 = vmul.f32 %v457_v1, %v444_v25  ;;  %v446_v31 = vadd.f32 %v445_v15, %v392_v27 }
 0x10e   :  { %v394_v32 = vpop.f32.mrf.mxu0 }
 0x10f   :  { %502 = vst [vmem:[%s871_s4 + $0x10] sm:$0xff] %v494_v28  ;;  %v495_v33 = vmax.f32 %v487_v29, 0.0  ;;  %v488_v34 = vadd.f32 %v477_v4, %v468_v30  ;;  %v469_v35 = vmul.f32 %v461_v5, %v446_v31  ;;  %v448_v36 = vadd.f32 %v447_v26, %v394_v32 }
 0x110   :  { %v396_v38 = vpop.f32.mrf.mxu0 }
 0x111   :  { %503 = vst [vmem:[%s871_s4 + $0x18] sm:$0xff] %v495_v33  ;;  %v496_v39 = vmax.f32 %v488_v34, 0.0  ;;  %v489_v40 = vadd.f32 %v481_v10, %v469_v35  ;;  %v470_v41 = vmul.f32 %v457_v1, %v448_v36  ;;  %v450_v42 = vadd.f32 %v449_v37, %v396_v38 }
 0x113   :  { %504 = vst [vmem:[%s871_s4 + $0x20] sm:$0xff] %v496_v39  ;;  %v497_v43 = vmax.f32 %v489_v40, 0.0  ;;  %v490_v44 = vadd.f32 %v477_v4, %v470_v41  ;;  %v471_v45 = vmul.f32 %v461_v5, %v450_v42 }
 0x115   :  { %505 = vst [vmem:[%s871_s4 + $0x28] sm:$0xff] %v497_v43  ;;  %v498_v46 = vmax.f32 %v490_v44, 0.0  ;;  %v491_v47 = vadd.f32 %v481_v10, %v471_v45 }
 0x117   :  { %506 = vst [vmem:[%s871_s4 + $0x30] sm:$0xff] %v498_v46  ;;  %v499_v48 = vmax.f32 %v491_v47, 0.0 }
 0x119   :  { %507 = vst [vmem:[%s871_s4 + $0x38] sm:$0xff] %v499_v48 }

// kernel: forward.33
= control target key start
LH: loop header
LB: loop body
LE: loop exit
PB: predicated region body
PF: predicated region fallthrough
CT: control target
= control target key end

     0   :  { %s1106_s1 = inlined_call_operand.vmem [shape: bf16[768,128], index: 1, kind: input, shape index: {}]   ;;  %s1107_s0 = inlined_call_operand.vmem [shape: bf16[32,768], index: 0, kind: input, shape index: {}]   ;;  %s1108_s2 = inlined_call_operand.vmem [shape: f32[1,128], index: 2, kind: input, shape index: {}]   ;;  %s1109_s3 = inlined_call_operand.vmem [shape: f32[1,128], index: 3, kind: input, shape index: {}]   ;;  %s1110_s4 = inlined_call_operand.vmem [shape: f32[32,128], index: 4, kind: output, shape index: {}]  }
   0x1   :  { %v817_v0 = vld [vmem:[%s1106_s1 + $0x78] sm:$0xff]   ;;  %v821_v4 = vld [vmem:[%s1106_s1 + $0x70] sm:$0xff]   ;;  %v825_v8 = vld [vmem:[%s1106_s1 + $0x68] sm:$0xff]  }
   0x2   :  { %v818_v1 = vld [vmem:[%s1106_s1 + $0xf8] sm:$0xff]   ;;  %717 = vmatprep.subr.bf16.mxu0 %v817_v0  ;;  %v822_v5 = vld [vmem:[%s1106_s1 + $0xf0] sm:$0xff]   ;;  %v826_v9 = vld [vmem:[%s1106_s1 + $0xe8] sm:$0xff]  }
   0x3   :  { %v819_v2 = vld [vmem:[%s1106_s1 + $0x38] sm:$0xff]   ;;  %745 = vmatprep.subr.bf16.mxu1 %v818_v1  ;;  %v823_v6 = vld [vmem:[%s1106_s1 + $0x30] sm:$0xff]   ;;  %v827_v10 = vld [vmem:[%s1106_s1 + $0x28] sm:$0xff]  }
   0x4   :  { %v820_v3 = vld [vmem:[%s1106_s1 + $0xb8] sm:$0xff]   ;;  %718 = vmatpush3.bf16.msra.mxu0 %v819_v2  ;;  %v824_v7 = vld [vmem:[%s1106_s1 + $0xb0] sm:$0xff]   ;;  %v828_v11 = vld [vmem:[%s1106_s1 + $0xa8] sm:$0xff]  }
   0x5   :  { %746 = vmatpush3.bf16.msra.mxu1 %v820_v3  ;;  %719 = vmatprep.subr.bf16.mxu0 %v821_v4  ;;  %v829_v12 = vld [vmem:[%s1106_s1 + $0x60] sm:$0xff]   ;;  %v833_v16 = vld [vmem:[%s1106_s1 + $0x58] sm:$0xff]   ;;  %v837_v20 = vld [vmem:[%s1106_s1 + $0x50] sm:$0xff]  }
   0x6   :  { %747 = vmatprep.subr.bf16.mxu1 %v822_v5  ;;  %v830_v13 = vld [vmem:[%s1106_s1 + $0xe0] sm:$0xff]   ;;  %v834_v17 = vld [vmem:[%s1106_s1 + $0xd8] sm:$0xff]   ;;  %v838_v21 = vld [vmem:[%s1106_s1 + $0xd0] sm:$0xff]  }
   0x7   :  { %v831_v14 = vld [vmem:[%s1106_s1 + $0x20] sm:$0xff]   ;;  %v835_v18 = vld [vmem:[%s1106_s1 + $0x18] sm:$0xff]   ;;  %v839_v22 = vld [vmem:[%s1106_s1 + $0x10] sm:$0xff]  }
   0x8   :  { %720 = vmatpush3.bf16.msra.mxu0 %v823_v6  ;;  %v832_v15 = vld [vmem:[%s1106_s1 + $0xa0] sm:$0xff]   ;;  %v836_v19 = vld [vmem:[%s1106_s1 + $0x98] sm:$0xff]   ;;  %v840_v23 = vld [vmem:[%s1106_s1 + $0x90] sm:$0xff]  }
   0x9   :  { %748 = vmatpush3.bf16.msra.mxu1 %v824_v7  ;;  %721 = vmatprep.subr.bf16.mxu0 %v825_v8  ;;  %v841_v24 = vld [vmem:[%s1106_s1 + $0x48] sm:$0xff]   ;;  %v845_v28 = vld [vmem:[%s1106_s1 + $0x40] sm:$0xff]   ;;  %v855_v36 = vld [vmem:[%s1106_s1 + $0x178] sm:$0xff]  }
   0xa   :  { %749 = vmatprep.subr.bf16.mxu1 %v826_v9  ;;  %v842_v25 = vld [vmem:[%s1106_s1 + $0xc8] sm:$0xff]   ;;  %v846_v29 = vld [vmem:[%s1106_s1 + $0xc0] sm:$0xff]   ;;  %v856_v37 = vld [vmem:[%s1106_s1 + $0x138] sm:$0xff]  }
   0xb   :  { %v843_v26 = vld [vmem:[%s1106_s1 + $0x8] sm:$0xff]   ;;  %v847_v30 = vld [vmem:[%s1106_s1] sm:$0xff]   ;;  %v857_v38 = vld [vmem:[%s1106_s1 + $0x170] sm:$0xff]  }
   0xc   :  { %722 = vmatpush3.bf16.msra.mxu0 %v827_v10  ;;  %v844_v27 = vld [vmem:[%s1106_s1 + $0x88] sm:$0xff]   ;;  %v848_v31 = vld [vmem:[%s1106_s1 + $0x80] sm:$0xff]   ;;  %v858_v39 = vld [vmem:[%s1106_s1 + $0x130] sm:$0xff]  }
   0xd   :  { %750 = vmatpush3.bf16.msra.mxu1 %v828_v11  ;;  %723 = vmatprep.subr.bf16.mxu0 %v829_v12  ;;  %v849_v32 = vld [vmem:[%s1107_s0] ss:$24 sps:$4 sm:$0xff]   ;;  %v851_v33 = vld [vmem:[%s1107_s0 + $0x4] ss:$24 sps:$4 sm:$0xff]   ;;  %v859_v40 = vld [vmem:[%s1106_s1 + $0x168] sm:$0xff]  }
   0xe   :  { %751 = vmatprep.subr.bf16.mxu1 %v830_v13  ;;  %v852_v34 = vld [vmem:[%s1107_s0 + $0x8] ss:$24 sps:$4 sm:$0xff]   ;;  %v854_v35 = vld [vmem:[%s1107_s0 + $0xc] ss:$24 sps:$4 sm:$0xff]   ;;  %506 = vmatprep.mubr.bf16.mxu0 %v851_v33  ;;  %v866_v45 = vld [vmem:[%s1107_s0 + $0x3c] ss:$24 sps:$4 sm:$0xff]  }
   0xf   :  { %555 = vmatprep.mubr.bf16.mxu1 %v854_v35  ;;  %v860_v41 = vld [vmem:[%s1106_s1 + $0x128] sm:$0xff]   ;;  %v861_v42 = vld [vmem:[%s1106_s1 + $0x160] sm:$0xff]   ;;  %v863_v46 = vld [vmem:[%s1106_s1 + $0x158] sm:$0xff]  }
  0x10   :  { %724 = vmatpush3.bf16.msra.mxu0 %v831_v14  ;;  %v862_v43 = vld [vmem:[%s1106_s1 + $0x120] sm:$0xff]   ;;  %v864_v44 = vld [vmem:[%s1107_s0 + $0x34] ss:$24 sps:$4 sm:$0xff]   ;;  %v869_v47 = vld [vmem:[%s1107_s0 + $0x30] ss:$24 sps:$4 sm:$0xff]  }
  0x11   :  { %752 = vmatpush3.bf16.msra.mxu1 %v832_v15  ;;  %725 = vmatprep.subr.bf16.mxu0 %v833_v16  ;;  %v870_v48 = vld [vmem:[%s1107_s0 + $0x38] ss:$24 sps:$4 sm:$0xff]   ;;  %v879_v52 = vld [vmem:[%s1107_s0 + $0x14] ss:$24 sps:$4 sm:$0xff]   ;;  %v882_v54 = vld [vmem:[%s1107_s0 + $0x44] ss:$24 sps:$4 sm:$0xff]  }
  0x12   :  { %753 = vmatprep.subr.bf16.mxu1 %v834_v17  ;;  %v868_v49 = vld [vmem:[%s1106_s1 + $0x118] sm:$0xff]   ;;  %v871_v50 = vld [vmem:[%s1106_s1 + $0x150] sm:$0xff]   ;;  %v873_v53 = vld [vmem:[%s1106_s1 + $0x148] sm:$0xff]  }
  0x13   :  { %v872_v51 = vld [vmem:[%s1106_s1 + $0x110] sm:$0xff]   ;;  %v874_v55 = vld [vmem:[%s1106_s1 + $0x108] sm:$0xff]   ;;  %v875_v56 = vld [vmem:[%s1106_s1 + $0x140] sm:$0xff]  }
  0x14   :  { %726 = vmatpush3.bf16.msra.mxu0 %v835_v18  ;;  %v876_v57 = vld [vmem:[%s1106_s1 + $0x100] sm:$0xff]   ;;  %v877_v58 = vld [vmem:[%s1107_s0 + $0x10] ss:$24 sps:$4 sm:$0xff]  }
  0x15   :  { %754 = vmatpush3.bf16.msra.mxu1 %v836_v19  ;;  %727 = vmatprep.subr.bf16.mxu0 %v837_v20  ;;  %v880_v59 = vld [vmem:[%s1107_s0 + $0x40] ss:$24 sps:$4 sm:$0xff]  }
  0x16   :  { %755 = vmatprep.subr.bf16.mxu1 %v838_v21 }
  0x18   :  { %728 = vmatpush3.bf16.msra.mxu0 %v839_v22 }
  0x19   :  { %756 = vmatpush3.bf16.msra.mxu1 %v840_v23  ;;  %729 = vmatprep.subr.bf16.mxu0 %v841_v24 }
  0x1a   :  { %757 = vmatprep.subr.bf16.mxu1 %v842_v25 }
  0x1c   :  { %730 = vmatpush3.bf16.msra.mxu0 %v843_v26 }
  0x1d   :  { %758 = vmatpush3.bf16.msra.mxu1 %v844_v27  ;;  %731 = vmatprep.subr.bf16.mxu0 %v845_v28  ;;  %v715_v27 = vld [vmem:[%s1108_s2] ss:$0 sm:$0xff] }
  0x1e   :  { %759 = vmatprep.subr.bf16.mxu1 %v846_v29 }
  0x20   :  { %732 = vmatpush3.bf16.msra.mxu0 %v847_v30 }
  0x21   :  { %760 = vmatpush3.bf16.msra.mxu1 %v848_v31  ;;  %773 = vmatprep.subr.bf16.mxu0 %v855_v36 }
  0x22   :  { %801 = vmatprep.subr.bf16.mxu1 %v855_v36 }
  0x23   :  { %507 = vmatmul.mubr.bf16.vlgmr.msra.gmra.mxu0 %v849_v32  ;;  %v716_v32 = vld [vmem:[%s1109_s3] ss:$0 sm:$0xff] }
  0x24   :  { %556 = vmatmul.mubr.bf16.vlgmr.msra.gmra.mxu1 %v852_v34  ;;  %774 = vmatpush3.bf16.msra.mxu0 %v856_v37 }
  0x25   :  { %809 = vmatpush3.bf16.msra.mxu1 %v856_v37  ;;  %775 = vmatprep.subr.bf16.mxu0 %v857_v38 }
  0x26   :  { %802 = vmatprep.subr.bf16.mxu1 %v857_v38  ;;  %514 = vmatprep.mubr.bf16.mxu0 %v864_v44 }
  0x27   :  { %563 = vmatprep.mubr.bf16.mxu1 %v866_v45 }
  0x28   :  { %776 = vmatpush3.bf16.msra.mxu0 %v858_v39 }
  0x29   :  { %810 = vmatpush3.bf16.msra.mxu1 %v858_v39  ;;  %777 = vmatprep.subr.bf16.mxu0 %v859_v40 }
  0x2a   :  { %803 = vmatprep.subr.bf16.mxu1 %v859_v40 }
  0x2b   :  { %515 = vmatmul.mubr.bf16.gmra.mxu0 %v869_v47 }
  0x2c   :  { %778 = vmatpush3.bf16.msra.mxu0 %v860_v41  ;;  %564 = vmatmul.mubr.bf16.gmra.mxu1 %v870_v48 }
  0x2d   :  { %811 = vmatpush3.bf16.msra.mxu1 %v860_v41  ;;  %779 = vmatprep.subr.bf16.mxu0 %v861_v42 }
  0x2e   :  { %804 = vmatprep.subr.bf16.mxu1 %v861_v42  ;;  %604 = vmatprep.mubr.bf16.mxu0 %v879_v52 }
  0x2f   :  { %612 = vmatprep.mubr.bf16.mxu1 %v882_v54 }
  0x30   :  { %780 = vmatpush3.bf16.msra.mxu0 %v862_v43 }
  0x31   :  { %812 = vmatpush3.bf16.msra.mxu1 %v862_v43  ;;  %781 = vmatprep.subr.bf16.mxu0 %v863_v46 }
  0x32   :  { %805 = vmatprep.subr.bf16.mxu1 %v863_v46 }
  0x34   :  { %782 = vmatpush3.bf16.msra.mxu0 %v868_v49 }
  0x35   :  { %813 = vmatpush3.bf16.msra.mxu1 %v868_v49  ;;  %783 = vmatprep.subr.bf16.mxu0 %v871_v50 }
  0x36   :  { %806 = vmatprep.subr.bf16.mxu1 %v871_v50 }
  0x38   :  { %784 = vmatpush3.bf16.msra.mxu0 %v872_v51 }
  0x39   :  { %814 = vmatpush3.bf16.msra.mxu1 %v872_v51  ;;  %785 = vmatprep.subr.bf16.mxu0 %v873_v53 }
  0x3a   :  { %807 = vmatprep.subr.bf16.mxu1 %v873_v53 }
  0x3c   :  { %786 = vmatpush3.bf16.msra.mxu0 %v874_v55 }
  0x3d   :  { %815 = vmatpush3.bf16.msra.mxu1 %v874_v55  ;;  %787 = vmatprep.subr.bf16.mxu0 %v875_v56 }
  0x3e   :  { %808 = vmatprep.subr.bf16.mxu1 %v875_v56 }
  0x40   :  { %788 = vmatpush3.bf16.msra.mxu0 %v876_v57 }
  0x41   :  { %816 = vmatpush3.bf16.msra.mxu1 %v876_v57 }
  0x43   :  { %605 = vmatmul.mubr.bf16.vlgmr.msra.gmra.mxu0 %v877_v58 }
  0x44   :  { %613 = vmatmul.mubr.bf16.vlgmr.msra.gmra.mxu1 %v880_v59 }
  0xe3   :  { %v733_v60 = vpop.f32.mrf.mxu0 }
  0xe4   :  { %v761_v61 = vpop.f32.mrf.mxu1 }
  0xe5   :  { %v734_v62 = vpop.f32.mrf.mxu0 }
  0xe6   :  { %v762_v63 = vpop.f32.mrf.mxu1  ;;  %v735_v11 = vadd.f32 %v734_v62, %v733_v60 }
  0xe7   :  { %v736_v0 = vpop.f32.mrf.mxu0  ;;  %v763_v12 = vadd.f32 %v762_v63, %v761_v61 }
  0xe8   :  { %v764_v1 = vpop.f32.mrf.mxu1 }
  0xe9   :  { %v737_v2 = vpop.f32.mrf.mxu0  ;;  %v558_v19 = vadd.f32 %v763_v12, %v735_v11 }
  0xea   :  { %v765_v3 = vpop.f32.mrf.mxu1  ;;  %v738_v20 = vadd.f32 %v737_v2, %v736_v0 }
  0xeb   :  { %v739_v4 = vpop.f32.mrf.mxu0  ;;  %v766_v21 = vadd.f32 %v765_v3, %v764_v1 }
  0xec   :  { %v767_v5 = vpop.f32.mrf.mxu1 }
  0xed   :  { %v740_v6 = vpop.f32.mrf.mxu0  ;;  %v561_v35 = vadd.f32 %v766_v21, %v738_v20 }
  0xee   :  { %v768_v7 = vpop.f32.mrf.mxu1  ;;  %v741_v14 = vadd.f32 %v740_v6, %v739_v4 }
  0xef   :  { %v742_v8 = vpop.f32.mrf.mxu0  ;;  %v769_v15 = vadd.f32 %v768_v7, %v767_v5 }
  0xf0   :  { %v770_v9 = vpop.f32.mrf.mxu1 }
  0xf1   :  { %v743_v10 = vpop.f32.mrf.mxu0  ;;  %v566_v24 = vadd.f32 %v769_v15, %v741_v14 }
  0xf2   :  { %v771_v13 = vpop.f32.mrf.mxu1  ;;  %v744_v25 = vadd.f32 %v743_v10, %v742_v8 }
  0xf3   :  { %v772_v26 = vadd.f32 %v771_v13, %v770_v9 }
  0xf5   :  { %v569_v39 = vadd.f32 %v772_v26, %v744_v25 }
 0x103   :  { %v789_v16 = vpop.f32.mrf.mxu0 }
 0x104   :  { %v795_v17 = vpop.f32.mrf.mxu1 }
 0x105   :  { %v790_v18 = vpop.f32.mrf.mxu0 }
 0x106   :  { %v791_v22 = vadd.f32 %v790_v18, %v789_v16  ;;  %v796_v23 = vpop.f32.mrf.mxu1 }
 0x107   :  { %v797_v28 = vadd.f32 %v796_v23, %v795_v17  ;;  %v792_v29 = vpop.f32.mrf.mxu0 }
 0x108   :  { %v607_v30 = vadd.f32 %v791_v22, %v558_v19  ;;  %v798_v31 = vpop.f32.mrf.mxu1 }
 0x109   :  { %v615_v33 = vadd.f32 %v797_v28, %v566_v24  ;;  %v793_v34 = vpop.f32.mrf.mxu0 }
 0x10a   :  { %v628_v36 = vmul.f32 %v715_v27, %v607_v30  ;;  %v794_v37 = vadd.f32 %v793_v34, %v792_v29  ;;  %v799_v38 = vpop.f32.mrf.mxu1 }
 0x10b   :  { %v630_v40 = vmul.f32 %v715_v27, %v615_v33  ;;  %v800_v41 = vadd.f32 %v799_v38, %v798_v31 }
 0x10c   :  { %v639_v42 = vadd.f32 %v716_v32, %v628_v36  ;;  %v610_v43 = vadd.f32 %v794_v37, %v561_v35 }
 0x10d   :  { %v641_v44 = vadd.f32 %v716_v32, %v630_v40  ;;  %v618_v45 = vadd.f32 %v800_v41, %v569_v39 }
 0x10e   :  { %v643_v46 = vmax.f32 %v639_v42, 0.0  ;;  %v629_v47 = vmul.f32 %v715_v27, %v610_v43 }
 0x10f   :  { %v645_v48 = vmax.f32 %v641_v44, 0.0  ;;  %v631_v49 = vmul.f32 %v715_v27, %v618_v45 }
 0x110   :  { %647 = vst [vmem:[%s1110_s4] sm:$0xff] %v643_v46  ;;  %v640_v50 = vadd.f32 %v716_v32, %v629_v47 }
 0x111   :  { %649 = vst [vmem:[%s1110_s4 + $0x10] sm:$0xff] %v645_v48  ;;  %v642_v51 = vadd.f32 %v716_v32, %v631_v49 }
 0x112   :  { %v644_v52 = vmax.f32 %v640_v50, 0.0 }
 0x113   :  { %v646_v53 = vmax.f32 %v642_v51, 0.0 }
 0x114   :  { %648 = vst [vmem:[%s1110_s4 + $0x8] sm:$0xff] %v644_v52 }
 0x115   :  { %650 = vst [vmem:[%s1110_s4 + $0x18] sm:$0xff] %v646_v53 }

// kernel: forward.34
= control target key start
LH: loop header
LB: loop body
LE: loop exit
PB: predicated region body
PF: predicated region fallthrough
CT: control target
= control target key end

     0   :  { %s807_s1 = inlined_call_operand.vmem [shape: bf16[384,128], index: 1, kind: input, shape index: {}]   ;;  %s808_s0 = inlined_call_operand.vmem [shape: bf16[64,384], index: 0, kind: input, shape index: {}]   ;;  %s809_s2 = inlined_call_operand.vmem [shape: f32[1,128], index: 2, kind: input, shape index: {}]   ;;  %s810_s3 = inlined_call_operand.vmem [shape: f32[1,128], index: 3, kind: input, shape index: {}]   ;;  %s811_s4 = inlined_call_operand.vmem [shape: f32[64,128], index: 4, kind: output, shape index: {}]  }
   0x1   :  { %v584_v0 = vld [vmem:[%s807_s1 + $0x78] sm:$0xff]   ;;  %v587_v3 = vld [vmem:[%s807_s1 + $0x70] sm:$0xff]   ;;  %v590_v6 = vld [vmem:[%s807_s1 + $0x68] sm:$0xff]  }
   0x2   :  { %v585_v1 = vld [vmem:[%s807_s1 + $0x38] sm:$0xff]   ;;  %508 = vmatprep.subr.bf16.mxu0 %v584_v0  ;;  %v588_v4 = vld [vmem:[%s807_s1 + $0x30] sm:$0xff]   ;;  %v591_v7 = vld [vmem:[%s807_s1 + $0x28] sm:$0xff]  }
   0x3   :  { %v586_v2 = vld [vmem:[%s807_s1 + $0xb8] sm:$0xff]   ;;  %509 = vmatpush3.bf16.msra.mxu0 %v585_v1  ;;  %v589_v5 = vld [vmem:[%s807_s1 + $0xb0] sm:$0xff]   ;;  %v592_v8 = vld [vmem:[%s807_s1 + $0xa8] sm:$0xff]  }
   0x4   :  { %560 = vmatprep.subr.bf16.mxu1 %v586_v2  ;;  %510 = vmatprep.subr.bf16.mxu0 %v587_v3  ;;  %v593_v9 = vld [vmem:[%s807_s1 + $0x60] sm:$0xff]   ;;  %v596_v12 = vld [vmem:[%s807_s1 + $0x58] sm:$0xff]   ;;  %v599_v15 = vld [vmem:[%s807_s1 + $0x50] sm:$0xff]  }
   0x5   :  { %561 = vmatpush3.bf16.msra.mxu1 %v586_v2  ;;  %v594_v10 = vld [vmem:[%s807_s1 + $0x20] sm:$0xff]   ;;  %v598_v13 = vld [vmem:[%s807_s1 + $0x98] sm:$0xff]   ;;  %v601_v16 = vld [vmem:[%s807_s1 + $0x90] sm:$0xff]  }
   0x6   :  { %562 = vmatprep.subr.bf16.mxu1 %v589_v5  ;;  %v595_v11 = vld [vmem:[%s807_s1 + $0xa0] sm:$0xff]   ;;  %v597_v14 = vld [vmem:[%s807_s1 + $0x18] sm:$0xff]   ;;  %v600_v17 = vld [vmem:[%s807_s1 + $0x10] sm:$0xff]  }
   0x7   :  { %511 = vmatpush3.bf16.msra.mxu0 %v588_v4  ;;  %v602_v18 = vld [vmem:[%s807_s1 + $0x48] sm:$0xff]   ;;  %v605_v21 = vld [vmem:[%s807_s1 + $0x40] sm:$0xff]   ;;  %v620_v32 = vld [vmem:[%s808_s0 + $0x50] ss:$12 sps:$4 sm:$0xff]  }
   0x8   :  { %512 = vmatprep.subr.bf16.mxu0 %v590_v6  ;;  %v603_v19 = vld [vmem:[%s807_s1 + $0x8] sm:$0xff]   ;;  %v607_v22 = vld [vmem:[%s807_s1 + $0x80] sm:$0xff]   ;;  %v618_v33 = vld [vmem:[%s808_s0 + $0x30] ss:$12 sps:$4 sm:$0xff]  }
   0x9   :  { %563 = vmatpush3.bf16.msra.mxu1 %v589_v5  ;;  %v604_v20 = vld [vmem:[%s807_s1 + $0x88] sm:$0xff]   ;;  %v610_v23 = vld [vmem:[%s808_s0 + $0x4] ss:$12 sps:$4 sm:$0xff]   ;;  %v616_v31 = vld [vmem:[%s808_s0 + $0x34] ss:$12 sps:$4 sm:$0xff]  }
   0xa   :  { %564 = vmatprep.subr.bf16.mxu1 %v592_v8  ;;  %v611_v24 = vld [vmem:[%s808_s0 + $0x8] ss:$12 sps:$4 sm:$0xff]   ;;  %v606_v25 = vld [vmem:[%s807_s1] sm:$0xff]   ;;  %322 = vmatprep.mubr.bf16.mxu0 %v610_v23  ;;  %v621_v34 = vld [vmem:[%s808_s0 + $0x4c] ss:$12 sps:$4 sm:$0xff]  }
   0xb   :  { %513 = vmatpush3.bf16.msra.mxu0 %v591_v7  ;;  %576 = vmatprep.mubr.bf16.mxu1 %v611_v24  ;;  %v608_v26 = vld [vmem:[%s808_s0] ss:$12 sps:$4 sm:$0xff]   ;;  %v613_v27 = vld [vmem:[%s808_s0 + $0x1c] ss:$12 sps:$4 sm:$0xff]   ;;  %v619_v29 = vld [vmem:[%s808_s0 + $0x38] ss:$12 sps:$4 sm:$0xff]  }
   0xc   :  { %514 = vmatprep.subr.bf16.mxu0 %v593_v9  ;;  %v612_v28 = vld [vmem:[%s808_s0 + $0x20] ss:$12 sps:$4 sm:$0xff]   ;;  %v615_v30 = vld [vmem:[%s808_s0 + $0x18] ss:$12 sps:$4 sm:$0xff]   ;;  %v623_v35 = vld [vmem:[%s808_s0 + $0x48] ss:$12 sps:$4 sm:$0xff]  }
   0xd   :  { %565 = vmatpush3.bf16.msra.mxu1 %v592_v8  ;;  %v760_v42 = vld [vmem:[%s809_s2] ss:$0 sm:$0xff] }
   0xe   :  { %566 = vmatprep.subr.bf16.mxu1 %v595_v11  ;;  %v765_v44 = vld [vmem:[%s810_s3] ss:$0 sm:$0xff] }
   0xf   :  { %515 = vmatpush3.bf16.msra.mxu0 %v594_v10 }
  0x10   :  { %516 = vmatprep.subr.bf16.mxu0 %v596_v12 }
  0x11   :  { %567 = vmatpush3.bf16.msra.mxu1 %v595_v11 }
  0x12   :  { %568 = vmatprep.subr.bf16.mxu1 %v598_v13 }
  0x13   :  { %517 = vmatpush3.bf16.msra.mxu0 %v597_v14 }
  0x14   :  { %518 = vmatprep.subr.bf16.mxu0 %v599_v15 }
  0x15   :  { %569 = vmatpush3.bf16.msra.mxu1 %v598_v13 }
  0x16   :  { %570 = vmatprep.subr.bf16.mxu1 %v601_v16 }
  0x17   :  { %519 = vmatpush3.bf16.msra.mxu0 %v600_v17 }
  0x18   :  { %520 = vmatprep.subr.bf16.mxu0 %v602_v18 }
  0x19   :  { %571 = vmatpush3.bf16.msra.mxu1 %v601_v16 }
  0x1a   :  { %572 = vmatprep.subr.bf16.mxu1 %v604_v20 }
  0x1b   :  { %521 = vmatpush3.bf16.msra.mxu0 %v603_v19 }
  0x1c   :  { %522 = vmatprep.subr.bf16.mxu0 %v605_v21 }
  0x1d   :  { %573 = vmatpush3.bf16.msra.mxu1 %v604_v20 }
  0x1e   :  { %574 = vmatprep.subr.bf16.mxu1 %v607_v22 }
  0x1f   :  { %523 = vmatpush3.bf16.msra.mxu0 %v606_v25 }
  0x21   :  { %575 = vmatpush3.bf16.msra.mxu1 %v607_v22 }
  0x22   :  { %323 = vmatmul.mubr.bf16.vlgmr.msra.gmra.mxu0 %v608_v26 }
  0x23   :  { %330 = vmatprep.mubr.bf16.mxu0 %v613_v27 }
  0x24   :  { %577 = vmatmul.mubr.bf16.vlgmr.msra.gmra.mxu1 %v612_v28 }
  0x25   :  { %580 = vmatprep.mubr.bf16.mxu1 %v619_v29 }
  0x2a   :  { %331 = vmatmul.mubr.bf16.gmra.mxu0 %v615_v30 }
  0x2b   :  { %338 = vmatprep.mubr.bf16.mxu0 %v616_v31 }
  0x2c   :  { %581 = vmatmul.mubr.bf16.gmra.mxu1 %v620_v32 }
  0x32   :  { %339 = vmatmul.mubr.bf16.gmra.mxu0 %v618_v33 }
  0x33   :  { %346 = vmatprep.mubr.bf16.mxu0 %v621_v34 }
  0x3a   :  { %347 = vmatmul.mubr.bf16.gmra.mxu0 %v623_v35 }
  0xe2   :  { %v524_v36 = vpop.f32.mrf.mxu0 }
  0xe4   :  { %v525_v37 = vpop.f32.mrf.mxu0  ;;  %v578_v38 = vpop.f32.mrf.mxu1 }
  0xe5   :  { %v526_v39 = vadd.f32 %v525_v37, %v524_v36 }
  0xe6   :  { %v527_v40 = vpop.f32.mrf.mxu0  ;;  %v389_v41 = vpop.f32.mrf.mxu1 }
  0xe7   :  { %v390_v43 = vadd.f32 %v526_v39, %v389_v41 }
  0xe8   :  { %v528_v45 = vpop.f32.mrf.mxu0  ;;  %v579_v46 = vpop.f32.mrf.mxu1 }
  0xe9   :  { %v427_v47 = vmul.f32 %v760_v42, %v390_v43  ;;  %v529_v48 = vadd.f32 %v528_v45, %v527_v40 }
  0xea   :  { %v530_v49 = vpop.f32.mrf.mxu0  ;;  %v392_v50 = vpop.f32.mrf.mxu1 }
  0xeb   :  { %v442_v51 = vadd.f32 %v765_v44, %v427_v47  ;;  %v393_v52 = vadd.f32 %v529_v48, %v392_v50 }
  0xec   :  { %v531_v53 = vpop.f32.mrf.mxu0  ;;  %v582_v54 = vpop.f32.mrf.mxu1 }
  0xed   :  { %v450_v55 = vmax.f32 %v442_v51, 0.0  ;;  %v428_v56 = vmul.f32 %v760_v42, %v393_v52  ;;  %v532_v57 = vadd.f32 %v531_v53, %v530_v49 }
  0xee   :  { %v533_v58 = vpop.f32.mrf.mxu0  ;;  %v405_v62 = vpop.f32.mrf.mxu1 }
  0xef   :  { %458 = vst [vmem:[%s811_s4] sm:$0xff] %v450_v55  ;;  %v443_v59 = vadd.f32 %v765_v44, %v428_v56  ;;  %v398_v60 = vadd.f32 %v578_v38, %v532_v57 }
  0xf0   :  { %v534_v61 = vpop.f32.mrf.mxu0  ;;  %v583_v6 = vpop.f32.mrf.mxu1 }
  0xf1   :  { %v451_v63 = vmax.f32 %v443_v59, 0.0  ;;  %v429_v0 = vmul.f32 %v760_v42, %v398_v60  ;;  %v535_v1 = vadd.f32 %v534_v61, %v533_v58 }
  0xf2   :  { %v536_v2 = vpop.f32.mrf.mxu0  ;;  %v408_v14 = vpop.f32.mrf.mxu1 }
  0xf3   :  { %459 = vst [vmem:[%s811_s4 + $0x8] sm:$0xff] %v451_v63  ;;  %v444_v3 = vadd.f32 %v765_v44, %v429_v0  ;;  %v401_v4 = vadd.f32 %v579_v46, %v535_v1 }
  0xf4   :  { %v537_v5 = vpop.f32.mrf.mxu0 }
  0xf5   :  { %v452_v7 = vmax.f32 %v444_v3, 0.0  ;;  %v430_v8 = vmul.f32 %v760_v42, %v401_v4  ;;  %v538_v9 = vadd.f32 %v537_v5, %v536_v2 }
  0xf6   :  { %v539_v10 = vpop.f32.mrf.mxu0 }
  0xf7   :  { %460 = vst [vmem:[%s811_s4 + $0x10] sm:$0xff] %v452_v7  ;;  %v445_v11 = vadd.f32 %v765_v44, %v430_v8  ;;  %v406_v12 = vadd.f32 %v538_v9, %v405_v62 }
  0xf8   :  { %v540_v13 = vpop.f32.mrf.mxu0 }
  0xf9   :  { %v453_v15 = vmax.f32 %v445_v11, 0.0  ;;  %v431_v16 = vmul.f32 %v760_v42, %v406_v12  ;;  %v541_v17 = vadd.f32 %v540_v13, %v539_v10 }
  0xfa   :  { %v542_v18 = vpop.f32.mrf.mxu0 }
  0xfb   :  { %461 = vst [vmem:[%s811_s4 + $0x18] sm:$0xff] %v453_v15  ;;  %v446_v19 = vadd.f32 %v765_v44, %v431_v16  ;;  %v409_v20 = vadd.f32 %v541_v17, %v408_v14 }
  0xfc   :  { %v543_v21 = vpop.f32.mrf.mxu0 }
  0xfd   :  { %v454_v22 = vmax.f32 %v446_v19, 0.0  ;;  %v432_v23 = vmul.f32 %v760_v42, %v409_v20  ;;  %v544_v24 = vadd.f32 %v543_v21, %v542_v18 }
  0xfe   :  { %v545_v25 = vpop.f32.mrf.mxu0 }
  0xff   :  { %462 = vst [vmem:[%s811_s4 + $0x20] sm:$0xff] %v454_v22  ;;  %v447_v26 = vadd.f32 %v765_v44, %v432_v23  ;;  %v414_v27 = vadd.f32 %v582_v54, %v544_v24 }
 0x100   :  { %v546_v28 = vpop.f32.mrf.mxu0 }
 0x101   :  { %v455_v29 = vmax.f32 %v447_v26, 0.0  ;;  %v433_v30 = vmul.f32 %v760_v42, %v414_v27  ;;  %v547_v31 = vadd.f32 %v546_v28, %v545_v25 }
 0x103   :  { %463 = vst [vmem:[%s811_s4 + $0x28] sm:$0xff] %v455_v29  ;;  %v448_v32 = vadd.f32 %v765_v44, %v433_v30  ;;  %v417_v33 = vadd.f32 %v583_v6, %v547_v31 }
 0x105   :  { %v456_v34 = vmax.f32 %v448_v32, 0.0  ;;  %v434_v35 = vmul.f32 %v760_v42, %v417_v33 }
 0x107   :  { %464 = vst [vmem:[%s811_s4 + $0x30] sm:$0xff] %v456_v34  ;;  %v449_v36 = vadd.f32 %v765_v44, %v434_v35 }
 0x109   :  { %v457_v37 = vmax.f32 %v449_v36, 0.0 }
 0x10b   :  { %465 = vst [vmem:[%s811_s4 + $0x38] sm:$0xff] %v457_v37 }

// kernel: forward.36
= control target key start
LH: loop header
LB: loop body
LE: loop exit
PB: predicated region body
PF: predicated region fallthrough
CT: control target
= control target key end

     0   :  { %s786_s1 = inlined_call_operand.vmem [shape: bf16[256,128], index: 1, kind: input, shape index: {}]   ;;  %s787_s0 = inlined_call_operand.vmem [shape: bf16[128,256], index: 0, kind: input, shape index: {}]   ;;  %s788_s2 = inlined_call_operand.vmem [shape: f32[1,128], index: 2, kind: input, shape index: {}]   ;;  %s789_s3 = inlined_call_operand.vmem [shape: f32[1,128], index: 3, kind: input, shape index: {}]   ;;  %s790_s4 = inlined_call_operand.vmem [shape: f32[128,128], index: 4, kind: output, shape index: {}]  }
   0x1   :  { %v535_v0 = vld [vmem:[%s786_s1 + $0x78] sm:$0xff]   ;;  %v537_v2 = vld [vmem:[%s786_s1 + $0x70] sm:$0xff]   ;;  %v539_v4 = vld [vmem:[%s786_s1 + $0x68] sm:$0xff]  }
   0x2   :  { %v536_v1 = vld [vmem:[%s786_s1 + $0x38] sm:$0xff]   ;;  %455 = vmatprep.subr.bf16.mxu0 %v535_v0  ;;  %519 = vmatprep.subr.bf16.mxu1 %v535_v0  ;;  %v538_v3 = vld [vmem:[%s786_s1 + $0x30] sm:$0xff]   ;;  %v540_v5 = vld [vmem:[%s786_s1 + $0x28] sm:$0xff]  }
   0x3   :  { %456 = vmatpush3.bf16.msra.mxu0 %v536_v1  ;;  %527 = vmatpush3.bf16.msra.mxu1 %v536_v1  ;;  %v541_v6 = vld [vmem:[%s786_s1 + $0x60] sm:$0xff]   ;;  %v543_v8 = vld [vmem:[%s786_s1 + $0x58] sm:$0xff]   ;;  %v545_v10 = vld [vmem:[%s786_s1 + $0x50] sm:$0xff]  }
   0x4   :  { %457 = vmatprep.subr.bf16.mxu0 %v537_v2  ;;  %520 = vmatprep.subr.bf16.mxu1 %v537_v2  ;;  %v542_v7 = vld [vmem:[%s786_s1 + $0x20] sm:$0xff]   ;;  %v544_v9 = vld [vmem:[%s786_s1 + $0x18] sm:$0xff]   ;;  %v546_v13 = vld [vmem:[%s786_s1 + $0x10] sm:$0xff]  }
   0x5   :  { %v553_v11 = vld [vmem:[%s787_s0 + $0x4] ss:$8 sps:$4 sm:$0xff]   ;;  %v551_v18 = vld [vmem:[%s787_s0] ss:$8 sps:$4 sm:$0xff]   ;;  %v557_v20 = vld [vmem:[%s787_s0 + $0x14] ss:$8 sps:$4 sm:$0xff]  }
   0x6   :  { %v556_v12 = vld [vmem:[%s787_s0 + $0x44] ss:$8 sps:$4 sm:$0xff]   ;;  %274 = vmatprep.mubr.bf16.mxu0 %v553_v11  ;;  %v554_v19 = vld [vmem:[%s787_s0 + $0x40] ss:$8 sps:$4 sm:$0xff]   ;;  %v559_v21 = vld [vmem:[%s787_s0 + $0x54] ss:$8 sps:$4 sm:$0xff]  }
   0x7   :  { %458 = vmatpush3.bf16.msra.mxu0 %v538_v3  ;;  %528 = vmatpush3.bf16.msra.mxu1 %v538_v3  ;;  %v547_v14 = vld [vmem:[%s786_s1 + $0x48] sm:$0xff]   ;;  %v549_v16 = vld [vmem:[%s786_s1 + $0x40] sm:$0xff]   ;;  %v561_v22 = vld [vmem:[%s787_s0 + $0x10] ss:$8 sps:$4 sm:$0xff]  }
   0x8   :  { %459 = vmatprep.subr.bf16.mxu0 %v539_v4  ;;  %521 = vmatprep.subr.bf16.mxu1 %v539_v4  ;;  %v548_v15 = vld [vmem:[%s786_s1 + $0x8] sm:$0xff]   ;;  %v550_v17 = vld [vmem:[%s786_s1] sm:$0xff]   ;;  %v562_v23 = vld [vmem:[%s787_s0 + $0x50] ss:$8 sps:$4 sm:$0xff]  }
   0x9   :  { %306 = vmatprep.mubr.bf16.mxu1 %v556_v12  ;;  %v563_v24 = vld [vmem:[%s787_s0 + $0x24] ss:$8 sps:$4 sm:$0xff]   ;;  %v567_v26 = vld [vmem:[%s787_s0 + $0x20] ss:$8 sps:$4 sm:$0xff]   ;;  %v569_v28 = vld [vmem:[%s787_s0 + $0x34] ss:$8 sps:$4 sm:$0xff]  }
   0xa   :  { %v565_v25 = vld [vmem:[%s787_s0 + $0x64] ss:$8 sps:$4 sm:$0xff]   ;;  %v568_v27 = vld [vmem:[%s787_s0 + $0x60] ss:$8 sps:$4 sm:$0xff]   ;;  %v571_v29 = vld [vmem:[%s787_s0 + $0x74] ss:$8 sps:$4 sm:$0xff]  }
   0xb   :  { %460 = vmatpush3.bf16.msra.mxu0 %v540_v5  ;;  %529 = vmatpush3.bf16.msra.mxu1 %v540_v5  ;;  %v573_v30 = vld [vmem:[%s787_s0 + $0x30] ss:$8 sps:$4 sm:$0xff]   ;;  %v699_v35 = vld [vmem:[%s788_s2] ss:$0 sm:$0xff] }
   0xc   :  { %461 = vmatprep.subr.bf16.mxu0 %v541_v6  ;;  %522 = vmatprep.subr.bf16.mxu1 %v541_v6  ;;  %v574_v31 = vld [vmem:[%s787_s0 + $0x70] ss:$8 sps:$4 sm:$0xff]   ;;  %v704_v39 = vld [vmem:[%s789_s3] ss:$0 sm:$0xff] }
   0xf   :  { %462 = vmatpush3.bf16.msra.mxu0 %v542_v7  ;;  %530 = vmatpush3.bf16.msra.mxu1 %v542_v7 }
  0x10   :  { %463 = vmatprep.subr.bf16.mxu0 %v543_v8  ;;  %523 = vmatprep.subr.bf16.mxu1 %v543_v8 }
  0x13   :  { %464 = vmatpush3.bf16.msra.mxu0 %v544_v9  ;;  %531 = vmatpush3.bf16.msra.mxu1 %v544_v9 }
  0x14   :  { %465 = vmatprep.subr.bf16.mxu0 %v545_v10  ;;  %524 = vmatprep.subr.bf16.mxu1 %v545_v10 }
  0x17   :  { %466 = vmatpush3.bf16.msra.mxu0 %v546_v13  ;;  %532 = vmatpush3.bf16.msra.mxu1 %v546_v13 }
  0x18   :  { %467 = vmatprep.subr.bf16.mxu0 %v547_v14  ;;  %525 = vmatprep.subr.bf16.mxu1 %v547_v14 }
  0x1b   :  { %468 = vmatpush3.bf16.msra.mxu0 %v548_v15  ;;  %533 = vmatpush3.bf16.msra.mxu1 %v548_v15 }
  0x1c   :  { %469 = vmatprep.subr.bf16.mxu0 %v549_v16  ;;  %526 = vmatprep.subr.bf16.mxu1 %v549_v16 }
  0x1f   :  { %470 = vmatpush3.bf16.msra.mxu0 %v550_v17  ;;  %534 = vmatpush3.bf16.msra.mxu1 %v550_v17 }
  0x22   :  { %275 = vmatmul.mubr.bf16.vlgmr.msra.gmra.mxu0 %v551_v18  ;;  %307 = vmatmul.mubr.bf16.vlgmr.msra.gmra.mxu1 %v554_v19 }
  0x23   :  { %282 = vmatprep.mubr.bf16.mxu0 %v557_v20  ;;  %314 = vmatprep.mubr.bf16.mxu1 %v559_v21 }
  0x2a   :  { %283 = vmatmul.mubr.bf16.gmra.mxu0 %v561_v22  ;;  %315 = vmatmul.mubr.bf16.gmra.mxu1 %v562_v23 }
  0x2b   :  { %290 = vmatprep.mubr.bf16.mxu0 %v563_v24  ;;  %322 = vmatprep.mubr.bf16.mxu1 %v565_v25 }
  0x32   :  { %291 = vmatmul.mubr.bf16.gmra.mxu0 %v567_v26  ;;  %323 = vmatmul.mubr.bf16.gmra.mxu1 %v568_v27 }
  0x33   :  { %298 = vmatprep.mubr.bf16.mxu0 %v569_v28  ;;  %330 = vmatprep.mubr.bf16.mxu1 %v571_v29 }
  0x3a   :  { %299 = vmatmul.mubr.bf16.gmra.mxu0 %v573_v30  ;;  %331 = vmatmul.mubr.bf16.gmra.mxu1 %v574_v31 }
  0xe2   :  { %v471_v32 = vpop.f32.mrf.mxu0  ;;  %v495_v33 = vpop.f32.mrf.mxu1 }
  0xe4   :  { %v472_v34 = vpop.f32.mrf.mxu0  ;;  %v496_v36 = vpop.f32.mrf.mxu1 }
  0xe5   :  { %v473_v37 = vadd.f32 %v472_v34, %v471_v32  ;;  %v497_v38 = vadd.f32 %v496_v36, %v495_v33 }
  0xe6   :  { %v474_v40 = vpop.f32.mrf.mxu0  ;;  %v498_v41 = vpop.f32.mrf.mxu1 }
  0xe7   :  { %v346_v42 = vmul.f32 %v473_v37, %v699_v35  ;;  %v354_v43 = vmul.f32 %v497_v38, %v699_v35 }
  0xe8   :  { %v475_v44 = vpop.f32.mrf.mxu0  ;;  %v499_v45 = vpop.f32.mrf.mxu1 }
  0xe9   :  { %v369_v46 = vadd.f32 %v704_v39, %v346_v42  ;;  %v377_v47 = vadd.f32 %v704_v39, %v354_v43  ;;  %v476_v48 = vadd.f32 %v475_v44, %v474_v40  ;;  %v500_v49 = vadd.f32 %v499_v45, %v498_v41 }
  0xea   :  { %v477_v50 = vpop.f32.mrf.mxu0  ;;  %v501_v51 = vpop.f32.mrf.mxu1 }
  0xeb   :  { %v385_v52 = vmax.f32 %v369_v46, 0.0  ;;  %v393_v53 = vmax.f32 %v377_v47, 0.0  ;;  %v347_v54 = vmul.f32 %v476_v48, %v699_v35  ;;  %v355_v55 = vmul.f32 %v500_v49, %v699_v35 }
  0xec   :  { %v478_v56 = vpop.f32.mrf.mxu0  ;;  %v502_v57 = vpop.f32.mrf.mxu1 }
  0xed   :  { %401 = vst [vmem:[%s790_s4] sm:$0xff] %v385_v52  ;;  %409 = vst [vmem:[%s790_s4 + $0x40] sm:$0xff] %v393_v53  ;;  %v370_v58 = vadd.f32 %v704_v39, %v347_v54  ;;  %v378_v59 = vadd.f32 %v704_v39, %v355_v55  ;;  %v479_v60 = vadd.f32 %v478_v56, %v477_v50 }
  0xee   :  { %v503_v61 = vadd.f32 %v502_v57, %v501_v51  ;;  %v480_v62 = vpop.f32.mrf.mxu0  ;;  %v504_v63 = vpop.f32.mrf.mxu1 }
  0xef   :  { %v386_v0 = vmax.f32 %v370_v58, 0.0  ;;  %v394_v1 = vmax.f32 %v378_v59, 0.0  ;;  %v348_v2 = vmul.f32 %v479_v60, %v699_v35 }
  0xf0   :  { %v356_v3 = vmul.f32 %v503_v61, %v699_v35  ;;  %v481_v4 = vpop.f32.mrf.mxu0  ;;  %v505_v5 = vpop.f32.mrf.mxu1 }
  0xf1   :  { %402 = vst [vmem:[%s790_s4 + $0x8] sm:$0xff] %v386_v0  ;;  %410 = vst [vmem:[%s790_s4 + $0x48] sm:$0xff] %v394_v1  ;;  %v371_v6 = vadd.f32 %v704_v39, %v348_v2  ;;  %v482_v8 = vadd.f32 %v481_v4, %v480_v62  ;;  %v506_v9 = vadd.f32 %v505_v5, %v504_v63 }
  0xf2   :  { %v379_v7 = vadd.f32 %v704_v39, %v356_v3  ;;  %v483_v10 = vpop.f32.mrf.mxu0  ;;  %v507_v11 = vpop.f32.mrf.mxu1 }
  0xf3   :  { %v387_v12 = vmax.f32 %v371_v6, 0.0  ;;  %v349_v14 = vmul.f32 %v482_v8, %v699_v35  ;;  %v357_v15 = vmul.f32 %v506_v9, %v699_v35 }
  0xf4   :  { %v395_v13 = vmax.f32 %v379_v7, 0.0  ;;  %v484_v16 = vpop.f32.mrf.mxu0  ;;  %v508_v17 = vpop.f32.mrf.mxu1 }
  0xf5   :  { %403 = vst [vmem:[%s790_s4 + $0x10] sm:$0xff] %v387_v12  ;;  %v372_v18 = vadd.f32 %v704_v39, %v349_v14  ;;  %v380_v19 = vadd.f32 %v704_v39, %v357_v15  ;;  %v485_v20 = vadd.f32 %v484_v16, %v483_v10  ;;  %v509_v21 = vadd.f32 %v508_v17, %v507_v11 }
  0xf6   :  { %411 = vst [vmem:[%s790_s4 + $0x50] sm:$0xff] %v395_v13  ;;  %v486_v22 = vpop.f32.mrf.mxu0  ;;  %v510_v23 = vpop.f32.mrf.mxu1 }
  0xf7   :  { %v388_v24 = vmax.f32 %v372_v18, 0.0  ;;  %v396_v25 = vmax.f32 %v380_v19, 0.0  ;;  %v350_v26 = vmul.f32 %v485_v20, %v699_v35  ;;  %v358_v27 = vmul.f32 %v509_v21, %v699_v35 }
  0xf8   :  { %v487_v28 = vpop.f32.mrf.mxu0  ;;  %v511_v29 = vpop.f32.mrf.mxu1 }
  0xf9   :  { %404 = vst [vmem:[%s790_s4 + $0x18] sm:$0xff] %v388_v24  ;;  %412 = vst [vmem:[%s790_s4 + $0x58] sm:$0xff] %v396_v25  ;;  %v373_v30 = vadd.f32 %v704_v39, %v350_v26  ;;  %v381_v31 = vadd.f32 %v704_v39, %v358_v27  ;;  %v488_v32 = vadd.f32 %v487_v28, %v486_v22 }
  0xfa   :  { %v512_v33 = vadd.f32 %v511_v29, %v510_v23  ;;  %v489_v34 = vpop.f32.mrf.mxu0  ;;  %v513_v36 = vpop.f32.mrf.mxu1 }
  0xfb   :  { %v389_v37 = vmax.f32 %v373_v30, 0.0  ;;  %v397_v38 = vmax.f32 %v381_v31, 0.0  ;;  %v351_v40 = vmul.f32 %v488_v32, %v699_v35 }
  0xfc   :  { %v359_v41 = vmul.f32 %v512_v33, %v699_v35  ;;  %v490_v42 = vpop.f32.mrf.mxu0  ;;  %v514_v43 = vpop.f32.mrf.mxu1 }
  0xfd   :  { %405 = vst [vmem:[%s790_s4 + $0x20] sm:$0xff] %v389_v37  ;;  %413 = vst [vmem:[%s790_s4 + $0x60] sm:$0xff] %v397_v38  ;;  %v374_v44 = vadd.f32 %v704_v39, %v351_v40  ;;  %v491_v46 = vadd.f32 %v490_v42, %v489_v34  ;;  %v515_v47 = vadd.f32 %v514_v43, %v513_v36 }
  0xfe   :  { %v382_v45 = vadd.f32 %v704_v39, %v359_v41  ;;  %v492_v48 = vpop.f32.mrf.mxu0  ;;  %v516_v49 = vpop.f32.mrf.mxu1 }
  0xff   :  { %v390_v50 = vmax.f32 %v374_v44, 0.0  ;;  %v352_v52 = vmul.f32 %v491_v46, %v699_v35  ;;  %v360_v53 = vmul.f32 %v515_v47, %v699_v35 }
 0x100   :  { %v398_v51 = vmax.f32 %v382_v45, 0.0  ;;  %v493_v54 = vpop.f32.mrf.mxu0  ;;  %v517_v55 = vpop.f32.mrf.mxu1 }
 0x101   :  { %406 = vst [vmem:[%s790_s4 + $0x28] sm:$0xff] %v390_v50  ;;  %v375_v56 = vadd.f32 %v704_v39, %v352_v52  ;;  %v383_v57 = vadd.f32 %v704_v39, %v360_v53  ;;  %v494_v58 = vadd.f32 %v493_v54, %v492_v48  ;;  %v518_v59 = vadd.f32 %v517_v55, %v516_v49 }
 0x102   :  { %414 = vst [vmem:[%s790_s4 + $0x68] sm:$0xff] %v398_v51 }
 0x103   :  { %v391_v60 = vmax.f32 %v375_v56, 0.0  ;;  %v399_v61 = vmax.f32 %v383_v57, 0.0  ;;  %v353_v62 = vmul.f32 %v494_v58, %v699_v35  ;;  %v361_v63 = vmul.f32 %v518_v59, %v699_v35 }
 0x105   :  { %407 = vst [vmem:[%s790_s4 + $0x30] sm:$0xff] %v391_v60  ;;  %415 = vst [vmem:[%s790_s4 + $0x70] sm:$0xff] %v399_v61  ;;  %v376_v0 = vadd.f32 %v704_v39, %v353_v62  ;;  %v384_v1 = vadd.f32 %v704_v39, %v361_v63 }
 0x107   :  { %v392_v2 = vmax.f32 %v376_v0, 0.0  ;;  %v400_v3 = vmax.f32 %v384_v1, 0.0 }
 0x109   :  { %408 = vst [vmem:[%s790_s4 + $0x38] sm:$0xff] %v392_v2  ;;  %416 = vst [vmem:[%s790_s4 + $0x78] sm:$0xff] %v400_v3 }

// kernel: forward.41
= control target key start
LH: loop header
LB: loop body
LE: loop exit
PB: predicated region body
PF: predicated region fallthrough
CT: control target
= control target key end

     0   :  { %s1708_s15 = smov 0   ;;  %s1710_s16 = smov 0   ;;  %s2098_s0 = inlined_call_operand.vmem [shape: bf16[2048,256], index: 0, kind: input, shape index: {}]   ;;  %s2099_s1 = inlined_call_operand.vmem [shape: bf16[256,128], index: 1, kind: input, shape index: {}]   ;;  %s2100_s2 = inlined_call_operand.vmem [shape: f32[1,128], index: 2, kind: input, shape index: {}]   ;;  %s2101_s3 = inlined_call_operand.vmem [shape: f32[1,128], index: 3, kind: input, shape index: {}]   ;;  %s2102_s4 = inlined_call_operand.vmem [shape: f32[2048,128], index: 4, kind: output, shape index: {}]  }
   0x1   :  { %s1712_s17 = smov 0  }
   0x2 LB: > { %s26_s18 = sadd.s32 1, %s1676_s16  ;;  %p1398_p0 = scmp.ge.s32.totalorder %s1680_s17, 1  ;;  %s1680_s17 = sphi %s1712_s17, %s14_s17   ;;  %s1676_s16 = sphi %s1710_s16, %s2104_s16   ;;  %s1672_s15 = sphi %s1708_s15, %s2103_s15  }
   0x3   : > { %p28_p1 = scmp.ge.s32.totalorder %s26_s18, 4  ;;  %p203_p2 = scmp.lt.s32.totalorder %s1680_s17, 5 }
   0x5   : > { %s2106_s18 = smov (%p28_p1, %s26_s18), 0  ;;  %p204_p3 = pnand %p1398_p0, %p203_p2 }
   0x6   : > { %s1399_s21 = sshll.u32 (!%p204_p3), %s1672_s15, 6 }
   0x7   : > { %207 = sbr.rel (%p204_p3) target bundleno = 399 (0x18f), region = 36  ;;  %p244_p4 = scmp.lt.s32.totalorder (!%p204_p3), %s1399_s21, 255 }
   0xc   : > { %v1546_v0 = vld [vmem:[%s2099_s1 + $0x38] sm:$0xff]   ;;  %v1682_v1 = vmov 0   ;;  %v1547_v2 = vld [vmem:[%s2099_s1 + $0x30] sm:$0xff]   ;;  %v1548_v3 = vld [vmem:[%s2099_s1 + $0x28] sm:$0xff]   ;;  %s2108_s21 = smov (!%p244_p4, %s1399_s21), 255 }
   0xd   : > { %782 = vmatprep.subr.bf16.mxu0 %v1682_v1  ;;  %1489 = vmatprep.subr.bf16.mxu1 %v1682_v1  ;;  %v1549_v4 = vld [vmem:[%s2099_s1 + $0x20] sm:$0xff]   ;;  %s1488_s28 = sshll.u32 %s2108_s21, 3  ;;  %v1550_v5 = vld [vmem:[%s2099_s1 + $0x18] sm:$0xff]   ;;  %v1551_v7 = vld [vmem:[%s2099_s1 + $0x10] sm:$0xff]  }
   0xe   : > { %783 = vmatpush1.bf16.msra.mxu0 %v1546_v0  ;;  %1505 = vmatpush1.bf16.msra.mxu1 %v1546_v0  ;;  %s1757_s7 = scalar_lea.vmem %s2098_s0, %s1488_s28  ;;  %v1552_v9 = vld [vmem:[%s2099_s1 + $0x8] sm:$0xff]   ;;  %v1553_v10 = vld [vmem:[%s2099_s1] sm:$0xff]   ;;  %v1554_v11 = vld [vmem:[%s2099_s1 + $0x78] sm:$0xff]   ;;  %s1897_s15 = scalar_lea.vmem %s2102_s4, %s1488_s28 }
   0xf   : > { %784 = vmatprep.subr.bf16.mxu0 %v1682_v1  ;;  %1490 = vmatprep.subr.bf16.mxu1 %v1682_v1  ;;  %v1564_v6 = vld [vmem:[%s1757_s7 + $0x4] ss:$8 sps:$4 sm:$0xff]   ;;  %v1555_v12 = vld [vmem:[%s2099_s1 + $0x70] sm:$0xff]   ;;  %v1558_v15 = vld [vmem:[%s2099_s1 + $0x58] sm:$0xff]  }
  0x10   : > { %v1567_v8 = vld [vmem:[%s1757_s7 + $0x104] ss:$8 sps:$4 sm:$0xff]   ;;  %814 = vmatprep.mubr.bf16.mxu0 %v1564_v6  ;;  %v1559_v16 = vld [vmem:[%s2099_s1 + $0x50] sm:$0xff]   ;;  %v1562_v19 = vld [vmem:[%s1757_s7] ss:$8 sps:$4 sm:$0xff]  }
  0x11   : > { %942 = vmatprep.mubr.bf16.mxu1 %v1567_v8  ;;  %v1556_v13 = vld [vmem:[%s2099_s1 + $0x68] sm:$0xff]   ;;  %v1557_v14 = vld [vmem:[%s2099_s1 + $0x60] sm:$0xff]   ;;  %v1568_v21 = vld [vmem:[%s1757_s7 + $0x14] ss:$8 sps:$4 sm:$0xff]  }
  0x12   : > { %785 = vmatpush1.bf16.msra.mxu0 %v1547_v2  ;;  %1506 = vmatpush1.bf16.msra.mxu1 %v1547_v2  ;;  %v1560_v17 = vld [vmem:[%s2099_s1 + $0x48] sm:$0xff]   ;;  %v1561_v18 = vld [vmem:[%s2099_s1 + $0x40] sm:$0xff]   ;;  %v1570_v22 = vld [vmem:[%s1757_s7 + $0x114] ss:$8 sps:$4 sm:$0xff]  }
  0x13   : > { %786 = vmatprep.subr.bf16.mxu0 %v1682_v1  ;;  %1491 = vmatprep.subr.bf16.mxu1 %v1682_v1  ;;  %v1565_v20 = vld [vmem:[%s1757_s7 + $0x100] ss:$8 sps:$4 sm:$0xff]   ;;  %v1572_v23 = vld [vmem:[%s1757_s7 + $0x10] ss:$8 sps:$4 sm:$0xff]   ;;  %v1574_v25 = vld [vmem:[%s1757_s7 + $0x24] ss:$8 sps:$4 sm:$0xff]  }
  0x14   : > { %v1573_v24 = vld [vmem:[%s1757_s7 + $0x110] ss:$8 sps:$4 sm:$0xff]   ;;  %v1576_v26 = vld [vmem:[%s1757_s7 + $0x124] ss:$8 sps:$4 sm:$0xff]   ;;  %v1578_v27 = vld [vmem:[%s1757_s7 + $0x20] ss:$8 sps:$4 sm:$0xff]  }
  0x15   : > { %v1579_v28 = vld [vmem:[%s1757_s7 + $0x120] ss:$8 sps:$4 sm:$0xff]   ;;  %v1580_v29 = vld [vmem:[%s1757_s7 + $0x34] ss:$8 sps:$4 sm:$0xff]   ;;  %v1584_v31 = vld [vmem:[%s1757_s7 + $0x30] ss:$8 sps:$4 sm:$0xff]  }
  0x16   : > { %787 = vmatpush1.bf16.msra.mxu0 %v1548_v3  ;;  %1507 = vmatpush1.bf16.msra.mxu1 %v1548_v3  ;;  %v1582_v30 = vld [vmem:[%s1757_s7 + $0x134] ss:$8 sps:$4 sm:$0xff]   ;;  %v1585_v32 = vld [vmem:[%s1757_s7 + $0x130] ss:$8 sps:$4 sm:$0xff]   ;;  %v1586_v33 = vld [vmem:[%s1757_s7 + $0x44] ss:$8 sps:$4 sm:$0xff]  }
  0x17   : > { %788 = vmatprep.subr.bf16.mxu0 %v1682_v1  ;;  %1492 = vmatprep.subr.bf16.mxu1 %v1682_v1  ;;  %v1588_v34 = vld [vmem:[%s1757_s7 + $0x144] ss:$8 sps:$4 sm:$0xff]   ;;  %v1590_v35 = vld [vmem:[%s1757_s7 + $0x40] ss:$8 sps:$4 sm:$0xff]   ;;  %v1592_v37 = vld [vmem:[%s1757_s7 + $0x54] ss:$8 sps:$4 sm:$0xff]  }
  0x18   : > { %v1591_v36 = vld [vmem:[%s1757_s7 + $0x140] ss:$8 sps:$4 sm:$0xff]   ;;  %v1594_v38 = vld [vmem:[%s1757_s7 + $0x154] ss:$8 sps:$4 sm:$0xff]   ;;  %v1596_v39 = vld [vmem:[%s1757_s7 + $0x50] ss:$8 sps:$4 sm:$0xff]  }
  0x19   : > { %v1597_v40 = vld [vmem:[%s1757_s7 + $0x150] ss:$8 sps:$4 sm:$0xff]   ;;  %v1598_v41 = vld [vmem:[%s1757_s7 + $0x64] ss:$8 sps:$4 sm:$0xff]   ;;  %v1602_v43 = vld [vmem:[%s1757_s7 + $0x60] ss:$8 sps:$4 sm:$0xff]  }
  0x1a   : > { %789 = vmatpush1.bf16.msra.mxu0 %v1549_v4  ;;  %1508 = vmatpush1.bf16.msra.mxu1 %v1549_v4  ;;  %v1600_v42 = vld [vmem:[%s1757_s7 + $0x164] ss:$8 sps:$4 sm:$0xff]   ;;  %v1603_v44 = vld [vmem:[%s1757_s7 + $0x160] ss:$8 sps:$4 sm:$0xff]   ;;  %v1604_v45 = vld [vmem:[%s1757_s7 + $0x74] ss:$8 sps:$4 sm:$0xff]  }
  0x1b   : > { %790 = vmatprep.subr.bf16.mxu0 %v1682_v1  ;;  %1493 = vmatprep.subr.bf16.mxu1 %v1682_v1  ;;  %v1606_v46 = vld [vmem:[%s1757_s7 + $0x174] ss:$8 sps:$4 sm:$0xff]   ;;  %v1608_v47 = vld [vmem:[%s1757_s7 + $0x70] ss:$8 sps:$4 sm:$0xff]   ;;  %v1610_v49 = vld [vmem:[%s1757_s7 + $0x84] ss:$8 sps:$4 sm:$0xff]  }
  0x1c   : > { %v1609_v48 = vld [vmem:[%s1757_s7 + $0x170] ss:$8 sps:$4 sm:$0xff]   ;;  %v1612_v50 = vld [vmem:[%s1757_s7 + $0x184] ss:$8 sps:$4 sm:$0xff]   ;;  %v1614_v51 = vld [vmem:[%s1757_s7 + $0x80] ss:$8 sps:$4 sm:$0xff]  }
  0x1d   : > { %v1615_v52 = vld [vmem:[%s1757_s7 + $0x180] ss:$8 sps:$4 sm:$0xff]   ;;  %v1616_v53 = vld [vmem:[%s1757_s7 + $0x94] ss:$8 sps:$4 sm:$0xff]   ;;  %v1620_v55 = vld [vmem:[%s1757_s7 + $0x90] ss:$8 sps:$4 sm:$0xff]  }
  0x1e   : > { %791 = vmatpush1.bf16.msra.mxu0 %v1550_v5  ;;  %1509 = vmatpush1.bf16.msra.mxu1 %v1550_v5  ;;  %v1618_v54 = vld [vmem:[%s1757_s7 + $0x194] ss:$8 sps:$4 sm:$0xff]   ;;  %v1621_v56 = vld [vmem:[%s1757_s7 + $0x190] ss:$8 sps:$4 sm:$0xff]   ;;  %v1622_v57 = vld [vmem:[%s1757_s7 + $0xa4] ss:$8 sps:$4 sm:$0xff]  }
  0x1f   : > { %792 = vmatprep.subr.bf16.mxu0 %v1682_v1  ;;  %1494 = vmatprep.subr.bf16.mxu1 %v1682_v1  ;;  %v1624_v58 = vld [vmem:[%s1757_s7 + $0x1a4] ss:$8 sps:$4 sm:$0xff]   ;;  %v1626_v59 = vld [vmem:[%s1757_s7 + $0xa0] ss:$8 sps:$4 sm:$0xff]   ;;  %v1628_v61 = vld [vmem:[%s1757_s7 + $0xb4] ss:$8 sps:$4 sm:$0xff]  }
  0x20   : > { %v1627_v60 = vld [vmem:[%s1757_s7 + $0x1a0] ss:$8 sps:$4 sm:$0xff]   ;;  %v1630_v62 = vld [vmem:[%s1757_s7 + $0x1b4] ss:$8 sps:$4 sm:$0xff]   ;;  %v1632_v63 = vld [vmem:[%s1757_s7 + $0xb0] ss:$8 sps:$4 sm:$0xff]  }
  0x21   : > { %v1633_v0 = vld [vmem:[%s1757_s7 + $0x1b0] ss:$8 sps:$4 sm:$0xff]   ;;  %v1636_v2 = vld [vmem:[%s1757_s7 + $0x1c4] ss:$8 sps:$4 sm:$0xff]   ;;  %v1638_v3 = vld [vmem:[%s1757_s7 + $0xc0] ss:$8 sps:$4 sm:$0xff]  }
  0x22   : > { %793 = vmatpush1.bf16.msra.mxu0 %v1551_v7  ;;  %1510 = vmatpush1.bf16.msra.mxu1 %v1551_v7  ;;  %v1639_v4 = vld [vmem:[%s1757_s7 + $0x1c0] ss:$8 sps:$4 sm:$0xff]   ;;  %v1640_v5 = vld [vmem:[%s1757_s7 + $0xd4] ss:$8 sps:$4 sm:$0xff]   ;;  %v1644_v7 = vld [vmem:[%s1757_s7 + $0xd0] ss:$8 sps:$4 sm:$0xff]  }
  0x23   : > { %794 = vmatprep.subr.bf16.mxu0 %v1682_v1  ;;  %1495 = vmatprep.subr.bf16.mxu1 %v1682_v1  ;;  %v1642_v6 = vld [vmem:[%s1757_s7 + $0x1d4] ss:$8 sps:$4 sm:$0xff]   ;;  %v1645_v8 = vld [vmem:[%s1757_s7 + $0x1d0] ss:$8 sps:$4 sm:$0xff]  }
  0x26   : > { %795 = vmatpush1.bf16.msra.mxu0 %v1552_v9  ;;  %1511 = vmatpush1.bf16.msra.mxu1 %v1552_v9  ;;  %v1646_v9 = vld [vmem:[%s1757_s7 + $0xe4] ss:$8 sps:$4 sm:$0xff]  }
  0x27   : > { %796 = vmatprep.subr.bf16.mxu0 %v1682_v1  ;;  %1496 = vmatprep.subr.bf16.mxu1 %v1682_v1 }
  0x2a   : > { %797 = vmatpush1.bf16.msra.mxu0 %v1553_v10  ;;  %1512 = vmatpush1.bf16.msra.mxu1 %v1553_v10  ;;  %v1648_v10 = vld [vmem:[%s1757_s7 + $0x1e4] ss:$8 sps:$4 sm:$0xff]  }
  0x2b   : > { %798 = vmatprep.subr.bf16.mxu0 %v1682_v1  ;;  %1497 = vmatprep.subr.bf16.mxu1 %v1682_v1 }
  0x2e   : > { %799 = vmatpush2.bf16.msra.mxu0 %v1554_v11  ;;  %1513 = vmatpush2.bf16.msra.mxu1 %v1554_v11  ;;  %v1650_v11 = vld [vmem:[%s1757_s7 + $0xe0] ss:$8 sps:$4 sm:$0xff]  }
  0x2f   : > { %800 = vmatprep.subr.bf16.mxu0 %v1682_v1  ;;  %1498 = vmatprep.subr.bf16.mxu1 %v1682_v1 }
  0x32   : > { %801 = vmatpush2.bf16.msra.mxu0 %v1555_v12  ;;  %1514 = vmatpush2.bf16.msra.mxu1 %v1555_v12  ;;  %v1651_v12 = vld [vmem:[%s1757_s7 + $0x1e0] ss:$8 sps:$4 sm:$0xff]  }
  0x33   : > { %802 = vmatprep.subr.bf16.mxu0 %v1682_v1  ;;  %1499 = vmatprep.subr.bf16.mxu1 %v1682_v1 }
  0x36   : > { %803 = vmatpush2.bf16.msra.mxu0 %v1556_v13  ;;  %1515 = vmatpush2.bf16.msra.mxu1 %v1556_v13  ;;  %v1652_v13 = vld [vmem:[%s1757_s7 + $0xf4] ss:$8 sps:$4 sm:$0xff]  }
  0x37   : > { %804 = vmatprep.subr.bf16.mxu0 %v1682_v1  ;;  %1500 = vmatprep.subr.bf16.mxu1 %v1682_v1 }
  0x3a   : > { %805 = vmatpush2.bf16.msra.mxu0 %v1557_v14  ;;  %1516 = vmatpush2.bf16.msra.mxu1 %v1557_v14  ;;  %v1654_v14 = vld [vmem:[%s1757_s7 + $0x1f4] ss:$8 sps:$4 sm:$0xff]  }
  0x3b   : > { %806 = vmatprep.subr.bf16.mxu0 %v1682_v1  ;;  %1501 = vmatprep.subr.bf16.mxu1 %v1682_v1 }
  0x3e   : > { %807 = vmatpush2.bf16.msra.mxu0 %v1558_v15  ;;  %1517 = vmatpush2.bf16.msra.mxu1 %v1558_v15  ;;  %v1656_v15 = vld [vmem:[%s1757_s7 + $0xf0] ss:$8 sps:$4 sm:$0xff]  }
  0x3f   : > { %808 = vmatprep.subr.bf16.mxu0 %v1682_v1  ;;  %1502 = vmatprep.subr.bf16.mxu1 %v1682_v1 }
  0x42   : > { %809 = vmatpush2.bf16.msra.mxu0 %v1559_v16  ;;  %1518 = vmatpush2.bf16.msra.mxu1 %v1559_v16  ;;  %v1657_v16 = vld [vmem:[%s1757_s7 + $0x1f0] ss:$8 sps:$4 sm:$0xff]  }
  0x43   : > { %810 = vmatprep.subr.bf16.mxu0 %v1682_v1  ;;  %1503 = vmatprep.subr.bf16.mxu1 %v1682_v1 }
  0x46   : > { %811 = vmatpush2.bf16.msra.mxu0 %v1560_v17  ;;  %1519 = vmatpush2.bf16.msra.mxu1 %v1560_v17  ;;  %v1883_v17 = vld [vmem:[%s2100_s2] ss:$0 sm:$0xff] }
  0x47   : > { %812 = vmatprep.subr.bf16.mxu0 %v1682_v1  ;;  %1504 = vmatprep.subr.bf16.mxu1 %v1682_v1  ;;  %v1634_v1 = vld [vmem:[%s1757_s7 + $0xc4] ss:$8 sps:$4 sm:$0xff]  }
  0x4a   : > { %813 = vmatpush2.bf16.msra.mxu0 %v1561_v18  ;;  %1520 = vmatpush2.bf16.msra.mxu1 %v1561_v18 }
  0x4d   : > { %815 = vmatmul.mubr.bf16.vlgmr.msra.gmra.mxu0 %v1562_v19  ;;  %943 = vmatmul.mubr.bf16.vlgmr.msra.gmra.mxu1 %v1565_v20  ;;  %v1888_v19 = vld [vmem:[%s2101_s3] ss:$0 sm:$0xff] }
  0x4e   : > { %822 = vmatprep.mubr.bf16.mxu0 %v1568_v21  ;;  %950 = vmatprep.mubr.bf16.mxu1 %v1570_v22 }
  0x55   : > { %823 = vmatmul.mubr.bf16.gmra.mxu0 %v1572_v23  ;;  %951 = vmatmul.mubr.bf16.gmra.mxu1 %v1573_v24 }
  0x56   : > { %830 = vmatprep.mubr.bf16.mxu0 %v1574_v25  ;;  %958 = vmatprep.mubr.bf16.mxu1 %v1576_v26 }
  0x5d   : > { %831 = vmatmul.mubr.bf16.gmra.mxu0 %v1578_v27  ;;  %959 = vmatmul.mubr.bf16.gmra.mxu1 %v1579_v28 }
  0x5e   : > { %838 = vmatprep.mubr.bf16.mxu0 %v1580_v29  ;;  %966 = vmatprep.mubr.bf16.mxu1 %v1582_v30 }
  0x65   : > { %839 = vmatmul.mubr.bf16.gmra.mxu0 %v1584_v31  ;;  %967 = vmatmul.mubr.bf16.gmra.mxu1 %v1585_v32 }
  0x66   : > { %846 = vmatprep.mubr.bf16.mxu0 %v1586_v33  ;;  %974 = vmatprep.mubr.bf16.mxu1 %v1588_v34 }
  0x6d   : > { %847 = vmatmul.mubr.bf16.gmra.mxu0 %v1590_v35  ;;  %975 = vmatmul.mubr.bf16.gmra.mxu1 %v1591_v36 }
  0x6e   : > { %854 = vmatprep.mubr.bf16.mxu0 %v1592_v37  ;;  %982 = vmatprep.mubr.bf16.mxu1 %v1594_v38 }
  0x75   : > { %855 = vmatmul.mubr.bf16.gmra.mxu0 %v1596_v39  ;;  %983 = vmatmul.mubr.bf16.gmra.mxu1 %v1597_v40 }
  0x76   : > { %862 = vmatprep.mubr.bf16.mxu0 %v1598_v41  ;;  %990 = vmatprep.mubr.bf16.mxu1 %v1600_v42 }
  0x7d   : > { %863 = vmatmul.mubr.bf16.gmra.mxu0 %v1602_v43  ;;  %991 = vmatmul.mubr.bf16.gmra.mxu1 %v1603_v44 }
  0x7e   : > { %870 = vmatprep.mubr.bf16.mxu0 %v1604_v45  ;;  %998 = vmatprep.mubr.bf16.mxu1 %v1606_v46 }
  0x85   : > { %871 = vmatmul.mubr.bf16.gmra.mxu0 %v1608_v47  ;;  %999 = vmatmul.mubr.bf16.gmra.mxu1 %v1609_v48 }
  0x86   : > { %878 = vmatprep.mubr.bf16.mxu0 %v1610_v49  ;;  %1006 = vmatprep.mubr.bf16.mxu1 %v1612_v50 }
  0x8d   : > { %879 = vmatmul.mubr.bf16.gmra.mxu0 %v1614_v51  ;;  %1007 = vmatmul.mubr.bf16.gmra.mxu1 %v1615_v52 }
  0x8e   : > { %886 = vmatprep.mubr.bf16.mxu0 %v1616_v53  ;;  %1014 = vmatprep.mubr.bf16.mxu1 %v1618_v54 }
  0x95   : > { %887 = vmatmul.mubr.bf16.gmra.mxu0 %v1620_v55  ;;  %1015 = vmatmul.mubr.bf16.gmra.mxu1 %v1621_v56 }
  0x96   : > { %894 = vmatprep.mubr.bf16.mxu0 %v1622_v57  ;;  %1022 = vmatprep.mubr.bf16.mxu1 %v1624_v58 }
  0x9d   : > { %895 = vmatmul.mubr.bf16.gmra.mxu0 %v1626_v59  ;;  %1023 = vmatmul.mubr.bf16.gmra.mxu1 %v1627_v60 }
  0x9e   : > { %902 = vmatprep.mubr.bf16.mxu0 %v1628_v61  ;;  %1030 = vmatprep.mubr.bf16.mxu1 %v1630_v62 }
  0xa5   : > { %903 = vmatmul.mubr.bf16.gmra.mxu0 %v1632_v63  ;;  %1031 = vmatmul.mubr.bf16.gmra.mxu1 %v1633_v0 }
  0xa6   : > { %910 = vmatprep.mubr.bf16.mxu0 %v1634_v1  ;;  %1038 = vmatprep.mubr.bf16.mxu1 %v1636_v2 }
  0xad   : > { %911 = vmatmul.mubr.bf16.gmra.mxu0 %v1638_v3  ;;  %1039 = vmatmul.mubr.bf16.gmra.mxu1 %v1639_v4 }
  0xae   : > { %918 = vmatprep.mubr.bf16.mxu0 %v1640_v5  ;;  %1046 = vmatprep.mubr.bf16.mxu1 %v1642_v6 }
  0xb5   : > { %919 = vmatmul.mubr.bf16.gmra.mxu0 %v1644_v7  ;;  %1047 = vmatmul.mubr.bf16.gmra.mxu1 %v1645_v8 }
  0xb6   : > { %926 = vmatprep.mubr.bf16.mxu0 %v1646_v9  ;;  %1054 = vmatprep.mubr.bf16.mxu1 %v1648_v10 }
  0xbd   : > { %927 = vmatmul.mubr.bf16.gmra.mxu0 %v1650_v11  ;;  %1055 = vmatmul.mubr.bf16.gmra.mxu1 %v1651_v12 }
  0xbe   : > { %934 = vmatprep.mubr.bf16.mxu0 %v1652_v13  ;;  %1062 = vmatprep.mubr.bf16.mxu1 %v1654_v14 }
  0xc5   : > { %935 = vmatmul.mubr.bf16.gmra.mxu0 %v1656_v15  ;;  %1063 = vmatmul.mubr.bf16.gmra.mxu1 %v1657_v16 }
 0x10d   : > { %v816_v18 = vpop.f32.mrf.mxu0  ;;  %v944_v20 = vpop.f32.mrf.mxu1 }
 0x10e   : > { %v1078_v21 = vmul.f32 %v1883_v17, %v816_v18  ;;  %v1110_v22 = vmul.f32 %v1883_v17, %v944_v20 }
 0x10f   : > { %v818_v23 = vpop.f32.mrf.mxu0  ;;  %v946_v24 = vpop.f32.mrf.mxu1 }
 0x110   : > { %v1149_v25 = vadd.f32 %v1888_v19, %v1078_v21  ;;  %v1181_v26 = vadd.f32 %v1888_v19, %v1110_v22 }
 0x111   : > { %v819_v27 = vpop.f32.mrf.mxu0  ;;  %v947_v28 = vpop.f32.mrf.mxu1 }
 0x112   : > { %1213 = vst [vmem:[%s1897_s15] sm:$0xff] %v1149_v25  ;;  %1245 = vst [vmem:[%s1897_s15 + $0x100] sm:$0xff] %v1181_v26  ;;  %v1079_v29 = vmul.f32 %v1883_v17, %v819_v27  ;;  %v1111_v30 = vmul.f32 %v1883_v17, %v947_v28 }
 0x113   : > { %v821_v31 = vpop.f32.mrf.mxu0  ;;  %v949_v32 = vpop.f32.mrf.mxu1 }
 0x114   : > { %v1150_v33 = vadd.f32 %v1888_v19, %v1079_v29  ;;  %v1182_v34 = vadd.f32 %v1888_v19, %v1111_v30 }
 0x115   : > { %v824_v35 = vpop.f32.mrf.mxu0  ;;  %v952_v36 = vpop.f32.mrf.mxu1 }
 0x116   : > { %1214 = vst [vmem:[%s1897_s15 + $0x8] sm:$0xff] %v1150_v33  ;;  %1246 = vst [vmem:[%s1897_s15 + $0x108] sm:$0xff] %v1182_v34  ;;  %v1080_v37 = vmul.f32 %v1883_v17, %v824_v35  ;;  %v1112_v38 = vmul.f32 %v1883_v17, %v952_v36 }
 0x117   : > { %v826_v39 = vpop.f32.mrf.mxu0  ;;  %v954_v40 = vpop.f32.mrf.mxu1 }
 0x118   : > { %v1151_v41 = vadd.f32 %v1888_v19, %v1080_v37  ;;  %v1183_v42 = vadd.f32 %v1888_v19, %v1112_v38 }
 0x119   : > { %v827_v43 = vpop.f32.mrf.mxu0  ;;  %v955_v44 = vpop.f32.mrf.mxu1 }
 0x11a   : > { %1215 = vst [vmem:[%s1897_s15 + $0x10] sm:$0xff] %v1151_v41  ;;  %1247 = vst [vmem:[%s1897_s15 + $0x110] sm:$0xff] %v1183_v42  ;;  %v1081_v45 = vmul.f32 %v1883_v17, %v827_v43  ;;  %v1113_v46 = vmul.f32 %v1883_v17, %v955_v44 }
 0x11b   : > { %v829_v47 = vpop.f32.mrf.mxu0  ;;  %v957_v48 = vpop.f32.mrf.mxu1 }
 0x11c   : > { %v1152_v49 = vadd.f32 %v1888_v19, %v1081_v45  ;;  %v1184_v50 = vadd.f32 %v1888_v19, %v1113_v46 }
 0x11d   : > { %v832_v51 = vpop.f32.mrf.mxu0  ;;  %v960_v52 = vpop.f32.mrf.mxu1 }
 0x11e   : > { %1216 = vst [vmem:[%s1897_s15 + $0x18] sm:$0xff] %v1152_v49  ;;  %1248 = vst [vmem:[%s1897_s15 + $0x118] sm:$0xff] %v1184_v50  ;;  %v1082_v53 = vmul.f32 %v1883_v17, %v832_v51  ;;  %v1114_v54 = vmul.f32 %v1883_v17, %v960_v52 }
 0x11f   : > { %v834_v55 = vpop.f32.mrf.mxu0  ;;  %v962_v56 = vpop.f32.mrf.mxu1 }
 0x120   : > { %v1153_v57 = vadd.f32 %v1888_v19, %v1082_v53  ;;  %v1185_v58 = vadd.f32 %v1888_v19, %v1114_v54 }
 0x121   : > { %v835_v59 = vpop.f32.mrf.mxu0  ;;  %v963_v60 = vpop.f32.mrf.mxu1 }
 0x122   : > { %1217 = vst [vmem:[%s1897_s15 + $0x20] sm:$0xff] %v1153_v57  ;;  %1249 = vst [vmem:[%s1897_s15 + $0x120] sm:$0xff] %v1185_v58  ;;  %v1083_v61 = vmul.f32 %v1883_v17, %v835_v59  ;;  %v1115_v62 = vmul.f32 %v1883_v17, %v963_v60 }
 0x123   : > { %v837_v63 = vpop.f32.mrf.mxu0  ;;  %v965_v0 = vpop.f32.mrf.mxu1 }
 0x124   : > { %v1154_v1 = vadd.f32 %v1888_v19, %v1083_v61  ;;  %v1186_v2 = vadd.f32 %v1888_v19, %v1115_v62 }
 0x125   : > { %v840_v3 = vpop.f32.mrf.mxu0  ;;  %v968_v4 = vpop.f32.mrf.mxu1 }
 0x126   : > { %1218 = vst [vmem:[%s1897_s15 + $0x28] sm:$0xff] %v1154_v1  ;;  %1250 = vst [vmem:[%s1897_s15 + $0x128] sm:$0xff] %v1186_v2  ;;  %v1084_v5 = vmul.f32 %v1883_v17, %v840_v3  ;;  %v1116_v6 = vmul.f32 %v1883_v17, %v968_v4 }
 0x127   : > { %v842_v7 = vpop.f32.mrf.mxu0  ;;  %v970_v8 = vpop.f32.mrf.mxu1 }
 0x128   : > { %v1155_v9 = vadd.f32 %v1888_v19, %v1084_v5  ;;  %v1187_v10 = vadd.f32 %v1888_v19, %v1116_v6 }
 0x129   : > { %v843_v11 = vpop.f32.mrf.mxu0  ;;  %v971_v12 = vpop.f32.mrf.mxu1 }
 0x12a   : > { %1219 = vst [vmem:[%s1897_s15 + $0x30] sm:$0xff] %v1155_v9  ;;  %1251 = vst [vmem:[%s1897_s15 + $0x130] sm:$0xff] %v1187_v10  ;;  %v1085_v13 = vmul.f32 %v1883_v17, %v843_v11  ;;  %v1117_v14 = vmul.f32 %v1883_v17, %v971_v12 }
 0x12b   : > { %v845_v15 = vpop.f32.mrf.mxu0  ;;  %v973_v16 = vpop.f32.mrf.mxu1 }
 0x12c   : > { %v1156_v18 = vadd.f32 %v1888_v19, %v1085_v13  ;;  %v1188_v20 = vadd.f32 %v1888_v19, %v1117_v14 }
 0x12d   : > { %v848_v21 = vpop.f32.mrf.mxu0  ;;  %v976_v22 = vpop.f32.mrf.mxu1 }
 0x12e   : > { %1220 = vst [vmem:[%s1897_s15 + $0x38] sm:$0xff] %v1156_v18  ;;  %1252 = vst [vmem:[%s1897_s15 + $0x138] sm:$0xff] %v1188_v20  ;;  %v1086_v23 = vmul.f32 %v1883_v17, %v848_v21  ;;  %v1118_v24 = vmul.f32 %v1883_v17, %v976_v22 }
 0x12f   : > { %v850_v25 = vpop.f32.mrf.mxu0  ;;  %v978_v26 = vpop.f32.mrf.mxu1 }
 0x130   : > { %v1157_v27 = vadd.f32 %v1888_v19, %v1086_v23  ;;  %v1189_v28 = vadd.f32 %v1888_v19, %v1118_v24 }
 0x131   : > { %v851_v29 = vpop.f32.mrf.mxu0  ;;  %v979_v30 = vpop.f32.mrf.mxu1 }
 0x132   : > { %1221 = vst [vmem:[%s1897_s15 + $0x40] sm:$0xff] %v1157_v27  ;;  %1253 = vst [vmem:[%s1897_s15 + $0x140] sm:$0xff] %v1189_v28  ;;  %v1087_v31 = vmul.f32 %v1883_v17, %v851_v29  ;;  %v1119_v32 = vmul.f32 %v1883_v17, %v979_v30 }
 0x133   : > { %v853_v33 = vpop.f32.mrf.mxu0  ;;  %v981_v34 = vpop.f32.mrf.mxu1 }
 0x134   : > { %v1158_v35 = vadd.f32 %v1888_v19, %v1087_v31  ;;  %v1190_v36 = vadd.f32 %v1888_v19, %v1119_v32 }
 0x135   : > { %v856_v37 = vpop.f32.mrf.mxu0  ;;  %v984_v38 = vpop.f32.mrf.mxu1 }
 0x136   : > { %1222 = vst [vmem:[%s1897_s15 + $0x48] sm:$0xff] %v1158_v35  ;;  %1254 = vst [vmem:[%s1897_s15 + $0x148] sm:$0xff] %v1190_v36  ;;  %v1088_v39 = vmul.f32 %v1883_v17, %v856_v37  ;;  %v1120_v40 = vmul.f32 %v1883_v17, %v984_v38 }
 0x137   : > { %v858_v41 = vpop.f32.mrf.mxu0  ;;  %v986_v42 = vpop.f32.mrf.mxu1 }
 0x138   : > { %v1159_v43 = vadd.f32 %v1888_v19, %v1088_v39  ;;  %v1191_v44 = vadd.f32 %v1888_v19, %v1120_v40 }
 0x139   : > { %v859_v45 = vpop.f32.mrf.mxu0  ;;  %v987_v46 = vpop.f32.mrf.mxu1 }
 0x13a   : > { %1223 = vst [vmem:[%s1897_s15 + $0x50] sm:$0xff] %v1159_v43  ;;  %1255 = vst [vmem:[%s1897_s15 + $0x150] sm:$0xff] %v1191_v44  ;;  %v1089_v47 = vmul.f32 %v1883_v17, %v859_v45  ;;  %v1121_v48 = vmul.f32 %v1883_v17, %v987_v46 }
 0x13b   : > { %v861_v49 = vpop.f32.mrf.mxu0  ;;  %v989_v50 = vpop.f32.mrf.mxu1 }
 0x13c   : > { %v1160_v51 = vadd.f32 %v1888_v19, %v1089_v47  ;;  %v1192_v52 = vadd.f32 %v1888_v19, %v1121_v48 }
 0x13d   : > { %v864_v53 = vpop.f32.mrf.mxu0  ;;  %v992_v54 = vpop.f32.mrf.mxu1 }
 0x13e   : > { %1224 = vst [vmem:[%s1897_s15 + $0x58] sm:$0xff] %v1160_v51  ;;  %1256 = vst [vmem:[%s1897_s15 + $0x158] sm:$0xff] %v1192_v52  ;;  %v1090_v55 = vmul.f32 %v1883_v17, %v864_v53  ;;  %v1122_v56 = vmul.f32 %v1883_v17, %v992_v54 }
 0x13f   : > { %v866_v57 = vpop.f32.mrf.mxu0  ;;  %v994_v58 = vpop.f32.mrf.mxu1 }
 0x140   : > { %v1161_v59 = vadd.f32 %v1888_v19, %v1090_v55  ;;  %v1193_v60 = vadd.f32 %v1888_v19, %v1122_v56 }
 0x141   : > { %v867_v61 = vpop.f32.mrf.mxu0  ;;  %v995_v62 = vpop.f32.mrf.mxu1 }
 0x142   : > { %1225 = vst [vmem:[%s1897_s15 + $0x60] sm:$0xff] %v1161_v59  ;;  %1257 = vst [vmem:[%s1897_s15 + $0x160] sm:$0xff] %v1193_v60  ;;  %v1091_v63 = vmul.f32 %v1883_v17, %v867_v61  ;;  %v1123_v0 = vmul.f32 %v1883_v17, %v995_v62 }
 0x143   : > { %v869_v1 = vpop.f32.mrf.mxu0  ;;  %v997_v2 = vpop.f32.mrf.mxu1 }
 0x144   : > { %v1162_v3 = vadd.f32 %v1888_v19, %v1091_v63  ;;  %v1194_v4 = vadd.f32 %v1888_v19, %v1123_v0 }
 0x145   : > { %v872_v5 = vpop.f32.mrf.mxu0  ;;  %v1000_v6 = vpop.f32.mrf.mxu1 }
 0x146   : > { %1226 = vst [vmem:[%s1897_s15 + $0x68] sm:$0xff] %v1162_v3  ;;  %1258 = vst [vmem:[%s1897_s15 + $0x168] sm:$0xff] %v1194_v4  ;;  %v1092_v7 = vmul.f32 %v1883_v17, %v872_v5  ;;  %v1124_v8 = vmul.f32 %v1883_v17, %v1000_v6 }
 0x147   : > { %v874_v9 = vpop.f32.mrf.mxu0  ;;  %v1002_v10 = vpop.f32.mrf.mxu1 }
 0x148   : > { %v1163_v11 = vadd.f32 %v1888_v19, %v1092_v7  ;;  %v1195_v12 = vadd.f32 %v1888_v19, %v1124_v8 }
 0x149   : > { %v875_v13 = vpop.f32.mrf.mxu0  ;;  %v1003_v14 = vpop.f32.mrf.mxu1 }
 0x14a   : > { %1227 = vst [vmem:[%s1897_s15 + $0x70] sm:$0xff] %v1163_v11  ;;  %1259 = vst [vmem:[%s1897_s15 + $0x170] sm:$0xff] %v1195_v12  ;;  %v1093_v15 = vmul.f32 %v1883_v17, %v875_v13  ;;  %v1125_v16 = vmul.f32 %v1883_v17, %v1003_v14 }
 0x14b   : > { %v877_v18 = vpop.f32.mrf.mxu0  ;;  %v1005_v20 = vpop.f32.mrf.mxu1 }
 0x14c   : > { %v1164_v21 = vadd.f32 %v1888_v19, %v1093_v15  ;;  %v1196_v22 = vadd.f32 %v1888_v19, %v1125_v16 }
 0x14d   : > { %v880_v23 = vpop.f32.mrf.mxu0  ;;  %v1008_v24 = vpop.f32.mrf.mxu1 }
 0x14e   : > { %1228 = vst [vmem:[%s1897_s15 + $0x78] sm:$0xff] %v1164_v21  ;;  %1260 = vst [vmem:[%s1897_s15 + $0x178] sm:$0xff] %v1196_v22  ;;  %v1094_v25 = vmul.f32 %v1883_v17, %v880_v23  ;;  %v1126_v26 = vmul.f32 %v1883_v17, %v1008_v24 }
 0x14f   : > { %v882_v27 = vpop.f32.mrf.mxu0  ;;  %v1010_v28 = vpop.f32.mrf.mxu1 }
 0x150   : > { %v1165_v29 = vadd.f32 %v1888_v19, %v1094_v25  ;;  %v1197_v30 = vadd.f32 %v1888_v19, %v1126_v26 }
 0x151   : > { %v883_v31 = vpop.f32.mrf.mxu0  ;;  %v1011_v32 = vpop.f32.mrf.mxu1 }
 0x152   : > { %1229 = vst [vmem:[%s1897_s15 + $0x80] sm:$0xff] %v1165_v29  ;;  %1261 = vst [vmem:[%s1897_s15 + $0x180] sm:$0xff] %v1197_v30  ;;  %v1095_v33 = vmul.f32 %v1883_v17, %v883_v31  ;;  %v1127_v34 = vmul.f32 %v1883_v17, %v1011_v32 }
 0x153   : > { %v885_v35 = vpop.f32.mrf.mxu0  ;;  %v1013_v36 = vpop.f32.mrf.mxu1 }
 0x154   : > { %v1166_v37 = vadd.f32 %v1888_v19, %v1095_v33  ;;  %v1198_v38 = vadd.f32 %v1888_v19, %v1127_v34 }
 0x155   : > { %v888_v39 = vpop.f32.mrf.mxu0  ;;  %v1016_v40 = vpop.f32.mrf.mxu1 }
 0x156   : > { %1230 = vst [vmem:[%s1897_s15 + $0x88] sm:$0xff] %v1166_v37  ;;  %1262 = vst [vmem:[%s1897_s15 + $0x188] sm:$0xff] %v1198_v38  ;;  %v1096_v41 = vmul.f32 %v1883_v17, %v888_v39  ;;  %v1128_v42 = vmul.f32 %v1883_v17, %v1016_v40 }
 0x157   : > { %v890_v43 = vpop.f32.mrf.mxu0  ;;  %v1018_v44 = vpop.f32.mrf.mxu1 }
 0x158   : > { %v1167_v45 = vadd.f32 %v1888_v19, %v1096_v41  ;;  %v1199_v46 = vadd.f32 %v1888_v19, %v1128_v42 }
 0x159   : > { %v891_v47 = vpop.f32.mrf.mxu0  ;;  %v1019_v48 = vpop.f32.mrf.mxu1 }
 0x15a   : > { %1231 = vst [vmem:[%s1897_s15 + $0x90] sm:$0xff] %v1167_v45  ;;  %1263 = vst [vmem:[%s1897_s15 + $0x190] sm:$0xff] %v1199_v46  ;;  %v1097_v49 = vmul.f32 %v1883_v17, %v891_v47  ;;  %v1129_v50 = vmul.f32 %v1883_v17, %v1019_v48 }
 0x15b   : > { %v893_v51 = vpop.f32.mrf.mxu0  ;;  %v1021_v52 = vpop.f32.mrf.mxu1 }
 0x15c   : > { %v1168_v53 = vadd.f32 %v1888_v19, %v1097_v49  ;;  %v1200_v54 = vadd.f32 %v1888_v19, %v1129_v50 }
 0x15d   : > { %v896_v55 = vpop.f32.mrf.mxu0  ;;  %v1024_v56 = vpop.f32.mrf.mxu1 }
 0x15e   : > { %1232 = vst [vmem:[%s1897_s15 + $0x98] sm:$0xff] %v1168_v53  ;;  %1264 = vst [vmem:[%s1897_s15 + $0x198] sm:$0xff] %v1200_v54  ;;  %v1098_v57 = vmul.f32 %v1883_v17, %v896_v55  ;;  %v1130_v58 = vmul.f32 %v1883_v17, %v1024_v56 }
 0x15f   : > { %v898_v59 = vpop.f32.mrf.mxu0  ;;  %v1026_v60 = vpop.f32.mrf.mxu1 }
 0x160   : > { %v1169_v61 = vadd.f32 %v1888_v19, %v1098_v57  ;;  %v1201_v62 = vadd.f32 %v1888_v19, %v1130_v58 }
 0x161   : > { %v899_v63 = vpop.f32.mrf.mxu0  ;;  %v1027_v0 = vpop.f32.mrf.mxu1 }
 0x162   : > { %1233 = vst [vmem:[%s1897_s15 + $0xa0] sm:$0xff] %v1169_v61  ;;  %1265 = vst [vmem:[%s1897_s15 + $0x1a0] sm:$0xff] %v1201_v62  ;;  %v1099_v1 = vmul.f32 %v1883_v17, %v899_v63  ;;  %v1131_v2 = vmul.f32 %v1883_v17, %v1027_v0 }
 0x163   : > { %v901_v3 = vpop.f32.mrf.mxu0  ;;  %v1029_v4 = vpop.f32.mrf.mxu1 }
 0x164   : > { %v1170_v5 = vadd.f32 %v1888_v19, %v1099_v1  ;;  %v1202_v6 = vadd.f32 %v1888_v19, %v1131_v2 }
 0x165   : > { %v904_v7 = vpop.f32.mrf.mxu0  ;;  %v1032_v8 = vpop.f32.mrf.mxu1 }
 0x166   : > { %1234 = vst [vmem:[%s1897_s15 + $0xa8] sm:$0xff] %v1170_v5  ;;  %1266 = vst [vmem:[%s1897_s15 + $0x1a8] sm:$0xff] %v1202_v6  ;;  %v1100_v9 = vmul.f32 %v1883_v17, %v904_v7  ;;  %v1132_v10 = vmul.f32 %v1883_v17, %v1032_v8 }
 0x167   : > { %v906_v11 = vpop.f32.mrf.mxu0  ;;  %v1034_v12 = vpop.f32.mrf.mxu1 }
 0x168   : > { %v1171_v13 = vadd.f32 %v1888_v19, %v1100_v9  ;;  %v1203_v14 = vadd.f32 %v1888_v19, %v1132_v10 }
 0x169   : > { %v907_v15 = vpop.f32.mrf.mxu0  ;;  %v1035_v16 = vpop.f32.mrf.mxu1 }
 0x16a   : > { %1235 = vst [vmem:[%s1897_s15 + $0xb0] sm:$0xff] %v1171_v13  ;;  %1267 = vst [vmem:[%s1897_s15 + $0x1b0] sm:$0xff] %v1203_v14  ;;  %v1101_v18 = vmul.f32 %v1883_v17, %v907_v15  ;;  %v1133_v20 = vmul.f32 %v1883_v17, %v1035_v16 }
 0x16b   : > { %v909_v21 = vpop.f32.mrf.mxu0  ;;  %v1037_v22 = vpop.f32.mrf.mxu1 }
 0x16c   : > { %v1172_v23 = vadd.f32 %v1888_v19, %v1101_v18  ;;  %v1204_v24 = vadd.f32 %v1888_v19, %v1133_v20 }
 0x16d   : > { %v912_v25 = vpop.f32.mrf.mxu0  ;;  %v1040_v26 = vpop.f32.mrf.mxu1 }
 0x16e   : > { %1236 = vst [vmem:[%s1897_s15 + $0xb8] sm:$0xff] %v1172_v23  ;;  %1268 = vst [vmem:[%s1897_s15 + $0x1b8] sm:$0xff] %v1204_v24  ;;  %v1102_v27 = vmul.f32 %v1883_v17, %v912_v25  ;;  %v1134_v28 = vmul.f32 %v1883_v17, %v1040_v26 }
 0x16f   : > { %v914_v29 = vpop.f32.mrf.mxu0  ;;  %v1042_v30 = vpop.f32.mrf.mxu1 }
 0x170   : > { %v1173_v31 = vadd.f32 %v1888_v19, %v1102_v27  ;;  %v1205_v32 = vadd.f32 %v1888_v19, %v1134_v28 }
 0x171   : > { %v915_v33 = vpop.f32.mrf.mxu0  ;;  %v1043_v34 = vpop.f32.mrf.mxu1 }
 0x172   : > { %1237 = vst [vmem:[%s1897_s15 + $0xc0] sm:$0xff] %v1173_v31  ;;  %1269 = vst [vmem:[%s1897_s15 + $0x1c0] sm:$0xff] %v1205_v32  ;;  %v1103_v35 = vmul.f32 %v1883_v17, %v915_v33  ;;  %v1135_v36 = vmul.f32 %v1883_v17, %v1043_v34 }
 0x173   : > { %v917_v37 = vpop.f32.mrf.mxu0  ;;  %v1045_v38 = vpop.f32.mrf.mxu1 }
 0x174   : > { %v1174_v39 = vadd.f32 %v1888_v19, %v1103_v35  ;;  %v1206_v40 = vadd.f32 %v1888_v19, %v1135_v36 }
 0x175   : > { %v920_v41 = vpop.f32.mrf.mxu0  ;;  %v1048_v42 = vpop.f32.mrf.mxu1 }
 0x176   : > { %1238 = vst [vmem:[%s1897_s15 + $0xc8] sm:$0xff] %v1174_v39  ;;  %1270 = vst [vmem:[%s1897_s15 + $0x1c8] sm:$0xff] %v1206_v40  ;;  %v1104_v43 = vmul.f32 %v1883_v17, %v920_v41  ;;  %v1136_v44 = vmul.f32 %v1883_v17, %v1048_v42 }
 0x177   : > { %v922_v45 = vpop.f32.mrf.mxu0  ;;  %v1050_v46 = vpop.f32.mrf.mxu1 }
 0x178   : > { %v1175_v47 = vadd.f32 %v1888_v19, %v1104_v43  ;;  %v1207_v48 = vadd.f32 %v1888_v19, %v1136_v44 }
 0x179   : > { %v923_v49 = vpop.f32.mrf.mxu0  ;;  %v1051_v50 = vpop.f32.mrf.mxu1 }
 0x17a   : > { %1239 = vst [vmem:[%s1897_s15 + $0xd0] sm:$0xff] %v1175_v47  ;;  %1271 = vst [vmem:[%s1897_s15 + $0x1d0] sm:$0xff] %v1207_v48  ;;  %v1105_v51 = vmul.f32 %v1883_v17, %v923_v49  ;;  %v1137_v52 = vmul.f32 %v1883_v17, %v1051_v50 }
 0x17b   : > { %v925_v53 = vpop.f32.mrf.mxu0  ;;  %v1053_v54 = vpop.f32.mrf.mxu1 }
 0x17c   : > { %v1176_v55 = vadd.f32 %v1888_v19, %v1105_v51  ;;  %v1208_v56 = vadd.f32 %v1888_v19, %v1137_v52 }
 0x17d   : > { %v928_v57 = vpop.f32.mrf.mxu0  ;;  %v1056_v58 = vpop.f32.mrf.mxu1 }
 0x17e   : > { %1240 = vst [vmem:[%s1897_s15 + $0xd8] sm:$0xff] %v1176_v55  ;;  %1272 = vst [vmem:[%s1897_s15 + $0x1d8] sm:$0xff] %v1208_v56  ;;  %v1106_v59 = vmul.f32 %v1883_v17, %v928_v57  ;;  %v1138_v60 = vmul.f32 %v1883_v17, %v1056_v58 }
 0x17f   : > { %v930_v61 = vpop.f32.mrf.mxu0  ;;  %v1058_v62 = vpop.f32.mrf.mxu1 }
 0x180   : > { %v1177_v63 = vadd.f32 %v1888_v19, %v1106_v59  ;;  %v1209_v0 = vadd.f32 %v1888_v19, %v1138_v60 }
 0x181   : > { %v931_v1 = vpop.f32.mrf.mxu0  ;;  %v1059_v2 = vpop.f32.mrf.mxu1 }
 0x182   : > { %1241 = vst [vmem:[%s1897_s15 + $0xe0] sm:$0xff] %v1177_v63  ;;  %1273 = vst [vmem:[%s1897_s15 + $0x1e0] sm:$0xff] %v1209_v0  ;;  %v1107_v3 = vmul.f32 %v1883_v17, %v931_v1  ;;  %v1139_v4 = vmul.f32 %v1883_v17, %v1059_v2 }
 0x183   : > { %v933_v5 = vpop.f32.mrf.mxu0  ;;  %v1061_v6 = vpop.f32.mrf.mxu1 }
 0x184   : > { %v1178_v7 = vadd.f32 %v1888_v19, %v1107_v3  ;;  %v1210_v8 = vadd.f32 %v1888_v19, %v1139_v4 }
 0x185   : > { %v936_v9 = vpop.f32.mrf.mxu0  ;;  %v1064_v10 = vpop.f32.mrf.mxu1 }
 0x186   : > { %1242 = vst [vmem:[%s1897_s15 + $0xe8] sm:$0xff] %v1178_v7  ;;  %1274 = vst [vmem:[%s1897_s15 + $0x1e8] sm:$0xff] %v1210_v8  ;;  %v1108_v11 = vmul.f32 %v1883_v17, %v936_v9  ;;  %v1140_v12 = vmul.f32 %v1883_v17, %v1064_v10 }
 0x187   : > { %v938_v13 = vpop.f32.mrf.mxu0  ;;  %v1066_v14 = vpop.f32.mrf.mxu1 }
 0x188   : > { %v1179_v15 = vadd.f32 %v1888_v19, %v1108_v11  ;;  %v1211_v16 = vadd.f32 %v1888_v19, %v1140_v12 }
 0x189   : > { %v939_v18 = vpop.f32.mrf.mxu0  ;;  %v1067_v20 = vpop.f32.mrf.mxu1 }
 0x18a   : > { %1243 = vst [vmem:[%s1897_s15 + $0xf0] sm:$0xff] %v1179_v15  ;;  %1275 = vst [vmem:[%s1897_s15 + $0x1f0] sm:$0xff] %v1211_v16  ;;  %v1109_v21 = vmul.f32 %v1883_v17, %v939_v18  ;;  %v1141_v22 = vmul.f32 %v1883_v17, %v1067_v20 }
 0x18b   : > { %v941_v23 = vpop.f32.mrf.mxu0  ;;  %v1069_v24 = vpop.f32.mrf.mxu1 }
 0x18c   : > { %v1180_v25 = vadd.f32 %v1888_v19, %v1109_v21  ;;  %v1212_v26 = vadd.f32 %v1888_v19, %v1141_v22 }
 0x18e   : > { %1244 = vst [vmem:[%s1897_s15 + $0xf8] sm:$0xff] %v1180_v25  ;;  %1276 = vst [vmem:[%s1897_s15 + $0x1f8] sm:$0xff] %v1212_v26 }
 0x18f PF: > { %s14_s17 = sadd.s32 1, %s1680_s17   ;;  %s2103_s15 = smov %s1676_s16 }
 0x190   : > { %p11_p5 = scmp.ge.s32.totalorder %s14_s17, 6   ;;  %s2104_s16 = smov %s2106_s18 }
 0x192   :  { %13 = sbr.rel (!%p11_p5) target bundleno = 2 (0x2), region = 75 }

</bundles_post_ra>
